<compile_context>
chip_gen: v6e
topology: v6e:2x2x1
jax: 0.10.0
libtpu: 0.0.40
codegen_flags: <defaults>
</compile_context>

<pallas_src>
import functools

import jax
import jax.numpy as jnp
import numpy as np
from jax import lax
from jax.experimental import pallas as pl
from jax.experimental.pallas import tpu as pltpu


# ---------------------------------------------------------------------------
# Fused kernel: 5x5 stride-2 conv (grouped, as block-diag dense) + bias + GDN
# ---------------------------------------------------------------------------
def _downsampler5x5_kernel(x_ref, wp_ref, b_ref, gamma_ref, beta_ref, o_ref,
                           xpad_ref, *, Bt, Ho, Wo, C):
    # x_ref:     (Bt, Ho, 2, Wo, 2C)  packed input:
    #            x_ref[b, a, ry, j, rx*C + c] == x_nhwc[b, 2a+ry, 2j+rx, c]
    # wp_ref:    (5, 3, 2C, C)        conv weights, kx taps paired along K (bf16)
    # b_ref:     (1, C)  f32          conv bias
    # gamma_ref: (C, C)               GDN gamma, [c_in, c_out] orientation
    #                                 (PyTorch GDN 1x1-conv weight is [out, in],
    #                                  i.e. load gamma_torch.T here)
    # beta_ref:  (1, C)  f32
    # o_ref:     (Bt, Ho, Wo, C)
    # xpad_ref:  VMEM (2, Bt, Ho+2, Wo+2, 2C) scratch — the pad=2 zero-padded
    #            input in the same parity/packed layout:
    #            xpad_ref[ry, b, i, jp, rx*C+c] == x_nhwc[b, 2(i-1)+ry, 2(jp-1)+rx, c]
    #            (zero outside the image).
    dt = xpad_ref.dtype

    # ---- Halo build --------------------------------------------------------
    # Only the 1-wide border of the scratch ever needs to be zero; the interior
    # is fully overwritten below on every grid step.  Zero just the four border
    # strips instead of the whole scratch (removes a full-scratch vector-store
    # pass per step; vst is the scarcest VLIW slot).
    zrow = jnp.zeros((Bt, 1, Wo + 2, 2 * C), dt)
    zcol = jnp.zeros((Bt, Ho + 2, 1, 2 * C), dt)
    for ry in range(2):
        xpad_ref[ry, :, pl.ds(0, 1), :, :] = zrow            # top halo row
        xpad_ref[ry, :, pl.ds(Ho + 1, 1), :, :] = zrow       # bottom halo row
        xpad_ref[ry, :, :, pl.ds(0, 1), :] = zcol            # left halo col
        xpad_ref[ry, :, :, pl.ds(Wo + 1, 1), :] = zcol       # right halo col
        # Interior: contiguous, lane-aligned copies (no wrapper-side jnp.pad,
        # no HBM round trip for the padded copy).
        xpad_ref[ry, :, pl.ds(1, Ho), pl.ds(1, Wo), :] = x_ref[:, :, ry, :, :]

    # ---- Convolution -------------------------------------------------------
    # out[oh,ow] = sum_{ky,kx} w[ky,kx] . xpad[2oh+ky, 2ow+kx]
    # With ky = 2qy+ry and kx = 2qx+rx the tap read is
    #   xpad_ref[ry, :, oh+qy, ow+qx, rx*C : rx*C+C]
    # so each (ky, qx) covers BOTH rx parities with one contiguous (Bt,Ho,Wo,2C)
    # slice and one MXU dot with K = 2C (15 dots, M = Bt*Ho*Wo, N = C).
    M = Bt * Ho * Wo

    def tap(ky, qx):
        ry, qy = ky % 2, ky // 2
        patch = xpad_ref[ry, :, pl.ds(qy, Ho), pl.ds(qx, Wo), :]
        return jnp.dot(patch.reshape(M, 2 * C), wp_ref[ky, qx],
                       preferred_element_type=jnp.float32)

    acc = tap(0, 0)                       # init from the first dot (no zeros+add)
    for ky in range(5):
        for qx in range(3):
            if ky == 0 and qx == 0:
                continue
            acc = acc + tap(ky, qx)

    y = acc + b_ref[...]                  # f32

    # ---- GDN (fused, all-f32 denominator) ----------------------------------
    #   norm_d = beta_d + sum_c gamma[c, d] * y_c^2 ;  out = y * rsqrt(norm)
    norm = jnp.dot(y * y, gamma_ref[...].astype(jnp.float32),
                   preferred_element_type=jnp.float32)
    norm = norm + beta_ref[...]
    out = y * lax.rsqrt(norm)

    o_ref[...] = out.reshape(Bt, Ho, Wo, C).astype(o_ref.dtype)


# ---------------------------------------------------------------------------
# Wrapper
# ---------------------------------------------------------------------------
def _pack_conv_weight(w):
    """HWIO (5,5,C,C) -> (5,3,2C,C): kx taps paired along K (phantom kx=5 is 0)."""
    C = w.shape[-1]
    wp = jnp.zeros((5, 3, 2 * C, C), w.dtype)
    for qx in range(3):
        wp = wp.at[:, qx, 0:C, :].set(w[:, 2 * qx])
        if 2 * qx + 1 < 5:
            wp = wp.at[:, qx, C:2 * C, :].set(w[:, 2 * qx + 1])
    return wp


def _pick_batch_tile(B, Ho, Wo, C, x_itemsize, out_itemsize, budget_bytes):
    """Largest Bt dividing B whose per-grid-step VMEM footprint fits the budget."""
    per_img = 2 * (Ho * 2 * Wo * 2 * C) * x_itemsize            # input block, 2 buffers
    per_img += 2 * (Ho * Wo * C) * out_itemsize                 # output block, 2 buffers
    per_img += (2 * (Ho + 2) * (Wo + 2) * 2 * C) * x_itemsize   # xpad scratch
    per_img += (Ho * Wo * C) * 4                                # f32 accumulator
    bt = int(max(1, min(B, budget_bytes // max(per_img, 1))))
    while B % bt:
        bt -= 1
    return bt


def downsampler5x5_forward_nhwc(x_nhwc, params, *, compute_dtype=jnp.bfloat16,
                                vmem_limit_bytes=32 * 1024 * 1024):
    """DownSampler5x5 forward on NHWC input (recommended, transpose-free path)."""
    B, H, W, C = x_nhwc.shape
    assert H % 2 == 0 and W % 2 == 0, "DownSampler5x5 expects even spatial dims"
    Ho, Wo = H // 2, W // 2
    out_dtype = x_nhwc.dtype

    # Free row-major reshape: splits H into (Ho, parity) and packs the W-parity
    # pair into lanes.  bf16 operands halve HBM traffic / VMEM footprint and hit
    # the MXU-native bf16 path; accumulation stays f32 in-kernel.
    x_packed = x_nhwc.reshape(B, Ho, 2, Wo, 2 * C).astype(compute_dtype)
    wp = _pack_conv_weight(params["w"]).astype(compute_dtype)
    gamma = params["gamma"].astype(compute_dtype)   # values quantized; math stays f32
    b2 = params["b"].reshape(1, C).astype(jnp.float32)
    beta2 = params["beta"].reshape(1, C).astype(jnp.float32)

    # Fold a batch tile into the MXU M dimension (M = Bt*Ho*Wo).
    Bt = _pick_batch_tile(B, Ho, Wo, C,
                          np.dtype(compute_dtype).itemsize,
                          np.dtype(out_dtype).itemsize,
                          budget_bytes=20 * 1024 * 1024)
    grid = (B // Bt,)

    kernel = functools.partial(_downsampler5x5_kernel, Bt=Bt, Ho=Ho, Wo=Wo, C=C)
    out = pl.pallas_call(
        kernel,
        out_shape=jax.ShapeDtypeStruct((B, Ho, Wo, C), out_dtype),
        grid_spec=pltpu.PrefetchScalarGridSpec(
            num_scalar_prefetch=0,
            grid=grid,
            in_specs=[
                pl.BlockSpec((Bt, Ho, 2, Wo, 2 * C), lambda i: (i, 0, 0, 0, 0)),
                pl.BlockSpec((5, 3, 2 * C, C), lambda i: (0, 0, 0, 0)),
                pl.BlockSpec((1, C), lambda i: (0, 0)),
                pl.BlockSpec((C, C), lambda i: (0, 0)),
                pl.BlockSpec((1, C), lambda i: (0, 0)),
            ],
            out_specs=pl.BlockSpec((Bt, Ho, Wo, C), lambda i: (i, 0, 0, 0)),
            scratch_shapes=[
                pltpu.VMEM((2, Bt, Ho + 2, Wo + 2, 2 * C), compute_dtype)],
        ),
        compiler_params=pltpu.CompilerParams(
            dimension_semantics=("parallel",),
            vmem_limit_bytes=vmem_limit_bytes,   # raise to 64-96 MiB on v5e/v6e
        ),                                       # keep <= ~48 MiB on v7x
    )(x_packed, wp, b2, gamma, beta2)
    return out


def downsampler5x5_forward(x_nchw, params, **kw):
    """NCHW adapter kept only for drop-in module compatibility.

    Perf note: each transpose below is a full HBM read+write pass; in a real
    model keep activations NHWC (or packed) across layers and call
    downsampler5x5_forward_nhwc directly.
    """
    x = jnp.transpose(x_nchw, (0, 2, 3, 1))
    out = downsampler5x5_forward_nhwc(x, params, **kw)
    return jnp.transpose(out, (0, 3, 1, 2))


# ---------------------------------------------------------------------------
# Deterministic synthetic parameters
# ---------------------------------------------------------------------------
def init_params(channel, groups, key):
    ks = jax.random.split(key, 4)
    cg = channel // groups
    # Grouped conv5x5 weights, materialized as a block-diagonal dense HWIO tensor.
    # NOTE: correctness of the grouped conv relies on exact zeros in the
    # cross-group blocks (and the phantom kx=5 column of the packed weight).
    wg = jax.random.normal(ks[0], (groups, 5, 5, cg, cg), jnp.float32) / np.sqrt(25 * cg)
    w = jnp.zeros((5, 5, channel, channel), jnp.float32)
    for g in range(groups):
        w = w.at[:, :, g * cg:(g + 1) * cg, g * cg:(g + 1) * cg].set(wg[g])
    b = 0.01 * jax.random.normal(ks[1], (channel,), jnp.float32)
    # GDN params. gamma is stored in [c_in, c_out] orientation (norm = y^2 @ gamma);
    # a PyTorch GDN 1x1-conv weight gamma_torch[out, in] must be loaded transposed.
    gamma = 0.1 * jnp.eye(channel, dtype=jnp.float32) + \
        0.005 * jnp.abs(jax.random.normal(ks[2], (channel, channel), jnp.float32))
    beta = 1.0 + 0.01 * jnp.abs(jax.random.normal(ks[3], (channel,), jnp.float32))
    return {"w": w, "b": b, "gamma": gamma, "beta": beta}


# ---------------------------------------------------------------------------
# Pure-JAX reference (correctness check)
# ---------------------------------------------------------------------------
def ref_forward_nhwc(x, p):
    dn = ("NHWC", "HWIO", "NHWC")
    y = lax.conv_general_dilated(x, p["w"], (2, 2), ((2, 2), (2, 2)),
                                 dimension_numbers=dn)
    y = y + p["b"]
    norm = jnp.einsum("bhwc,cd->bhwd", y * y, p["gamma"]) + p["beta"]
    return y / jnp.sqrt(norm)


if __name__ == "__main__":
    # channel = 128 so channels exactly fill the 128-wide lane dim
    # (lane-dense loads/stores + full-width MXU N), per the perf review.
    B, C, H, W = 2, 128, 16, 16
    groups = 2
    key = jax.random.PRNGKey(0)
    kx_, kp_ = jax.random.split(key)
    x_nchw = jax.random.normal(kx_, (B, C, H, W), jnp.float32)
    params = init_params(C, groups, kp_)

    # Recommended transpose-free path: keep NHWC across layers.
    x_nhwc = jnp.transpose(x_nchw, (0, 2, 3, 1))   # model-boundary only, not per layer
    out_nhwc = jax.jit(downsampler5x5_forward_nhwc)(x_nhwc, params)
    out_nhwc = jax.block_until_ready(out_nhwc)
    assert out_nhwc.shape == (B, H // 2, W // 2, C), out_nhwc.shape

    ref_nhwc = ref_forward_nhwc(x_nhwc, params)
    np.testing.assert_allclose(np.asarray(out_nhwc), np.asarray(ref_nhwc),
                               rtol=2e-2, atol=2e-2)

    # Module-faithful NCHW interface (adds boundary transposes only).
    out_nchw = jax.jit(downsampler5x5_forward)(x_nchw, params)
    out_nchw = jax.block_until_ready(out_nchw)
    assert out_nchw.shape == (B, C, H // 2, W // 2), out_nchw.shape
    np.testing.assert_allclose(np.asarray(out_nchw),
                               np.asarray(jnp.transpose(ref_nhwc, (0, 3, 1, 2))),
                               rtol=2e-2, atol=2e-2)

    print("KERNEL_OK")
</pallas_src>

<mosaic_0001>
module attributes {stable_mosaic.version = 11 : i64} {
  func.func @_downsampler5x5_kernel(%arg0: i32, %arg1: memref<2x8x2x8x256xbf16, #tpu.memory_space<vmem>>, %arg2: memref<5x3x256x128xbf16, #tpu.memory_space<vmem>>, %arg3: memref<1x128xf32, #tpu.memory_space<vmem>>, %arg4: memref<128x128xbf16, #tpu.memory_space<vmem>>, %arg5: memref<1x128xf32, #tpu.memory_space<vmem>>, %arg6: memref<2x8x8x128xf32, #tpu.memory_space<vmem>>, %arg7: memref<2x2x10x10x256xbf16, #tpu.memory_space<vmem>>) attributes {dimension_semantics = [#tpu.dimension_semantics<parallel>], iteration_bounds = array<i64: 1>, scalar_prefetch = 0 : i64, scratch_operands = 1 : i64, tpu.core_type = #tpu.core_type<tc>, window_params = [{transform_indices = @transform_0, window_bounds = array<i64: 2, 8, 2, 8, 256>}, {pipeline_mode = #tpu.pipeline_mode<synchronous>, transform_indices = @transform_1, window_bounds = array<i64: 5, 3, 256, 128>}, {pipeline_mode = #tpu.pipeline_mode<synchronous>, transform_indices = @transform_2, window_bounds = array<i64: 1, 128>}, {pipeline_mode = #tpu.pipeline_mode<synchronous>, transform_indices = @transform_3, window_bounds = array<i64: 128, 128>}, {pipeline_mode = #tpu.pipeline_mode<synchronous>, transform_indices = @transform_4, window_bounds = array<i64: 1, 128>}, {transform_indices = @transform_5, window_bounds = array<i64: 2, 8, 8, 128>}]} {
    %cst = arith.constant 0.000000e+00 : bf16
    %0 = vector.broadcast %cst : bf16 to vector<2x1x10x256xbf16>
    %cst_0 = arith.constant 0.000000e+00 : bf16
    %1 = vector.broadcast %cst_0 : bf16 to vector<2x10x1x256xbf16>
    %c0 = arith.constant 0 : index
    %c0_1 = arith.constant 0 : index
    %c0_2 = arith.constant 0 : index
    %c0_3 = arith.constant 0 : index
    %c0_4 = arith.constant 0 : index
    %2 = vector.load %arg7[%c0, %c0_1, %c0_2, %c0_3, %c0_4] : memref<2x2x10x10x256xbf16, #tpu.memory_space<vmem>>, vector<1x2x1x10x256xbf16>
    %3 = vector.shape_cast %2 : vector<1x2x1x10x256xbf16> to vector<2x1x10x256xbf16>
    %4 = vector.shape_cast %0 : vector<2x1x10x256xbf16> to vector<1x2x1x10x256xbf16>
    tpu.vector_store %arg7[%c0, %c0_1, %c0_2, %c0_3, %c0_4], %4 {strides = array<i32>} : memref<2x2x10x10x256xbf16, #tpu.memory_space<vmem>>, vector<1x2x1x10x256xbf16>,
    %c0_5 = arith.constant 0 : index
    %c0_6 = arith.constant 0 : index
    %c9 = arith.constant 9 : index
    %c0_7 = arith.constant 0 : index
    %c0_8 = arith.constant 0 : index
    %5 = vector.load %arg7[%c0_5, %c0_6, %c9, %c0_7, %c0_8] : memref<2x2x10x10x256xbf16, #tpu.memory_space<vmem>>, vector<1x2x1x10x256xbf16>
    %6 = vector.shape_cast %5 : vector<1x2x1x10x256xbf16> to vector<2x1x10x256xbf16>
    %7 = vector.shape_cast %0 : vector<2x1x10x256xbf16> to vector<1x2x1x10x256xbf16>
    tpu.vector_store %arg7[%c0_5, %c0_6, %c9, %c0_7, %c0_8], %7 {strides = array<i32>} : memref<2x2x10x10x256xbf16, #tpu.memory_space<vmem>>, vector<1x2x1x10x256xbf16>,
    %c0_9 = arith.constant 0 : index
    %c0_10 = arith.constant 0 : index
    %c0_11 = arith.constant 0 : index
    %c0_12 = arith.constant 0 : index
    %c0_13 = arith.constant 0 : index
    %8 = vector.load %arg7[%c0_9, %c0_10, %c0_11, %c0_12, %c0_13] : memref<2x2x10x10x256xbf16, #tpu.memory_space<vmem>>, vector<1x2x10x1x256xbf16>
    %9 = vector.shape_cast %8 : vector<1x2x10x1x256xbf16> to vector<2x10x1x256xbf16>
    %10 = vector.shape_cast %1 : vector<2x10x1x256xbf16> to vector<1x2x10x1x256xbf16>
    tpu.vector_store %arg7[%c0_9, %c0_10, %c0_11, %c0_12, %c0_13], %10 {strides = array<i32>} : memref<2x2x10x10x256xbf16, #tpu.memory_space<vmem>>, vector<1x2x10x1x256xbf16>,
    %c0_14 = arith.constant 0 : index
    %c0_15 = arith.constant 0 : index
    %c0_16 = arith.constant 0 : index
    %c9_17 = arith.constant 9 : index
    %c0_18 = arith.constant 0 : index
    %11 = vector.load %arg7[%c0_14, %c0_15, %c0_16, %c9_17, %c0_18] : memref<2x2x10x10x256xbf16, #tpu.memory_space<vmem>>, vector<1x2x10x1x256xbf16>
    %12 = vector.shape_cast %11 : vector<1x2x10x1x256xbf16> to vector<2x10x1x256xbf16>
    %13 = vector.shape_cast %1 : vector<2x10x1x256xbf16> to vector<1x2x10x1x256xbf16>
    tpu.vector_store %arg7[%c0_14, %c0_15, %c0_16, %c9_17, %c0_18], %13 {strides = array<i32>} : memref<2x2x10x10x256xbf16, #tpu.memory_space<vmem>>, vector<1x2x10x1x256xbf16>,
    %c0_19 = arith.constant 0 : index
    %c0_20 = arith.constant 0 : index
    %c0_21 = arith.constant 0 : index
    %c0_22 = arith.constant 0 : index
    %c0_23 = arith.constant 0 : index
    %14 = vector.load %arg1[%c0_19, %c0_20, %c0_21, %c0_22, %c0_23] : memref<2x8x2x8x256xbf16, #tpu.memory_space<vmem>>, vector<2x8x1x8x256xbf16>
    %15 = vector.shape_cast %14 : vector<2x8x1x8x256xbf16> to vector<2x8x8x256xbf16>
    %c0_24 = arith.constant 0 : index
    %c0_25 = arith.constant 0 : index
    %c1 = arith.constant 1 : index
    %c1_26 = arith.constant 1 : index
    %c0_27 = arith.constant 0 : index
    %16 = vector.load %arg7[%c0_24, %c0_25, %c1, %c1_26, %c0_27] : memref<2x2x10x10x256xbf16, #tpu.memory_space<vmem>>, vector<1x2x8x8x256xbf16>
    %17 = vector.shape_cast %16 : vector<1x2x8x8x256xbf16> to vector<2x8x8x256xbf16>
    %18 = vector.shape_cast %15 : vector<2x8x8x256xbf16> to vector<1x2x8x8x256xbf16>
    tpu.vector_store %arg7[%c0_24, %c0_25, %c1, %c1_26, %c0_27], %18 {strides = array<i32>} : memref<2x2x10x10x256xbf16, #tpu.memory_space<vmem>>, vector<1x2x8x8x256xbf16>,
    %c1_28 = arith.constant 1 : index
    %c0_29 = arith.constant 0 : index
    %c0_30 = arith.constant 0 : index
    %c0_31 = arith.constant 0 : index
    %c0_32 = arith.constant 0 : index
    %19 = vector.load %arg7[%c1_28, %c0_29, %c0_30, %c0_31, %c0_32] : memref<2x2x10x10x256xbf16, #tpu.memory_space<vmem>>, vector<1x2x1x10x256xbf16>
    %20 = vector.shape_cast %19 : vector<1x2x1x10x256xbf16> to vector<2x1x10x256xbf16>
    %21 = vector.shape_cast %0 : vector<2x1x10x256xbf16> to vector<1x2x1x10x256xbf16>
    tpu.vector_store %arg7[%c1_28, %c0_29, %c0_30, %c0_31, %c0_32], %21 {strides = array<i32>} : memref<2x2x10x10x256xbf16, #tpu.memory_space<vmem>>, vector<1x2x1x10x256xbf16>,
    %c1_33 = arith.constant 1 : index
    %c0_34 = arith.constant 0 : index
    %c9_35 = arith.constant 9 : index
    %c0_36 = arith.constant 0 : index
    %c0_37 = arith.constant 0 : index
    %22 = vector.load %arg7[%c1_33, %c0_34, %c9_35, %c0_36, %c0_37] : memref<2x2x10x10x256xbf16, #tpu.memory_space<vmem>>, vector<1x2x1x10x256xbf16>
    %23 = vector.shape_cast %22 : vector<1x2x1x10x256xbf16> to vector<2x1x10x256xbf16>
    %24 = vector.shape_cast %0 : vector<2x1x10x256xbf16> to vector<1x2x1x10x256xbf16>
    tpu.vector_store %arg7[%c1_33, %c0_34, %c9_35, %c0_36, %c0_37], %24 {strides = array<i32>} : memref<2x2x10x10x256xbf16, #tpu.memory_space<vmem>>, vector<1x2x1x10x256xbf16>,
    %c1_38 = arith.constant 1 : index
    %c0_39 = arith.constant 0 : index
    %c0_40 = arith.constant 0 : index
    %c0_41 = arith.constant 0 : index
    %c0_42 = arith.constant 0 : index
    %25 = vector.load %arg7[%c1_38, %c0_39, %c0_40, %c0_41, %c0_42] : memref<2x2x10x10x256xbf16, #tpu.memory_space<vmem>>, vector<1x2x10x1x256xbf16>
    %26 = vector.shape_cast %25 : vector<1x2x10x1x256xbf16> to vector<2x10x1x256xbf16>
    %27 = vector.shape_cast %1 : vector<2x10x1x256xbf16> to vector<1x2x10x1x256xbf16>
    tpu.vector_store %arg7[%c1_38, %c0_39, %c0_40, %c0_41, %c0_42], %27 {strides = array<i32>} : memref<2x2x10x10x256xbf16, #tpu.memory_space<vmem>>, vector<1x2x10x1x256xbf16>,
    %c1_43 = arith.constant 1 : index
    %c0_44 = arith.constant 0 : index
    %c0_45 = arith.constant 0 : index
    %c9_46 = arith.constant 9 : index
    %c0_47 = arith.constant 0 : index
    %28 = vector.load %arg7[%c1_43, %c0_44, %c0_45, %c9_46, %c0_47] : memref<2x2x10x10x256xbf16, #tpu.memory_space<vmem>>, vector<1x2x10x1x256xbf16>
    %29 = vector.shape_cast %28 : vector<1x2x10x1x256xbf16> to vector<2x10x1x256xbf16>
    %30 = vector.shape_cast %1 : vector<2x10x1x256xbf16> to vector<1x2x10x1x256xbf16>
    tpu.vector_store %arg7[%c1_43, %c0_44, %c0_45, %c9_46, %c0_47], %30 {strides = array<i32>} : memref<2x2x10x10x256xbf16, #tpu.memory_space<vmem>>, vector<1x2x10x1x256xbf16>,
    %c0_48 = arith.constant 0 : index
    %c0_49 = arith.constant 0 : index
    %c1_50 = arith.constant 1 : index
    %c0_51 = arith.constant 0 : index
    %c0_52 = arith.constant 0 : index
    %31 = vector.load %arg1[%c0_48, %c0_49, %c1_50, %c0_51, %c0_52] : memref<2x8x2x8x256xbf16, #tpu.memory_space<vmem>>, vector<2x8x1x8x256xbf16>
    %32 = vector.shape_cast %31 : vector<2x8x1x8x256xbf16> to vector<2x8x8x256xbf16>
    %c1_53 = arith.constant 1 : index
    %c0_54 = arith.constant 0 : index
    %c1_55 = arith.constant 1 : index
    %c1_56 = arith.constant 1 : index
    %c0_57 = arith.constant 0 : index
    %33 = vector.load %arg7[%c1_53, %c0_54, %c1_55, %c1_56, %c0_57] : memref<2x2x10x10x256xbf16, #tpu.memory_space<vmem>>, vector<1x2x8x8x256xbf16>
    %34 = vector.shape_cast %33 : vector<1x2x8x8x256xbf16> to vector<2x8x8x256xbf16>
    %35 = vector.shape_cast %32 : vector<2x8x8x256xbf16> to vector<1x2x8x8x256xbf16>
    tpu.vector_store %arg7[%c1_53, %c0_54, %c1_55, %c1_56, %c0_57], %35 {strides = array<i32>} : memref<2x2x10x10x256xbf16, #tpu.memory_space<vmem>>, vector<1x2x8x8x256xbf16>,
    %c0_58 = arith.constant 0 : index
    %c0_59 = arith.constant 0 : index
    %c0_60 = arith.constant 0 : index
    %c0_61 = arith.constant 0 : index
    %c0_62 = arith.constant 0 : index
    %36 = vector.load %arg7[%c0_58, %c0_59, %c0_60, %c0_61, %c0_62] : memref<2x2x10x10x256xbf16, #tpu.memory_space<vmem>>, vector<1x2x8x8x256xbf16>
    %37 = vector.shape_cast %36 : vector<1x2x8x8x256xbf16> to vector<2x8x8x256xbf16>
    %38 = vector.shape_cast %37 : vector<2x8x8x256xbf16> to vector<128x256xbf16>
    %c0_63 = arith.constant 0 : index
    %c0_64 = arith.constant 0 : index
    %c0_65 = arith.constant 0 : index
    %c0_66 = arith.constant 0 : index
    %39 = vector.load %arg2[%c0_63, %c0_64, %c0_65, %c0_66] : memref<5x3x256x128xbf16, #tpu.memory_space<vmem>>, vector<1x1x256x128xbf16>
    %40 = vector.shape_cast %39 : vector<1x1x256x128xbf16> to vector<256x128xbf16>
    %cst_67 = arith.constant dense<0.000000e+00> : vector<128x128xf32>
    %41 = tpu.matmul %38, %40, %cst_67 {dimension_numbers = #tpu.dot_dimension_numbers<[1], [0], [0], [1], [0, 0, 1, 1], [], []>} : vector<128x256xbf16>, vector<256x128xbf16>, vector<128x128xf32> -> vector<128x128xf32>
    %c0_68 = arith.constant 0 : index
    %c0_69 = arith.constant 0 : index
    %c0_70 = arith.constant 0 : index
    %c1_71 = arith.constant 1 : index
    %c0_72 = arith.constant 0 : index
    %42 = vector.load %arg7[%c0_68, %c0_69, %c0_70, %c1_71, %c0_72] : memref<2x2x10x10x256xbf16, #tpu.memory_space<vmem>>, vector<1x2x8x8x256xbf16>
    %43 = vector.shape_cast %42 : vector<1x2x8x8x256xbf16> to vector<2x8x8x256xbf16>
    %44 = vector.shape_cast %43 : vector<2x8x8x256xbf16> to vector<128x256xbf16>
    %c0_73 = arith.constant 0 : index
    %c1_74 = arith.constant 1 : index
    %c0_75 = arith.constant 0 : index
    %c0_76 = arith.constant 0 : index
    %45 = vector.load %arg2[%c0_73, %c1_74, %c0_75, %c0_76] : memref<5x3x256x128xbf16, #tpu.memory_space<vmem>>, vector<1x1x256x128xbf16>
    %46 = vector.shape_cast %45 : vector<1x1x256x128xbf16> to vector<256x128xbf16>
    %cst_77 = arith.constant dense<0.000000e+00> : vector<128x128xf32>
    %47 = tpu.matmul %44, %46, %cst_77 {dimension_numbers = #tpu.dot_dimension_numbers<[1], [0], [0], [1], [0, 0, 1, 1], [], []>} : vector<128x256xbf16>, vector<256x128xbf16>, vector<128x128xf32> -> vector<128x128xf32>
    %48 = arith.addf %41, %47 : vector<128x128xf32>
    %c0_78 = arith.constant 0 : index
    %c0_79 = arith.constant 0 : index
    %c0_80 = arith.constant 0 : index
    %c2 = arith.constant 2 : index
    %c0_81 = arith.constant 0 : index
    %49 = vector.load %arg7[%c0_78, %c0_79, %c0_80, %c2, %c0_81] : memref<2x2x10x10x256xbf16, #tpu.memory_space<vmem>>, vector<1x2x8x8x256xbf16>
    %50 = vector.shape_cast %49 : vector<1x2x8x8x256xbf16> to vector<2x8x8x256xbf16>
    %51 = vector.shape_cast %50 : vector<2x8x8x256xbf16> to vector<128x256xbf16>
    %c0_82 = arith.constant 0 : index
    %c2_83 = arith.constant 2 : index
    %c0_84 = arith.constant 0 : index
    %c0_85 = arith.constant 0 : index
    %52 = vector.load %arg2[%c0_82, %c2_83, %c0_84, %c0_85] : memref<5x3x256x128xbf16, #tpu.memory_space<vmem>>, vector<1x1x256x128xbf16>
    %53 = vector.shape_cast %52 : vector<1x1x256x128xbf16> to vector<256x128xbf16>
    %cst_86 = arith.constant dense<0.000000e+00> : vector<128x128xf32>
    %54 = tpu.matmul %51, %53, %cst_86 {dimension_numbers = #tpu.dot_dimension_numbers<[1], [0], [0], [1], [0, 0, 1, 1], [], []>} : vector<128x256xbf16>, vector<256x128xbf16>, vector<128x128xf32> -> vector<128x128xf32>
    %55 = arith.addf %48, %54 : vector<128x128xf32>
    %c1_87 = arith.constant 1 : index
    %c0_88 = arith.constant 0 : index
    %c0_89 = arith.constant 0 : index
    %c0_90 = arith.constant 0 : index
    %c0_91 = arith.constant 0 : index
    %56 = vector.load %arg7[%c1_87, %c0_88, %c0_89, %c0_90, %c0_91] : memref<2x2x10x10x256xbf16, #tpu.memory_space<vmem>>, vector<1x2x8x8x256xbf16>
    %57 = vector.shape_cast %56 : vector<1x2x8x8x256xbf16> to vector<2x8x8x256xbf16>
    %58 = vector.shape_cast %57 : vector<2x8x8x256xbf16> to vector<128x256xbf16>
    %c1_92 = arith.constant 1 : index
    %c0_93 = arith.constant 0 : index
    %c0_94 = arith.constant 0 : index
    %c0_95 = arith.constant 0 : index
    %59 = vector.load %arg2[%c1_92, %c0_93, %c0_94, %c0_95] : memref<5x3x256x128xbf16, #tpu.memory_space<vmem>>, vector<1x1x256x128xbf16>
    %60 = vector.shape_cast %59 : vector<1x1x256x128xbf16> to vector<256x128xbf16>
    %cst_96 = arith.constant dense<0.000000e+00> : vector<128x128xf32>
    %61 = tpu.matmul %58, %60, %cst_96 {dimension_numbers = #tpu.dot_dimension_numbers<[1], [0], [0], [1], [0, 0, 1, 1], [], []>} : vector<128x256xbf16>, vector<256x128xbf16>, vector<128x128xf32> -> vector<128x128xf32>
    %62 = arith.addf %55, %61 : vector<128x128xf32>
    %c1_97 = arith.constant 1 : index
    %c0_98 = arith.constant 0 : index
    %c0_99 = arith.constant 0 : index
    %c1_100 = arith.constant 1 : index
    %c0_101 = arith.constant 0 : index
    %63 = vector.load %arg7[%c1_97, %c0_98, %c0_99, %c1_100, %c0_101] : memref<2x2x10x10x256xbf16, #tpu.memory_space<vmem>>, vector<1x2x8x8x256xbf16>
    %64 = vector.shape_cast %63 : vector<1x2x8x8x256xbf16> to vector<2x8x8x256xbf16>
    %65 = vector.shape_cast %64 : vector<2x8x8x256xbf16> to vector<128x256xbf16>
    %c1_102 = arith.constant 1 : index
    %c1_103 = arith.constant 1 : index
    %c0_104 = arith.constant 0 : index
    %c0_105 = arith.constant 0 : index
    %66 = vector.load %arg2[%c1_102, %c1_103, %c0_104, %c0_105] : memref<5x3x256x128xbf16, #tpu.memory_space<vmem>>, vector<1x1x256x128xbf16>
    %67 = vector.shape_cast %66 : vector<1x1x256x128xbf16> to vector<256x128xbf16>
    %cst_106 = arith.constant dense<0.000000e+00> : vector<128x128xf32>
    %68 = tpu.matmul %65, %67, %cst_106 {dimension_numbers = #tpu.dot_dimension_numbers<[1], [0], [0], [1], [0, 0, 1, 1], [], []>} : vector<128x256xbf16>, vector<256x128xbf16>, vector<128x128xf32> -> vector<128x128xf32>
    %69 = arith.addf %62, %68 : vector<128x128xf32>
    %c1_107 = arith.constant 1 : index
    %c0_108 = arith.constant 0 : index
    %c0_109 = arith.constant 0 : index
    %c2_110 = arith.constant 2 : index
    %c0_111 = arith.constant 0 : index
    %70 = vector.load %arg7[%c1_107, %c0_108, %c0_109, %c2_110, %c0_111] : memref<2x2x10x10x256xbf16, #tpu.memory_space<vmem>>, vector<1x2x8x8x256xbf16>
    %71 = vector.shape_cast %70 : vector<1x2x8x8x256xbf16> to vector<2x8x8x256xbf16>
    %72 = vector.shape_cast %71 : vector<2x8x8x256xbf16> to vector<128x256xbf16>
    %c1_112 = arith.constant 1 : index
    %c2_113 = arith.constant 2 : index
    %c0_114 = arith.constant 0 : index
    %c0_115 = arith.constant 0 : index
    %73 = vector.load %arg2[%c1_112, %c2_113, %c0_114, %c0_115] : memref<5x3x256x128xbf16, #tpu.memory_space<vmem>>, vector<1x1x256x128xbf16>
    %74 = vector.shape_cast %73 : vector<1x1x256x128xbf16> to vector<256x128xbf16>
    %cst_116 = arith.constant dense<0.000000e+00> : vector<128x128xf32>
    %75 = tpu.matmul %72, %74, %cst_116 {dimension_numbers = #tpu.dot_dimension_numbers<[1], [0], [0], [1], [0, 0, 1, 1], [], []>} : vector<128x256xbf16>, vector<256x128xbf16>, vector<128x128xf32> -> vector<128x128xf32>
    %76 = arith.addf %69, %75 : vector<128x128xf32>
    %c0_117 = arith.constant 0 : index
    %c0_118 = arith.constant 0 : index
    %c1_119 = arith.constant 1 : index
    %c0_120 = arith.constant 0 : index
    %c0_121 = arith.constant 0 : index
    %77 = vector.load %arg7[%c0_117, %c0_118, %c1_119, %c0_120, %c0_121] : memref<2x2x10x10x256xbf16, #tpu.memory_space<vmem>>, vector<1x2x8x8x256xbf16>
    %78 = vector.shape_cast %77 : vector<1x2x8x8x256xbf16> to vector<2x8x8x256xbf16>
    %79 = vector.shape_cast %78 : vector<2x8x8x256xbf16> to vector<128x256xbf16>
    %c2_122 = arith.constant 2 : index
    %c0_123 = arith.constant 0 : index
    %c0_124 = arith.constant 0 : index
    %c0_125 = arith.constant 0 : index
    %80 = vector.load %arg2[%c2_122, %c0_123, %c0_124, %c0_125] : memref<5x3x256x128xbf16, #tpu.memory_space<vmem>>, vector<1x1x256x128xbf16>
    %81 = vector.shape_cast %80 : vector<1x1x256x128xbf16> to vector<256x128xbf16>
    %cst_126 = arith.constant dense<0.000000e+00> : vector<128x128xf32>
    %82 = tpu.matmul %79, %81, %cst_126 {dimension_numbers = #tpu.dot_dimension_numbers<[1], [0], [0], [1], [0, 0, 1, 1], [], []>} : vector<128x256xbf16>, vector<256x128xbf16>, vector<128x128xf32> -> vector<128x128xf32>
    %83 = arith.addf %76, %82 : vector<128x128xf32>
    %c0_127 = arith.constant 0 : index
    %c0_128 = arith.constant 0 : index
    %c1_129 = arith.constant 1 : index
    %c1_130 = arith.constant 1 : index
    %c0_131 = arith.constant 0 : index
    %84 = vector.load %arg7[%c0_127, %c0_128, %c1_129, %c1_130, %c0_131] : memref<2x2x10x10x256xbf16, #tpu.memory_space<vmem>>, vector<1x2x8x8x256xbf16>
    %85 = vector.shape_cast %84 : vector<1x2x8x8x256xbf16> to vector<2x8x8x256xbf16>
    %86 = vector.shape_cast %85 : vector<2x8x8x256xbf16> to vector<128x256xbf16>
    %c2_132 = arith.constant 2 : index
    %c1_133 = arith.constant 1 : index
    %c0_134 = arith.constant 0 : index
    %c0_135 = arith.constant 0 : index
    %87 = vector.load %arg2[%c2_132, %c1_133, %c0_134, %c0_135] : memref<5x3x256x128xbf16, #tpu.memory_space<vmem>>, vector<1x1x256x128xbf16>
    %88 = vector.shape_cast %87 : vector<1x1x256x128xbf16> to vector<256x128xbf16>
    %cst_136 = arith.constant dense<0.000000e+00> : vector<128x128xf32>
    %89 = tpu.matmul %86, %88, %cst_136 {dimension_numbers = #tpu.dot_dimension_numbers<[1], [0], [0], [1], [0, 0, 1, 1], [], []>} : vector<128x256xbf16>, vector<256x128xbf16>, vector<128x128xf32> -> vector<128x128xf32>
    %90 = arith.addf %83, %89 : vector<128x128xf32>
    %c0_137 = arith.constant 0 : index
    %c0_138 = arith.constant 0 : index
    %c1_139 = arith.constant 1 : index
    %c2_140 = arith.constant 2 : index
    %c0_141 = arith.constant 0 : index
    %91 = vector.load %arg7[%c0_137, %c0_138, %c1_139, %c2_140, %c0_141] : memref<2x2x10x10x256xbf16, #tpu.memory_space<vmem>>, vector<1x2x8x8x256xbf16>
    %92 = vector.shape_cast %91 : vector<1x2x8x8x256xbf16> to vector<2x8x8x256xbf16>
    %93 = vector.shape_cast %92 : vector<2x8x8x256xbf16> to vector<128x256xbf16>
    %c2_142 = arith.constant 2 : index
    %c2_143 = arith.constant 2 : index
    %c0_144 = arith.constant 0 : index
    %c0_145 = arith.constant 0 : index
    %94 = vector.load %arg2[%c2_142, %c2_143, %c0_144, %c0_145] : memref<5x3x256x128xbf16, #tpu.memory_space<vmem>>, vector<1x1x256x128xbf16>
    %95 = vector.shape_cast %94 : vector<1x1x256x128xbf16> to vector<256x128xbf16>
    %cst_146 = arith.constant dense<0.000000e+00> : vector<128x128xf32>
    %96 = tpu.matmul %93, %95, %cst_146 {dimension_numbers = #tpu.dot_dimension_numbers<[1], [0], [0], [1], [0, 0, 1, 1], [], []>} : vector<128x256xbf16>, vector<256x128xbf16>, vector<128x128xf32> -> vector<128x128xf32>
    %97 = arith.addf %90, %96 : vector<128x128xf32>
    %c1_147 = arith.constant 1 : index
    %c0_148 = arith.constant 0 : index
    %c1_149 = arith.constant 1 : index
    %c0_150 = arith.constant 0 : index
    %c0_151 = arith.constant 0 : index
    %98 = vector.load %arg7[%c1_147, %c0_148, %c1_149, %c0_150, %c0_151] : memref<2x2x10x10x256xbf16, #tpu.memory_space<vmem>>, vector<1x2x8x8x256xbf16>
    %99 = vector.shape_cast %98 : vector<1x2x8x8x256xbf16> to vector<2x8x8x256xbf16>
    %100 = vector.shape_cast %99 : vector<2x8x8x256xbf16> to vector<128x256xbf16>
    %c3 = arith.constant 3 : index
    %c0_152 = arith.constant 0 : index
    %c0_153 = arith.constant 0 : index
    %c0_154 = arith.constant 0 : index
    %101 = vector.load %arg2[%c3, %c0_152, %c0_153, %c0_154] : memref<5x3x256x128xbf16, #tpu.memory_space<vmem>>, vector<1x1x256x128xbf16>
    %102 = vector.shape_cast %101 : vector<1x1x256x128xbf16> to vector<256x128xbf16>
    %cst_155 = arith.constant dense<0.000000e+00> : vector<128x128xf32>
    %103 = tpu.matmul %100, %102, %cst_155 {dimension_numbers = #tpu.dot_dimension_numbers<[1], [0], [0], [1], [0, 0, 1, 1], [], []>} : vector<128x256xbf16>, vector<256x128xbf16>, vector<128x128xf32> -> vector<128x128xf32>
    %104 = arith.addf %97, %103 : vector<128x128xf32>
    %c1_156 = arith.constant 1 : index
    %c0_157 = arith.constant 0 : index
    %c1_158 = arith.constant 1 : index
    %c1_159 = arith.constant 1 : index
    %c0_160 = arith.constant 0 : index
    %105 = vector.load %arg7[%c1_156, %c0_157, %c1_158, %c1_159, %c0_160] : memref<2x2x10x10x256xbf16, #tpu.memory_space<vmem>>, vector<1x2x8x8x256xbf16>
    %106 = vector.shape_cast %105 : vector<1x2x8x8x256xbf16> to vector<2x8x8x256xbf16>
    %107 = vector.shape_cast %106 : vector<2x8x8x256xbf16> to vector<128x256xbf16>
    %c3_161 = arith.constant 3 : index
    %c1_162 = arith.constant 1 : index
    %c0_163 = arith.constant 0 : index
    %c0_164 = arith.constant 0 : index
    %108 = vector.load %arg2[%c3_161, %c1_162, %c0_163, %c0_164] : memref<5x3x256x128xbf16, #tpu.memory_space<vmem>>, vector<1x1x256x128xbf16>
    %109 = vector.shape_cast %108 : vector<1x1x256x128xbf16> to vector<256x128xbf16>
    %cst_165 = arith.constant dense<0.000000e+00> : vector<128x128xf32>
    %110 = tpu.matmul %107, %109, %cst_165 {dimension_numbers = #tpu.dot_dimension_numbers<[1], [0], [0], [1], [0, 0, 1, 1], [], []>} : vector<128x256xbf16>, vector<256x128xbf16>, vector<128x128xf32> -> vector<128x128xf32>
    %111 = arith.addf %104, %110 : vector<128x128xf32>
    %c1_166 = arith.constant 1 : index
    %c0_167 = arith.constant 0 : index
    %c1_168 = arith.constant 1 : index
    %c2_169 = arith.constant 2 : index
    %c0_170 = arith.constant 0 : index
    %112 = vector.load %arg7[%c1_166, %c0_167, %c1_168, %c2_169, %c0_170] : memref<2x2x10x10x256xbf16, #tpu.memory_space<vmem>>, vector<1x2x8x8x256xbf16>
    %113 = vector.shape_cast %112 : vector<1x2x8x8x256xbf16> to vector<2x8x8x256xbf16>
    %114 = vector.shape_cast %113 : vector<2x8x8x256xbf16> to vector<128x256xbf16>
    %c3_171 = arith.constant 3 : index
    %c2_172 = arith.constant 2 : index
    %c0_173 = arith.constant 0 : index
    %c0_174 = arith.constant 0 : index
    %115 = vector.load %arg2[%c3_171, %c2_172, %c0_173, %c0_174] : memref<5x3x256x128xbf16, #tpu.memory_space<vmem>>, vector<1x1x256x128xbf16>
    %116 = vector.shape_cast %115 : vector<1x1x256x128xbf16> to vector<256x128xbf16>
    %cst_175 = arith.constant dense<0.000000e+00> : vector<128x128xf32>
    %117 = tpu.matmul %114, %116, %cst_175 {dimension_numbers = #tpu.dot_dimension_numbers<[1], [0], [0], [1], [0, 0, 1, 1], [], []>} : vector<128x256xbf16>, vector<256x128xbf16>, vector<128x128xf32> -> vector<128x128xf32>
    %118 = arith.addf %111, %117 : vector<128x128xf32>
    %c0_176 = arith.constant 0 : index
    %c0_177 = arith.constant 0 : index
    %c2_178 = arith.constant 2 : index
    %c0_179 = arith.constant 0 : index
    %c0_180 = arith.constant 0 : index
    %119 = vector.load %arg7[%c0_176, %c0_177, %c2_178, %c0_179, %c0_180] : memref<2x2x10x10x256xbf16, #tpu.memory_space<vmem>>, vector<1x2x8x8x256xbf16>
    %120 = vector.shape_cast %119 : vector<1x2x8x8x256xbf16> to vector<2x8x8x256xbf16>
    %121 = vector.shape_cast %120 : vector<2x8x8x256xbf16> to vector<128x256xbf16>
    %c4 = arith.constant 4 : index
    %c0_181 = arith.constant 0 : index
    %c0_182 = arith.constant 0 : index
    %c0_183 = arith.constant 0 : index
    %122 = vector.load %arg2[%c4, %c0_181, %c0_182, %c0_183] : memref<5x3x256x128xbf16, #tpu.memory_space<vmem>>, vector<1x1x256x128xbf16>
    %123 = vector.shape_cast %122 : vector<1x1x256x128xbf16> to vector<256x128xbf16>
    %cst_184 = arith.constant dense<0.000000e+00> : vector<128x128xf32>
    %124 = tpu.matmul %121, %123, %cst_184 {dimension_numbers = #tpu.dot_dimension_numbers<[1], [0], [0], [1], [0, 0, 1, 1], [], []>} : vector<128x256xbf16>, vector<256x128xbf16>, vector<128x128xf32> -> vector<128x128xf32>
    %125 = arith.addf %118, %124 : vector<128x128xf32>
    %c0_185 = arith.constant 0 : index
    %c0_186 = arith.constant 0 : index
    %c2_187 = arith.constant 2 : index
    %c1_188 = arith.constant 1 : index
    %c0_189 = arith.constant 0 : index
    %126 = vector.load %arg7[%c0_185, %c0_186, %c2_187, %c1_188, %c0_189] : memref<2x2x10x10x256xbf16, #tpu.memory_space<vmem>>, vector<1x2x8x8x256xbf16>
    %127 = vector.shape_cast %126 : vector<1x2x8x8x256xbf16> to vector<2x8x8x256xbf16>
    %128 = vector.shape_cast %127 : vector<2x8x8x256xbf16> to vector<128x256xbf16>
    %c4_190 = arith.constant 4 : index
    %c1_191 = arith.constant 1 : index
    %c0_192 = arith.constant 0 : index
    %c0_193 = arith.constant 0 : index
    %129 = vector.load %arg2[%c4_190, %c1_191, %c0_192, %c0_193] : memref<5x3x256x128xbf16, #tpu.memory_space<vmem>>, vector<1x1x256x128xbf16>
    %130 = vector.shape_cast %129 : vector<1x1x256x128xbf16> to vector<256x128xbf16>
    %cst_194 = arith.constant dense<0.000000e+00> : vector<128x128xf32>
    %131 = tpu.matmul %128, %130, %cst_194 {dimension_numbers = #tpu.dot_dimension_numbers<[1], [0], [0], [1], [0, 0, 1, 1], [], []>} : vector<128x256xbf16>, vector<256x128xbf16>, vector<128x128xf32> -> vector<128x128xf32>
    %132 = arith.addf %125, %131 : vector<128x128xf32>
    %c0_195 = arith.constant 0 : index
    %c0_196 = arith.constant 0 : index
    %c2_197 = arith.constant 2 : index
    %c2_198 = arith.constant 2 : index
    %c0_199 = arith.constant 0 : index
    %133 = vector.load %arg7[%c0_195, %c0_196, %c2_197, %c2_198, %c0_199] : memref<2x2x10x10x256xbf16, #tpu.memory_space<vmem>>, vector<1x2x8x8x256xbf16>
    %134 = vector.shape_cast %133 : vector<1x2x8x8x256xbf16> to vector<2x8x8x256xbf16>
    %135 = vector.shape_cast %134 : vector<2x8x8x256xbf16> to vector<128x256xbf16>
    %c4_200 = arith.constant 4 : index
    %c2_201 = arith.constant 2 : index
    %c0_202 = arith.constant 0 : index
    %c0_203 = arith.constant 0 : index
    %136 = vector.load %arg2[%c4_200, %c2_201, %c0_202, %c0_203] : memref<5x3x256x128xbf16, #tpu.memory_space<vmem>>, vector<1x1x256x128xbf16>
    %137 = vector.shape_cast %136 : vector<1x1x256x128xbf16> to vector<256x128xbf16>
    %cst_204 = arith.constant dense<0.000000e+00> : vector<128x128xf32>
    %138 = tpu.matmul %135, %137, %cst_204 {dimension_numbers = #tpu.dot_dimension_numbers<[1], [0], [0], [1], [0, 0, 1, 1], [], []>} : vector<128x256xbf16>, vector<256x128xbf16>, vector<128x128xf32> -> vector<128x128xf32>
    %139 = arith.addf %132, %138 : vector<128x128xf32>
    %c0_205 = arith.constant 0 : index
    %c0_206 = arith.constant 0 : index
    %140 = vector.load %arg3[%c0_205, %c0_206] : memref<1x128xf32, #tpu.memory_space<vmem>>, vector<1x128xf32>
    %141 = vector.broadcast %140 : vector<1x128xf32> to vector<128x128xf32>
    %142 = arith.addf %139, %141 : vector<128x128xf32>
    %143 = arith.mulf %142, %142 : vector<128x128xf32>
    %c0_207 = arith.constant 0 : index
    %c0_208 = arith.constant 0 : index
    %144 = vector.load %arg4[%c0_207, %c0_208] : memref<128x128xbf16, #tpu.memory_space<vmem>>, vector<128x128xbf16>
    %145 = arith.extf %144 : vector<128x128xbf16> to vector<128x128xf32>
    %cst_209 = arith.constant dense<0.000000e+00> : vector<128x128xf32>
    %146 = tpu.matmul %143, %145, %cst_209 {dimension_numbers = #tpu.dot_dimension_numbers<[1], [0], [0], [1], [0, 0, 1, 1], [], []>} : vector<128x128xf32>, vector<128x128xf32>, vector<128x128xf32> -> vector<128x128xf32>
    %c0_210 = arith.constant 0 : index
    %c0_211 = arith.constant 0 : index
    %147 = vector.load %arg5[%c0_210, %c0_211] : memref<1x128xf32, #tpu.memory_space<vmem>>, vector<1x128xf32>
    %148 = vector.broadcast %147 : vector<1x128xf32> to vector<128x128xf32>
    %149 = arith.addf %146, %148 : vector<128x128xf32>
    %150 = math.rsqrt %149 : vector<128x128xf32>
    %151 = arith.mulf %142, %150 : vector<128x128xf32>
    %152 = vector.shape_cast %151 : vector<128x128xf32> to vector<2x8x8x128xf32>
    %c0_212 = arith.constant 0 : index
    %c0_213 = arith.constant 0 : index
    %c0_214 = arith.constant 0 : index
    %c0_215 = arith.constant 0 : index
    %153 = vector.load %arg6[%c0_212, %c0_213, %c0_214, %c0_215] : memref<2x8x8x128xf32, #tpu.memory_space<vmem>>, vector<2x8x8x128xf32>
    tpu.vector_store %arg6[%c0_212, %c0_213, %c0_214, %c0_215], %152 {strides = array<i32>} : memref<2x8x8x128xf32, #tpu.memory_space<vmem>>, vector<2x8x8x128xf32>,
    return
  }
  func.func @transform_0(%arg0: i32) -> (i32, i32, i32, i32, i32) {
    %c0_i32 = arith.constant 0 : i32
    %c0_i32_0 = arith.constant 0 : i32
    %c0_i32_1 = arith.constant 0 : i32
    %c0_i32_2 = arith.constant 0 : i32
    %c0_i32_3 = arith.constant 0 : i32
    return %arg0, %c0_i32, %c0_i32_0, %c0_i32_1, %c0_i32_2 : i32, i32, i32, i32, i32
  }
  func.func @transform_1(%arg0: i32) -> (i32, i32, i32, i32) {
    %c0_i32 = arith.constant 0 : i32
    %c0_i32_0 = arith.constant 0 : i32
    %c0_i32_1 = arith.constant 0 : i32
    %c0_i32_2 = arith.constant 0 : i32
    %c0_i32_3 = arith.constant 0 : i32
    return %c0_i32, %c0_i32_0, %c0_i32_1, %c0_i32_2 : i32, i32, i32, i32
  }
  func.func @transform_2(%arg0: i32) -> (i32, i32) {
    %c0_i32 = arith.constant 0 : i32
    %c0_i32_0 = arith.constant 0 : i32
    %c0_i32_1 = arith.constant 0 : i32
    return %c0_i32, %c0_i32_0 : i32, i32
  }
  func.func @transform_3(%arg0: i32) -> (i32, i32) {
    %c0_i32 = arith.constant 0 : i32
    %c0_i32_0 = arith.constant 0 : i32
    %c0_i32_1 = arith.constant 0 : i32
    return %c0_i32, %c0_i32_0 : i32, i32
  }
  func.func @transform_4(%arg0: i32) -> (i32, i32) {
    %c0_i32 = arith.constant 0 : i32
    %c0_i32_0 = arith.constant 0 : i32
    %c0_i32_1 = arith.constant 0 : i32
    return %c0_i32, %c0_i32_0 : i32, i32
  }
  func.func @transform_5(%arg0: i32) -> (i32, i32, i32, i32) {
    %c0_i32 = arith.constant 0 : i32
    %c0_i32_0 = arith.constant 0 : i32
    %c0_i32_1 = arith.constant 0 : i32
    %c0_i32_2 = arith.constant 0 : i32
    return %arg0, %c0_i32, %c0_i32_0, %c0_i32_1 : i32, i32, i32, i32
  }
}

</mosaic_0001>

<bundles_post_ra>
// kernel: downsampler5x5_forward_nhwc.1
= control target key start
LH: loop header
LB: loop body
LE: loop exit
PB: predicated region body
PF: predicated region fallthrough
CT: control target
= control target key end

     0   :  { %v10123_v2 = vmov 0   ;;  %vm31_vm0 = vcmask 1040384   ;;  %vm32_vm1 = vsmask.f32 256  ;;  %vm34_vm2 = vcmask 1044484   ;;  %s13881_s0 = inlined_call_operand.vmem [shape: bf16[2,8,2,8,256], index: 0, kind: input, shape index: {}]   ;;  %s13882_s1 = inlined_call_operand.vmem [shape: bf16[5,3,256,128], index: 1, kind: input, shape index: {}]   ;;  %s13883_s2 = inlined_call_operand.vmem [shape: f32[1,128], index: 2, kind: input, shape index: {}]   ;;  %s13884_s3 = inlined_call_operand.vmem [shape: bf16[128,128], index: 3, kind: input, shape index: {}]   ;;  %s13885_s4 = inlined_call_operand.vmem [shape: f32[1,128], index: 4, kind: input, shape index: {}]   ;;  %s13886_s5 = inlined_call_operand.hbm [shape: f32[2,8,8,128], index: 5, kind: output, shape index: {}]  }
   0x1   :  { %v9797_v0 = vld [vmem:[%s13882_s1 + $0xf8] sm:$0xff]   ;;  %22 = vst [vmem:[#allocation2 + $0x28] sm:$0xff] %v10123_v2  ;;  %23 = vst [vmem:[#allocation2 + $0x8] sm:$0x11] %v10123_v2  ;;  %v9801_v5 = vld [vmem:[%s13882_s1 + $0xf0] sm:$0xff]   ;;  %vm340_vm9 = vcmask 1043456  }
   0x2   :  { %v9798_v1 = vld [vmem:[%s13882_s1 + $0x78] sm:$0xff]   ;;  %447 = vst [vmem:[#allocation2 + $0x240] sm:$0xff] %v10123_v2  ;;  %448 = vst [vmem:[#allocation2 + $0x138] sm:$0x11] %v10123_v2  ;;  %8745 = vmatprep.subr.bf16.mxu0 %v9797_v0  ;;  %v9802_v6 = vld [vmem:[%s13882_s1 + $0x70] sm:$0xff]   ;;  %vm342_vm10 = vcmask 1047556  }
   0x3   :  { %449 = vst [vmem:[#allocation2 + $0x200] sm:$0xff] %v10123_v2  ;;  %450 = vst [vmem:[#allocation2 + $0xa8] sm:$0x11] %v10123_v2  ;;  %v9799_v3 = vld [vmem:[%s13882_s1 + $0xb8] sm:$0xff]   ;;  %8809 = vmatprep.subr.bf16.mxu1 %v9798_v1  ;;  %v9803_v7 = vld [vmem:[%s13882_s1 + $0xb0] sm:$0xff]  }
   0x4   :  { %24 = vst [vmem:[#allocation2 + $0x10] sm:$0xff] %v10123_v2  ;;  %25 = vst [vmem:[#allocation2 + $0x98] sm:$0x11] %v10123_v2  ;;  %v9800_v4 = vld [vmem:[%s13882_s1 + $0x38] sm:$0xff]   ;;  %8746 = vmatpush3.bf16.msra.mxu0 %v9799_v3  ;;  %v9804_v8 = vld [vmem:[%s13882_s1 + $0x30] sm:$0xff]  }
   0x5   :  { %27 = vst [vmem:[#allocation2 + $0x68] sm:$0xff] %v10123_v2  ;;  %28 = vst [vmem:[#allocation2 + $0x78] sm:$0x11] %v10123_v2  ;;  %8810 = vmatpush3.bf16.msra.mxu1 %v9800_v4  ;;  %8747 = vmatprep.subr.bf16.mxu0 %v9801_v5  ;;  %v9805_v9 = vld [vmem:[%s13882_s1 + $0xe8] sm:$0xff]   ;;  %v9809_v13 = vld [vmem:[%s13882_s1 + $0xe0] sm:$0xff]  }
   0x6   :  { %29 = vst [vmem:[#allocation2 + $0x70] sm:$0xff] %v10123_v2  ;;  %30 = vst [vmem:[#allocation2 + $0xf8] sm:$0x11] %v10123_v2  ;;  %8811 = vmatprep.subr.bf16.mxu1 %v9802_v6  ;;  %v9806_v10 = vld [vmem:[%s13882_s1 + $0x68] sm:$0xff]   ;;  %v9810_v14 = vld [vmem:[%s13882_s1 + $0x60] sm:$0xff]  }
   0x7   :  { %442 = vst [vmem:[#allocation2] sm:$0xff] %v10123_v2  ;;  %443 = vst [vmem:[#allocation2 + $0x1b0] sm:$0x11] %v10123_v2  ;;  %v9807_v11 = vld [vmem:[%s13882_s1 + $0xa8] sm:$0xff]   ;;  %v9811_v15 = vld [vmem:[%s13882_s1 + $0xa0] sm:$0xff]  }
   0x8   :  { %444 = vst [vmem:[#allocation2 + $0xd0] sm:$0xff] %v10123_v2  ;;  %445 = vst [vmem:[#allocation2 + $0x258] sm:$0x11] %v10123_v2  ;;  %8748 = vmatpush3.bf16.msra.mxu0 %v9803_v7  ;;  %v9808_v12 = vld [vmem:[%s13882_s1 + $0x28] sm:$0xff]   ;;  %v9812_v16 = vld [vmem:[%s13882_s1 + $0x20] sm:$0xff]  }
   0x9   :  { %8812 = vmatpush3.bf16.msra.mxu1 %v9804_v8  ;;  %8749 = vmatprep.subr.bf16.mxu0 %v9805_v9  ;;  %v9813_v17 = vld [vmem:[%s13882_s1 + $0xd8] sm:$0xff]   ;;  %v9817_v21 = vld [vmem:[%s13882_s1 + $0xd0] sm:$0xff]   ;;  %v9821_v25 = vld [vmem:[%s13882_s1 + $0xc8] sm:$0xff]   ;;  %vm35_vm3 = vsmask.f32 4352 }
   0xa   :  { %8813 = vmatprep.subr.bf16.mxu1 %v9806_v10  ;;  %v9814_v18 = vld [vmem:[%s13882_s1 + $0x58] sm:$0xff]   ;;  %v9818_v22 = vld [vmem:[%s13882_s1 + $0x50] sm:$0xff]   ;;  %v9822_v26 = vld [vmem:[%s13882_s1 + $0x48] sm:$0xff]   ;;  %vm98_vm5 = vsmask.f32 7938 }
   0xb   :  { %v9815_v19 = vld [vmem:[%s13882_s1 + $0x98] sm:$0xff]   ;;  %v9819_v23 = vld [vmem:[%s13882_s1 + $0x90] sm:$0xff]   ;;  %v9823_v27 = vld [vmem:[%s13882_s1 + $0x88] sm:$0xff]   ;;  %vm100_vm7 = vsmask.f32 7954 }
   0xc   :  { %8750 = vmatpush3.bf16.msra.mxu0 %v9807_v11  ;;  %v9816_v20 = vld [vmem:[%s13882_s1 + $0x18] sm:$0xff]   ;;  %v9820_v24 = vld [vmem:[%s13882_s1 + $0x10] sm:$0xff]   ;;  %v9824_v28 = vld [vmem:[%s13882_s1 + $0x8] sm:$0xff]  }
   0xd   :  { %8814 = vmatpush3.bf16.msra.mxu1 %v9808_v12  ;;  %8751 = vmatprep.subr.bf16.mxu0 %v9809_v13  ;;  %v9825_v29 = vld [vmem:[%s13882_s1 + $0xc0] sm:$0xff]   ;;  %vm33_vm4 = vmand %vm31_vm0, %vm32_vm1  ;;  %v38_v33 = vld [vmem:[#allocation2 + $0x28] sm:$0x11]  ;;  %vm909_vm1 = vsmask.f32 3328 }
   0xe   :  { %8815 = vmatprep.subr.bf16.mxu1 %v9810_v14  ;;  %v9826_v30 = vld [vmem:[%s13882_s1 + $0x40] sm:$0xff]   ;;  %v41_v34 = vld [vmem:[#allocation2 + $0x48] sm:$0x11]  ;;  %vm36_vm6 = vmand %vm34_vm2, %vm35_vm3 }
   0xf   :  { %v9827_v31 = vld [vmem:[%s13882_s1 + $0x80] sm:$0xff]   ;;  %v103_v35 = vld [vmem:[#allocation2 + $0x8] sm:$0x11]  ;;  %v106_v36 = vld [vmem:[#allocation2 + $0x170] sm:$0x11] }
  0x10   :  { %8752 = vmatpush3.bf16.msra.mxu0 %v9811_v15  ;;  %v9828_v32 = vld [vmem:[%s13882_s1] sm:$0xff]   ;;  %vm10255_vm8 = vmor %vm36_vm6, %vm33_vm4  ;;  %v538_v47 = vld [vmem:[#allocation2 + $0x138] sm:$0x11]  ;;  %vm1747_vm4 = vcmask 1042432  }
  0x11   :  { %8816 = vmatpush3.bf16.msra.mxu1 %v9812_v16  ;;  %8753 = vmatprep.subr.bf16.mxu0 %v9813_v17  ;;  %v163_v38 = vld [vmem:[%s13881_s0] sm:$0xff]  ;;  %v39_v40 = vsel %vm10255_vm8, 0, %v38_v33  ;;  %v42_v41 = vsel %vm10255_vm8, 0, %v41_v34  ;;  %vm99_vm11 = vmand %vm31_vm0, %vm98_vm5  ;;  %v568_v48 = vld [vmem:[#allocation2 + $0xa8] sm:$0x11] }
  0x12   :  { %8817 = vmatprep.subr.bf16.mxu1 %v9814_v18  ;;  %v478_v39 = vld [vmem:[#allocation2 + $0x240] sm:$0x11]  ;;  %v180_v42 = vshrl.u32 %v163_v38, 16  ;;  %v183_v43 = vshll.u32 %v163_v38, 16  ;;  %40 = vst [vmem:[#allocation2 + $0x28] sm:$0x11] %v39_v40  ;;  %vm101_vm12 = vmand %vm34_vm2, %vm100_vm7 }
  0x13   :  { %v508_v44 = vld [vmem:[#allocation2 + $0x200] sm:$0x11]  ;;  %43 = vst [vmem:[#allocation2 + $0x48] sm:$0x11] %v42_v41  ;;  %v479_v45 = vsel %vm10255_vm8, 0, %v478_v39  ;;  %vm10274_vm13 = vmor %vm101_vm12, %vm99_vm11  ;;  %v9829_v55 = vld [vmem:[%s13882_s1 + $0x178] sm:$0xff]  }
  0x14   :  { %8754 = vmatpush3.bf16.msra.mxu0 %v9815_v19  ;;  %v509_v46 = vsel %vm10255_vm8, 0, %v508_v44  ;;  %v182_v50 = vrot.slane %v180_v42, 7  ;;  %480 = vst [vmem:[#allocation2 + $0x240] sm:$0x11] %v479_v45  ;;  %v104_v51 = vsel %vm10274_vm13, 0, %v103_v35  ;;  %v107_v52 = vsel %vm10274_vm13, 0, %v106_v36  ;;  %vm341_vm14 = vmand %vm340_vm9, %vm98_vm5 }
  0x15   :  { %8818 = vmatpush3.bf16.msra.mxu1 %v9816_v20  ;;  %8755 = vmatprep.subr.bf16.mxu0 %v9817_v21  ;;  %510 = vst [vmem:[#allocation2 + $0x200] sm:$0x11] %v509_v46  ;;  %v539_v53 = vsel %vm10274_vm13, 0, %v538_v47  ;;  %v569_v54 = vsel %vm10274_vm13, 0, %v568_v48  ;;  %105 = vst [vmem:[#allocation2 + $0x8] sm:$0x11] %v104_v51 }
  0x16   :  { %8819 = vmatprep.subr.bf16.mxu1 %v9818_v22  ;;  %108 = vst [vmem:[#allocation2 + $0x170] sm:$0x11] %v107_v52  ;;  %vm343_vm15 = vmand %vm342_vm10, %vm100_vm7  ;;  %v185_v56 = vor.u32 %v183_v43, %v182_v50  ;;  %v44_v57 = vld [vmem:[#allocation2 + $0x148] sm:$0x11]  ;;  %v109_v62 = vld [vmem:[#allocation2 + $0x20] sm:$0x11] }
  0x17   :  { %540 = vst [vmem:[#allocation2 + $0x138] sm:$0x11] %v539_v53  ;;  %570 = vst [vmem:[#allocation2 + $0xa8] sm:$0x11] %v569_v54  ;;  %v47_v58 = vld [vmem:[#allocation2 + $0x1e8] sm:$0x11] }
  0x18   :  { %8756 = vmatpush3.bf16.msra.mxu0 %v9819_v23  ;;  %vm10293_vm0 = vmor %vm343_vm15, %vm341_vm14  ;;  %v45_v60 = vsel %vm10255_vm8, 0, %v44_v57  ;;  %v48_v61 = vsel %vm10255_vm8, 0, %v47_v58  ;;  %v112_v63 = vld [vmem:[#allocation2 + $0x60] sm:$0x11]  ;;  %vm910_vm2 = vsmask.f32 7440 }
  0x19   :  { %8820 = vmatpush3.bf16.msra.mxu1 %v9820_v24  ;;  %8757 = vmatprep.subr.bf16.mxu0 %v9821_v25  ;;  %46 = vst [vmem:[#allocation2 + $0x148] sm:$0x11] %v45_v60  ;;  %49 = vst [vmem:[#allocation2 + $0x1e8] sm:$0x11] %v48_v61  ;;  %v110_v0 = vsel %vm10274_vm13, 0, %v109_v62  ;;  %v113_v1 = vsel %vm10274_vm13, 0, %v112_v63 }
  0x1a   :  { %8821 = vmatprep.subr.bf16.mxu1 %v9822_v26  ;;  %v164_v2 = vld [vmem:[%s13881_s0 + $0x10] sm:$0xff]  ;;  %v165_v3 = vld [vmem:[%s13881_s0 + $0x20] sm:$0xff]  ;;  %v186_v4 = vrot.slane %v182_v50, 4  ;;  %v345_v5 = vld [vmem:[#allocation2 + $0x48] sm:$0xff]  ;;  %111 = vst [vmem:[#allocation2 + $0x20] sm:$0x11] %v110_v0 }
  0x1b   :  { %v845_v6 = vld [vmem:[#allocation2 + $0x28] sm:$0xff]  ;;  %114 = vst [vmem:[#allocation2 + $0x60] sm:$0x11] %v113_v1  ;;  %v188_v7 = vshrl.u32 %v164_v2, 16  ;;  %v191_v8 = vshll.u32 %v164_v2, 16  ;;  %v196_v9 = vshrl.u32 %v165_v3, 16  ;;  %v346_v10 = vsel %vm10293_vm0, %v185_v56, %v345_v5  ;;  %vm10334_vm3 = vmor %vm909_vm1, %vm910_vm2 }
  0x1c   :  { %8758 = vmatpush3.bf16.msra.mxu0 %v9823_v27  ;;  %v913_v11 = vshrl.u32 %v845_v6, 16  ;;  %v916_v12 = vshll.u32 %v845_v6, 16  ;;  %v199_v13 = vshll.u32 %v165_v3, 16  ;;  %347 = vst [vmem:[#allocation2 + $0x48] sm:$0xff] %v346_v10  ;;  %v927_v14 = vshrl.u32 %v346_v10, 16  ;;  %v166_v50 = vld [vmem:[%s13881_s0 + $0x30] sm:$0xff] }
  0x1d   :  { %8822 = vmatpush3.bf16.msra.mxu1 %v9824_v28  ;;  %8759 = vmatprep.subr.bf16.mxu0 %v9825_v29  ;;  %v930_v15 = vshll.u32 %v346_v10, 16  ;;  %v7761_v16 = vcombine.high %v845_v6, %v346_v10  ;;  %v7760_v17 = vcombine.low %v845_v6, %v346_v10  ;;  %v348_v18 = vld [vmem:[#allocation2 + $0x170] sm:$0x11]  ;;  %v10313_v19 = vld [vmem:[#allocation2 + $0x8] sm:$0x11]  ;;  %v190_v29 = vrot.slane %v188_v7, 7 }
  0x1e   :  { %8823 = vmatprep.subr.bf16.mxu1 %v9826_v30  ;;  %v915_v20 = vrot.slane %v913_v11, 4  ;;  %v918_v21 = vrot.slane %v916_v12, 5  ;;  %v349_v22 = vsel %vm10255_vm8, %v186_v4, %v348_v18  ;;  %v922_v23 = vshll.u32 %v10313_v19, 16  ;;  %v50_v26 = vld [vmem:[#allocation2 + $0xc8] sm:$0x11]  ;;  %v167_v60 = vld [vmem:[%s13881_s0 + $0x40] sm:$0xff] }
  0x1f   :  { %v929_v24 = vrot.slane %v927_v14, 4  ;;  %v932_v25 = vrot.slane %v930_v15, 5  ;;  %1634 = vmatprep.mubr.bf16.mxu1 %v7761_v16  ;;  %350 = vst [vmem:[#allocation2 + $0x170] sm:$0x11] %v349_v22  ;;  %v1752_v28 = vrot.slane %v10313_v19, 5  ;;  %v198_v30 = vrot.slane %v196_v9, 7 }
  0x20   :  { %8760 = vmatpush3.bf16.msra.mxu0 %v9827_v31  ;;  %v919_v27 = vor.u32 %v918_v21, %v915_v20  ;;  %v53_v31 = vld [vmem:[#allocation2 + $0x198] sm:$0x11]  ;;  %v351_v34 = vld [vmem:[#allocation2 + $0x148] sm:$0xff]  ;;  %v51_v36 = vsel %vm10255_vm8, 0, %v50_v26  ;;  %v193_v40 = vor.u32 %v191_v8, %v190_v29  ;;  %v194_v41 = vrot.slane %v190_v29, 4 }
  0x21   :  { %8824 = vmatpush3.bf16.msra.mxu1 %v9828_v32  ;;  %8873 = vmatprep.subr.bf16.mxu0 %v9829_v55  ;;  %v924_v32 = vrot.slane %v922_v23, 5  ;;  %v933_v33 = vor.u32 %v932_v25, %v929_v24  ;;  %v357_v35 = vld [vmem:[#allocation2 + $0x1e8] sm:$0xff]  ;;  %v54_v38 = vsel %vm10255_vm8, 0, %v53_v31  ;;  %v201_v42 = vor.u32 %v199_v13, %v198_v30  ;;  %v354_v43 = vld [vmem:[#allocation2 + $0x20] sm:$0x11] }
  0x22   :  { %v920_v39 = vrot.slane %v919_v27, 4  ;;  %v360_v44 = vld [vmem:[#allocation2 + $0x60] sm:$0x11]  ;;  %52 = vst [vmem:[#allocation2 + $0xc8] sm:$0x11] %v51_v36  ;;  %v202_v46 = vrot.slane %v198_v30, 4  ;;  %v352_v51 = vsel %vm10293_vm0, %v193_v40, %v351_v34  ;;  %v355_v52 = vsel %vm10255_vm8, %v194_v41, %v354_v43 }
  0x23   :  { %55 = vst [vmem:[#allocation2 + $0x198] sm:$0x11] %v54_v38  ;;  %v934_v45 = vrot.slane %v933_v33, 4  ;;  %v115_v47 = vld [vmem:[#allocation2 + $0x1c8] sm:$0x11]  ;;  %v358_v53 = vsel %vm10293_vm0, %v201_v42, %v357_v35  ;;  %353 = vst [vmem:[#allocation2 + $0x148] sm:$0xff] %v352_v51 }
  0x24   :  { %1635 = vmatmul.mubr.bf16.vlgmr.msra.gmra.mxu1 %v7760_v17  ;;  %v118_v48 = vld [vmem:[#allocation2 + $0x160] sm:$0x11]  ;;  %356 = vst [vmem:[#allocation2 + $0x20] sm:$0x11] %v355_v52  ;;  %359 = vst [vmem:[#allocation2 + $0x1e8] sm:$0xff] %v358_v53  ;;  %v361_v55 = vsel %vm10255_vm8, %v202_v46, %v360_v44  ;;  %v941_v56 = vshrl.u32 %v352_v51, 16  ;;  %v7763_v62 = vcombine.high %v352_v51, %v358_v53 }
  0x25   :  { %v944_v57 = vshll.u32 %v352_v51, 16  ;;  %v955_v58 = vshrl.u32 %v358_v53, 16  ;;  %362 = vst [vmem:[#allocation2 + $0x60] sm:$0x11] %v361_v55  ;;  %v958_v61 = vshll.u32 %v358_v53, 16  ;;  %v7762_v63 = vcombine.low %v352_v51, %v358_v53  ;;  %v9830_v38 = vld [vmem:[%s13882_s1 + $0x138] sm:$0xff]  }
  0x26   :  { %v116_v0 = vsel %vm10274_vm13, 0, %v115_v47  ;;  %v56_v1 = vld [vmem:[#allocation2 + $0x18] sm:$0x11]  ;;  %v59_v2 = vld [vmem:[#allocation2 + $0x140] sm:$0x11]  ;;  %v943_v4 = vrot.slane %v941_v56, 4  ;;  %v925_v8 = vsel %vm10334_vm3, %v920_v39, %v924_v32  ;;  %1642 = vmatprep.mubr.bf16.mxu1 %v7763_v62 }
  0x27   :  { %v10345_v3 = vld [vmem:[#allocation2 + $0x170] sm:$0x11]  ;;  %v946_v5 = vrot.slane %v944_v57, 5  ;;  %v957_v6 = vrot.slane %v955_v58, 4  ;;  %117 = vst [vmem:[#allocation2 + $0x1c8] sm:$0x11] %v116_v0 }
  0x28   :  { %v119_v7 = vsel %vm10274_vm13, 0, %v118_v48  ;;  %v936_v9 = vshll.u32 %v10345_v3, 16  ;;  %v960_v10 = vrot.slane %v958_v61, 5  ;;  %v204_v11 = vshrl.u32 %v166_v50, 16  ;;  %v121_v12 = vld [vmem:[#allocation2 + $0x218] sm:$0x11] }
  0x29   :  { %120 = vst [vmem:[#allocation2 + $0x160] sm:$0x11] %v119_v7  ;;  %v947_v13 = vor.u32 %v946_v5, %v943_v4  ;;  %v207_v14 = vshll.u32 %v166_v50, 16  ;;  %v212_v15 = vshrl.u32 %v167_v60, 16  ;;  %v215_v16 = vshll.u32 %v167_v60, 16  ;;  %v363_v17 = vld [vmem:[#allocation2 + $0xc8] sm:$0xff] }
  0x2a   :  { %v938_v18 = vrot.slane %v936_v9, 5  ;;  %v961_v20 = vor.u32 %v960_v10, %v957_v6  ;;  %v206_v21 = vrot.slane %v204_v11, 7  ;;  %v369_v22 = vld [vmem:[#allocation2 + $0x198] sm:$0xff]  ;;  %v57_v23 = vsel %vm10255_vm8, 0, %v56_v1  ;;  %v124_v24 = vld [vmem:[#allocation2 + $0x120] sm:$0x11] }
  0x2b   :  { %v948_v25 = vrot.slane %v947_v13, 4  ;;  %v214_v26 = vrot.slane %v212_v15, 7  ;;  %58 = vst [vmem:[#allocation2 + $0x18] sm:$0x11] %v57_v23  ;;  %v60_v27 = vsel %vm10255_vm8, 0, %v59_v2  ;;  %v122_v29 = vsel %vm10274_vm13, 0, %v121_v12 }
  0x2c   :  { %1643 = vmatmul.mubr.bf16.gmra.mxu1 %v7762_v63  ;;  %v939_v30 = vsel %vm10334_vm3, %v934_v45, %v938_v18  ;;  %v10360_v31 = vld [vmem:[#allocation2 + $0x20] sm:$0x11]  ;;  %v962_v32 = vrot.slane %v961_v20, 4  ;;  %v209_v33 = vor.u32 %v207_v14, %v206_v21  ;;  %v210_v34 = vrot.slane %v206_v21, 4  ;;  %61 = vst [vmem:[#allocation2 + $0x140] sm:$0x11] %v60_v27 }
  0x2d   :  { %123 = vst [vmem:[#allocation2 + $0x218] sm:$0x11] %v122_v29  ;;  %v7728_v35 = vcombine.low %v925_v8, %v939_v30  ;;  %v7729_v36 = vcombine.high %v925_v8, %v939_v30  ;;  %v10365_v39 = vld [vmem:[#allocation2 + $0x60] sm:$0x11]  ;;  %v950_v40 = vshll.u32 %v10360_v31, 16  ;;  %v217_v41 = vor.u32 %v215_v16, %v214_v26  ;;  %v9831_v43 = vld [vmem:[%s13882_s1 + $0x170] sm:$0xff]  }
  0x2e   :  { %v964_v42 = vshll.u32 %v10365_v39, 16  ;;  %v218_v44 = vrot.slane %v214_v26, 4  ;;  %v364_v45 = vsel %vm10293_vm0, %v209_v33, %v363_v17  ;;  %v366_v46 = vld [vmem:[#allocation2 + $0x1c8] sm:$0x11]  ;;  %v125_v47 = vsel %vm10274_vm13, 0, %v124_v24  ;;  %v168_v60 = vld [vmem:[%s13881_s0 + $0x50] sm:$0xff] }
  0x2f   :  { %1361 = vmatprep.mubr.bf16.mxu0 %v7729_v36  ;;  %v952_v48 = vrot.slane %v950_v40, 5  ;;  %365 = vst [vmem:[#allocation2 + $0xc8] sm:$0xff] %v364_v45  ;;  %v367_v50 = vsel %vm10255_vm8, %v210_v34, %v366_v46  ;;  %v370_v51 = vsel %vm10293_vm0, %v217_v41, %v369_v22  ;;  %v969_v53 = vshrl.u32 %v364_v45, 16  ;;  %126 = vst [vmem:[#allocation2 + $0x120] sm:$0x11] %v125_v47  ;;  %v9832_v62 = vld [vmem:[%s13882_s1 + $0x130] sm:$0xff]  }
  0x30   :  { %v372_v52 = vld [vmem:[#allocation2 + $0x160] sm:$0x11]  ;;  %1362 = vmatmul.mubr.bf16.vlgmr.msra.gmra.mxu0 %v7728_v35  ;;  %v966_v55 = vrot.slane %v964_v42, 5  ;;  %368 = vst [vmem:[#allocation2 + $0x1c8] sm:$0x11] %v367_v50  ;;  %371 = vst [vmem:[#allocation2 + $0x198] sm:$0xff] %v370_v51  ;;  %v7765_v1 = vcombine.high %v364_v45, %v370_v51  ;;  %v7764_v8 = vcombine.low %v364_v45, %v370_v51 }
  0x31   :  { %v373_v56 = vsel %vm10255_vm8, %v218_v44, %v372_v52  ;;  %v972_v57 = vshll.u32 %v364_v45, 16  ;;  %v983_v58 = vshrl.u32 %v370_v51, 16  ;;  %8874 = vmatpush3.bf16.msra.mxu0 %v9830_v38  ;;  %v953_v61 = vsel %vm10334_vm3, %v948_v25, %v952_v48  ;;  %v169_v2 = vld [vmem:[%s13881_s0 + $0x60] sm:$0xff]  ;;  %v68_v4 = vld [vmem:[#allocation2 + $0x10] sm:$0x11]  ;;  %v9833_v9 = vld [vmem:[%s13882_s1 + $0x168] sm:$0xff]  }
  0x32   :  { %374 = vst [vmem:[#allocation2 + $0x160] sm:$0x11] %v373_v56  ;;  %v971_v63 = vrot.slane %v969_v53, 4  ;;  %v986_v0 = vshll.u32 %v370_v51, 16  ;;  %v967_v5 = vsel %vm10334_vm3, %v962_v32, %v966_v55  ;;  %8875 = vmatprep.subr.bf16.mxu0 %v9831_v43  ;;  %v71_v10 = vld [vmem:[#allocation2 + $0xb0] sm:$0x11]  ;;  %1650 = vmatprep.mubr.bf16.mxu1 %v7765_v1 }
  0x33   :  { %v974_v6 = vrot.slane %v972_v57, 5  ;;  %v985_v7 = vrot.slane %v983_v58, 4  ;;  %v10401_v11 = vld [vmem:[%s13881_s0 + $0x80] sm:$0xff]  ;;  %v7731_v12 = vcombine.high %v953_v61, %v967_v5  ;;  %v7730_v13 = vcombine.low %v953_v61, %v967_v5  ;;  %v9834_v15 = vld [vmem:[%s13882_s1 + $0x128] sm:$0xff]   ;;  %v133_v17 = vld [vmem:[#allocation2 + $0x98] sm:$0x11] }
  0x34   :  { %v988_v14 = vrot.slane %v986_v0, 5  ;;  %v220_v16 = vshrl.u32 %v168_v60, 16  ;;  %v136_v18 = vld [vmem:[#allocation2 + $0x88] sm:$0x11]  ;;  %1651 = vmatmul.mubr.bf16.gmra.mxu1 %v7764_v8  ;;  %v223_v21 = vshll.u32 %v168_v60, 16  ;;  %v228_v22 = vshrl.u32 %v169_v2, 16 }
  0x35   :  { %v975_v20 = vor.u32 %v974_v6, %v971_v63  ;;  %v231_v23 = vshll.u32 %v169_v2, 16  ;;  %v375_v24 = vld [vmem:[#allocation2 + $0x18] sm:$0xff]  ;;  %v9835_v26 = vld [vmem:[%s13882_s1 + $0x160] sm:$0xff]   ;;  %1369 = vmatprep.mubr.bf16.mxu0 %v7731_v12  ;;  %8876 = vmatpush3.bf16.msra.mxu0 %v9832_v62  ;;  %v69_v33 = vsel %vm10255_vm8, 0, %v68_v4  ;;  %v72_v34 = vsel %vm10255_vm8, 0, %v71_v10  ;;  %v9841_v50 = vld [vmem:[%s13882_s1 + $0x1f0] sm:$0xff]  }
  0x36   :  { %v378_v25 = vld [vmem:[#allocation2 + $0x218] sm:$0x11]  ;;  %v989_v29 = vor.u32 %v988_v14, %v985_v7  ;;  %v222_v30 = vrot.slane %v220_v16, 7  ;;  %v381_v32 = vld [vmem:[#allocation2 + $0x140] sm:$0xff]  ;;  %8877 = vmatprep.subr.bf16.mxu0 %v9833_v9  ;;  %v230_v38 = vrot.slane %v228_v22, 7  ;;  %v134_v41 = vsel %vm10274_vm13, 0, %v133_v17 }
  0x37   :  { %v9839_v27 = vld [vmem:[%s13882_s1 + $0x1f8] sm:$0xff]   ;;  %v976_v36 = vrot.slane %v975_v20, 4  ;;  %v384_v40 = vld [vmem:[#allocation2 + $0x120] sm:$0x11]  ;;  %70 = vst [vmem:[#allocation2 + $0x10] sm:$0x11] %v69_v33 }
  0x38   :  { %v9840_v35 = vld [vmem:[%s13882_s1 + $0x1b8] sm:$0xff]   ;;  %73 = vst [vmem:[#allocation2 + $0xb0] sm:$0x11] %v72_v34  ;;  %v137_v42 = vsel %vm10274_vm13, 0, %v136_v18  ;;  %8937 = vmatprep.subr.bf16.mxu1 %v9839_v27  ;;  %v10423_v43 = vld [vmem:[#allocation2 + $0x1c8] sm:$0x11]  ;;  %v225_v45 = vor.u32 %v223_v21, %v222_v30  ;;  %1370 = vmatmul.mubr.bf16.gmra.mxu0 %v7730_v13  ;;  %v233_v53 = vor.u32 %v231_v23, %v230_v38 }
  0x39   :  { %v990_v44 = vrot.slane %v989_v29, 4  ;;  %v226_v46 = vrot.slane %v222_v30, 4  ;;  %v9836_v47 = vld [vmem:[%s13882_s1 + $0x120] sm:$0xff]   ;;  %135 = vst [vmem:[#allocation2 + $0x98] sm:$0x11] %v134_v41  ;;  %v244_v48 = vshrl.u32 %v10401_v11, 16  ;;  %8938 = vmatpush3.bf16.msra.mxu1 %v9840_v35  ;;  %8878 = vmatpush3.bf16.msra.mxu0 %v9834_v15 }
  0x3a   :  { %138 = vst [vmem:[#allocation2 + $0x88] sm:$0x11] %v137_v42  ;;  %v10432_v51 = vld [vmem:[#allocation2 + $0x160] sm:$0x11]  ;;  %v978_v52 = vshll.u32 %v10423_v43, 16  ;;  %v234_v55 = vrot.slane %v230_v38, 4  ;;  %v376_v60 = vsel %vm10293_vm0, %v225_v45, %v375_v24  ;;  %8939 = vmatprep.subr.bf16.mxu1 %v9841_v50  ;;  %v382_v0 = vsel %vm10293_vm0, %v233_v53, %v381_v32  ;;  %8879 = vmatprep.subr.bf16.mxu0 %v9835_v26 }
  0x3b   :  { %v247_v56 = vshll.u32 %v10401_v11, 16  ;;  %v9837_v57 = vld [vmem:[%s13882_s1 + $0x158] sm:$0xff]   ;;  %v992_v58 = vshll.u32 %v10432_v51, 16  ;;  %v379_v61 = vsel %vm10255_vm8, %v226_v46, %v378_v25  ;;  %v246_v62 = vrot.slane %v244_v48, 7  ;;  %377 = vst [vmem:[#allocation2 + $0x18] sm:$0xff] %v376_v60  ;;  %383 = vst [vmem:[#allocation2 + $0x140] sm:$0xff] %v382_v0 }
  0x3c   :  { %v980_v63 = vrot.slane %v978_v52, 5  ;;  %380 = vst [vmem:[#allocation2 + $0x218] sm:$0x11] %v379_v61  ;;  %v385_v1 = vsel %vm10255_vm8, %v234_v55, %v384_v40  ;;  %v997_v2 = vshrl.u32 %v376_v60, 16  ;;  %v1000_v5 = vshll.u32 %v376_v60, 16  ;;  %v9838_v12 = vld [vmem:[%s13882_s1 + $0x118] sm:$0xff]  }
  0x3d   :  { %v994_v4 = vrot.slane %v992_v58, 5  ;;  %386 = vst [vmem:[#allocation2 + $0x120] sm:$0x11] %v385_v1  ;;  %v1011_v6 = vshrl.u32 %v382_v0, 16  ;;  %v1014_v7 = vshll.u32 %v382_v0, 16  ;;  %v7767_v10 = vcombine.high %v376_v60, %v382_v0  ;;  %8880 = vmatpush3.bf16.msra.mxu0 %v9836_v47  ;;  %v9842_v20 = vld [vmem:[%s13882_s1 + $0x1b0] sm:$0xff]  }
  0x3e   :  { %v981_v8 = vsel %vm10334_vm3, %v976_v36, %v980_v63  ;;  %v999_v9 = vrot.slane %v997_v2, 4  ;;  %v7766_v11 = vcombine.low %v376_v60, %v382_v0  ;;  %v1002_v14 = vrot.slane %v1000_v5, 5  ;;  %v10455_v18 = vld [vmem:[#allocation2 + $0x10] sm:$0xff]  ;;  %8881 = vmatprep.subr.bf16.mxu0 %v9837_v57  ;;  %v77_v41 = vld [vmem:[#allocation2 + $0xa0] sm:$0x11]  ;;  %8940 = vmatpush3.bf16.msra.mxu1 %v9842_v20  ;;  %v10002_v59 = vld [vmem:[%s13882_s1 + $0x5c8] sm:$0xff]  }
  0x3f   :  { %v995_v13 = vsel %vm10334_vm3, %v990_v44, %v994_v4  ;;  %v1013_v15 = vrot.slane %v1011_v6, 4  ;;  %v1016_v16 = vrot.slane %v1014_v7, 5  ;;  %v393_v17 = vld [vmem:[#allocation2 + $0xb0] sm:$0xff]  ;;  %1658 = vmatprep.mubr.bf16.mxu1 %v7767_v10  ;;  %v249_v23 = vor.u32 %v247_v56, %v246_v62  ;;  %v139_v42 = vld [vmem:[#allocation2 + $0xe0] sm:$0x11] }
  0x40   :  { %v7733_v21 = vcombine.high %v981_v8, %v995_v13  ;;  %v7732_v22 = vcombine.low %v981_v8, %v995_v13  ;;  %v250_v24 = vrot.slane %v246_v62, 4  ;;  %v10460_v26 = vld [vmem:[#allocation2 + $0x98] sm:$0x11]  ;;  %v9843_v27 = vld [vmem:[%s13882_s1 + $0x150] sm:$0xff]   ;;  %v1003_v29 = vor.u32 %v1002_v14, %v999_v9  ;;  %1659 = vmatmul.mubr.bf16.gmra.mxu1 %v7766_v11  ;;  %v173_v58 = vld [vmem:[%s13881_s0 + $0xa0] sm:$0xff] }
  0x41   :  { %v396_v25 = vld [vmem:[#allocation2 + $0x88] sm:$0x11]  ;;  %v1017_v30 = vor.u32 %v1016_v16, %v1013_v15  ;;  %v1025_v32 = vshrl.u32 %v10455_v18, 16  ;;  %v1028_v33 = vshll.u32 %v10455_v18, 16  ;;  %v74_v34 = vld [vmem:[#allocation2 + $0x130] sm:$0x11]  ;;  %v394_v35 = vsel %vm10293_vm0, %v249_v23, %v393_v17  ;;  %8882 = vmatpush3.bf16.msra.mxu0 %v9838_v12 }
  0x42   :  { %1377 = vmatprep.mubr.bf16.mxu0 %v7733_v21  ;;  %v397_v36 = vsel %vm10255_vm8, %v250_v24, %v396_v25  ;;  %v1034_v38 = vshll.u32 %v10460_v26, 16  ;;  %v75_v40 = vsel %vm10255_vm8, 0, %v74_v34  ;;  %v1004_v45 = vrot.slane %v1003_v29, 4  ;;  %395 = vst [vmem:[#allocation2 + $0xb0] sm:$0xff] %v394_v35  ;;  %v172_v50 = vld [vmem:[%s13881_s0 + $0x90] sm:$0xff]  ;;  %8883 = vmatprep.subr.bf16.mxu0 %v9843_v27  ;;  %v9845_v25 = vld [vmem:[%s13882_s1 + $0x1e8] sm:$0xff]  }
  0x43   :  { %1378 = vmatmul.mubr.bf16.gmra.mxu0 %v7732_v22  ;;  %v10474_v44 = vld [vmem:[#allocation2 + $0x218] sm:$0x11]  ;;  %v1018_v46 = vrot.slane %v1017_v30, 4  ;;  %398 = vst [vmem:[#allocation2 + $0x88] sm:$0x11] %v397_v36  ;;  %v1027_v47 = vrot.slane %v1025_v32, 4  ;;  %v7769_v62 = vcombine.high %v10455_v18, %v394_v35  ;;  %v7768_v63 = vcombine.low %v10455_v18, %v394_v35  ;;  %8941 = vmatprep.subr.bf16.mxu1 %v9845_v25 }
  0x44   :  { %v1030_v48 = vrot.slane %v1028_v33, 5  ;;  %76 = vst [vmem:[#allocation2 + $0x130] sm:$0x11] %v75_v40  ;;  %v10479_v52 = vld [vmem:[#allocation2 + $0x120] sm:$0x11]  ;;  %v1006_v53 = vshll.u32 %v10474_v44, 16 }
  0x45   :  { %v1036_v55 = vrot.slane %v1034_v38, 5  ;;  %v1039_v56 = vshrl.u32 %v394_v35, 16  ;;  %v1042_v57 = vshll.u32 %v394_v35, 16  ;;  %v1020_v60 = vshll.u32 %v10479_v52, 16  ;;  %v142_v0 = vld [vmem:[#allocation2 + $0x58] sm:$0x11]  ;;  %1666 = vmatprep.mubr.bf16.mxu1 %v7769_v62 }
  0x46   :  { %v1031_v61 = vor.u32 %v1030_v48, %v1027_v47  ;;  %v9844_v1 = vld [vmem:[%s13882_s1 + $0x110] sm:$0xff]   ;;  %v1008_v2 = vrot.slane %v1006_v53, 5  ;;  %v78_v6 = vsel %vm10255_vm8, 0, %v77_v41  ;;  %v140_v9 = vsel %vm10274_vm13, 0, %v139_v42  ;;  %v9846_v33 = vld [vmem:[%s13882_s1 + $0x1a8] sm:$0xff]   ;;  %v9847_v40 = vld [vmem:[%s13882_s1 + $0x1e0] sm:$0xff]  }
  0x47   :  { %v1041_v4 = vrot.slane %v1039_v56, 4  ;;  %v1044_v5 = vrot.slane %v1042_v57, 5  ;;  %v1022_v7 = vrot.slane %v1020_v60, 5  ;;  %79 = vst [vmem:[#allocation2 + $0xa0] sm:$0x11] %v78_v6  ;;  %v143_v10 = vsel %vm10274_vm13, 0, %v142_v0  ;;  %8884 = vmatpush3.bf16.msra.mxu0 %v9844_v1  ;;  %8942 = vmatpush3.bf16.msra.mxu1 %v9846_v33 }
  0x48   :  { %v1032_v8 = vrot.slane %v1031_v61, 4  ;;  %v1009_v11 = vsel %vm10334_vm3, %v1004_v45, %v1008_v2  ;;  %141 = vst [vmem:[#allocation2 + $0xe0] sm:$0x11] %v140_v9  ;;  %144 = vst [vmem:[#allocation2 + $0x58] sm:$0x11] %v143_v10  ;;  %v252_v13 = vshrl.u32 %v172_v50, 16  ;;  %1667 = vmatmul.mubr.bf16.gmra.mxu1 %v7768_v63  ;;  %8943 = vmatprep.subr.bf16.mxu1 %v9847_v40 }
  0x49   :  { %v1045_v12 = vor.u32 %v1044_v5, %v1041_v4  ;;  %v255_v14 = vshll.u32 %v172_v50, 16  ;;  %v1023_v15 = vsel %vm10334_vm3, %v1018_v46, %v1022_v7  ;;  %v260_v16 = vshrl.u32 %v173_v58, 16  ;;  %v174_v41 = vld [vmem:[%s13881_s0 + $0xb0] sm:$0xff]  ;;  %v83_v47 = vld [vmem:[#allocation2 + $0x220] sm:$0x11] }
  0x4a   :  { %v263_v17 = vshll.u32 %v173_v58, 16  ;;  %v7735_v18 = vcombine.high %v1009_v11, %v1023_v15  ;;  %v7734_v20 = vcombine.low %v1009_v11, %v1023_v15  ;;  %v10501_v21 = vld [vmem:[#allocation2 + $0x88] sm:$0x11]  ;;  %v254_v23 = vrot.slane %v252_v13, 7  ;;  %v80_v46 = vld [vmem:[#allocation2 + $0x1d0] sm:$0x11] }
  0x4b   :  { %v1046_v22 = vrot.slane %v1045_v12, 4  ;;  %v399_v24 = vld [vmem:[#allocation2 + $0x130] sm:$0xff]  ;;  %v1048_v27 = vshll.u32 %v10501_v21, 16  ;;  %v262_v29 = vrot.slane %v260_v16, 7  ;;  %v1037_v34 = vsel %vm10334_vm3, %v1032_v8, %v1036_v55  ;;  %v145_v0 = vld [vmem:[#allocation2 + $0x180] sm:$0x11] }
  0x4c   :  { %1385 = vmatprep.mubr.bf16.mxu0 %v7735_v18  ;;  %v257_v30 = vor.u32 %v255_v14, %v254_v23  ;;  %v258_v32 = vrot.slane %v254_v23, 4  ;;  %v268_v48 = vshrl.u32 %v174_v41, 16  ;;  %v148_v1 = vld [vmem:[#allocation2 + $0x210] sm:$0x11]  ;;  %v175_v2 = vld [vmem:[%s13881_s0 + $0xc0] sm:$0xff]  ;;  %v81_v10 = vsel %vm10255_vm8, 0, %v80_v46 }
  0x4d   :  { %1386 = vmatmul.mubr.bf16.gmra.mxu0 %v7734_v20  ;;  %v1050_v35 = vrot.slane %v1048_v27, 5  ;;  %v265_v36 = vor.u32 %v263_v17, %v262_v29  ;;  %v266_v38 = vrot.slane %v262_v29, 4  ;;  %v84_v11 = vsel %vm10255_vm8, 0, %v83_v47  ;;  %v9848_v12 = vld [vmem:[%s13882_s1 + $0x1a0] sm:$0xff]   ;;  %v9849_v13 = vld [vmem:[%s13882_s1 + $0x148] sm:$0xff]  }
  0x4e   :  { %v400_v42 = vsel %vm10293_vm0, %v257_v30, %v399_v24  ;;  %v405_v45 = vld [vmem:[#allocation2 + $0xa0] sm:$0xff]  ;;  %82 = vst [vmem:[#allocation2 + $0x1d0] sm:$0x11] %v81_v10  ;;  %85 = vst [vmem:[#allocation2 + $0x220] sm:$0x11] %v84_v11  ;;  %v146_v17 = vsel %vm10274_vm13, 0, %v145_v0  ;;  %8944 = vmatpush3.bf16.msra.mxu1 %v9848_v12  ;;  %8885 = vmatprep.subr.bf16.mxu0 %v9849_v13 }
  0x4f   :  { %v1051_v50 = vsel %vm10334_vm3, %v1046_v22, %v1050_v35  ;;  %401 = vst [vmem:[#allocation2 + $0x130] sm:$0xff] %v400_v42  ;;  %v402_v53 = vld [vmem:[#allocation2 + $0xe0] sm:$0x11]  ;;  %v406_v55 = vsel %vm10293_vm0, %v265_v36, %v405_v45  ;;  %v408_v56 = vld [vmem:[#allocation2 + $0x58] sm:$0x11]  ;;  %v1053_v57 = vshrl.u32 %v400_v42, 16 }
  0x50   :  { %v1056_v58 = vshll.u32 %v400_v42, 16  ;;  %v7737_v60 = vcombine.high %v1037_v34, %v1051_v50  ;;  %v7736_v61 = vcombine.low %v1037_v34, %v1051_v50  ;;  %v403_v62 = vsel %vm10255_vm8, %v258_v32, %v402_v53  ;;  %407 = vst [vmem:[#allocation2 + $0xa0] sm:$0xff] %v406_v55  ;;  %v9850_v18 = vld [vmem:[%s13882_s1 + $0x108] sm:$0xff]   ;;  %147 = vst [vmem:[#allocation2 + $0x180] sm:$0x11] %v146_v17  ;;  %v9851_v35 = vld [vmem:[%s13882_s1 + $0x1d8] sm:$0xff]  }
  0x51   :  { %v409_v63 = vsel %vm10255_vm8, %v266_v38, %v408_v56  ;;  %404 = vst [vmem:[#allocation2 + $0xe0] sm:$0x11] %v403_v62  ;;  %v1055_v4 = vrot.slane %v1053_v57, 4  ;;  %v1067_v6 = vshrl.u32 %v406_v55, 16  ;;  %v1070_v7 = vshll.u32 %v406_v55, 16  ;;  %8886 = vmatpush3.bf16.msra.mxu0 %v9850_v18  ;;  %8945 = vmatprep.subr.bf16.mxu1 %v9851_v35  ;;  %v9853_v53 = vld [vmem:[%s13882_s1 + $0x1d0] sm:$0xff]  }
  0x52   :  { %410 = vst [vmem:[#allocation2 + $0x58] sm:$0x11] %v409_v63  ;;  %v1058_v5 = vrot.slane %v1056_v58, 5  ;;  %1393 = vmatprep.mubr.bf16.mxu0 %v7737_v60  ;;  %v7771_v8 = vcombine.high %v400_v42, %v406_v55  ;;  %v7770_v9 = vcombine.low %v400_v42, %v406_v55  ;;  %v149_v20 = vsel %vm10274_vm13, 0, %v148_v1  ;;  %v9852_v42 = vld [vmem:[%s13882_s1 + $0x198] sm:$0xff]   ;;  %v177_v13 = vld [vmem:[%s13881_s0 + $0xe0] sm:$0xff] }
  0x53   :  { %v1069_v15 = vrot.slane %v1067_v6, 4  ;;  %v1072_v16 = vrot.slane %v1070_v7, 5  ;;  %v270_v22 = vrot.slane %v268_v48, 7  ;;  %v271_v23 = vshll.u32 %v174_v41, 16  ;;  %150 = vst [vmem:[#allocation2 + $0x210] sm:$0x11] %v149_v20  ;;  %8946 = vmatpush3.bf16.msra.mxu1 %v9852_v42 }
  0x54   :  { %v1059_v14 = vor.u32 %v1058_v5, %v1055_v4  ;;  %1674 = vmatprep.mubr.bf16.mxu1 %v7771_v8  ;;  %v276_v24 = vshrl.u32 %v175_v2, 16  ;;  %v279_v29 = vshll.u32 %v175_v2, 16  ;;  %v1756_v47 = vrot.slane %v10345_v3, 5  ;;  %v86_v63 = vld [vmem:[#allocation2 + $0x190] sm:$0x11]  ;;  %8947 = vmatprep.subr.bf16.mxu1 %v9853_v53  ;;  %v9858_v53 = vld [vmem:[%s13882_s1 + $0x188] sm:$0xff]  }
  0x55   :  { %1394 = vmatmul.mubr.bf16.gmra.mxu0 %v7736_v61  ;;  %v1073_v27 = vor.u32 %v1072_v16, %v1069_v15  ;;  %1675 = vmatmul.mubr.bf16.gmra.mxu1 %v7770_v9  ;;  %v274_v30 = vrot.slane %v270_v22, 4  ;;  %v273_v34 = vor.u32 %v271_v23, %v270_v22  ;;  %v411_v48 = vld [vmem:[#allocation2 + $0x1d0] sm:$0xff]  ;;  %v417_v50 = vld [vmem:[#allocation2 + $0x220] sm:$0xff]  ;;  %v1760_v55 = vrot.slane %v10360_v31, 5  ;;  %v89_v11 = vld [vmem:[#allocation2 + $0x208] sm:$0x11] }
  0x56   :  { %v1060_v25 = vrot.slane %v1059_v14, 4  ;;  %v278_v32 = vrot.slane %v276_v24, 7  ;;  %v1764_v56 = vrot.slane %v10365_v39, 5  ;;  %v176_v6 = vld [vmem:[%s13881_s0 + $0xd0] sm:$0xff]  ;;  %v154_v18 = vld [vmem:[#allocation2 + $0x1a0] sm:$0x11] }
  0x57   :  { %v1074_v33 = vrot.slane %v1073_v27, 4  ;;  %v412_v60 = vsel %vm10293_vm0, %v273_v34, %v411_v48  ;;  %v414_v61 = vld [vmem:[#allocation2 + $0x180] sm:$0x11]  ;;  %v151_v12 = vld [vmem:[#allocation2 + $0x230] sm:$0x11]  ;;  %vm1748_vm5 = vcmask 1046532  }
  0x58   :  { %v10551_v36 = vld [vmem:[#allocation2 + $0xe0] sm:$0x11]  ;;  %v281_v40 = vor.u32 %v279_v29, %v278_v32  ;;  %v282_v41 = vrot.slane %v278_v32, 4  ;;  %413 = vst [vmem:[#allocation2 + $0x1d0] sm:$0xff] %v412_v60  ;;  %v415_v0 = vsel %vm10255_vm8, %v274_v30, %v414_v61  ;;  %v1081_v2 = vshrl.u32 %v412_v60, 16  ;;  %vm10633_vm6 = vmor %vm1747_vm4, %vm1748_vm5  ;;  %v7681_v3 = vld [vmem:[%s13881_s0 + $0x18] sm:$0xff] }
  0x59   :  { %v10553_v38 = vld [vmem:[#allocation2 + $0x58] sm:$0x11]  ;;  %v1062_v45 = vshll.u32 %v10551_v36, 16  ;;  %v1084_v4 = vshll.u32 %v412_v60, 16  ;;  %416 = vst [vmem:[#allocation2 + $0x180] sm:$0x11] %v415_v0 }
  0x5a   :  { %v1076_v46 = vshll.u32 %v10553_v38, 16  ;;  %v418_v62 = vsel %vm10293_vm0, %v281_v40, %v417_v50  ;;  %v420_v1 = vld [vmem:[#allocation2 + $0x210] sm:$0x11]  ;;  %v1083_v16 = vrot.slane %v1081_v2, 4  ;;  %v9855_v27 = vld [vmem:[%s13882_s1 + $0x140] sm:$0xff]   ;;  %v87_v30 = vsel %vm10255_vm8, 0, %v86_v63 }
  0x5b   :  { %v1064_v57 = vrot.slane %v1062_v45, 5  ;;  %419 = vst [vmem:[#allocation2 + $0x220] sm:$0xff] %v418_v62  ;;  %v1095_v5 = vshrl.u32 %v418_v62, 16  ;;  %v421_v9 = vsel %vm10255_vm8, %v282_v41, %v420_v1  ;;  %v1098_v10 = vshll.u32 %v418_v62, 16  ;;  %v9856_v34 = vld [vmem:[%s13882_s1 + $0x100] sm:$0xff]   ;;  %v9857_v45 = vld [vmem:[%s13882_s1 + $0x1c8] sm:$0xff]   ;;  %8887 = vmatprep.subr.bf16.mxu0 %v9855_v27 }
  0x5c   :  { %v1078_v58 = vrot.slane %v1076_v46, 5  ;;  %422 = vst [vmem:[#allocation2 + $0x210] sm:$0x11] %v421_v9  ;;  %v1086_v17 = vrot.slane %v1084_v4, 5  ;;  %v7773_v23 = vcombine.high %v412_v60, %v418_v62  ;;  %v7772_v24 = vcombine.low %v412_v60, %v418_v62  ;;  %88 = vst [vmem:[#allocation2 + $0x190] sm:$0x11] %v87_v30  ;;  %8888 = vmatpush3.bf16.msra.mxu0 %v9856_v34 }
  0x5d   :  { %v1065_v7 = vsel %vm10334_vm3, %v1060_v25, %v1064_v57  ;;  %v1097_v20 = vrot.slane %v1095_v5, 4  ;;  %v1100_v22 = vrot.slane %v1098_v10, 5  ;;  %v9854_v25 = vld [vmem:[%s13882_s1 + $0x190] sm:$0xff]   ;;  %v90_v32 = vsel %vm10255_vm8, 0, %v89_v11  ;;  %v9859_v62 = vld [vmem:[%s13882_s1 + $0x1c0] sm:$0xff]  }
  0x5e   :  { %v1079_v8 = vsel %vm10334_vm3, %v1074_v33, %v1078_v58  ;;  %v1087_v29 = vor.u32 %v1086_v17, %v1083_v16  ;;  %v152_v33 = vsel %vm10274_vm13, 0, %v151_v12  ;;  %1682 = vmatprep.mubr.bf16.mxu1 %v7773_v23  ;;  %91 = vst [vmem:[#allocation2 + $0x208] sm:$0x11] %v90_v32  ;;  %v155_v40 = vsel %vm10274_vm13, 0, %v154_v18  ;;  %8948 = vmatpush3.bf16.msra.mxu1 %v9854_v25  ;;  %v9860_v9 = vld [vmem:[%s13882_s1 + $0x180] sm:$0xff]  }
  0x5f   :  { %v7739_v14 = vcombine.high %v1065_v7, %v1079_v8  ;;  %v7738_v15 = vcombine.low %v1065_v7, %v1079_v8  ;;  %v1101_v35 = vor.u32 %v1100_v22, %v1097_v20  ;;  %153 = vst [vmem:[#allocation2 + $0x230] sm:$0x11] %v152_v33  ;;  %v284_v41 = vshrl.u32 %v176_v6, 16  ;;  %1683 = vmatmul.mubr.bf16.gmra.mxu1 %v7772_v24  ;;  %v1699_v8 = vld [vmem:[#allocation2 + $0x28] sm:$0xee] }
  0x60   :  { %v287_v42 = vshll.u32 %v176_v6, 16  ;;  %v1088_v46 = vrot.slane %v1087_v29, 4  ;;  %156 = vst [vmem:[#allocation2 + $0x1a0] sm:$0x11] %v155_v40  ;;  %v292_v48 = vshrl.u32 %v177_v13, 16  ;;  %v295_v50 = vshll.u32 %v177_v13, 16  ;;  %8949 = vmatprep.subr.bf16.mxu1 %v9857_v45 }
  0x61   :  { %1401 = vmatprep.mubr.bf16.mxu0 %v7739_v14  ;;  %v1102_v57 = vrot.slane %v1101_v35, 4  ;;  %v286_v58 = vrot.slane %v284_v41, 7  ;;  %v10607_v60 = vld [vmem:[#allocation2 + $0x180] sm:$0x11]  ;;  %v7792_v14 = vrot.slane %v1699_v8, 9  ;;  %v9861_v35 = vld [vmem:[%s13882_s1 + $0x278] sm:$0xff]  }
  0x62   :  { %1402 = vmatmul.mubr.bf16.gmra.mxu0 %v7738_v15  ;;  %v294_v61 = vrot.slane %v292_v48, 7  ;;  %v1090_v0 = vshll.u32 %v10607_v60, 16  ;;  %8950 = vmatpush3.bf16.msra.mxu1 %v9858_v53  ;;  %v1700_v22 = vld [vmem:[#allocation2 + $0x48] sm:$0xee]  ;;  %v451_v48 = vld [vmem:[#allocation2] sm:$0x11] }
  0x63   :  { %v10612_v63 = vld [vmem:[#allocation2 + $0x210] sm:$0x11]  ;;  %v289_v1 = vor.u32 %v287_v42, %v286_v58  ;;  %v290_v2 = vrot.slane %v286_v58, 4  ;;  %8951 = vmatprep.subr.bf16.mxu1 %v9859_v62  ;;  %v7680_v40 = vld [vmem:[%s13881_s0 + $0x8] sm:$0xff]  ;;  %v10647_v58 = vsel %vm10633_vm6, %v7792_v14, %v1752_v28  ;;  %9001 = vmatprep.subr.bf16.mxu0 %v9861_v35 }
  0x64   :  { %v1104_v4 = vshll.u32 %v10612_v63, 16  ;;  %v297_v5 = vor.u32 %v295_v50, %v294_v61  ;;  %v298_v6 = vrot.slane %v294_v61, 4  ;;  %v1092_v7 = vrot.slane %v1090_v0, 5  ;;  %v423_v11 = vld [vmem:[#allocation2 + $0x190] sm:$0xff]  ;;  %v454_v50 = vld [vmem:[#allocation2 + $0x80] sm:$0x11] }
  0x65   :  { %v429_v13 = vld [vmem:[#allocation2 + $0x208] sm:$0xff]  ;;  %v424_v16 = vsel %vm10293_vm0, %v289_v1, %v423_v11  ;;  %v7793_v61 = vrot.slane %v1700_v22, 9  ;;  %v452_v0 = vsel %vm10255_vm8, 0, %v451_v48  ;;  %v455_v1 = vsel %vm10255_vm8, 0, %v454_v50 }
  0x66   :  { %v1106_v10 = vrot.slane %v1104_v4, 5  ;;  %v426_v12 = vld [vmem:[#allocation2 + $0x230] sm:$0x11]  ;;  %v1093_v15 = vsel %vm10334_vm3, %v1088_v46, %v1092_v7  ;;  %v430_v18 = vsel %vm10293_vm0, %v297_v5, %v429_v13  ;;  %425 = vst [vmem:[#allocation2 + $0x190] sm:$0xff] %v424_v16  ;;  %v1109_v25 = vshrl.u32 %v424_v16, 16  ;;  %8952 = vmatpush3.bf16.msra.mxu1 %v9860_v9 }
  0x67   :  { %v427_v17 = vsel %vm10255_vm8, %v290_v2, %v426_v12  ;;  %v432_v20 = vld [vmem:[#allocation2 + $0x1a0] sm:$0x11]  ;;  %431 = vst [vmem:[#allocation2 + $0x208] sm:$0xff] %v430_v18  ;;  %v1112_v27 = vshll.u32 %v424_v16, 16  ;;  %v1123_v33 = vshrl.u32 %v430_v18, 16  ;;  %v1126_v34 = vshll.u32 %v430_v18, 16 }
  0x68   :  { %v1107_v23 = vsel %vm10334_vm3, %v1102_v57, %v1106_v10  ;;  %428 = vst [vmem:[#allocation2 + $0x230] sm:$0x11] %v427_v17  ;;  %v433_v24 = vsel %vm10255_vm8, %v298_v6, %v432_v20  ;;  %v1111_v41 = vrot.slane %v1109_v25, 4  ;;  %v7775_v45 = vcombine.high %v424_v16, %v430_v18  ;;  %453 = vst [vmem:[#allocation2] sm:$0x11] %v452_v0 }
  0x69   :  { %v7741_v30 = vcombine.high %v1093_v15, %v1107_v23  ;;  %v7740_v32 = vcombine.low %v1093_v15, %v1107_v23  ;;  %434 = vst [vmem:[#allocation2 + $0x1a0] sm:$0x11] %v433_v24  ;;  %v1114_v42 = vrot.slane %v1112_v27, 5  ;;  %v7774_v46 = vcombine.low %v424_v16, %v430_v18  ;;  %456 = vst [vmem:[#allocation2 + $0x80] sm:$0x11] %v455_v1  ;;  %v7682_v18 = vld [vmem:[%s13881_s0 + $0x28] sm:$0xff] }
  0x6a   :  { %v1125_v53 = vrot.slane %v1123_v33, 4  ;;  %v1128_v57 = vrot.slane %v1126_v34, 5  ;;  %1690 = vmatprep.mubr.bf16.mxu1 %v7775_v45  ;;  %v589_v2 = vshrl.u32 %v7680_v40, 16  ;;  %v10657_v19 = vsel %vm10633_vm6, %v7793_v61, %v1756_v47  ;;  %v1701_v5 = vld [vmem:[#allocation2 + $0x148] sm:$0xee] }
  0x6b   :  { %1409 = vmatprep.mubr.bf16.mxu0 %v7741_v30  ;;  %v1115_v62 = vor.u32 %v1114_v42, %v1111_v41  ;;  %1691 = vmatmul.mubr.bf16.gmra.mxu1 %v7774_v46  ;;  %v592_v28 = vshll.u32 %v7680_v40, 16  ;;  %v1702_v6 = vld [vmem:[#allocation2 + $0x1e8] sm:$0xee]  ;;  %v1768_v7 = vrot.slane %v10423_v43, 5  ;;  %v7840_v8 = vcombine.low %v10647_v58, %v10657_v19  ;;  %v457_v17 = vld [vmem:[#allocation2 + $0x250] sm:$0x11] }
  0x6c   :  { %1410 = vmatmul.mubr.bf16.gmra.mxu0 %v7740_v32  ;;  %v1129_v4 = vor.u32 %v1128_v57, %v1125_v53  ;;  %v7841_v9 = vcombine.high %v10647_v58, %v10657_v19  ;;  %v10664_v10 = vrot.slane %v589_v2, 7  ;;  %v7794_v13 = vrot.slane %v1701_v5, 9  ;;  %v460_v25 = vld [vmem:[#allocation2 + $0xf0] sm:$0x11]  ;;  %v1703_v34 = vld [vmem:[#allocation2 + $0xc8] sm:$0xee] }
  0x6d   :  { %v1116_v11 = vrot.slane %v1115_v62, 4  ;;  %v7795_v14 = vrot.slane %v1702_v6, 9  ;;  %v458_v24 = vsel %vm10255_vm8, 0, %v457_v17  ;;  %v597_v32 = vshrl.u32 %v7681_v3, 16  ;;  %v1704_v45 = vld [vmem:[#allocation2 + $0x198] sm:$0xee] }
  0x6e   :  { %v1130_v12 = vrot.slane %v1129_v4, 4  ;;  %v594_v16 = vor.u32 %v592_v28, %v10664_v10  ;;  %v10683_v22 = vsel %vm10633_vm6, %v7794_v13, %v1760_v55  ;;  %459 = vst [vmem:[#allocation2 + $0x250] sm:$0x11] %v458_v24  ;;  %v461_v55 = vsel %vm10255_vm8, 0, %v460_v25  ;;  %v463_v2 = vld [vmem:[#allocation2 + $0x260] sm:$0x11] }
  0x6f   :  { %v10669_v47 = vld [vmem:[#allocation2 + $0x230] sm:$0x11]  ;;  %v10689_v23 = vsel %vm10633_vm6, %v7795_v14, %v1764_v56  ;;  %462 = vst [vmem:[#allocation2 + $0xf0] sm:$0x11] %v461_v55  ;;  %v600_v56 = vshll.u32 %v7681_v3, 16  ;;  %v605_v33 = vshrl.u32 %v7682_v18, 16 }
  0x70   :  { %v10671_v15 = vld [vmem:[#allocation2 + $0x1a0] sm:$0x11]  ;;  %v1118_v43 = vshll.u32 %v10669_v47, 16  ;;  %v7843_v30 = vcombine.high %v10683_v22, %v10689_v23  ;;  %v7842_v31 = vcombine.low %v10683_v22, %v10689_v23  ;;  %v608_v42 = vshll.u32 %v7682_v18, 16  ;;  %v7683_v28 = vld [vmem:[%s13881_s0 + $0x38] sm:$0xff]  ;;  %v7684_v3 = vld [vmem:[%s13881_s0 + $0x48] sm:$0xff] }
  0x71   :  { %v1132_v20 = vshll.u32 %v10671_v15, 16  ;;  %v749_v40 = vld [vmem:[#allocation2 + $0x80] sm:$0xff]  ;;  %v7796_v46 = vrot.slane %v1703_v34, 9  ;;  %v10709_v53 = vrot.slane %v597_v32, 7  ;;  %v10711_v57 = vrot.slane %v605_v33, 7  ;;  %v7685_v33 = vld [vmem:[%s13881_s0 + $0x58] sm:$0xff] }
  0x72   :  { %v1120_v27 = vrot.slane %v1118_v43, 5  ;;  %v10701_v41 = vld [vmem:[#allocation2] sm:$0xff]  ;;  %v10707_v50 = vsel %vm10293_vm0, %v594_v16, %v749_v40  ;;  %v1772_v13 = vrot.slane %v10432_v51, 5  ;;  %v464_v14 = vsel %vm10255_vm8, 0, %v463_v2  ;;  %v9862_v2 = vld [vmem:[%s13882_s1 + $0x238] sm:$0xff]   ;;  %v9865_v19 = vld [vmem:[%s13882_s1 + $0x268] sm:$0xff]  }
  0x73   :  { %v1134_v39 = vrot.slane %v1132_v20, 5  ;;  %751 = vst [vmem:[#allocation2 + $0x80] sm:$0xff] %v10707_v50  ;;  %v7904_v0 = vcombine.low %v10701_v41, %v10707_v50  ;;  %v7905_v1 = vcombine.high %v10701_v41, %v10707_v50  ;;  %v466_v4 = vld [vmem:[#allocation2 + $0x40] sm:$0x11]  ;;  %v602_v5 = vor.u32 %v600_v56, %v10709_v53  ;;  %465 = vst [vmem:[#allocation2 + $0x260] sm:$0x11] %v464_v14 }
  0x74   :  { %v1121_v35 = vsel %vm10334_vm3, %v1116_v11, %v1120_v27  ;;  %v610_v6 = vor.u32 %v608_v42, %v10711_v57  ;;  %v10728_v11 = vsel %vm10633_vm6, %v7796_v46, %v1768_v7  ;;  %v467_v16 = vsel %vm10255_vm8, 0, %v466_v4  ;;  %v1705_v27 = vld [vmem:[#allocation2 + $0x18] sm:$0xee]  ;;  %v1706_v55 = vld [vmem:[#allocation2 + $0x140] sm:$0xee] }
  0x75   :  { %v1135_v48 = vsel %vm10334_vm3, %v1130_v12, %v1134_v39  ;;  %2377 = vmatprep.mubr.bf16.mxu1 %v7905_v1  ;;  %v7797_v12 = vrot.slane %v1704_v45, 9  ;;  %v755_v43 = vld [vmem:[#allocation2 + $0x250] sm:$0xff]  ;;  %v613_v17 = vshrl.u32 %v7683_v28, 16  ;;  %v616_v18 = vshll.u32 %v7683_v28, 16  ;;  %468 = vst [vmem:[#allocation2 + $0x40] sm:$0x11] %v467_v16 }
  0x76   :  { %v7743_v61 = vcombine.high %v1121_v35, %v1135_v48  ;;  %v7742_v62 = vcombine.low %v1121_v35, %v1135_v48  ;;  %2378 = vmatmul.mubr.bf16.vlgmr.msra.gmra.mxu1 %v7904_v0  ;;  %v621_v20 = vshrl.u32 %v7684_v3, 16  ;;  %v10740_v51 = vsel %vm10293_vm0, %v602_v5, %v755_v43  ;;  %v761_v7 = vld [vmem:[#allocation2 + $0xf0] sm:$0xff]  ;;  %v469_v42 = vld [vmem:[#allocation2 + $0x228] sm:$0x11]  ;;  %v472_v45 = vld [vmem:[#allocation2 + $0x238] sm:$0x11] }
  0x77   :  { %v10744_v24 = vsel %vm10633_vm6, %v7797_v12, %v1772_v13  ;;  %v624_v25 = vshll.u32 %v7684_v3, 16  ;;  %757 = vst [vmem:[#allocation2 + $0x250] sm:$0xff] %v10740_v51  ;;  %v10749_v39 = vsel %vm10293_vm0, %v610_v6, %v761_v7  ;;  %v10755_v56 = vrot.slane %v613_v17, 7  ;;  %v7686_v0 = vld [vmem:[%s13881_s0 + $0x68] sm:$0xff]  ;;  %v514_v58 = vld [vmem:[#allocation2 + $0x100] sm:$0x11] }
  0x78   :  { %1417 = vmatprep.mubr.bf16.mxu0 %v7743_v61  ;;  %v7844_v32 = vcombine.low %v10728_v11, %v10744_v24  ;;  %763 = vst [vmem:[#allocation2 + $0xf0] sm:$0xff] %v10749_v39  ;;  %v7907_v34 = vcombine.high %v10740_v51, %v10749_v39  ;;  %v10763_v35 = vrot.slane %v621_v20, 7  ;;  %v7798_v40 = vrot.slane %v1705_v27, 9 }
  0x79   :  { %1418 = vmatmul.mubr.bf16.gmra.mxu0 %v7742_v62  ;;  %v7906_v46 = vcombine.low %v10740_v51, %v10749_v39  ;;  %v618_v48 = vor.u32 %v616_v18, %v10755_v56  ;;  %v1776_v61 = vrot.slane %v10474_v44, 5  ;;  %v7799_v62 = vrot.slane %v1706_v55, 9  ;;  %v9863_v44 = vld [vmem:[%s13882_s1 + $0x270] sm:$0xff]  }
  0x7a   :  { %2039 = vmatprep.mubr.bf16.mxu0 %v7841_v9  ;;  %v7845_v9 = vcombine.high %v10728_v11, %v10744_v24  ;;  %v595_v1 = vrot.slane %v10664_v10, 4  ;;  %2385 = vmatprep.mubr.bf16.mxu1 %v7907_v34  ;;  %v626_v4 = vor.u32 %v624_v25, %v10763_v35  ;;  %v1780_v28 = vrot.slane %v10479_v52, 5  ;;  %v9864_v52 = vld [vmem:[%s13882_s1 + $0x230] sm:$0xff]   ;;  %v767_v14 = vld [vmem:[#allocation2 + $0x260] sm:$0xff] }
  0x7b   :  { %v470_v5 = vsel %vm10255_vm8, 0, %v469_v42  ;;  %v10785_v6 = vsel %vm10633_vm6, %v7798_v40, %v1776_v61  ;;  %v473_v3 = vsel %vm10255_vm8, 0, %v472_v45  ;;  %v629_v12 = vshrl.u32 %v7685_v33, 16  ;;  %v10796_v18 = vld [vmem:[#allocation2 + $0x10] sm:$0xee]  ;;  %v7688_v40 = vld [vmem:[%s13881_s0 + $0x88] sm:$0xff] }
  0x7c   :  { %471 = vst [vmem:[#allocation2 + $0x228] sm:$0x11] %v470_v5  ;;  %v632_v13 = vshll.u32 %v7685_v33, 16  ;;  %v10794_v43 = vsel %vm10633_vm6, %v7799_v62, %v1780_v28  ;;  %474 = vst [vmem:[#allocation2 + $0x238] sm:$0x11] %v473_v3  ;;  %v637_v16 = vshrl.u32 %v7686_v0, 16  ;;  %v10803_v20 = vsel %vm10293_vm0, %v618_v48, %v767_v14 }
  0x7d   :  { %v640_v17 = vshll.u32 %v7686_v0, 16  ;;  %v773_v7 = vld [vmem:[#allocation2 + $0x40] sm:$0xff]  ;;  %v7847_v25 = vcombine.high %v10785_v6, %v10794_v43  ;;  %v7846_v27 = vcombine.low %v10785_v6, %v10794_v43  ;;  %v10809_v55 = vrot.slane %v629_v12, 7  ;;  %769 = vst [vmem:[#allocation2 + $0x260] sm:$0xff] %v10803_v20  ;;  %v481_v34 = vld [vmem:[#allocation2 + $0xd0] sm:$0x11] }
  0x7e   :  { %2386 = vmatmul.mubr.bf16.gmra.mxu1 %v7906_v46  ;;  %v10823_v33 = vrot.slane %v637_v16, 7  ;;  %v484_v46 = vld [vmem:[#allocation2 + $0x1c0] sm:$0x11]  ;;  %v9871_v48 = vld [vmem:[%s13882_s1 + $0x2f8] sm:$0xff]   ;;  %v9866_v61 = vld [vmem:[%s13882_s1 + $0x228] sm:$0xff]   ;;  %v482_v5 = vsel %vm10255_vm8, 0, %v481_v34 }
  0x7f   :  { %v634_v45 = vor.u32 %v632_v13, %v10809_v55  ;;  %v10840_v0 = vld [vmem:[#allocation2 + $0xb0] sm:$0xee]  ;;  %v9867_v28 = vld [vmem:[%s13882_s1 + $0x260] sm:$0xff]   ;;  %v653_v3 = vshrl.u32 %v7688_v40, 16  ;;  %9065 = vmatprep.subr.bf16.mxu1 %v9871_v48  ;;  %483 = vst [vmem:[#allocation2 + $0xd0] sm:$0x11] %v482_v5 }
  0x80   :  { %v642_v62 = vor.u32 %v640_v17, %v10823_v33  ;;  %v656_v13 = vshll.u32 %v7688_v40, 16  ;;  %v1784_v17 = vrot.slane %v10460_v26, 5  ;;  %v1792_v34 = vrot.slane %v10551_v36, 5  ;;  %v9872_v40 = vld [vmem:[%s13882_s1 + $0x2b8] sm:$0xff]   ;;  %v9874_v5 = vld [vmem:[%s13882_s1 + $0x2b0] sm:$0xff]   ;;  %v9879_v26 = vld [vmem:[%s13882_s1 + $0x2e0] sm:$0xff]  }
  0x81   :  { %2040 = vmatmul.mubr.bf16.vlgmr.msra.gmra.mxu0 %v7840_v8  ;;  %v10821_v8 = vsel %vm10293_vm0, %v626_v4, %v773_v7  ;;  %v10857_v7 = vrot.slane %v653_v3, 7  ;;  %v9869_v48 = vld [vmem:[%s13882_s1 + $0x258] sm:$0xff]   ;;  %9066 = vmatpush3.bf16.msra.mxu1 %v9872_v40  ;;  %v9876_v11 = vld [vmem:[%s13882_s1 + $0x210] sm:$0xff]   ;;  %v1804_v24 = vrot.slane %v10612_v63, 5  ;;  %v9891_v63 = vld [vmem:[%s13882_s1 + $0x2c0] sm:$0xff]  }
  0x82   :  { %9002 = vmatpush3.bf16.msra.mxu0 %v9862_v2  ;;  %2047 = vmatprep.mubr.bf16.mxu0 %v7843_v30  ;;  %775 = vst [vmem:[#allocation2 + $0x40] sm:$0xff] %v10821_v8  ;;  %v7909_v42 = vcombine.high %v10803_v20, %v10821_v8  ;;  %v7800_v2 = vrot.slane %v10796_v18, 9  ;;  %v7908_v4 = vcombine.low %v10803_v20, %v10821_v8  ;;  %v490_v3 = vld [vmem:[#allocation2 + $0x38] sm:$0x11] }
  0x83   :  { %9003 = vmatprep.subr.bf16.mxu0 %v9863_v44  ;;  %v485_v44 = vsel %vm10255_vm8, 0, %v484_v46  ;;  %v779_v12 = vld [vmem:[#allocation2 + $0x228] sm:$0xff]  ;;  %v785_v16 = vld [vmem:[#allocation2 + $0x238] sm:$0xff]  ;;  %v7801_v46 = vrot.slane %v10840_v0, 9  ;;  %v658_v22 = vor.u32 %v656_v13, %v10857_v7  ;;  %v1800_v13 = vrot.slane %v10607_v60, 5 }
  0x84   :  { %2393 = vmatprep.mubr.bf16.mxu1 %v7909_v42  ;;  %486 = vst [vmem:[#allocation2 + $0x1c0] sm:$0x11] %v485_v44  ;;  %v10854_v14 = vsel %vm10293_vm0, %v634_v45, %v779_v12  ;;  %v1709_v42 = vld [vmem:[#allocation2 + $0x130] sm:$0xee]  ;;  %v1796_v45 = vrot.slane %v10553_v38, 5  ;;  %v7690_v12 = vld [vmem:[%s13881_s0 + $0xa8] sm:$0xff] }
  0x85   :  { %781 = vst [vmem:[#allocation2 + $0x228] sm:$0xff] %v10854_v14  ;;  %v9873_v38 = vld [vmem:[%s13882_s1 + $0x2f0] sm:$0xff]   ;;  %v7802_v23 = vrot.slane %v1709_v42, 9  ;;  %v487_v44 = vld [vmem:[#allocation2 + $0x1d8] sm:$0x11] }
  0x86   :  { %9004 = vmatpush3.bf16.msra.mxu0 %v9864_v52  ;;  %v10863_v52 = vsel %vm10293_vm0, %v642_v62, %v785_v16  ;;  %2394 = vmatmul.mubr.bf16.gmra.mxu1 %v7908_v4  ;;  %v1710_v62 = vld [vmem:[#allocation2 + $0xa0] sm:$0xee]  ;;  %v1788_v4 = vrot.slane %v10501_v21, 5  ;;  %v7689_v21 = vld [vmem:[%s13881_s0 + $0x98] sm:$0xff] }
  0x87   :  { %9005 = vmatprep.subr.bf16.mxu0 %v9865_v19  ;;  %v9868_v19 = vld [vmem:[%s13882_s1 + $0x220] sm:$0xff]   ;;  %787 = vst [vmem:[#allocation2 + $0x238] sm:$0xff] %v10863_v52  ;;  %v7911_v36 = vcombine.high %v10854_v14, %v10863_v52  ;;  %v7910_v0 = vcombine.low %v10854_v14, %v10863_v52  ;;  %v9870_v40 = vld [vmem:[%s13882_s1 + $0x218] sm:$0xff]   ;;  %9067 = vmatprep.subr.bf16.mxu1 %v9873_v38  ;;  %v9875_v38 = vld [vmem:[%s13882_s1 + $0x250] sm:$0xff]  }
  0x88   :  { %9068 = vmatpush3.bf16.msra.mxu1 %v9874_v5  ;;  %v10956_v5 = vsel %vm10633_vm6, %v7801_v46, %v1788_v4  ;;  %v9880_v46 = vld [vmem:[%s13882_s1 + $0x2a0] sm:$0xff]  }
  0x89   :  { %2048 = vmatmul.mubr.bf16.gmra.mxu0 %v7842_v31  ;;  %v7803_v31 = vrot.slane %v1710_v62, 9  ;;  %2401 = vmatprep.mubr.bf16.mxu1 %v7911_v36  ;;  %v491_v36 = vsel %vm10255_vm8, 0, %v490_v3  ;;  %v661_v62 = vshrl.u32 %v7689_v21, 16 }
  0x8a   :  { %2055 = vmatprep.mubr.bf16.mxu0 %v7845_v9  ;;  %9006 = vmatpush3.bf16.msra.mxu0 %v9866_v61  ;;  %v10897_v9 = vsel %vm10633_vm6, %v7802_v23, %v1792_v34  ;;  %v10912_v34 = vld [vmem:[#allocation2 + $0xd0] sm:$0xff]  ;;  %492 = vst [vmem:[#allocation2 + $0x38] sm:$0x11] %v491_v36  ;;  %v664_v23 = vshll.u32 %v7689_v21, 16  ;;  %v9878_v21 = vld [vmem:[%s13882_s1 + $0x2a8] sm:$0xff]  }
  0x8b   :  { %9007 = vmatprep.subr.bf16.mxu0 %v9867_v28  ;;  %v10901_v61 = vsel %vm10633_vm6, %v7803_v31, %v1796_v45  ;;  %v488_v28 = vsel %vm10255_vm8, 0, %v487_v44  ;;  %v797_v16 = vld [vmem:[#allocation2 + $0x1c0] sm:$0xff]  ;;  %v669_v31 = vshrl.u32 %v7690_v12, 16  ;;  %v672_v44 = vshll.u32 %v7690_v12, 16 }
  0x8c   :  { %v7851_v42 = vcombine.high %v10897_v9, %v10901_v61  ;;  %v7850_v45 = vcombine.low %v10897_v9, %v10901_v61  ;;  %489 = vst [vmem:[#allocation2 + $0x1d8] sm:$0x11] %v488_v28  ;;  %v10925_v60 = vsel %vm10293_vm0, %v658_v22, %v797_v16  ;;  %v10933_v3 = vrot.slane %v661_v62, 7 }
  0x8d   :  { %799 = vst [vmem:[#allocation2 + $0x1c0] sm:$0xff] %v10925_v60  ;;  %v7913_v28 = vcombine.high %v10912_v34, %v10925_v60  ;;  %v10938_v22 = vrot.slane %v669_v31, 7  ;;  %v7912_v36 = vcombine.low %v10912_v34, %v10925_v60 }
  0x8e   :  { %9008 = vmatpush3.bf16.msra.mxu0 %v9868_v19  ;;  %v9877_v19 = vld [vmem:[%s13882_s1 + $0x2e8] sm:$0xff]   ;;  %2402 = vmatmul.mubr.bf16.gmra.mxu1 %v7910_v0  ;;  %v666_v12 = vor.u32 %v664_v23, %v10933_v3 }
  0x8f   :  { %9009 = vmatprep.subr.bf16.mxu0 %v9869_v48  ;;  %v10952_v48 = vsel %vm10633_vm6, %v7800_v2, %v1784_v17  ;;  %2409 = vmatprep.mubr.bf16.mxu1 %v7913_v28  ;;  %v674_v18 = vor.u32 %v672_v44, %v10938_v22  ;;  %v1711_v2 = vld [vmem:[#allocation2 + $0x1d0] sm:$0xee]  ;;  %v1712_v17 = vld [vmem:[#allocation2 + $0x220] sm:$0xee]  ;;  %v493_v44 = vld [vmem:[#allocation2 + $0x268] sm:$0x11] }
  0x90   :  { %9069 = vmatprep.subr.bf16.mxu1 %v9877_v19  ;;  %v7804_v0 = vrot.slane %v1711_v2, 9  ;;  %v7805_v4 = vrot.slane %v1712_v17, 9  ;;  %v7849_v16 = vcombine.high %v10952_v48, %v10956_v5 }
  0x91   :  { %2056 = vmatmul.mubr.bf16.gmra.mxu0 %v7844_v32  ;;  %9070 = vmatpush3.bf16.msra.mxu1 %v9878_v21  ;;  %v809_v23 = vld [vmem:[#allocation2 + $0x38] sm:$0xff]  ;;  %v494_v21 = vsel %vm10255_vm8, 0, %v493_v44 }
  0x92   :  { %2063 = vmatprep.mubr.bf16.mxu0 %v7847_v25  ;;  %9010 = vmatpush3.bf16.msra.mxu0 %v9870_v40  ;;  %v10985_v40 = vsel %vm10633_vm6, %v7804_v0, %v1800_v13  ;;  %v10989_v31 = vsel %vm10633_vm6, %v7805_v4, %v1804_v24  ;;  %v10997_v28 = vsel %vm10293_vm0, %v674_v18, %v809_v23  ;;  %v7692_v24 = vld [vmem:[%s13881_s0 + $0xc8] sm:$0xff]  ;;  %v9884_v44 = vld [vmem:[%s13882_s1 + $0x298] sm:$0xff]  }
  0x93   :  { %9011 = vmatprep.subr.bf16.mxu0 %v9875_v38  ;;  %v803_v25 = vld [vmem:[#allocation2 + $0x1d8] sm:$0xff]  ;;  %9071 = vmatprep.subr.bf16.mxu1 %v9879_v26  ;;  %v9881_v38 = vld [vmem:[%s13882_s1 + $0x248] sm:$0xff]   ;;  %v7853_v19 = vcombine.high %v10985_v40, %v10989_v31  ;;  %v7852_v13 = vcombine.low %v10985_v40, %v10989_v31  ;;  %811 = vst [vmem:[#allocation2 + $0x38] sm:$0xff] %v10997_v28  ;;  %495 = vst [vmem:[#allocation2 + $0x268] sm:$0x11] %v494_v21  ;;  %v685_v4 = vshrl.u32 %v7692_v24, 16 }
  0x94   :  { %v10981_v62 = vsel %vm10293_vm0, %v666_v12, %v803_v25  ;;  %v496_v12 = vld [vmem:[#allocation2 + $0x178] sm:$0x11]  ;;  %v688_v25 = vshll.u32 %v7692_v24, 16  ;;  %v9882_v23 = vld [vmem:[%s13882_s1 + $0x208] sm:$0xff]   ;;  %v1808_v24 = vrot.slane %v10669_v47, 5 }
  0x95   :  { %805 = vst [vmem:[#allocation2 + $0x1d8] sm:$0xff] %v10981_v62  ;;  %v7691_v26 = vld [vmem:[%s13881_s0 + $0xb8] sm:$0xff]  ;;  %v7915_v18 = vcombine.high %v10981_v62, %v10997_v28  ;;  %v497_v2 = vsel %vm10255_vm8, 0, %v496_v12  ;;  %9072 = vmatpush3.bf16.msra.mxu1 %v9880_v46  ;;  %v2494_v12 = vshll.u32 %v10701_v41, 16  ;;  %v517_v47 = vld [vmem:[#allocation2 + $0x50] sm:$0x11] }
  0x96   :  { %9012 = vmatpush3.bf16.msra.mxu0 %v9876_v11  ;;  %v677_v17 = vshrl.u32 %v7691_v26, 16  ;;  %498 = vst [vmem:[#allocation2 + $0x178] sm:$0x11] %v497_v2  ;;  %v680_v0 = vshll.u32 %v7691_v26, 16  ;;  %2410 = vmatmul.mubr.bf16.gmra.mxu1 %v7912_v36  ;;  %v9883_v46 = vld [vmem:[%s13882_s1 + $0x2d8] sm:$0xff]   ;;  %v7914_v2 = vcombine.low %v10981_v62, %v10997_v28 }
  0x97   :  { %9013 = vmatprep.subr.bf16.mxu0 %v9881_v38  ;;  %2417 = vmatprep.mubr.bf16.mxu1 %v7915_v18  ;;  %v11027_v38 = vrot.slane %v685_v4, 7  ;;  %v7848_v18 = vcombine.low %v10952_v48, %v10956_v5  ;;  %v11066_v36 = vld [vmem:[#allocation2 + $0x190] sm:$0xee] }
  0x98   :  { %v11022_v11 = vrot.slane %v677_v17, 7  ;;  %9073 = vmatprep.subr.bf16.mxu1 %v9883_v46  ;;  %v1812_v17 = vrot.slane %v10671_v15, 5  ;;  %v2491_v46 = vshrl.u32 %v10701_v41, 16  ;;  %v7694_v41 = vld [vmem:[%s13881_s0 + $0xe8] sm:$0xff]  ;;  %v2522_v15 = vshll.u32 %v10740_v51, 16 }
  0x99   :  { %2064 = vmatmul.mubr.bf16.gmra.mxu0 %v7846_v27  ;;  %v690_v26 = vor.u32 %v688_v25, %v11027_v38  ;;  %9074 = vmatpush3.bf16.msra.mxu1 %v9884_v44  ;;  %v9887_v25 = vld [vmem:[%s13882_s1 + $0x240] sm:$0xff]   ;;  %v499_v44 = vld [vmem:[#allocation2 + $0x150] sm:$0x11]  ;;  %v701_v6 = vshrl.u32 %v7694_v41, 16 }
  0x9a   :  { %2071 = vmatprep.mubr.bf16.mxu0 %v7849_v16  ;;  %v682_v27 = vor.u32 %v680_v0, %v11022_v11  ;;  %9014 = vmatpush3.bf16.msra.mxu0 %v9882_v23  ;;  %v9885_v16 = vld [vmem:[%s13882_s1 + $0x2d0] sm:$0xff]   ;;  %v815_v23 = vld [vmem:[#allocation2 + $0x268] sm:$0xff]  ;;  %v500_v43 = vsel %vm10255_vm8, 0, %v499_v44  ;;  %v9888_v44 = vld [vmem:[%s13882_s1 + $0x200] sm:$0xff]  }
  0x9b   :  { %9075 = vmatprep.subr.bf16.mxu1 %v9885_v16  ;;  %v9886_v0 = vld [vmem:[%s13882_s1 + $0x290] sm:$0xff]   ;;  %v502_v16 = vld [vmem:[#allocation2 + $0x118] sm:$0x11]  ;;  %9015 = vmatprep.subr.bf16.mxu0 %v9887_v25  ;;  %501 = vst [vmem:[#allocation2 + $0x150] sm:$0x11] %v500_v43  ;;  %v704_v43 = vshll.u32 %v7694_v41, 16 }
  0x9c   :  { %v11058_v48 = vsel %vm10293_vm0, %v682_v27, %v815_v23  ;;  %v7693_v27 = vld [vmem:[%s13881_s0 + $0xd8] sm:$0xff]  ;;  %v2505_v23 = vshrl.u32 %v10707_v50, 16  ;;  %v503_v25 = vsel %vm10255_vm8, 0, %v502_v16  ;;  %v9890_v16 = vld [vmem:[%s13882_s1 + $0x288] sm:$0xff]   ;;  %v11099_v32 = vrot.slane %v701_v6, 7 }
  0x9d   :  { %v821_v5 = vld [vmem:[#allocation2 + $0x178] sm:$0xff]  ;;  %817 = vst [vmem:[#allocation2 + $0x268] sm:$0xff] %v11058_v48  ;;  %9076 = vmatpush3.bf16.msra.mxu1 %v9886_v0  ;;  %v1714_v0 = vld [vmem:[#allocation2 + $0x208] sm:$0xee]  ;;  %504 = vst [vmem:[#allocation2 + $0x118] sm:$0x11] %v503_v25 }
  0x9e   :  { %v11064_v4 = vsel %vm10293_vm0, %v690_v26, %v821_v5  ;;  %2418 = vmatmul.mubr.bf16.gmra.mxu1 %v7914_v2  ;;  %v693_v5 = vshrl.u32 %v7693_v27, 16  ;;  %v696_v2 = vshll.u32 %v7693_v27, 16  ;;  %9016 = vmatpush3.bf16.msra.mxu0 %v9888_v44  ;;  %v7806_v41 = vrot.slane %v11066_v36, 9 }
  0x9f   :  { %823 = vst [vmem:[#allocation2 + $0x178] sm:$0xff] %v11064_v4  ;;  %v7917_v26 = vcombine.high %v11058_v48, %v11064_v4  ;;  %v7916_v27 = vcombine.low %v11058_v48, %v11064_v4  ;;  %v7807_v30 = vrot.slane %v1714_v0, 9  ;;  %v706_v44 = vor.u32 %v704_v43, %v11099_v32 }
  0xa0   :  { %v11094_v21 = vrot.slane %v693_v5, 7  ;;  %v2496_v5 = vrot.slane %v2494_v12, 5  ;;  %v515_v36 = vsel %vm10274_vm13, 0, %v514_v58  ;;  %v2508_v12 = vshll.u32 %v10707_v50, 16  ;;  %v9893_v50 = vld [vmem:[%s13882_s1 + $0x378] sm:$0xff]  }
  0xa1   :  { %2072 = vmatmul.mubr.bf16.gmra.mxu0 %v7848_v18  ;;  %v9889_v18 = vld [vmem:[%s13882_s1 + $0x2c8] sm:$0xff]   ;;  %2425 = vmatprep.mubr.bf16.mxu1 %v7917_v26  ;;  %v511_v26 = vld [vmem:[#allocation2 + $0x1b0] sm:$0x11]  ;;  %516 = vst [vmem:[#allocation2 + $0x100] sm:$0x11] %v515_v36  ;;  %v707_v9 = vrot.slane %v11099_v32, 4 }
  0xa2   :  { %2079 = vmatprep.mubr.bf16.mxu0 %v7851_v42  ;;  %9077 = vmatprep.subr.bf16.mxu1 %v9889_v18  ;;  %v2493_v42 = vrot.slane %v2491_v46, 4  ;;  %v698_v25 = vor.u32 %v696_v2, %v11094_v21  ;;  %v512_v6 = vsel %vm10274_vm13, 0, %v511_v26  ;;  %v2507_v18 = vrot.slane %v2505_v23, 4  ;;  %v9892_v46 = vld [vmem:[%s13882_s1 + $0x280] sm:$0xff]   ;;  %v827_v0 = vld [vmem:[#allocation2 + $0x150] sm:$0xff] }
  0xa3   :  { %9078 = vmatpush3.bf16.msra.mxu1 %v9890_v16  ;;  %513 = vst [vmem:[#allocation2 + $0x1b0] sm:$0x11] %v512_v6  ;;  %v691_v23 = vrot.slane %v11027_v38, 4  ;;  %v699_v43 = vrot.slane %v11094_v21, 4  ;;  %9129 = vmatprep.subr.bf16.mxu0 %v9893_v50  ;;  %v2536_v36 = vshll.u32 %v10749_v39, 16 }
  0xa4   :  { %9079 = vmatprep.subr.bf16.mxu1 %v9891_v63  ;;  %v2497_v2 = vor.u32 %v2496_v5, %v2493_v42  ;;  %v2519_v63 = vshrl.u32 %v10740_v51, 16  ;;  %v11122_v16 = vsel %vm10293_vm0, %v698_v25, %v827_v0  ;;  %v833_v58 = vld [vmem:[#allocation2 + $0x118] sm:$0xff]  ;;  %v2510_v42 = vrot.slane %v2508_v12, 5 }
  0xa5   :  { %829 = vst [vmem:[#allocation2 + $0x150] sm:$0xff] %v11122_v16  ;;  %v11134_v61 = vsel %vm10293_vm0, %v706_v44, %v833_v58  ;;  %v11144_v25 = vsel %vm10633_vm6, %v7806_v41, %v1808_v24  ;;  %v11155_v44 = vld [vmem:[#allocation2 + $0x80] sm:$0xee]  ;;  %v518_v24 = vsel %vm10274_vm13, 0, %v517_v47  ;;  %v520_v41 = vld [vmem:[#allocation2 + $0x128] sm:$0x11] }
  0xa6   :  { %2426 = vmatmul.mubr.bf16.gmra.mxu1 %v7916_v27  ;;  %v11138_v27 = vld [vmem:[#allocation2] sm:$0xee]  ;;  %835 = vst [vmem:[#allocation2 + $0x118] sm:$0xff] %v11134_v61  ;;  %v7919_v26 = vcombine.high %v11122_v16, %v11134_v61  ;;  %v2511_v5 = vor.u32 %v2510_v42, %v2507_v18  ;;  %v2521_v6 = vrot.slane %v2519_v63, 4  ;;  %519 = vst [vmem:[#allocation2 + $0x50] sm:$0x11] %v518_v24 }
  0xa7   :  { %9080 = vmatpush3.bf16.msra.mxu1 %v9892_v46  ;;  %v8000_v46 = vrot.slane %v11138_v27, 9  ;;  %v521_v18 = vsel %vm10274_vm13, 0, %v520_v41  ;;  %v2524_v51 = vrot.slane %v2522_v15, 5  ;;  %v8001_v42 = vrot.slane %v11155_v44, 9  ;;  %v11177_v41 = vld [vmem:[#allocation2 + $0x250] sm:$0xee] }
  0xa8   :  { %2433 = vmatprep.mubr.bf16.mxu1 %v7919_v26  ;;  %522 = vst [vmem:[#allocation2 + $0x128] sm:$0x11] %v521_v18  ;;  %v752_v63 = vld [vmem:[#allocation2 + $0x100] sm:$0x11]  ;;  %v2538_v50 = vrot.slane %v2536_v36, 5  ;;  %v2547_v27 = vshrl.u32 %v10803_v20, 16 }
  0xa9   :  { %2080 = vmatmul.mubr.bf16.gmra.mxu0 %v7850_v45  ;;  %v11136_v45 = vrot.slane %v2497_v2, 4  ;;  %v753_v26 = vsel %vm10255_vm8, %v595_v1, %v752_v63  ;;  %v2525_v24 = vor.u32 %v2524_v51, %v2521_v6  ;;  %v11182_v44 = vld [vmem:[#allocation2 + $0xf0] sm:$0xee]  ;;  %v523_v15 = vld [vmem:[#allocation2 + $0x168] sm:$0x11]  ;;  %v8002_v1 = vrot.slane %v11177_v41, 9 }
  0xaa   :  { %2087 = vmatprep.mubr.bf16.mxu0 %v7853_v19  ;;  %v11150_v19 = vsel %vm10633_vm6, %v7807_v30, %v1812_v17  ;;  %v2533_v30 = vshrl.u32 %v10749_v39, 16  ;;  %v7918_v17 = vcombine.low %v11122_v16, %v11134_v61  ;;  %v2459_v12 = vld [vmem:[#allocation2 + $0x1b0] sm:$0x11]  ;;  %v11175_v39 = vrot.slane %v2511_v5, 4  ;;  %754 = vst [vmem:[#allocation2 + $0x100] sm:$0x11] %v753_v26 }
  0xab   :  { %v7855_v2 = vcombine.high %v11144_v25, %v11150_v19  ;;  %v2500_v58 = vshll.u32 %v2459_v12, 16  ;;  %v3070_v47 = vrot.slane %v2459_v12, 5  ;;  %v524_v5 = vsel %vm10274_vm13, 0, %v523_v15  ;;  %v526_v6 = vld [vmem:[#allocation2 + $0x1f8] sm:$0x11] }
  0xac   :  { %v2535_v0 = vrot.slane %v2533_v30, 4  ;;  %v11187_v18 = vrot.slane %v2525_v24, 4  ;;  %525 = vst [vmem:[#allocation2 + $0x168] sm:$0x11] %v524_v5  ;;  %v527_v40 = vsel %vm10274_vm13, 0, %v526_v6  ;;  %v11191_v31 = vrot.slane %v2547_v27, 4 }
  0xad   :  { %v2502_v10 = vrot.slane %v2500_v58, 5  ;;  %528 = vst [vmem:[#allocation2 + $0x1f8] sm:$0x11] %v527_v40  ;;  %v2561_v36 = vshrl.u32 %v10821_v8, 16  ;;  %v7854_v12 = vcombine.low %v11144_v25, %v11150_v19  ;;  %v13905_v51 = vrot.slane %v10709_v53, 4 }
  0xae   :  { %2434 = vmatmul.mubr.bf16.gmra.mxu1 %v7918_v17  ;;  %v2539_v30 = vor.u32 %v2538_v50, %v2535_v0  ;;  %v758_v17 = vld [vmem:[#allocation2 + $0x50] sm:$0x11]  ;;  %v8003_v58 = vrot.slane %v11182_v44, 9  ;;  %v11203_v27 = vld [vmem:[#allocation2 + $0x260] sm:$0xee]  ;;  %v2575_v15 = vshrl.u32 %v10854_v14, 16 }
  0xaf   :  { %v759_v0 = vsel %vm10255_vm8, %v13905_v51, %v758_v17  ;;  %v764_v63 = vld [vmem:[#allocation2 + $0x128] sm:$0x11]  ;;  %v2563_v25 = vrot.slane %v2561_v36, 4  ;;  %v11211_v53 = vld [vmem:[#allocation2 + $0x40] sm:$0xee]  ;;  %v8004_v24 = vrot.slane %v11203_v27, 9  ;;  %v2503_v6 = vsel %vm10334_vm3, %v11136_v45, %v2502_v10 }
  0xb0   :  { %760 = vst [vmem:[#allocation2 + $0x50] sm:$0x11] %v759_v0  ;;  %v11209_v26 = vrot.slane %v2539_v30, 4  ;;  %v529_v40 = vld [vmem:[#allocation2 + $0xc0] sm:$0x11]  ;;  %v11226_v10 = vrot.slane %v2575_v15, 4 }
  0xb1   :  { %2088 = vmatmul.mubr.bf16.gmra.mxu0 %v7852_v13  ;;  %v2550_v13 = vshll.u32 %v10803_v20, 16  ;;  %v13906_v20 = vrot.slane %v10711_v57, 4  ;;  %v2461_v5 = vld [vmem:[#allocation2 + $0x100] sm:$0x11]  ;;  %v3071_v57 = vsel %vm10633_vm6, %v8000_v46, %v3070_v47  ;;  %v530_v51 = vsel %vm10274_vm13, 0, %v529_v40  ;;  %v9894_v15 = vld [vmem:[%s13882_s1 + $0x338] sm:$0xff]  }
  0xb2   :  { %2095 = vmatprep.mubr.bf16.mxu0 %v7855_v2  ;;  %v2564_v2 = vshll.u32 %v10821_v8, 16  ;;  %v2514_v17 = vshll.u32 %v2461_v5, 16  ;;  %v3074_v36 = vrot.slane %v2461_v5, 5  ;;  %531 = vst [vmem:[#allocation2 + $0xc0] sm:$0x11] %v530_v51  ;;  %v2578_v46 = vshll.u32 %v10854_v14, 16 }
  0xb3   :  { %v2552_v50 = vrot.slane %v2550_v13, 5  ;;  %v765_v8 = vsel %vm10255_vm8, %v13906_v20, %v764_v63  ;;  %v532_v13 = vld [vmem:[#allocation2 + $0xe8] sm:$0x11]  ;;  %v13908_v14 = vrot.slane %v10763_v35, 4  ;;  %v11245_v5 = vld [vmem:[#allocation2 + $0x228] sm:$0xee] }
  0xb4   :  { %v2566_v19 = vrot.slane %v2564_v2, 5  ;;  %766 = vst [vmem:[#allocation2 + $0x128] sm:$0x11] %v765_v8  ;;  %v8005_v2 = vrot.slane %v11211_v53, 9  ;;  %v770_v0 = vld [vmem:[#allocation2 + $0x168] sm:$0x11] }
  0xb5   :  { %v2553_v30 = vor.u32 %v2552_v50, %v11191_v31  ;;  %v533_v45 = vsel %vm10274_vm13, 0, %v532_v13  ;;  %v2516_v47 = vrot.slane %v2514_v17, 5  ;;  %v3075_v31 = vsel %vm10633_vm6, %v8001_v42, %v3074_v36  ;;  %v776_v20 = vld [vmem:[#allocation2 + $0x1f8] sm:$0x11]  ;;  %v11256_v36 = vld [vmem:[#allocation2 + $0x238] sm:$0xee] }
  0xb6   :  { %v2567_v63 = vor.u32 %v2566_v19, %v2563_v25  ;;  %534 = vst [vmem:[#allocation2 + $0xe8] sm:$0x11] %v533_v45  ;;  %v2589_v8 = vshrl.u32 %v10863_v52, 16  ;;  %v8048_v25 = vcombine.low %v3071_v57, %v3075_v31  ;;  %v8049_v19 = vcombine.high %v3071_v57, %v3075_v31  ;;  %v9895_v57 = vld [vmem:[%s13882_s1 + $0x370] sm:$0xff]   ;;  %v11331_v53 = vld [vmem:[#allocation2 + $0x1c0] sm:$0xee] }
  0xb7   :  { %v777_v42 = vsel %vm10255_vm8, %v13908_v14, %v776_v20  ;;  %v2517_v40 = vsel %vm10334_vm3, %v11175_v39, %v2516_v47  ;;  %v2463_v13 = vld [vmem:[#allocation2 + $0x50] sm:$0x11]  ;;  %v2592_v35 = vshll.u32 %v10863_v52, 16 }
  0xb8   :  { %778 = vst [vmem:[#allocation2 + $0x1f8] sm:$0x11] %v777_v42  ;;  %v11253_v17 = vrot.slane %v2589_v8, 4  ;;  %v7968_v51 = vcombine.low %v2503_v6, %v2517_v40  ;;  %3357 = vmatprep.mubr.bf16.mxu1 %v8049_v19  ;;  %v3078_v31 = vrot.slane %v2463_v13, 5  ;;  %v11267_v8 = vrot.slane %v2567_v63, 4 }
  0xb9   :  { %2096 = vmatmul.mubr.bf16.gmra.mxu0 %v7854_v12  ;;  %v13907_v12 = vrot.slane %v10755_v56, 4  ;;  %v11243_v56 = vrot.slane %v2578_v46, 5  ;;  %v2528_v46 = vshll.u32 %v2463_v13, 16  ;;  %3358 = vmatmul.mubr.bf16.vlgmr.msra.gmra.mxu1 %v8048_v25  ;;  %v8006_v25 = vrot.slane %v11245_v5, 9  ;;  %v541_v19 = vld [vmem:[#allocation2 + $0x258] sm:$0x11] }
  0xba   :  { %v3079_v52 = vsel %vm10633_vm6, %v8002_v1, %v3078_v31  ;;  %v782_v41 = vld [vmem:[#allocation2 + $0xc0] sm:$0x11]  ;;  %v8007_v42 = vrot.slane %v11256_v36, 9  ;;  %v13909_v13 = vrot.slane %v10809_v55, 4  ;;  %v13910_v55 = vrot.slane %v10823_v33, 4 }
  0xbb   :  { %v771_v50 = vsel %vm10255_vm8, %v13907_v12, %v770_v0  ;;  %v7969_v0 = vcombine.high %v2503_v6, %v2517_v40  ;;  %v2465_v45 = vld [vmem:[#allocation2 + $0x128] sm:$0x11]  ;;  %v2554_v12 = vrot.slane %v2553_v30, 4  ;;  %v2530_v20 = vrot.slane %v2528_v46, 5  ;;  %v9896_v6 = vld [vmem:[%s13882_s1 + $0x330] sm:$0xff]  }
  0xbc   :  { %772 = vst [vmem:[#allocation2 + $0x168] sm:$0x11] %v771_v50  ;;  %v2542_v39 = vshll.u32 %v2465_v45, 16  ;;  %v3082_v47 = vrot.slane %v2465_v45, 5  ;;  %v11258_v50 = vrot.slane %v2592_v35, 5  ;;  %v2581_v1 = vor.u32 %v11243_v56, %v11226_v10 }
  0xbd   :  { %2939 = vmatprep.mubr.bf16.mxu0 %v7969_v0  ;;  %v2531_v63 = vsel %vm10334_vm3, %v11187_v18, %v2530_v20  ;;  %v783_v44 = vsel %vm10255_vm8, %v13909_v13, %v782_v41  ;;  %v788_v35 = vld [vmem:[#allocation2 + $0xe8] sm:$0x11]  ;;  %v2606_v41 = vshll.u32 %v10912_v34, 16  ;;  %v13911_v5 = vrot.slane %v10857_v7, 4 }
  0xbe   :  { %v2544_v30 = vrot.slane %v2542_v39, 5  ;;  %v3083_v14 = vsel %vm10633_vm6, %v8003_v58, %v3082_v47  ;;  %v2595_v58 = vor.u32 %v11258_v50, %v11253_v17  ;;  %v9897_v18 = vld [vmem:[%s13882_s1 + $0x368] sm:$0xff]   ;;  %784 = vst [vmem:[#allocation2 + $0xc0] sm:$0x11] %v783_v44  ;;  %v789_v0 = vsel %vm10255_vm8, %v13910_v55, %v788_v35  ;;  %v9899_v50 = vld [vmem:[%s13882_s1 + $0x360] sm:$0xff]   ;;  %v9906_v55 = vld [vmem:[%s13882_s1 + $0x3b0] sm:$0xff]  }
  0xbf   :  { %v8051_v40 = vcombine.high %v3079_v52, %v3083_v14  ;;  %v542_v17 = vsel %vm10274_vm13, 0, %v541_v19  ;;  %v9898_v39 = vld [vmem:[%s13882_s1 + $0x328] sm:$0xff]   ;;  %790 = vst [vmem:[#allocation2 + $0xe8] sm:$0x11] %v789_v0  ;;  %v11307_v19 = vld [vmem:[#allocation2 + $0xd0] sm:$0xee] }
  0xc0   :  { %v2545_v10 = vsel %vm10334_vm3, %v11209_v26, %v2544_v30  ;;  %v2469_v26 = vld [vmem:[#allocation2 + $0x1f8] sm:$0x11]  ;;  %543 = vst [vmem:[#allocation2 + $0x258] sm:$0x11] %v542_v17  ;;  %v9909_v7 = vld [vmem:[%s13882_s1 + $0x3e8] sm:$0xff]  }
  0xc1   :  { %2940 = vmatmul.mubr.bf16.vlgmr.msra.gmra.mxu0 %v7968_v51  ;;  %v544_v51 = vld [vmem:[#allocation2 + $0x1f0] sm:$0x11]  ;;  %v7971_v45 = vcombine.high %v2531_v63, %v2545_v10  ;;  %v7970_v46 = vcombine.low %v2531_v63, %v2545_v10  ;;  %3365 = vmatprep.mubr.bf16.mxu1 %v8051_v40  ;;  %v2570_v47 = vshll.u32 %v2469_v26, 16  ;;  %v3090_v33 = vrot.slane %v2469_v26, 5  ;;  %v9903_v40 = vld [vmem:[%s13882_s1 + $0x3f8] sm:$0xff]  }
  0xc2   :  { %9130 = vmatpush3.bf16.msra.mxu0 %v9894_v15  ;;  %v8050_v15 = vcombine.low %v3079_v52, %v3083_v14  ;;  %v545_v20 = vsel %vm10274_vm13, 0, %v544_v51  ;;  %v2603_v52 = vshrl.u32 %v10912_v34, 16  ;;  %v2617_v63 = vshrl.u32 %v10925_v60, 16  ;;  %v9904_v34 = vld [vmem:[%s13882_s1 + $0x3b8] sm:$0xff]   ;;  %v9900_v51 = vld [vmem:[%s13882_s1 + $0x320] sm:$0xff]   ;;  %9193 = vmatprep.subr.bf16.mxu1 %v9903_v40 }
  0xc3   :  { %9131 = vmatprep.subr.bf16.mxu0 %v9895_v57  ;;  %v2467_v56 = vld [vmem:[#allocation2 + $0x168] sm:$0x11]  ;;  %2947 = vmatprep.mubr.bf16.mxu0 %v7971_v45  ;;  %546 = vst [vmem:[#allocation2 + $0x1f0] sm:$0x11] %v545_v20  ;;  %v2572_v13 = vrot.slane %v2570_v47, 5  ;;  %v3091_v27 = vsel %vm10633_vm6, %v8005_v2, %v3090_v33  ;;  %v2608_v10 = vrot.slane %v2606_v41, 5 }
  0xc4   :  { %v2556_v57 = vshll.u32 %v2467_v56, 16  ;;  %v3086_v31 = vrot.slane %v2467_v56, 5  ;;  %3366 = vmatmul.mubr.bf16.gmra.mxu1 %v8050_v15  ;;  %v2582_v15 = vrot.slane %v2581_v1, 4  ;;  %v2596_v45 = vrot.slane %v2595_v58, 4  ;;  %v9902_v58 = vld [vmem:[%s13882_s1 + $0x318] sm:$0xff]  }
  0xc5   :  { %v2573_v2 = vsel %vm10334_vm3, %v11267_v8, %v2572_v13  ;;  %9194 = vmatpush3.bf16.msra.mxu1 %v9904_v34  ;;  %v2471_v17 = vld [vmem:[#allocation2 + $0xc0] sm:$0x11]  ;;  %v8008_v8 = vrot.slane %v11307_v19, 9  ;;  %v8009_v40 = vrot.slane %v11331_v53, 9  ;;  %v9907_v13 = vld [vmem:[%s13882_s1 + $0x350] sm:$0xff]  }
  0xc6   :  { %9132 = vmatpush3.bf16.msra.mxu0 %v9896_v6  ;;  %v2558_v30 = vrot.slane %v2556_v57, 5  ;;  %v3087_v14 = vsel %vm10633_vm6, %v8004_v24, %v3086_v31  ;;  %v2605_v6 = vrot.slane %v2603_v52, 4  ;;  %v2620_v24 = vshll.u32 %v10925_v60, 16  ;;  %v9905_v60 = vld [vmem:[%s13882_s1 + $0x3f0] sm:$0xff]   ;;  %v2473_v26 = vld [vmem:[#allocation2 + $0xe8] sm:$0x11] }
  0xc7   :  { %9133 = vmatprep.subr.bf16.mxu0 %v9897_v18  ;;  %v8053_v35 = vcombine.high %v3087_v14, %v3091_v27  ;;  %v9901_v18 = vld [vmem:[%s13882_s1 + $0x358] sm:$0xff]   ;;  %v8052_v1 = vcombine.low %v3087_v14, %v3091_v27  ;;  %v2584_v57 = vshll.u32 %v2471_v17, 16  ;;  %v3094_v31 = vrot.slane %v2471_v17, 5  ;;  %9195 = vmatprep.subr.bf16.mxu1 %v9905_v60  ;;  %v550_v34 = vld [vmem:[#allocation2 + $0x270] sm:$0x11] }
  0xc8   :  { %v2559_v44 = vsel %vm10334_vm3, %v2554_v12, %v2558_v30  ;;  %v2619_v12 = vrot.slane %v2617_v63, 4  ;;  %v2622_v56 = vrot.slane %v2620_v24, 5  ;;  %v11346_v47 = vld [vmem:[#allocation2 + $0x258] sm:$0x11]  ;;  %v2598_v20 = vshll.u32 %v2473_v26, 16 }
  0xc9   :  { %2948 = vmatmul.mubr.bf16.gmra.mxu0 %v7970_v46  ;;  %v7973_v0 = vcombine.high %v2559_v44, %v2573_v2  ;;  %3373 = vmatprep.mubr.bf16.mxu1 %v8053_v35  ;;  %v2609_v46 = vor.u32 %v2608_v10, %v2605_v6  ;;  %v7972_v33 = vcombine.low %v2559_v44, %v2573_v2  ;;  %v3098_v52 = vrot.slane %v2473_v26, 5  ;;  %v9910_v2 = vld [vmem:[%s13882_s1 + $0x3a8] sm:$0xff]  }
  0xca   :  { %9134 = vmatpush3.bf16.msra.mxu0 %v9898_v39  ;;  %v2623_v30 = vor.u32 %v2622_v56, %v2619_v12  ;;  %v547_v39 = vld [vmem:[#allocation2 + $0x1b8] sm:$0x11]  ;;  %v2586_v41 = vrot.slane %v2584_v57, 5  ;;  %v800_v14 = vld [vmem:[#allocation2 + $0x1f0] sm:$0x11]  ;;  %9196 = vmatpush3.bf16.msra.mxu1 %v9906_v55  ;;  %v2600_v27 = vrot.slane %v2598_v20, 5 }
  0xcb   :  { %9135 = vmatprep.subr.bf16.mxu0 %v9899_v50  ;;  %2955 = vmatprep.mubr.bf16.mxu0 %v7973_v0  ;;  %v3095_v50 = vsel %vm10633_vm6, %v8006_v25, %v3094_v31  ;;  %v2610_v63 = vrot.slane %v2609_v46, 4  ;;  %v3099_v6 = vsel %vm10633_vm6, %v8007_v42, %v3098_v52  ;;  %v801_v25 = vsel %vm10255_vm8, %v13911_v5, %v800_v14  ;;  %v11394_v57 = vld [vmem:[#allocation2 + $0x38] sm:$0xee] }
  0xcc   :  { %v2612_v24 = vshll.u32 %v11346_v47, 16  ;;  %3374 = vmatmul.mubr.bf16.gmra.mxu1 %v8052_v1  ;;  %v2587_v44 = vsel %vm10334_vm3, %v2582_v15, %v2586_v41  ;;  %v8055_v35 = vcombine.high %v3095_v50, %v3099_v6  ;;  %802 = vst [vmem:[#allocation2 + $0x1f0] sm:$0x11] %v801_v25  ;;  %v548_v36 = vsel %vm10274_vm13, 0, %v547_v39  ;;  %9197 = vmatprep.subr.bf16.mxu1 %v9909_v7  ;;  %v553_v39 = vld [vmem:[#allocation2 + $0x1e0] sm:$0x11] }
  0xcd   :  { %v2601_v42 = vsel %vm10334_vm3, %v2596_v45, %v2600_v27  ;;  %v3102_v10 = vrot.slane %v11346_v47, 5  ;;  %549 = vst [vmem:[#allocation2 + $0x1b8] sm:$0x11] %v548_v36  ;;  %v551_v60 = vsel %vm10274_vm13, 0, %v550_v34  ;;  %v2631_v12 = vshrl.u32 %v10981_v62, 16  ;;  %v9908_v45 = vld [vmem:[%s13882_s1 + $0x310] sm:$0xff]  }
  0xce   :  { %9136 = vmatpush3.bf16.msra.mxu0 %v9900_v51  ;;  %v11377_v51 = vrot.slane %v2623_v30, 4  ;;  %v7975_v15 = vcombine.high %v2587_v44, %v2601_v42  ;;  %3381 = vmatprep.mubr.bf16.mxu1 %v8055_v35  ;;  %552 = vst [vmem:[#allocation2 + $0x270] sm:$0x11] %v551_v60  ;;  %v2634_v56 = vshll.u32 %v10981_v62, 16  ;;  %v2614_v55 = vrot.slane %v2612_v24, 5  ;;  %v9912_v34 = vld [vmem:[%s13882_s1 + $0x3a0] sm:$0xff]  }
  0xcf   :  { %9137 = vmatprep.subr.bf16.mxu0 %v9901_v18  ;;  %v11387_v18 = vld [vmem:[#allocation2 + $0x1d8] sm:$0xee]  ;;  %v2645_v0 = vshrl.u32 %v10997_v28, 16  ;;  %v2648_v17 = vshll.u32 %v10997_v28, 16  ;;  %v8054_v46 = vcombine.low %v3095_v50, %v3099_v6  ;;  %v2633_v1 = vrot.slane %v2631_v12, 4  ;;  %9198 = vmatpush3.bf16.msra.mxu1 %v9910_v2  ;;  %v9911_v28 = vld [vmem:[%s13882_s1 + $0x3e0] sm:$0xff]  }
  0xd0   :  { %v2636_v26 = vrot.slane %v2634_v56, 5  ;;  %v8010_v31 = vrot.slane %v11387_v18, 9  ;;  %v7974_v47 = vcombine.low %v2587_v44, %v2601_v42  ;;  %v2615_v30 = vsel %vm10334_vm3, %v2610_v63, %v2614_v55  ;;  %v556_v41 = vld [vmem:[#allocation2 + $0x90] sm:$0x11]  ;;  %9199 = vmatprep.subr.bf16.mxu1 %v9911_v28  ;;  %v11440_v55 = vld [vmem:[#allocation2 + $0x268] sm:$0xee] }
  0xd1   :  { %2956 = vmatmul.mubr.bf16.gmra.mxu0 %v7972_v33  ;;  %v2647_v62 = vrot.slane %v2645_v0, 4  ;;  %v2650_v20 = vrot.slane %v2648_v17, 5  ;;  %v554_v27 = vsel %vm10274_vm13, 0, %v553_v39  ;;  %v2659_v6 = vshrl.u32 %v11058_v48, 16  ;;  %v9915_v17 = vld [vmem:[%s13882_s1 + $0x3d8] sm:$0xff]   ;;  %v9917_v28 = vld [vmem:[%s13882_s1 + $0x3d0] sm:$0xff]  }
  0xd2   :  { %9138 = vmatpush3.bf16.msra.mxu0 %v9902_v58  ;;  %2963 = vmatprep.mubr.bf16.mxu0 %v7975_v15  ;;  %v2637_v33 = vor.u32 %v2636_v26, %v2633_v1  ;;  %v3103_v58 = vsel %vm10633_vm6, %v8008_v8, %v3102_v10  ;;  %v13912_v63 = vrot.slane %v10933_v3, 4  ;;  %v8011_v25 = vrot.slane %v11394_v57, 9  ;;  %555 = vst [vmem:[#allocation2 + $0x1e0] sm:$0x11] %v554_v27  ;;  %v9916_v1 = vld [vmem:[%s13882_s1 + $0x398] sm:$0xff]  }
  0xd3   :  { %9139 = vmatprep.subr.bf16.mxu0 %v9907_v13  ;;  %v2477_v52 = vld [vmem:[#allocation2 + $0x1f0] sm:$0x11]  ;;  %v557_v24 = vsel %vm10274_vm13, 0, %v556_v41  ;;  %v13913_v35 = vrot.slane %v10938_v22, 4  ;;  %v2662_v7 = vshll.u32 %v11058_v48, 16  ;;  %v2651_v10 = vor.u32 %v2650_v20, %v2647_v62  ;;  %9200 = vmatpush3.bf16.msra.mxu1 %v9912_v34  ;;  %v9913_v48 = vld [vmem:[%s13882_s1 + $0x348] sm:$0xff]  }
  0xd4   :  { %3382 = vmatmul.mubr.bf16.gmra.mxu1 %v8054_v46  ;;  %v2626_v50 = vshll.u32 %v2477_v52, 16  ;;  %v3106_v14 = vrot.slane %v2477_v52, 5  ;;  %v806_v13 = vld [vmem:[#allocation2 + $0x1b8] sm:$0x11]  ;;  %v11413_v8 = vrot.slane %v2637_v33, 4  ;;  %v2673_v60 = vshrl.u32 %v11064_v4, 16  ;;  %9201 = vmatprep.subr.bf16.mxu1 %v9915_v17 }
  0xd5   :  { %v807_v19 = vsel %vm10255_vm8, %v13912_v63, %v806_v13  ;;  %v812_v5 = vld [vmem:[#allocation2 + $0x270] sm:$0x11]  ;;  %558 = vst [vmem:[#allocation2 + $0x90] sm:$0x11] %v557_v24  ;;  %v2676_v2 = vshll.u32 %v11064_v4, 16  ;;  %v11435_v22 = vrot.slane %v2659_v6, 4 }
  0xd6   :  { %9140 = vmatpush3.bf16.msra.mxu0 %v9908_v45  ;;  %v2628_v44 = vrot.slane %v2626_v50, 5  ;;  %v3107_v3 = vsel %vm10633_vm6, %v8009_v40, %v3106_v14  ;;  %808 = vst [vmem:[#allocation2 + $0x1b8] sm:$0x11] %v807_v19  ;;  %v813_v36 = vsel %vm10255_vm8, %v13913_v35, %v812_v5  ;;  %v2664_v15 = vrot.slane %v2662_v7, 5  ;;  %v11467_v41 = vld [vmem:[#allocation2 + $0x178] sm:$0xee] }
  0xd7   :  { %v8057_v42 = vcombine.high %v3103_v58, %v3107_v3  ;;  %814 = vst [vmem:[#allocation2 + $0x270] sm:$0x11] %v813_v36  ;;  %v8056_v40 = vcombine.low %v3103_v58, %v3107_v3  ;;  %v11442_v0 = vrot.slane %v2673_v60, 4  ;;  %v11444_v4 = vrot.slane %v2676_v2, 5  ;;  %9141 = vmatprep.subr.bf16.mxu0 %v9913_v48  ;;  %9202 = vmatpush3.bf16.msra.mxu1 %v9916_v1  ;;  %v559_v6 = vld [vmem:[#allocation2 + $0x278] sm:$0x11] }
  0xd8   :  { %v2629_v53 = vsel %vm10334_vm3, %v11377_v51, %v2628_v44  ;;  %v9914_v51 = vld [vmem:[%s13882_s1 + $0x308] sm:$0xff]   ;;  %v2652_v45 = vrot.slane %v2651_v10, 4  ;;  %v13914_v62 = vrot.slane %v11022_v11, 4  ;;  %v8012_v20 = vrot.slane %v11440_v55, 9  ;;  %9203 = vmatprep.subr.bf16.mxu1 %v9917_v28  ;;  %v562_v63 = vld [vmem:[#allocation2 + $0x30] sm:$0x11] }
  0xd9   :  { %2964 = vmatmul.mubr.bf16.gmra.mxu0 %v7974_v47  ;;  %v7977_v12 = vcombine.high %v2615_v30, %v2629_v53  ;;  %v7976_v56 = vcombine.low %v2615_v30, %v2629_v53  ;;  %3389 = vmatprep.mubr.bf16.mxu1 %v8057_v42  ;;  %v818_v46 = vld [vmem:[#allocation2 + $0x1e0] sm:$0x11]  ;;  %v2665_v13 = vor.u32 %v2664_v15, %v11435_v22  ;;  %v563_v24 = vsel %vm10274_vm13, 0, %v562_v63  ;;  %v9918_v34 = vld [vmem:[%s13882_s1 + $0x390] sm:$0xff]   ;;  %v9922_v28 = vld [vmem:[%s13882_s1 + $0x388] sm:$0xff]  }
  0xda   :  { %9142 = vmatpush3.bf16.msra.mxu0 %v9914_v51  ;;  %v819_v47 = vsel %vm10255_vm8, %v13914_v62, %v818_v46  ;;  %v2679_v27 = vor.u32 %v11444_v4, %v11442_v0  ;;  %564 = vst [vmem:[#allocation2 + $0x30] sm:$0x11] %v563_v24  ;;  %v2687_v18 = vshrl.u32 %v11122_v16, 16  ;;  %v9919_v35 = vld [vmem:[%s13882_s1 + $0x340] sm:$0xff]   ;;  %v2701_v10 = vshrl.u32 %v11134_v61, 16 }
  0xdb   :  { %2971 = vmatprep.mubr.bf16.mxu0 %v7977_v12  ;;  %820 = vst [vmem:[#allocation2 + $0x1e0] sm:$0x11] %v819_v47  ;;  %9204 = vmatpush3.bf16.msra.mxu1 %v9918_v34  ;;  %v2666_v60 = vrot.slane %v2665_v13, 4  ;;  %v8013_v2 = vrot.slane %v11467_v41, 9  ;;  %v2704_v53 = vshll.u32 %v11134_v61, 16 }
  0xdc   :  { %3390 = vmatmul.mubr.bf16.gmra.mxu1 %v8056_v40  ;;  %v824_v33 = vld [vmem:[#allocation2 + $0x90] sm:$0x11]  ;;  %9143 = vmatprep.subr.bf16.mxu0 %v9919_v35  ;;  %v2680_v48 = vrot.slane %v2679_v27, 4  ;;  %v11506_v12 = vrot.slane %v2687_v18, 4  ;;  %v11510_v4 = vrot.slane %v2701_v10, 4 }
  0xdd   :  { %v2479_v26 = vld [vmem:[#allocation2 + $0x1b8] sm:$0x11]  ;;  %v825_v11 = vsel %vm10255_vm8, %v691_v23, %v824_v33  ;;  %v560_v23 = vsel %vm10274_vm13, 0, %v559_v6  ;;  %v11512_v61 = vld [vmem:[#allocation2 + $0x150] sm:$0xee]  ;;  %v2706_v33 = vrot.slane %v2704_v53, 5 }
  0xde   :  { %v2481_v30 = vld [vmem:[#allocation2 + $0x270] sm:$0x11]  ;;  %v2640_v58 = vshll.u32 %v2479_v26, 16  ;;  %v3110_v39 = vrot.slane %v2479_v26, 5  ;;  %826 = vst [vmem:[#allocation2 + $0x90] sm:$0x11] %v825_v11 }
  0xdf   :  { %v2654_v50 = vshll.u32 %v2481_v30, 16  ;;  %v3114_v14 = vrot.slane %v2481_v30, 5  ;;  %561 = vst [vmem:[#allocation2 + $0x278] sm:$0x11] %v560_v23  ;;  %v9923_v11 = vld [vmem:[%s13882_s1 + $0x3c0] sm:$0xff]   ;;  %v8014_v21 = vrot.slane %v11512_v61, 9 }
  0xe0   :  { %v2642_v5 = vrot.slane %v2640_v58, 5  ;;  %v3111_v38 = vsel %vm10633_vm6, %v8010_v31, %v3110_v39  ;;  %v2690_v31 = vshll.u32 %v11122_v16, 16  ;;  %v9924_v23 = vld [vmem:[%s13882_s1 + $0x380] sm:$0xff]  }
  0xe1   :  { %2972 = vmatmul.mubr.bf16.gmra.mxu0 %v7976_v56  ;;  %v2656_v44 = vrot.slane %v2654_v50, 5  ;;  %v3115_v3 = vsel %vm10633_vm6, %v8011_v25, %v3114_v14  ;;  %v9920_v25 = vld [vmem:[%s13882_s1 + $0x300] sm:$0xff]   ;;  %v836_v39 = vld [vmem:[#allocation2 + $0x30] sm:$0x11] }
  0xe2   :  { %v2643_v7 = vsel %vm10334_vm3, %v11413_v8, %v2642_v5  ;;  %v8059_v42 = vcombine.high %v3111_v38, %v3115_v3  ;;  %v8058_v57 = vcombine.low %v3111_v38, %v3115_v3  ;;  %v9921_v8 = vld [vmem:[%s13882_s1 + $0x3c8] sm:$0xff]   ;;  %9144 = vmatpush3.bf16.msra.mxu0 %v9920_v25  ;;  %v2483_v56 = vld [vmem:[#allocation2 + $0x1e0] sm:$0x11]  ;;  %v11508_v0 = vrot.slane %v2690_v31, 5  ;;  %v9925_v3 = vld [vmem:[%s13882_s1 + $0x478] sm:$0xff]  }
  0xe3   :  { %v2657_v16 = vsel %vm10334_vm3, %v2652_v45, %v2656_v44  ;;  %9205 = vmatprep.subr.bf16.mxu1 %v9921_v8  ;;  %v2668_v45 = vshll.u32 %v2483_v56, 16  ;;  %v3118_v46 = vrot.slane %v2483_v56, 5  ;;  %v837_v55 = vsel %vm10255_vm8, %v707_v9, %v836_v39  ;;  %9257 = vmatprep.subr.bf16.mxu0 %v9925_v3  ;;  %v11607_v3 = vld [vmem:[#allocation2 + $0x1c8] sm:$0x11] }
  0xe4   :  { %v8825_v52 = vpop.f32.mrf.mxu1  ;;  %v7979_v22 = vcombine.high %v2643_v7, %v2657_v16  ;;  %v7978_v15 = vcombine.low %v2643_v7, %v2657_v16  ;;  %3397 = vmatprep.mubr.bf16.mxu1 %v8059_v42  ;;  %9206 = vmatpush3.bf16.msra.mxu1 %v9922_v28  ;;  %838 = vst [vmem:[#allocation2 + $0x30] sm:$0x11] %v837_v55  ;;  %v11566_v7 = vld [vmem:[#allocation2 + $0x20] sm:$0x11] }
  0xe5   :  { %3398 = vmatmul.mubr.bf16.gmra.mxu1 %v8058_v57  ;;  %v2485_v17 = vld [vmem:[#allocation2 + $0x90] sm:$0x11]  ;;  %v2670_v30 = vrot.slane %v2668_v45, 5  ;;  %9207 = vmatprep.subr.bf16.mxu1 %v9923_v11  ;;  %v2693_v5 = vor.u32 %v11508_v0, %v11506_v12  ;;  %v2707_v38 = vor.u32 %v2706_v33, %v11510_v4  ;;  %v11575_v4 = vld [vmem:[#allocation2 + $0x1e8] sm:$0xff] }
  0xe6   :  { %v8826_v19 = vpop.f32.mrf.mxu1  ;;  %2979 = vmatprep.mubr.bf16.mxu0 %v7979_v22  ;;  %v2682_v62 = vshll.u32 %v2485_v17, 16  ;;  %v3122_v47 = vrot.slane %v2485_v17, 5  ;;  %v830_v58 = vld [vmem:[#allocation2 + $0x278] sm:$0x11] }
  0xe7   :  { %v11514_v51 = vadd.f32 %v8826_v19, %v8825_v52  ;;  %v3119_v52 = vsel %vm10633_vm6, %v8012_v20, %v3118_v46  ;;  %v831_v13 = vsel %vm10255_vm8, %v699_v43, %v830_v58  ;;  %v11538_v20 = vld [vmem:[#allocation2 + $0x48] sm:$0xff]  ;;  %v2671_v27 = vsel %vm10334_vm3, %v2666_v60, %v2670_v30  ;;  %v11542_v19 = vld [vmem:[#allocation2 + $0x118] sm:$0xee] }
  0xe8   :  { %v8828_v36 = vpop.f32.mrf.mxu1  ;;  %v2684_v50 = vrot.slane %v2682_v62, 5  ;;  %v3123_v14 = vsel %vm10633_vm6, %v8013_v2, %v3122_v47  ;;  %832 = vst [vmem:[#allocation2 + $0x278] sm:$0x11] %v831_v13  ;;  %v11545_v43 = vld [vmem:[#allocation2 + $0x148] sm:$0xff]  ;;  %v3809_v24 = vshrl.u32 %v11538_v20, 16  ;;  %v3812_v18 = vshll.u32 %v11538_v20, 16  ;;  %9208 = vmatpush3.bf16.msra.mxu1 %v9924_v23 }
  0xe9   :  { %2980 = vmatmul.mubr.bf16.gmra.mxu0 %v7978_v15  ;;  %v8061_v6 = vcombine.high %v3119_v52, %v3123_v14  ;;  %v8060_v63 = vcombine.low %v3119_v52, %v3123_v14  ;;  %v3823_v57 = vshrl.u32 %v11545_v43, 16  ;;  %v3826_v60 = vshll.u32 %v11545_v43, 16 }
  0xea   :  { %v8829_v40 = vpop.f32.mrf.mxu1  ;;  %v2685_v9 = vsel %vm10334_vm3, %v2680_v48, %v2684_v50  ;;  %v3811_v42 = vrot.slane %v3809_v24, 4  ;;  %v3814_v25 = vrot.slane %v3812_v18, 5  ;;  %v3832_v2 = vshll.u32 %v11566_v7, 16 }
  0xeb   :  { %v11516_v1 = vadd.f32 %v8829_v40, %v8828_v36  ;;  %v7981_v34 = vcombine.high %v2671_v27, %v2685_v9  ;;  %v7980_v44 = vcombine.low %v2671_v27, %v2685_v9  ;;  %3405 = vmatprep.mubr.bf16.mxu1 %v8061_v6  ;;  %v11564_v36 = vld [vmem:[#allocation2 + $0x170] sm:$0x11]  ;;  %v2694_v53 = vrot.slane %v2693_v5, 4 }
  0xec   :  { %v8831_v26 = vpop.f32.mrf.mxu1  ;;  %v3818_v16 = vshll.u32 %v11564_v36, 16  ;;  %v2708_v8 = vrot.slane %v2707_v38, 4  ;;  %v8015_v40 = vrot.slane %v11542_v19, 9  ;;  %v3825_v22 = vrot.slane %v3823_v57, 4  ;;  %v2489_v17 = vld [vmem:[#allocation2 + $0x30] sm:$0x11] }
  0xed   :  { %3406 = vmatmul.mubr.bf16.gmra.mxu1 %v8060_v63  ;;  %2987 = vmatprep.mubr.bf16.mxu0 %v7981_v34  ;;  %v3815_v48 = vor.u32 %v3814_v25, %v3811_v42  ;;  %v3828_v56 = vrot.slane %v3826_v60, 5  ;;  %v3834_v0 = vrot.slane %v3832_v2, 5  ;;  %v8112_v45 = vcombine.low %v11538_v20, %v11545_v43  ;;  %v11597_v38 = vld [vmem:[#allocation2 + $0x60] sm:$0x11] }
  0xee   :  { %v8832_v41 = vpop.f32.mrf.mxu1  ;;  %v3820_v12 = vrot.slane %v3818_v16, 5  ;;  %v8113_v46 = vcombine.high %v11538_v20, %v11545_v43  ;;  %v2710_v28 = vshll.u32 %v2489_v17, 16  ;;  %v3130_v52 = vrot.slane %v2489_v17, 5  ;;  %v9929_v20 = vld [vmem:[%s13882_s1 + $0x468] sm:$0xff]  }
  0xef   :  { %v11562_v31 = vadd.f32 %v8832_v41, %v8831_v26  ;;  %v2487_v61 = vld [vmem:[#allocation2 + $0x278] sm:$0x11]  ;;  %v3816_v58 = vrot.slane %v3815_v48, 4  ;;  %v3829_v39 = vor.u32 %v3828_v56, %v3825_v22  ;;  %v3837_v50 = vshrl.u32 %v11575_v4, 16 }
  0xf0   :  { %v11547_v32 = vpop.f32.mrf.mxu1  ;;  %v8761_v35 = vpop.f32.mrf.mxu0  ;;  %v2696_v33 = vshll.u32 %v2487_v61, 16  ;;  %v3126_v30 = vrot.slane %v2487_v61, 5  ;;  %v2712_v55 = vrot.slane %v2710_v28, 5  ;;  %v3131_v6 = vsel %vm10633_vm6, %v8015_v40, %v3130_v52  ;;  %v11619_v40 = vld [vmem:[#allocation2 + $0x198] sm:$0xff]  ;;  %v11624_v61 = vld [vmem:[#allocation2 + $0x160] sm:$0x11] }
  0xf1   :  { %2988 = vmatmul.mubr.bf16.gmra.mxu0 %v7980_v44  ;;  %v11595_v9 = vsel %vm10334_vm3, %v3816_v58, %v3820_v12  ;;  %v11605_v44 = vld [vmem:[#allocation2 + $0xc8] sm:$0xff]  ;;  %v3839_v18 = vrot.slane %v3837_v50, 4  ;;  %v3840_v25 = vshll.u32 %v11575_v4, 16  ;;  %v3860_v56 = vshll.u32 %v11607_v3, 16  ;;  %v11631_v58 = vld [vmem:[#allocation2 + $0x218] sm:$0x11] }
  0xf2   :  { %v11569_v10 = vpop.f32.mrf.mxu1  ;;  %v8762_v15 = vpop.f32.mrf.mxu0  ;;  %v2698_v13 = vrot.slane %v2696_v33, 5  ;;  %v3127_v27 = vsel %vm10633_vm6, %v8014_v21, %v3126_v30  ;;  %v2713_v21 = vsel %vm10334_vm3, %v2708_v8, %v2712_v55  ;;  %v3851_v48 = vshrl.u32 %v11605_v44, 16  ;;  %v62_v55 = vld [vmem:[#allocation2 + $0x158] sm:$0x11] }
  0xf3   :  { %v8763_v26 = vadd.f32 %v8762_v15, %v8761_v35  ;;  %v8063_v63 = vcombine.high %v3127_v27, %v3131_v6  ;;  %v8062_v19 = vcombine.low %v3127_v27, %v3131_v6  ;;  %v8836_v8 = vadd.f32 %v11569_v10, %v11547_v32 }
  0xf4   :  { %v8764_v62 = vpop.f32.mrf.mxu0  ;;  %v11581_v47 = vpop.f32.mrf.mxu1  ;;  %v2699_v24 = vsel %vm10334_vm3, %v2694_v53, %v2698_v13  ;;  %v3846_v53 = vshll.u32 %v11597_v38, 16  ;;  %v3842_v15 = vrot.slane %v3840_v25, 5  ;;  %v3854_v12 = vshll.u32 %v11605_v44, 16 }
  0xf5   :  { %v11584_v11 = vadd.f32 %v11514_v51, %v8763_v26  ;;  %v3830_v51 = vrot.slane %v3829_v39, 4  ;;  %v7983_v35 = vcombine.high %v2699_v24, %v2713_v21  ;;  %v7982_v42 = vcombine.low %v2699_v24, %v2713_v21  ;;  %3413 = vmatprep.mubr.bf16.mxu1 %v8063_v63  ;;  %v11629_v26 = vld [vmem:[#allocation2 + $0x18] sm:$0xff] }
  0xf6   :  { %v8765_v41 = vpop.f32.mrf.mxu0  ;;  %v11587_v14 = vpop.f32.mrf.mxu1  ;;  %3414 = vmatmul.mubr.bf16.gmra.mxu1 %v8062_v19  ;;  %v8115_v32 = vcombine.high %v11575_v4, %v11605_v44  ;;  %v3848_v10 = vrot.slane %v3846_v53, 5  ;;  %v3853_v33 = vrot.slane %v3851_v48, 4  ;;  %v3856_v28 = vrot.slane %v3854_v12, 5  ;;  %v170_v48 = vld [vmem:[%s13881_s0 + $0x70] sm:$0xff]  ;;  %v11661_v12 = vld [vmem:[#allocation2 + $0x140] sm:$0xff] }
  0xf7   :  { %v8766_v34 = vadd.f32 %v8765_v41, %v8764_v62  ;;  %v3835_v57 = vsel %vm10334_vm3, %v3830_v51, %v3834_v0  ;;  %2995 = vmatprep.mubr.bf16.mxu0 %v7983_v35  ;;  %v3843_v62 = vor.u32 %v3842_v15, %v3839_v18  ;;  %v3862_v30 = vrot.slane %v3860_v56, 5  ;;  %v9927_v18 = vld [vmem:[%s13882_s1 + $0x470] sm:$0xff]   ;;  %v127_v56 = vld [vmem:[#allocation2 + $0x248] sm:$0x11] }
  0xf8   :  { %v8767_v5 = vpop.f32.mrf.mxu0  ;;  %v11599_v23 = vpop.f32.mrf.mxu1  ;;  %v8177_v60 = vcombine.high %v11595_v9, %v3835_v57  ;;  %v3865_v50 = vshrl.u32 %v11619_v40, 16  ;;  %v3868_v13 = vshll.u32 %v11619_v40, 16  ;;  %v3874_v63 = vshll.u32 %v11624_v61, 16 }
  0xf9   :  { %v11614_v2 = vadd.f32 %v11516_v1, %v8766_v34  ;;  %2996 = vmatmul.mubr.bf16.gmra.mxu0 %v7982_v42  ;;  %v8176_v1 = vcombine.low %v11595_v9, %v3835_v57  ;;  %v3844_v6 = vrot.slane %v3843_v62, 4  ;;  %v3879_v19 = vshrl.u32 %v11629_v26, 16  ;;  %v9926_v9 = vld [vmem:[%s13882_s1 + $0x438] sm:$0xff]  }
  0xfa   :  { %v8768_v16 = vpop.f32.mrf.mxu0  ;;  %v8841_v22 = vpop.f32.mrf.mxu1  ;;  %4257 = vmatprep.mubr.bf16.mxu1 %v8177_v60  ;;  %3695 = vmatprep.mubr.bf16.mxu0 %v8113_v46  ;;  %v3857_v46 = vor.u32 %v3856_v28, %v3853_v33  ;;  %v3870_v24 = vrot.slane %v3868_v13, 5  ;;  %v3882_v21 = vshll.u32 %v11629_v26, 16  ;;  %v3876_v57 = vrot.slane %v3874_v63, 5  ;;  %v9935_v33 = vld [vmem:[%s13882_s1 + $0x4f8] sm:$0xff]  }
  0xfb   :  { %v8769_v17 = vadd.f32 %v8768_v16, %v8767_v5  ;;  %v3867_v5 = vrot.slane %v3865_v50, 4  ;;  %v11653_v35 = vsel %vm10334_vm3, %v3844_v6, %v3848_v10  ;;  %v3881_v25 = vrot.slane %v3879_v19, 4  ;;  %v9936_v50 = vld [vmem:[%s13882_s1 + $0x4b8] sm:$0xff]   ;;  %9321 = vmatprep.subr.bf16.mxu1 %v9935_v33  ;;  %v9932_v33 = vld [vmem:[%s13882_s1 + $0x420] sm:$0xff]  }
  0xfc   :  { %v8770_v0 = vpop.f32.mrf.mxu0  ;;  %v3858_v42 = vrot.slane %v3857_v46, 4  ;;  %v3884_v60 = vrot.slane %v3882_v21, 5  ;;  %v3888_v53 = vshll.u32 %v11631_v58, 16  ;;  %v8839_v15 = vadd.f32 %v11587_v14, %v11581_v47  ;;  %v11671_v14 = vld [vmem:[#allocation2 + $0x120] sm:$0x11] }
  0xfd   :  { %v11634_v39 = vadd.f32 %v11562_v31, %v8769_v17  ;;  %v3871_v16 = vor.u32 %v3870_v24, %v3867_v5  ;;  %v8842_v62 = vadd.f32 %v8841_v22, %v11599_v23  ;;  %v63_v47 = vsel %vm10255_vm8, 0, %v62_v55  ;;  %v9930_v24 = vld [vmem:[%s13882_s1 + $0x428] sm:$0xff]  }
  0xfe   :  { %v8771_v52 = vpop.f32.mrf.mxu0  ;;  %4258 = vmatmul.mubr.bf16.vlgmr.msra.gmra.mxu1 %v8176_v1  ;;  %v3863_v10 = vsel %vm10334_vm3, %v3858_v42, %v3862_v30  ;;  %v9928_v1 = vld [vmem:[%s13882_s1 + $0x430] sm:$0xff]   ;;  %64 = vst [vmem:[#allocation2 + $0x158] sm:$0x11] %v63_v47  ;;  %v3890_v43 = vrot.slane %v3888_v53, 5  ;;  %v236_v13 = vshrl.u32 %v170_v48, 16  ;;  %v239_v55 = vshll.u32 %v170_v48, 16 }
  0xff   :  { %v8772_v41 = vadd.f32 %v8771_v52, %v8770_v0  ;;  %v8179_v28 = vcombine.high %v11653_v35, %v3863_v10  ;;  %v8178_v30 = vcombine.low %v11653_v35, %v3863_v10  ;;  %v3872_v52 = vrot.slane %v3871_v16, 4  ;;  %v11706_v42 = vld [vmem:[#allocation2 + $0x130] sm:$0xff]  ;;  %9322 = vmatpush3.bf16.msra.mxu1 %v9936_v50  ;;  %v11735_v10 = vld [vmem:[#allocation2 + $0x88] sm:$0x11]  ;;  %v9933_v50 = vld [vmem:[%s13882_s1 + $0x458] sm:$0xff]  }
 0x100   :  { %v11638_v27 = vpop.f32.mrf.mxu1  ;;  %v3893_v19 = vshrl.u32 %v11661_v12, 16  ;;  %v8114_v5 = vcombine.low %v11575_v4, %v11605_v44  ;;  %v3896_v35 = vshll.u32 %v11661_v12, 16  ;;  %v3902_v4 = vshll.u32 %v11671_v14, 16  ;;  %v9940_v53 = vld [vmem:[%s13882_s1 + $0x4b0] sm:$0xff]  }
 0x101   :  { %v11645_v31 = vadd.f32 %v8836_v8, %v8772_v41  ;;  %3696 = vmatmul.mubr.bf16.vlgmr.msra.gmra.mxu0 %v8112_v45  ;;  %v3885_v41 = vor.u32 %v3884_v60, %v3881_v25  ;;  %4265 = vmatprep.mubr.bf16.mxu1 %v8179_v28  ;;  %v11691_v6 = vsel %vm10334_vm3, %v3872_v52, %v3876_v57  ;;  %v9937_v57 = vld [vmem:[%s13882_s1 + $0x4f0] sm:$0xff]  }
 0x102   :  { %v8844_v34 = vpop.f32.mrf.mxu1  ;;  %9258 = vmatpush3.bf16.msra.mxu0 %v9926_v9  ;;  %3703 = vmatprep.mubr.bf16.mxu0 %v8115_v32  ;;  %v128_v32 = vsel %vm10274_vm13, 0, %v127_v56  ;;  %v11696_v9 = vld [vmem:[#allocation2 + $0xb0] sm:$0xff]  ;;  %v3898_v14 = vrot.slane %v3896_v35, 5  ;;  %v8116_v52 = vcombine.low %v11619_v40, %v11629_v26 }
 0x103   :  { %v8773_v51 = vpop.f32.mrf.mxu0  ;;  %9259 = vmatprep.subr.bf16.mxu0 %v9927_v18  ;;  %v3886_v46 = vrot.slane %v3885_v41, 4  ;;  %v238_v18 = vrot.slane %v236_v13, 7  ;;  %129 = vst [vmem:[#allocation2 + $0x248] sm:$0x11] %v128_v32  ;;  %v8845_v44 = vadd.f32 %v8844_v34, %v11638_v27  ;;  %v9931_v34 = vld [vmem:[%s13882_s1 + $0x460] sm:$0xff]   ;;  %v3921_v28 = vshrl.u32 %v11696_v9, 16  ;;  %9323 = vmatprep.subr.bf16.mxu1 %v9937_v57 }
 0x104   :  { %v8846_v0 = vpop.f32.mrf.mxu1  ;;  %9324 = vmatpush3.bf16.msra.mxu1 %v9940_v53  ;;  %v9934_v53 = vld [vmem:[%s13882_s1 + $0x418] sm:$0xff]  }
 0x105   :  { %v8774_v8 = vpop.f32.mrf.mxu0  ;;  %v11713_v25 = vsel %vm10334_vm3, %v3886_v46, %v3890_v43  ;;  %v241_v56 = vor.u32 %v239_v55, %v238_v18  ;;  %v242_v47 = vrot.slane %v238_v18, 4  ;;  %v3935_v43 = vshrl.u32 %v11706_v42, 16  ;;  %v9943_v46 = vld [vmem:[%s13882_s1 + $0x4e8] sm:$0xff]  }
 0x106   :  { %v8775_v17 = vadd.f32 %v8774_v8, %v8773_v51  ;;  %v8847_v22 = vpop.f32.mrf.mxu1  ;;  %9260 = vmatpush3.bf16.msra.mxu0 %v9928_v1  ;;  %v8117_v8 = vcombine.high %v11619_v40, %v11629_v26  ;;  %4266 = vmatmul.mubr.bf16.gmra.mxu1 %v8178_v30  ;;  %v3924_v30 = vshll.u32 %v11696_v9, 16  ;;  %v8180_v40 = vcombine.low %v11691_v6, %v11713_v25  ;;  %v9944_v18 = vld [vmem:[%s13882_s1 + $0x4a8] sm:$0xff]  }
 0x107   :  { %v8776_v23 = vpop.f32.mrf.mxu0  ;;  %v11717_v16 = vadd.f32 %v8847_v22, %v8846_v0  ;;  %9261 = vmatprep.subr.bf16.mxu0 %v9929_v20  ;;  %v11733_v0 = vrot.slane %v3893_v19, 4  ;;  %v11756_v20 = vld [vmem:[#allocation2 + $0xe0] sm:$0x11]  ;;  %v3938_v55 = vshll.u32 %v11706_v42, 16  ;;  %9325 = vmatprep.subr.bf16.mxu1 %v9943_v46 }
 0x108   :  { %v11687_v45 = vadd.f32 %v8839_v15, %v8775_v17  ;;  %v11698_v51 = vpop.f32.mrf.mxu1  ;;  %v8181_v15 = vcombine.high %v11691_v6, %v11713_v25  ;;  %v3930_v6 = vshll.u32 %v11735_v10, 16  ;;  %9326 = vmatpush3.bf16.msra.mxu1 %v9944_v18 }
 0x109   :  { %v8777_v63 = vpop.f32.mrf.mxu0  ;;  %3704 = vmatmul.mubr.bf16.gmra.mxu0 %v8114_v5  ;;  %v3923_v5 = vrot.slane %v3921_v28, 4  ;;  %v3899_v57 = vor.u32 %v3898_v14, %v11733_v0  ;;  %v9941_v14 = vld [vmem:[%s13882_s1 + $0x450] sm:$0xff]  }
 0x10a   :  { %v8778_v21 = vadd.f32 %v8777_v63, %v8776_v23  ;;  %v11719_v60 = vpop.f32.mrf.mxu1  ;;  %4273 = vmatprep.mubr.bf16.mxu1 %v8181_v15  ;;  %v11751_v23 = vrot.slane %v3902_v4, 5  ;;  %3711 = vmatprep.mubr.bf16.mxu0 %v8117_v8  ;;  %v390_v63 = vld [vmem:[#allocation2 + $0x248] sm:$0x11]  ;;  %v11778_v8 = vld [vmem:[#allocation2 + $0xa0] sm:$0xff] }
 0x10b   :  { %9262 = vmatpush3.bf16.msra.mxu0 %v9930_v24  ;;  %v3926_v24 = vrot.slane %v3924_v30, 5  ;;  %v391_v35 = vsel %vm10255_vm8, %v242_v47, %v390_v63  ;;  %v9945_v15 = vld [vmem:[%s13882_s1 + $0x4e0] sm:$0xff]   ;;  %v3937_v47 = vrot.slane %v3935_v43, 4  ;;  %v8851_v43 = vadd.f32 %v11719_v60, %v11698_v51 }
 0x10c   :  { %v11728_v48 = vadd.f32 %v8842_v62, %v8778_v21  ;;  %v11737_v1 = vpop.f32.mrf.mxu1  ;;  %v387_v62 = vld [vmem:[#allocation2 + $0x158] sm:$0xff]  ;;  %9263 = vmatprep.subr.bf16.mxu0 %v9931_v34  ;;  %392 = vst [vmem:[#allocation2 + $0x248] sm:$0x11] %v391_v35  ;;  %9327 = vmatprep.subr.bf16.mxu1 %v9945_v15  ;;  %v3949_v51 = vshrl.u32 %v11778_v8, 16  ;;  %v3952_v60 = vshll.u32 %v11778_v8, 16 }
 0x10d   :  { %v8779_v27 = vpop.f32.mrf.mxu0  ;;  %v11749_v41 = vsel %vm10293_vm0, %v241_v56, %v387_v62  ;;  %v3927_v0 = vor.u32 %v3926_v24, %v3923_v5  ;;  %v11787_v62 = vld [vmem:[#allocation2 + $0x1d0] sm:$0xff]  ;;  %v3900_v5 = vrot.slane %v3899_v57, 4 }
 0x10e   :  { %389 = vst [vmem:[#allocation2 + $0x158] sm:$0xff] %v11749_v41  ;;  %v3907_v26 = vshrl.u32 %v11749_v41, 16  ;;  %v3910_v13 = vshll.u32 %v11749_v41, 16  ;;  %v8853_v21 = vpop.f32.mrf.mxu1  ;;  %v8119_v56 = vcombine.high %v11661_v12, %v11749_v41  ;;  %4274 = vmatmul.mubr.bf16.gmra.mxu1 %v8180_v40  ;;  %v9948_v40 = vld [vmem:[%s13882_s1 + $0x4a0] sm:$0xff]   ;;  %v9942_v57 = vld [vmem:[%s13882_s1 + $0x410] sm:$0xff]   ;;  %v3954_v15 = vrot.slane %v3952_v60, 5 }
 0x10f   :  { %v8780_v22 = vpop.f32.mrf.mxu0  ;;  %9264 = vmatpush3.bf16.msra.mxu0 %v9932_v33  ;;  %v8854_v46 = vadd.f32 %v8853_v21, %v11737_v1  ;;  %v3928_v24 = vrot.slane %v3927_v0, 4  ;;  %v11817_v0 = vld [vmem:[#allocation2 + $0x220] sm:$0xff]  ;;  %9328 = vmatpush3.bf16.msra.mxu1 %v9948_v40 }
 0x110   :  { %v8781_v32 = vadd.f32 %v8780_v22, %v8779_v27  ;;  %v3909_v25 = vrot.slane %v3907_v26, 4  ;;  %v3912_v4 = vrot.slane %v3910_v13, 5  ;;  %v3940_v22 = vrot.slane %v3938_v55, 5  ;;  %v11793_v13 = vld [vmem:[#allocation2 + $0x58] sm:$0x11]  ;;  %9265 = vmatprep.subr.bf16.mxu0 %v9933_v50 }
 0x111   :  { %v8782_v19 = vpop.f32.mrf.mxu0  ;;  %v3944_v26 = vshll.u32 %v11756_v20, 16  ;;  %v3932_v55 = vrot.slane %v3930_v6, 5  ;;  %3712 = vmatmul.mubr.bf16.gmra.mxu0 %v8116_v52  ;;  %v3963_v6 = vshrl.u32 %v11787_v62, 16  ;;  %v9949_v52 = vld [vmem:[%s13882_s1 + $0x448] sm:$0xff]  }
 0x112   :  { %v11785_v27 = vadd.f32 %v8845_v44, %v8781_v32  ;;  %v3913_v28 = vor.u32 %v3912_v4, %v3909_v25  ;;  %v11798_v32 = vld [vmem:[#allocation2 + $0x180] sm:$0x11]  ;;  %3719 = vmatprep.mubr.bf16.mxu0 %v8119_v56  ;;  %v3951_v4 = vrot.slane %v3949_v51, 4  ;;  %v3958_v56 = vshll.u32 %v11793_v13, 16 }
 0x113   :  { %v8783_v34 = vpop.f32.mrf.mxu0  ;;  %v3946_v35 = vrot.slane %v3944_v26, 5  ;;  %9266 = vmatpush3.bf16.msra.mxu0 %v9934_v53  ;;  %v8118_v26 = vcombine.low %v11661_v12, %v11749_v41  ;;  %v11842_v41 = vld [vmem:[#allocation2 + $0x190] sm:$0xff] }
 0x114   :  { %v8784_v30 = vadd.f32 %v8783_v34, %v8782_v19  ;;  %v3941_v19 = vor.u32 %v3940_v22, %v3937_v47  ;;  %v3914_v50 = vrot.slane %v3913_v28, 4  ;;  %9267 = vmatprep.subr.bf16.mxu0 %v9941_v14  ;;  %v3966_v34 = vshll.u32 %v11787_v62, 16  ;;  %v11819_v47 = vld [vmem:[#allocation2 + $0x248] sm:$0x11] }
 0x115   :  { %v8785_v44 = vpop.f32.mrf.mxu0  ;;  %v8855_v63 = vpop.f32.mrf.mxu1  ;;  %v8121_v28 = vcombine.high %v11696_v9, %v11706_v42  ;;  %v3965_v22 = vrot.slane %v3963_v6, 4  ;;  %v3972_v14 = vshll.u32 %v11798_v32, 16 }
 0x116   :  { %v11801_v33 = vadd.f32 %v11717_v16, %v8784_v30  ;;  %v3942_v21 = vrot.slane %v3941_v19, 4  ;;  %v11831_v19 = vsel %vm10334_vm3, %v3928_v24, %v3932_v55  ;;  %v3968_v6 = vrot.slane %v3966_v34, 5  ;;  %v9950_v55 = vld [vmem:[%s13882_s1 + $0x408] sm:$0xff]  }
 0x117   :  { %v8786_v18 = vpop.f32.mrf.mxu0  ;;  %v8856_v1 = vpop.f32.mrf.mxu1  ;;  %9268 = vmatpush3.bf16.msra.mxu0 %v9942_v57  ;;  %v3905_v24 = vsel %vm10334_vm3, %v3900_v5, %v11751_v23  ;;  %v3974_v23 = vrot.slane %v3972_v14, 5  ;;  %v11862_v5 = vld [vmem:[#allocation2 + $0x230] sm:$0x11] }
 0x118   :  { %v8787_v16 = vadd.f32 %v8786_v18, %v8785_v44  ;;  %v3916_v44 = vshll.u32 %v11819_v47, 16  ;;  %v3955_v18 = vor.u32 %v3954_v15, %v3951_v4  ;;  %v11838_v60 = vsel %vm10334_vm3, %v3942_v21, %v3946_v35  ;;  %9269 = vmatprep.subr.bf16.mxu0 %v9949_v52  ;;  %v11852_v21 = vld [vmem:[#allocation2 + $0x210] sm:$0x11]  ;;  %v92_v52 = vld [vmem:[#allocation2 + $0x188] sm:$0x11] }
 0x119   :  { %v8788_v25 = vpop.f32.mrf.mxu0  ;;  %v8858_v53 = vpop.f32.mrf.mxu1  ;;  %v11840_v12 = vadd.f32 %v8856_v1, %v8855_v63  ;;  %v3960_v15 = vrot.slane %v3958_v56, 5  ;;  %v9952_v63 = vld [vmem:[%s13882_s1 + $0x498] sm:$0xff]   ;;  %v9953_v1 = vld [vmem:[%s13882_s1 + $0x4d0] sm:$0xff]   ;;  %v3969_v57 = vor.u32 %v3968_v6, %v3965_v22  ;;  %3720 = vmatmul.mubr.bf16.gmra.mxu0 %v8118_v26  ;;  %v8185_v34 = vcombine.high %v11831_v19, %v11838_v60 }
 0x11a   :  { %v11823_v30 = vadd.f32 %v8851_v43, %v8787_v16  ;;  %v9951_v43 = vld [vmem:[%s13882_s1 + $0x4d8] sm:$0xff]   ;;  %v3918_v4 = vrot.slane %v3916_v44, 5  ;;  %v3980_v44 = vshll.u32 %v11817_v0, 16  ;;  %v9954_v22 = vld [vmem:[%s13882_s1 + $0x490] sm:$0xff]   ;;  %3727 = vmatprep.mubr.bf16.mxu0 %v8121_v28  ;;  %v3994_v6 = vshll.u32 %v11842_v41, 16 }
 0x11b   :  { %v8789_v40 = vpop.f32.mrf.mxu0  ;;  %v8859_v51 = vpop.f32.mrf.mxu1  ;;  %9329 = vmatprep.subr.bf16.mxu1 %v9951_v43  ;;  %9270 = vmatpush3.bf16.msra.mxu0 %v9950_v55  ;;  %v3986_v28 = vshll.u32 %v11852_v21, 16  ;;  %v93_v55 = vsel %vm10255_vm8, 0, %v92_v52  ;;  %v9956_v52 = vld [vmem:[%s13882_s1 + $0x400] sm:$0xff]  }
 0x11c   :  { %13915 = vst [vmem:[#allocation6_spill] sm:$0xff] %v11823_v30  ;;  %v8790_v16 = vadd.f32 %v8789_v40, %v8788_v25  ;;  %v11850_v17 = vadd.f32 %v8859_v51, %v8858_v53  ;;  %v3977_v25 = vshrl.u32 %v11817_v0, 16  ;;  %v3919_v56 = vsel %vm10334_vm3, %v3914_v50, %v3918_v4  ;;  %9330 = vmatpush3.bf16.msra.mxu1 %v9952_v63 }
 0x11d   :  { %v3956_v53 = vrot.slane %v3955_v18, 4  ;;  %v8183_v14 = vcombine.high %v3905_v24, %v3919_v56  ;;  %v8182_v26 = vcombine.low %v3905_v24, %v3919_v56  ;;  %v3970_v40 = vrot.slane %v3969_v57, 4  ;;  %9331 = vmatprep.subr.bf16.mxu1 %v9953_v1  ;;  %94 = vst [vmem:[#allocation2 + $0x188] sm:$0x11] %v93_v55  ;;  %v11907_v55 = vld [vmem:[#allocation2 + $0x208] sm:$0xff] }
 0x11e   :  { %v11860_v35 = vadd.f32 %v8854_v46, %v8790_v16  ;;  %v178_v46 = vld [vmem:[%s13881_s0 + $0xf0] sm:$0xff]  ;;  %v3979_v50 = vrot.slane %v3977_v25, 4  ;;  %v8120_v18 = vcombine.low %v11696_v9, %v11706_v42  ;;  %v3982_v43 = vrot.slane %v3980_v44, 5  ;;  %v9955_v9 = vld [vmem:[%s13882_s1 + $0x440] sm:$0xff]   ;;  %v157_v42 = vld [vmem:[#allocation2 + $0x1a8] sm:$0x11] }
 0x11f   :  { %v3991_v16 = vshrl.u32 %v11842_v41, 16  ;;  %4281 = vmatprep.mubr.bf16.mxu1 %v8183_v14  ;;  %v8123_v4 = vcombine.high %v11778_v8, %v11787_v62  ;;  %v8861_v63 = vpop.f32.mrf.mxu1  ;;  %v300_v24 = vshrl.u32 %v178_v46, 16  ;;  %v11890_v1 = vsel %vm10334_vm3, %v3956_v53, %v3960_v15  ;;  %v9957_v53 = vld [vmem:[%s13882_s1 + $0x4c8] sm:$0xff]   ;;  %9271 = vmatprep.subr.bf16.mxu0 %v9955_v9 }
 0x120   :  { %13916 = vst [vmem:[#allocation7_spill] sm:$0xff] %v11860_v35  ;;  %4282 = vmatmul.mubr.bf16.gmra.mxu1 %v8182_v26  ;;  %v3983_v25 = vor.u32 %v3982_v43, %v3979_v50  ;;  %v4000_v44 = vshll.u32 %v11862_v5, 16  ;;  %v11898_v14 = vsel %vm10334_vm3, %v3970_v40, %v3974_v23  ;;  %v3996_v35 = vrot.slane %v3994_v6, 5  ;;  %9272 = vmatpush3.bf16.msra.mxu0 %v9956_v52 }
 0x121   :  { %v3993_v56 = vrot.slane %v3991_v16, 4  ;;  %4289 = vmatprep.mubr.bf16.mxu1 %v8185_v34  ;;  %v8862_v30 = vpop.f32.mrf.mxu1  ;;  %v11900_v15 = vrot.slane %v300_v24, 7  ;;  %9332 = vmatpush3.bf16.msra.mxu1 %v9954_v22  ;;  %v303_v16 = vshll.u32 %v178_v46, 16  ;;  %v158_v23 = vsel %vm10274_vm13, 0, %v157_v42  ;;  %v9958_v34 = vld [vmem:[%s13882_s1 + $0x488] sm:$0xff]  }
 0x122   :  { %v8791_v51 = vpop.f32.mrf.mxu0  ;;  %v11905_v43 = vadd.f32 %v8862_v30, %v8861_v63  ;;  %v8184_v22 = vcombine.low %v11831_v19, %v11838_v60  ;;  %159 = vst [vmem:[#allocation2 + $0x1a8] sm:$0x11] %v158_v23  ;;  %9333 = vmatprep.subr.bf16.mxu1 %v9957_v53  ;;  %3728 = vmatmul.mubr.bf16.gmra.mxu0 %v8120_v18  ;;  %v3984_v24 = vrot.slane %v3983_v25, 4  ;;  %v4002_v9 = vrot.slane %v4000_v44, 5  ;;  %v9959_v18 = vld [vmem:[%s13882_s1 + $0x4c0] sm:$0xff]  }
 0x123   :  { %v3997_v30 = vor.u32 %v3996_v35, %v3993_v56  ;;  %v8864_v6 = vpop.f32.mrf.mxu1  ;;  %v8187_v46 = vcombine.high %v11890_v1, %v11898_v14  ;;  %v305_v42 = vor.u32 %v303_v16, %v11900_v15  ;;  %3735 = vmatprep.mubr.bf16.mxu0 %v8123_v4  ;;  %v4005_v35 = vshrl.u32 %v11907_v55, 16  ;;  %v4338_v25 = vld [vmem:[#allocation2 + $0x48] sm:$0xee] }
 0x124   :  { %v8792_v57 = vpop.f32.mrf.mxu0  ;;  %v4339_v44 = vld [vmem:[#allocation2 + $0x148] sm:$0xee]  ;;  %v4392_v4 = vrot.slane %v11566_v7, 5  ;;  %v8122_v16 = vcombine.low %v11778_v8, %v11787_v62  ;;  %v8125_v23 = vcombine.high %v11817_v0, %v11842_v41  ;;  %v9961_v62 = vld [vmem:[%s13882_s1 + $0x578] sm:$0xff]  }
 0x125   :  { %v8793_v26 = vadd.f32 %v8792_v57, %v8791_v51  ;;  %v3988_v51 = vrot.slane %v3986_v28, 5  ;;  %v8865_v60 = vpop.f32.mrf.mxu1  ;;  %v4008_v28 = vshll.u32 %v11907_v55, 16  ;;  %9334 = vmatpush3.bf16.msra.mxu1 %v9958_v34  ;;  %v3998_v57 = vrot.slane %v3997_v30, 4  ;;  %v11950_v34 = vld [vmem:[#allocation2 + $0x1a0] sm:$0x11]  ;;  %9385 = vmatprep.subr.bf16.mxu0 %v9961_v62 }
 0x126   :  { %v8794_v50 = vpop.f32.mrf.mxu0  ;;  %v11928_v56 = vadd.f32 %v8865_v60, %v8864_v6  ;;  %9335 = vmatprep.subr.bf16.mxu1 %v9959_v18  ;;  %v8209_v53 = vrot.slane %v4339_v44, 9  ;;  %v4341_v44 = vld [vmem:[#allocation2 + $0xc8] sm:$0xee] }
 0x127   :  { %v11917_v40 = vadd.f32 %v11840_v12, %v8793_v26  ;;  %v306_v12 = vrot.slane %v11900_v15, 4  ;;  %v435_v26 = vld [vmem:[#allocation2 + $0x188] sm:$0xff]  ;;  %v8208_v15 = vrot.slane %v4338_v25, 9  ;;  %v11959_v6 = vsel %vm10334_vm3, %v3998_v57, %v4002_v9 }
 0x128   :  { %v8795_v63 = vpop.f32.mrf.mxu0  ;;  %4290 = vmatmul.mubr.bf16.gmra.mxu1 %v8184_v22  ;;  %v11943_v7 = vsel %vm10293_vm0, %v305_v42, %v435_v26  ;;  %v4007_v22 = vrot.slane %v4005_v35, 4  ;;  %v11969_v42 = vsel %vm10633_vm6, %v8209_v53, %v4392_v4  ;;  %v8211_v53 = vrot.slane %v4341_v44, 9 }
 0x129   :  { %v8796_v19 = vadd.f32 %v8795_v63, %v8794_v50  ;;  %v9960_v50 = vld [vmem:[%s13882_s1 + $0x480] sm:$0xff]   ;;  %4297 = vmatprep.mubr.bf16.mxu1 %v8187_v46  ;;  %437 = vst [vmem:[#allocation2 + $0x188] sm:$0xff] %v11943_v7  ;;  %v4019_v30 = vshrl.u32 %v11943_v7, 16  ;;  %v4022_v8 = vshll.u32 %v11943_v7, 16  ;;  %v4010_v46 = vrot.slane %v4008_v28, 5 }
 0x12a   :  { %9336 = vmatpush3.bf16.msra.mxu1 %v9960_v50  ;;  %v13917_v63 = vrot.slane %v11564_v36, 5  ;;  %v4340_v28 = vld [vmem:[#allocation2 + $0x1e8] sm:$0xee]  ;;  %3736 = vmatmul.mubr.bf16.gmra.mxu0 %v8122_v16  ;;  %v8186_v36 = vcombine.low %v11890_v1, %v11898_v14  ;;  %v4400_v50 = vrot.slane %v11607_v3, 5  ;;  %v4014_v1 = vshll.u32 %v11950_v34, 16 }
 0x12b   :  { %v11932_v52 = vadd.f32 %v11850_v17, %v8796_v19  ;;  %v11947_v17 = vsel %vm10334_vm3, %v3984_v24, %v3988_v51  ;;  %v438_v51 = vld [vmem:[#allocation2 + $0x1a8] sm:$0x11]  ;;  %v4021_v35 = vrot.slane %v4019_v30, 4  ;;  %v4024_v18 = vrot.slane %v4022_v8, 5  ;;  %v8867_v57 = vpop.f32.mrf.mxu1  ;;  %3743 = vmatprep.mubr.bf16.mxu0 %v8125_v23 }
 0x12c   :  { %v11965_v24 = vsel %vm10633_vm6, %v8208_v15, %v13917_v63  ;;  %v8797_v19 = vpop.f32.mrf.mxu0  ;;  %v439_v60 = vsel %vm10255_vm8, %v306_v12, %v438_v51  ;;  %v8210_v4 = vrot.slane %v4340_v28, 9  ;;  %v8189_v12 = vcombine.high %v11947_v17, %v11959_v6 }
 0x12d   :  { %v8256_v9 = vcombine.low %v11965_v24, %v11969_v42  ;;  %440 = vst [vmem:[#allocation2 + $0x1a8] sm:$0x11] %v439_v60  ;;  %v8257_v25 = vcombine.high %v11965_v24, %v11969_v42  ;;  %v4396_v15 = vrot.slane %v11597_v38, 5  ;;  %v4011_v30 = vor.u32 %v4010_v46, %v4007_v22  ;;  %v8868_v8 = vpop.f32.mrf.mxu1  ;;  %v4342_v38 = vld [vmem:[#allocation2 + $0x198] sm:$0xee] }
 0x12e   :  { %v8798_v26 = vpop.f32.mrf.mxu0  ;;  %v4025_v14 = vor.u32 %v4024_v18, %v4021_v35  ;;  %v8869_v51 = vadd.f32 %v8868_v8, %v8867_v57  ;;  %v11990_v63 = vsel %vm10633_vm6, %v8211_v53, %v4400_v50  ;;  %v4343_v60 = vld [vmem:[#allocation2 + $0x18] sm:$0xee]  ;;  %v4404_v3 = vrot.slane %v11624_v61, 5  ;;  %v4344_v42 = vld [vmem:[#allocation2 + $0x140] sm:$0xee] }
 0x12f   :  { %v8799_v16 = vadd.f32 %v8798_v26, %v8797_v19  ;;  %v11986_v23 = vsel %vm10633_vm6, %v8210_v4, %v4396_v15  ;;  %v8124_v22 = vcombine.low %v11817_v0, %v11842_v41  ;;  %v8870_v19 = vpop.f32.mrf.mxu1  ;;  %v8127_v57 = vcombine.high %v11907_v55, %v11943_v7 }
 0x130   :  { %v8800_v62 = vpop.f32.mrf.mxu0  ;;  %4298 = vmatmul.mubr.bf16.gmra.mxu1 %v8186_v36  ;;  %v8259_v18 = vcombine.high %v11986_v23, %v11990_v63  ;;  %v8212_v61 = vrot.slane %v4342_v38, 9  ;;  %v8213_v36 = vrot.slane %v4343_v60, 9  ;;  %v4408_v44 = vrot.slane %v11631_v58, 5 }
 0x131   :  { %v11996_v46 = vadd.f32 %v11905_v43, %v8799_v16  ;;  %4305 = vmatprep.mubr.bf16.mxu1 %v8189_v12  ;;  %v8188_v0 = vcombine.low %v11947_v17, %v11959_v6  ;;  %v4012_v43 = vrot.slane %v4011_v30, 4  ;;  %v4016_v4 = vrot.slane %v4014_v1, 5  ;;  %v8871_v26 = vpop.f32.mrf.mxu1  ;;  %v7687_v1 = vld [vmem:[%s13881_s0 + $0x78] sm:$0xff]  ;;  %v9973_v6 = vld [vmem:[%s13882_s1 + $0x560] sm:$0xff]   ;;  %v12112_v30 = vld [vmem:[#allocation2 + $0x130] sm:$0xee] }
 0x132   :  { %v8801_v28 = vpop.f32.mrf.mxu0  ;;  %v4026_v53 = vrot.slane %v4025_v14, 4  ;;  %v8872_v50 = vadd.f32 %v8871_v26, %v8870_v19  ;;  %v12011_v12 = vsel %vm10633_vm6, %v8212_v61, %v4404_v3  ;;  %v12015_v16 = vsel %vm10633_vm6, %v8213_v36, %v4408_v44  ;;  %3744 = vmatmul.mubr.bf16.gmra.mxu0 %v8124_v22  ;;  %v475_v14 = vld [vmem:[#allocation2 + $0xb8] sm:$0x11]  ;;  %v12038_v44 = vld [vmem:[#allocation2 + $0x80] sm:$0xff] }
 0x133   :  { %v8802_v41 = vadd.f32 %v8801_v28, %v8800_v62  ;;  %3751 = vmatprep.mubr.bf16.mxu0 %v8127_v57  ;;  %v645_v8 = vshrl.u32 %v7687_v1, 16  ;;  %v4017_v62 = vsel %vm10334_vm3, %v4012_v43, %v4016_v4  ;;  %v476_v38 = vsel %vm10255_vm8, 0, %v475_v14 }
 0x134   :  { %v12007_v15 = vld [vmem:[#allocation2 + $0x1a8] sm:$0x11]  ;;  %477 = vst [vmem:[#allocation2 + $0xb8] sm:$0x11] %v476_v38  ;;  %v648_v3 = vshll.u32 %v7687_v1, 16  ;;  %v8126_v22 = vcombine.low %v11907_v55, %v11943_v7 }
 0x135   :  { %v12018_v58 = vadd.f32 %v11928_v56, %v8802_v41  ;;  %v4028_v17 = vshll.u32 %v12007_v15, 16  ;;  %v12032_v60 = vrot.slane %v645_v8, 7  ;;  %v12040_v41 = vld [vmem:[#allocation2 + $0x250] sm:$0xff] }
 0x136   :  { %v8953_v57 = vpop.f32.mrf.mxu1  ;;  %v8321_v14 = vcombine.high %v12038_v44, %v12040_v41 }
 0x137   :  { %13918 = vst [vmem:[#allocation8_spill] sm:$0xff] %v12018_v58  ;;  %v4030_v56 = vrot.slane %v4028_v17, 5  ;;  %v12293_v58 = vld [vmem:[#allocation2 + $0x268] sm:$0xff] }
 0x138   :  { %4306 = vmatmul.mubr.bf16.gmra.mxu1 %v8188_v0  ;;  %v8954_v43 = vpop.f32.mrf.mxu1  ;;  %v650_v0 = vor.u32 %v648_v3, %v12032_v60 }
 0x139   :  { %v8803_v19 = vpop.f32.mrf.mxu0  ;;  %v4031_v28 = vsel %vm10334_vm3, %v4026_v53, %v4030_v56  ;;  %v8955_v26 = vadd.f32 %v8954_v43, %v8953_v57  ;;  %v9979_v53 = vld [vmem:[%s13882_s1 + $0x5f8] sm:$0xff]   ;;  %v9965_v57 = vld [vmem:[%s13882_s1 + $0x570] sm:$0xff]   ;;  %v12068_v43 = vld [vmem:[#allocation2 + $0x260] sm:$0xff] }
 0x13a   :  { %v8191_v61 = vcombine.high %v4017_v62, %v4031_v28  ;;  %3752 = vmatmul.mubr.bf16.gmra.mxu0 %v8126_v22  ;;  %v8190_v17 = vcombine.low %v4017_v62, %v4031_v28  ;;  %v8956_v7 = vpop.f32.mrf.mxu1  ;;  %9449 = vmatprep.subr.bf16.mxu1 %v9979_v53 }
 0x13b   :  { %v8804_v36 = vpop.f32.mrf.mxu0  ;;  %4675 = vmatprep.mubr.bf16.mxu0 %v8257_v25  ;;  %v791_v38 = vld [vmem:[#allocation2 + $0xb8] sm:$0xff] }
 0x13c   :  { %4313 = vmatprep.mubr.bf16.mxu1 %v8191_v61  ;;  %v8805_v4 = vadd.f32 %v8804_v36, %v8803_v19  ;;  %v8957_v56 = vpop.f32.mrf.mxu1  ;;  %v12055_v22 = vsel %vm10293_vm0, %v650_v0, %v791_v38  ;;  %v9964_v19 = vld [vmem:[%s13882_s1 + $0x538] sm:$0xff]   ;;  %v12066_v61 = vld [vmem:[#allocation2 + $0xf0] sm:$0xff] }
 0x13d   :  { %v8806_v55 = vpop.f32.mrf.mxu0  ;;  %v8958_v3 = vadd.f32 %v8957_v56, %v8956_v7  ;;  %13920 = vst [vmem:[#allocation10_spill] sm:$0xff] %v12055_v22  ;;  %793 = vst [vmem:[#allocation2 + $0xb8] sm:$0xff] %v12055_v22  ;;  %v8323_v24 = vcombine.high %v12066_v61, %v12068_v43  ;;  %v4345_v38 = vld [vmem:[#allocation2 + $0x158] sm:$0xee] }
 0x13e   :  { %v12046_v1 = vadd.f32 %v8869_v51, %v8805_v4  ;;  %v8959_v25 = vpop.f32.mrf.mxu1 }
 0x13f   :  { %v8807_v8 = vpop.f32.mrf.mxu0 }
 0x140   :  { %13919 = vst [vmem:[#allocation9_spill] sm:$0xff] %v12046_v1  ;;  %v8808_v62 = vadd.f32 %v8807_v8, %v8806_v55  ;;  %4314 = vmatmul.mubr.bf16.gmra.mxu1 %v8190_v17  ;;  %v8960_v4 = vpop.f32.mrf.mxu1  ;;  %v9968_v17 = vld [vmem:[%s13882_s1 + $0x530] sm:$0xff]  }
 0x141   :  { %v8889_v51 = vpop.f32.mrf.mxu0  ;;  %5013 = vmatprep.mubr.bf16.mxu1 %v8321_v14  ;;  %v12073_v55 = vadd.f32 %v8960_v4, %v8959_v25  ;;  %v9969_v14 = vld [vmem:[%s13882_s1 + $0x568] sm:$0xff]   ;;  %v12096_v25 = vld [vmem:[#allocation2 + $0x40] sm:$0xff] }
 0x142   :  { %v12061_v28 = vadd.f32 %v8872_v50, %v8808_v62  ;;  %4676 = vmatmul.mubr.bf16.vlgmr.msra.gmra.mxu0 %v8256_v9  ;;  %v8320_v50 = vcombine.low %v12038_v44, %v12040_v41  ;;  %v8962_v53 = vpop.f32.mrf.mxu1  ;;  %v9980_v62 = vld [vmem:[%s13882_s1 + $0x5b8] sm:$0xff]  }
 0x143   :  { %v8890_v36 = vpop.f32.mrf.mxu0  ;;  %9386 = vmatpush3.bf16.msra.mxu0 %v9964_v19  ;;  %4683 = vmatprep.mubr.bf16.mxu0 %v8259_v18  ;;  %v12098_v18 = vld [vmem:[#allocation2 + $0x228] sm:$0xff] }
 0x144   :  { %13921 = vst [vmem:[#allocation11_spill] sm:$0xff] %v12061_v28  ;;  %v8891_v0 = vadd.f32 %v8890_v36, %v8889_v51  ;;  %9387 = vmatprep.subr.bf16.mxu0 %v9965_v57  ;;  %v8963_v56 = vpop.f32.mrf.mxu1  ;;  %v9972_v36 = vld [vmem:[%s13882_s1 + $0x528] sm:$0xff]   ;;  %v9981_v57 = vld [vmem:[%s13882_s1 + $0x5f0] sm:$0xff]  }
 0x145   :  { %v8892_v7 = vpop.f32.mrf.mxu0 }
 0x146   :  { %v2104_v8 = vadd.f32 %v8891_v0, %v11584_v11  ;;  %v12094_v11 = vadd.f32 %v8963_v56, %v8962_v53  ;;  %v8965_v0 = vpop.f32.mrf.mxu1  ;;  %v10100_v53 = vld [vmem:[#allocation2 + $0x120] sm:$0x11]  ;;  %v8215_v56 = vrot.slane %v4345_v38, 9 }
 0x147   :  { %v8893_v9 = vpop.f32.mrf.mxu0  ;;  %9388 = vmatpush3.bf16.msra.mxu0 %v9968_v17 }
 0x148   :  { %v12092_v51 = vadd.f32 %v8955_v26, %v2104_v8  ;;  %v8894_v19 = vadd.f32 %v8893_v9, %v8892_v7  ;;  %5014 = vmatmul.mubr.bf16.vlgmr.msra.gmra.mxu1 %v8320_v50  ;;  %v8214_v26 = vrot.slane %v4344_v42, 9  ;;  %v12106_v8 = vld [vmem:[#allocation2 + $0xb0] sm:$0xee]  ;;  %v4412_v9 = vrot.slane %v10100_v53, 5  ;;  %9389 = vmatprep.subr.bf16.mxu0 %v9969_v14  ;;  %v8966_v50 = vpop.f32.mrf.mxu1 }
 0x149   :  { %v8895_v4 = vpop.f32.mrf.mxu0  ;;  %5021 = vmatprep.mubr.bf16.mxu1 %v8323_v24  ;;  %v4416_v42 = vrot.slane %v11819_v47, 5  ;;  %9450 = vmatpush3.bf16.msra.mxu1 %v9980_v62  ;;  %v12120_v38 = vadd.f32 %v8966_v50, %v8965_v0  ;;  %v9987_v47 = vld [vmem:[%s13882_s1 + $0x5e8] sm:$0xff]   ;;  %v13924_v14 = vcombine.low %v11986_v23, %v11990_v63  ;;  %v8325_v62 = vcombine.high %v12096_v25, %v12098_v18 }
 0x14a   :  { %13922 = vst [vmem:[#allocation12_spill] sm:$0xff] %v12092_v51  ;;  %v2105_v7 = vadd.f32 %v8894_v19, %v11614_v2  ;;  %v9982_v2 = vld [vmem:[%s13882_s1 + $0x5b0] sm:$0xff]   ;;  %v9974_v19 = vld [vmem:[%s13882_s1 + $0x520] sm:$0xff]   ;;  %9451 = vmatprep.subr.bf16.mxu1 %v9981_v57  ;;  %v4420_v0 = vrot.slane %v11735_v10, 5  ;;  %v9975_v57 = vld [vmem:[%s13882_s1 + $0x558] sm:$0xff]   ;;  %v13925_v23 = vcombine.high %v12011_v12, %v12015_v16  ;;  %v12146_v63 = vsel %vm10633_vm6, %v8214_v26, %v4412_v9 }
 0x14b   :  { %v8896_v35 = vpop.f32.mrf.mxu0  ;;  %4684 = vmatmul.mubr.bf16.gmra.mxu0 %v13924_v14  ;;  %v12152_v53 = vsel %vm10633_vm6, %v8215_v56, %v4416_v42  ;;  %v12168_v56 = vld [vmem:[#allocation2 + $0xa0] sm:$0xee] }
 0x14c   :  { %v12118_v17 = vadd.f32 %v8958_v3, %v2105_v7  ;;  %v8897_v24 = vadd.f32 %v8896_v35, %v8895_v4  ;;  %v8322_v35 = vcombine.low %v12066_v61, %v12068_v43  ;;  %v8968_v4 = vpop.f32.mrf.mxu1  ;;  %4691 = vmatprep.mubr.bf16.mxu0 %v13925_v23  ;;  %9390 = vmatpush3.bf16.msra.mxu0 %v9972_v36  ;;  %v9988_v36 = vld [vmem:[%s13882_s1 + $0x5a8] sm:$0xff]   ;;  %v9989_v42 = vld [vmem:[%s13882_s1 + $0x5e0] sm:$0xff]  }
 0x14d   :  { %v8898_v3 = vpop.f32.mrf.mxu0  ;;  %9391 = vmatprep.subr.bf16.mxu0 %v9973_v6  ;;  %9452 = vmatpush3.bf16.msra.mxu1 %v9982_v2  ;;  %v9978_v6 = vld [vmem:[%s13882_s1 + $0x518] sm:$0xff]  }
 0x14e   :  { %13923 = vst [vmem:[#allocation13_spill] sm:$0xff] %v12118_v17  ;;  %v2106_v7 = vadd.f32 %v8897_v24, %v11634_v39  ;;  %v8969_v17 = vpop.f32.mrf.mxu1  ;;  %9453 = vmatprep.subr.bf16.mxu1 %v9987_v47  ;;  %v8263_v47 = vcombine.high %v12146_v63, %v12152_v53  ;;  %v7695_v2 = vld [vmem:[%s13881_s0 + $0xf8] sm:$0xff]  ;;  %v5127_v24 = vshrl.u32 %v12038_v44, 16 }
 0x14f   :  { %v8899_v10 = vpop.f32.mrf.mxu0  ;;  %v12163_v50 = vadd.f32 %v8969_v17, %v8968_v4  ;;  %v12176_v17 = vld [vmem:[#allocation2 + $0x1d0] sm:$0xee]  ;;  %v505_v4 = vld [vmem:[#allocation2 + $0xd8] sm:$0x11] }
 0x150   :  { %v12161_v9 = vadd.f32 %v12073_v55, %v2106_v7  ;;  %v8900_v23 = vadd.f32 %v8899_v10, %v8898_v3  ;;  %5022 = vmatmul.mubr.bf16.gmra.mxu1 %v8322_v35  ;;  %v12174_v55 = vld [vmem:[#allocation2 + $0x238] sm:$0xff]  ;;  %v8971_v3 = vpop.f32.mrf.mxu1  ;;  %9392 = vmatpush3.bf16.msra.mxu0 %v9974_v19  ;;  %v9983_v10 = vld [vmem:[%s13882_s1 + $0x550] sm:$0xff]   ;;  %v506_v35 = vsel %vm10255_vm8, 0, %v505_v4  ;;  %v9990_v19 = vld [vmem:[%s13882_s1 + $0x5a0] sm:$0xff]   ;;  %v712_v4 = vshll.u32 %v7695_v2, 16 }
 0x151   :  { %v8901_v26 = vpop.f32.mrf.mxu0  ;;  %5029 = vmatprep.mubr.bf16.mxu1 %v8325_v62  ;;  %9393 = vmatprep.subr.bf16.mxu0 %v9975_v57  ;;  %v9996_v62 = vld [vmem:[%s13882_s1 + $0x5d8] sm:$0xff]   ;;  %507 = vst [vmem:[#allocation2 + $0xd8] sm:$0x11] %v506_v35  ;;  %v13928_v57 = vcombine.low %v12011_v12, %v12015_v16  ;;  %v13929_v35 = vrot.slane %v12106_v8, 9  ;;  %v8327_v12 = vcombine.high %v12174_v55, %v12055_v22  ;;  %v12218_v16 = vld [vmem:[#allocation2 + $0x1c0] sm:$0xff]  ;;  %v8219_v8 = vrot.slane %v12176_v17, 9 }
 0x152   :  { %13926 = vst [vmem:[#allocation14_spill] sm:$0xff] %v12161_v9  ;;  %v2107_v7 = vadd.f32 %v8900_v23, %v11645_v31  ;;  %v8972_v31 = vpop.f32.mrf.mxu1  ;;  %9454 = vmatpush3.bf16.msra.mxu1 %v9988_v36  ;;  %v709_v23 = vshrl.u32 %v7695_v2, 16  ;;  %v8324_v36 = vcombine.low %v12096_v25, %v12098_v18  ;;  %v9991_v17 = vld [vmem:[%s13882_s1 + $0x548] sm:$0xff]  }
 0x153   :  { %v8902_v39 = vpop.f32.mrf.mxu0  ;;  %v12199_v51 = vadd.f32 %v8972_v31, %v8971_v3  ;;  %9455 = vmatprep.subr.bf16.mxu1 %v9989_v42  ;;  %4692 = vmatmul.mubr.bf16.gmra.mxu0 %v13928_v57  ;;  %v12210_v2 = vsel %vm10633_vm6, %v13929_v35, %v4420_v0  ;;  %v12220_v42 = vld [vmem:[#allocation2 + $0x1d8] sm:$0xff]  ;;  %v9986_v0 = vld [vmem:[%s13882_s1 + $0x510] sm:$0xff]   ;;  %v5130_v57 = vshll.u32 %v12038_v44, 16  ;;  %v8262_v44 = vcombine.low %v12146_v63, %v12152_v53  ;;  %v10000_v3 = vld [vmem:[%s13882_s1 + $0x540] sm:$0xff]  }
 0x154   :  { %v12197_v14 = vadd.f32 %v12094_v11, %v2107_v7  ;;  %v8903_v9 = vadd.f32 %v8902_v39, %v8901_v26  ;;  %v8974_v1 = vpop.f32.mrf.mxu1  ;;  %v12213_v39 = vrot.slane %v709_v23, 7  ;;  %4699 = vmatprep.mubr.bf16.mxu0 %v8263_v47  ;;  %9394 = vmatpush3.bf16.msra.mxu0 %v9978_v6  ;;  %v12235_v6 = vld [vmem:[#allocation2 + $0x220] sm:$0xee]  ;;  %v9997_v23 = vld [vmem:[%s13882_s1 + $0x598] sm:$0xff]   ;;  %v5141_v53 = vshrl.u32 %v12040_v41, 16 }
 0x155   :  { %v8904_v28 = vpop.f32.mrf.mxu0  ;;  %9395 = vmatprep.subr.bf16.mxu0 %v9983_v10  ;;  %v5144_v63 = vshll.u32 %v12040_v41, 16  ;;  %v5132_v41 = vrot.slane %v5130_v57, 5  ;;  %v13933_v57 = vrot.slane %v11793_v13, 5 }
 0x156   :  { %13927 = vst [vmem:[#allocation15_spill] sm:$0xff] %v12197_v14  ;;  %v2108_v26 = vadd.f32 %v8903_v9, %v11687_v45  ;;  %v13930_v45 = vrot.slane %v11756_v20, 5  ;;  %v13931_v9 = vrot.slane %v12112_v30, 9  ;;  %v8975_v31 = vpop.f32.mrf.mxu1  ;;  %9456 = vmatpush3.bf16.msra.mxu1 %v9990_v19  ;;  %v714_v30 = vor.u32 %v712_v4, %v12213_v39  ;;  %v12251_v19 = vld [vmem:[#allocation2 + $0x190] sm:$0xee] }
 0x157   :  { %v8905_v7 = vpop.f32.mrf.mxu0  ;;  %9457 = vmatprep.subr.bf16.mxu1 %v9996_v62  ;;  %v9998_v20 = vld [vmem:[%s13882_s1 + $0x5d0] sm:$0xff]   ;;  %v12259_v4 = vrot.slane %v5127_v24, 4 }
 0x158   :  { %v12233_v47 = vsel %vm10633_vm6, %v13931_v9, %v13930_v45  ;;  %v12247_v35 = vadd.f32 %v12120_v38, %v2108_v26  ;;  %v8906_v10 = vadd.f32 %v8905_v7, %v8904_v28  ;;  %v12249_v45 = vadd.f32 %v8975_v31, %v8974_v1  ;;  %v9995_v9 = vld [vmem:[%s13882_s1 + $0x508] sm:$0xff]   ;;  %5030 = vmatmul.mubr.bf16.gmra.mxu1 %v8324_v36  ;;  %v8977_v1 = vpop.f32.mrf.mxu1  ;;  %v9999_v24 = vld [vmem:[%s13882_s1 + $0x590] sm:$0xff]   ;;  %v839_v36 = vld [vmem:[#allocation2 + $0xd8] sm:$0xff] }
 0x159   :  { %v8907_v28 = vpop.f32.mrf.mxu0  ;;  %v12263_v38 = vld [vmem:[#allocation2 + $0x208] sm:$0xee]  ;;  %5037 = vmatprep.mubr.bf16.mxu1 %v8327_v12  ;;  %v8265_v62 = vcombine.high %v12210_v2, %v12233_v47  ;;  %9396 = vmatpush3.bf16.msra.mxu0 %v9986_v0  ;;  %v8326_v31 = vcombine.low %v12174_v55, %v12055_v22  ;;  %v8329_v12 = vcombine.high %v12218_v16, %v12220_v42  ;;  %v12279_v0 = vld [vmem:[#allocation2 + $0x38] sm:$0xff] }
 0x15a   :  { %13932 = vst [vmem:[#allocation16_spill] sm:$0xff] %v12247_v35  ;;  %v2109_v26 = vadd.f32 %v8906_v10, %v11728_v48  ;;  %v12268_v7 = vld [vmem:[#allocation2 + $0x188] sm:$0xee]  ;;  %v8978_v10 = vpop.f32.mrf.mxu1  ;;  %9397 = vmatprep.subr.bf16.mxu0 %v9991_v17  ;;  %9458 = vmatpush3.bf16.msra.mxu1 %v9997_v23  ;;  %v12286_v11 = vsel %vm10293_vm0, %v714_v30, %v839_v36  ;;  %v8220_v17 = vrot.slane %v12235_v6, 9  ;;  %v12300_v23 = vld [vmem:[#allocation2 + $0x100] sm:$0x11] }
 0x15b   :  { %v8908_v48 = vpop.f32.mrf.mxu0  ;;  %v12291_v22 = vadd.f32 %v8978_v10, %v8977_v1  ;;  %9459 = vmatprep.subr.bf16.mxu1 %v9998_v20  ;;  %841 = vst [vmem:[#allocation2 + $0xd8] sm:$0xff] %v12286_v11  ;;  %4700 = vmatmul.mubr.bf16.gmra.mxu0 %v8262_v44  ;;  %v13935_v6 = vrot.slane %v11798_v32, 5  ;;  %v8222_v44 = vrot.slane %v12263_v38, 9  ;;  %v8223_v13 = vrot.slane %v12268_v7, 9 }
 0x15c   :  { %v12289_v35 = vadd.f32 %v12163_v50, %v2109_v26  ;;  %v8909_v14 = vadd.f32 %v8908_v48, %v8907_v28  ;;  %v8980_v50 = vpop.f32.mrf.mxu1  ;;  %v13934_v28 = vrot.slane %v12168_v56, 9  ;;  %v8221_v26 = vrot.slane %v12251_v19, 9  ;;  %4707 = vmatprep.mubr.bf16.mxu0 %v8265_v62  ;;  %v10001_v56 = vld [vmem:[%s13882_s1 + $0x500] sm:$0xff]   ;;  %v10006_v62 = vld [vmem:[%s13882_s1 + $0x678] sm:$0xff]  }
 0x15d   :  { %v8910_v30 = vpop.f32.mrf.mxu0  ;;  %v12314_v20 = vsel %vm10633_vm6, %v8219_v8, %v13935_v6  ;;  %9398 = vmatpush3.bf16.msra.mxu0 %v9995_v9  ;;  %v5143_v48 = vrot.slane %v5141_v53, 4  ;;  %v5146_v32 = vrot.slane %v5144_v63, 5  ;;  %v8264_v8 = vcombine.low %v12210_v2, %v12233_v47 }
 0x15e   :  { %v12308_v1 = vsel %vm10633_vm6, %v13934_v28, %v13933_v57  ;;  %v2110_v36 = vadd.f32 %v8909_v14, %v11785_v27  ;;  %v8328_v19 = vcombine.low %v12218_v16, %v12220_v42  ;;  %v8981_v38 = vpop.f32.mrf.mxu1  ;;  %9460 = vmatpush3.bf16.msra.mxu1 %v9999_v24  ;;  %9399 = vmatprep.subr.bf16.mxu0 %v10000_v3  ;;  %v10003_v27 = vld [vmem:[%s13882_s1 + $0x588] sm:$0xff]   ;;  %v5136_v9 = vshll.u32 %v12300_v23, 16  ;;  %v12345_v24 = vld [vmem:[#allocation2 + $0x50] sm:$0x11] }
 0x15f   :  { %v8911_v10 = vpop.f32.mrf.mxu0  ;;  %v5133_v14 = vor.u32 %v5132_v41, %v12259_v4  ;;  %v12338_v7 = vadd.f32 %v8981_v38, %v8980_v50  ;;  %v8330_v3 = vcombine.low %v12279_v0, %v12293_v58  ;;  %9461 = vmatprep.subr.bf16.mxu1 %v10002_v59  ;;  %v10004_v4 = vld [vmem:[%s13882_s1 + $0x5c0] sm:$0xff]   ;;  %v8267_v63 = vcombine.high %v12308_v1, %v12314_v20 }
 0x160   :  { %v12336_v2 = vadd.f32 %v12199_v51, %v2110_v36  ;;  %v8912_v47 = vadd.f32 %v8911_v10, %v8910_v30  ;;  %5038 = vmatmul.mubr.bf16.gmra.mxu1 %v8326_v31  ;;  %v8983_v51 = vpop.f32.mrf.mxu1  ;;  %v13936_v41 = vrot.slane %v11852_v21, 5  ;;  %v13937_v59 = vrot.slane %v11862_v5, 5 }
 0x161   :  { %v8913_v53 = vpop.f32.mrf.mxu0  ;;  %v13938_v57 = vrot.slane %v11950_v34, 5  ;;  %5045 = vmatprep.mubr.bf16.mxu1 %v8329_v12  ;;  %9400 = vmatpush3.bf16.msra.mxu0 %v10001_v56  ;;  %v5147_v6 = vor.u32 %v5146_v32, %v5143_v48  ;;  %v8331_v34 = vcombine.high %v12279_v0, %v12293_v58  ;;  %v5138_v10 = vrot.slane %v5136_v9, 5  ;;  %v5656_v48 = vld [vmem:[#allocation2 + $0x80] sm:$0xee] }
 0x162   :  { %v12353_v30 = vsel %vm10633_vm6, %v8220_v17, %v13936_v41  ;;  %v12359_v50 = vsel %vm10633_vm6, %v8221_v26, %v13937_v59  ;;  %v2111_v21 = vadd.f32 %v8912_v47, %v11801_v33  ;;  %v13939_v17 = vrot.slane %v12007_v15, 5  ;;  %v8984_v36 = vpop.f32.mrf.mxu1  ;;  %9462 = vmatpush3.bf16.msra.mxu1 %v10003_v27  ;;  %v10005_v33 = vld [vmem:[%s13882_s1 + $0x580] sm:$0xff]   ;;  %9513 = vmatprep.subr.bf16.mxu0 %v10006_v62  ;;  %v12394_v62 = vld [vmem:[#allocation2 + $0x250] sm:$0xee]  ;;  %v12401_v59 = vld [vmem:[#allocation2 + $0x118] sm:$0xff] }
 0x163   :  { %v12365_v31 = vsel %vm10633_vm6, %v8222_v44, %v13938_v57  ;;  %v8914_v26 = vpop.f32.mrf.mxu0  ;;  %v5134_v44 = vrot.slane %v5133_v14, 4  ;;  %v5150_v38 = vshll.u32 %v12345_v24, 16  ;;  %v12386_v56 = vadd.f32 %v8984_v36, %v8983_v51  ;;  %9463 = vmatprep.subr.bf16.mxu1 %v10004_v4  ;;  %4708 = vmatmul.mubr.bf16.gmra.mxu0 %v8264_v8 }
 0x164   :  { %v12373_v5 = vsel %vm10633_vm6, %v8223_v13, %v13939_v17  ;;  %v12382_v15 = vadd.f32 %v12249_v45, %v2111_v21  ;;  %v8915_v12 = vadd.f32 %v8914_v26, %v8913_v53  ;;  %v8266_v13 = vcombine.low %v12308_v1, %v12314_v20  ;;  %v8986_v27 = vpop.f32.mrf.mxu1  ;;  %v13940_v20 = vld [vmem:[#allocation6_spill] sm:$0xff]  ;;  %4715 = vmatprep.mubr.bf16.mxu0 %v8267_v63 }
 0x165   :  { %v8916_v32 = vpop.f32.mrf.mxu0  ;;  %v8269_v9 = vcombine.high %v12353_v30, %v12359_v50  ;;  %v5155_v1 = vshrl.u32 %v12066_v61, 16  ;;  %v5148_v53 = vrot.slane %v5147_v6, 4  ;;  %v12405_v57 = vsel %vm10334_vm3, %v5134_v44, %v5138_v10  ;;  %v10016_v44 = vld [vmem:[%s13882_s1 + $0x6f8] sm:$0xff]  }
 0x166   :  { %v2112_v47 = vadd.f32 %v8915_v12, %v13940_v20  ;;  %v8987_v41 = vpop.f32.mrf.mxu1  ;;  %v5152_v21 = vrot.slane %v5150_v38, 5  ;;  %9464 = vmatpush3.bf16.msra.mxu1 %v10005_v33  ;;  %v8416_v17 = vrot.slane %v5656_v48, 9  ;;  %v5706_v26 = vrot.slane %v12300_v23, 5  ;;  %v12414_v20 = vld [vmem:[#allocation2 + $0x128] sm:$0x11] }
 0x167   :  { %v8917_v51 = vpop.f32.mrf.mxu0  ;;  %v12411_v12 = vadd.f32 %v8987_v41, %v8986_v27  ;;  %v8417_v6 = vrot.slane %v12394_v62, 9  ;;  %v5169_v38 = vshrl.u32 %v12068_v43, 16  ;;  %v5172_v33 = vshll.u32 %v12068_v43, 16  ;;  %9577 = vmatprep.subr.bf16.mxu1 %v10016_v44  ;;  %v9994_v44 = vld [vmem:[#allocation2 + $0x17c] ss:$-40 sps:$4 sm:$0xff]  }
 0x168   :  { %v12409_v63 = vadd.f32 %v12291_v22, %v2112_v47  ;;  %v8918_v36 = vadd.f32 %v8917_v51, %v8916_v32  ;;  %5046 = vmatmul.mubr.bf16.gmra.mxu1 %v8328_v19  ;;  %v8989_v23 = vpop.f32.mrf.mxu1  ;;  %v5158_v22 = vshll.u32 %v12066_v61, 16  ;;  %v5183_v48 = vshrl.u32 %v12096_v25, 16  ;;  %v13941_v32 = vld [vmem:[#allocation7_spill] sm:$0xff] }
 0x169   :  { %v8919_v10 = vpop.f32.mrf.mxu0  ;;  %5053 = vmatprep.mubr.bf16.mxu1 %v8331_v34  ;;  %v5186_v19 = vshll.u32 %v12096_v25, 16  ;;  %v12434_v41 = vsel %vm10334_vm3, %v5148_v53, %v5152_v21  ;;  %v12438_v43 = vsel %vm10633_vm6, %v8416_v17, %v5706_v26  ;;  %v5710_v34 = vrot.slane %v12345_v24, 5  ;;  %v5658_v53 = vld [vmem:[#allocation2 + $0xf0] sm:$0xee]  ;;  %v12449_v21 = vld [vmem:[#allocation2 + $0x260] sm:$0xee] }
 0x16a   :  { %v2113_v27 = vadd.f32 %v8918_v36, %v13941_v32  ;;  %v8990_v61 = vpop.f32.mrf.mxu1  ;;  %v12441_v36 = vld [vmem:[#allocation2 + $0x168] sm:$0x11]  ;;  %v5157_v32 = vrot.slane %v5155_v1, 4  ;;  %v5164_v45 = vshll.u32 %v12414_v20, 16  ;;  %v5160_v24 = vrot.slane %v5158_v22, 5 }
 0x16b   :  { %v8920_v51 = vpop.f32.mrf.mxu0  ;;  %v12446_v62 = vadd.f32 %v8990_v61, %v8989_v23  ;;  %v535_v47 = vld [vmem:[#allocation2 + $0x108] sm:$0x11]  ;;  %4716 = vmatmul.mubr.bf16.gmra.mxu0 %v8266_v13  ;;  %v5171_v28 = vrot.slane %v5169_v38, 4  ;;  %v5174_v8 = vrot.slane %v5172_v33, 5  ;;  %v12451_v1 = vld [vmem:[#allocation2 + $0x1f8] sm:$0x11]  ;;  %v12461_v22 = vsel %vm10633_vm6, %v8417_v6, %v5710_v34 }
 0x16c   :  { %v12444_v4 = vadd.f32 %v12338_v7, %v2113_v27  ;;  %v8921_v25 = vadd.f32 %v8920_v51, %v8919_v10  ;;  %v8992_v26 = vpop.f32.mrf.mxu1  ;;  %v5185_v7 = vrot.slane %v5183_v48, 4  ;;  %4723 = vmatprep.mubr.bf16.mxu0 %v8269_v9  ;;  %v5188_v27 = vrot.slane %v5186_v19, 5 }
 0x16d   :  { %v8922_v17 = vpop.f32.mrf.mxu0  ;;  %v5197_v51 = vshrl.u32 %v12098_v18, 16  ;;  %v5200_v38 = vshll.u32 %v12098_v18, 16  ;;  %v5178_v19 = vshll.u32 %v12441_v36, 16  ;;  %v8418_v18 = vrot.slane %v5658_v53, 9 }
 0x16e   :  { %13942 = vst [vmem:[#allocation6_spill] sm:$0xff] %v12444_v4  ;;  %v2114_v10 = vadd.f32 %v8921_v25, %v11917_v40  ;;  %v8993_v14 = vpop.f32.mrf.mxu1  ;;  %v536_v40 = vsel %vm10274_vm13, 0, %v535_v47  ;;  %v5161_v25 = vor.u32 %v5160_v24, %v5157_v32  ;;  %v5714_v23 = vrot.slane %v12414_v20, 5 }
 0x16f   :  { %v8923_v61 = vpop.f32.mrf.mxu0  ;;  %v12469_v48 = vadd.f32 %v8993_v14, %v8992_v26  ;;  %537 = vst [vmem:[#allocation2 + $0x108] sm:$0x11] %v536_v40  ;;  %v8419_v47 = vrot.slane %v12449_v21, 9  ;;  %v5175_v14 = vor.u32 %v5174_v8, %v5171_v28  ;;  %v12479_v26 = vld [vmem:[#allocation2 + $0xc0] sm:$0x11]  ;;  %v8464_v32 = vcombine.low %v12438_v43, %v12461_v22 }
 0x170   :  { %v12467_v9 = vadd.f32 %v12386_v56, %v2114_v10  ;;  %v8924_v33 = vadd.f32 %v8923_v61, %v8922_v17  ;;  %5054 = vmatmul.mubr.bf16.gmra.mxu1 %v8330_v3  ;;  %v8995_v34 = vpop.f32.mrf.mxu1  ;;  %v5718_v17 = vrot.slane %v12441_v36, 5  ;;  %v5192_v10 = vshll.u32 %v12451_v1, 16  ;;  %v9992_v61 = vld [vmem:[#allocation2 + $0x178] ss:$-40 sps:$4 sm:$0xff]   ;;  %v5660_v36 = vld [vmem:[#allocation2 + $0x40] sm:$0xee] }
 0x171   :  { %v8925_v6 = vpop.f32.mrf.mxu0  ;;  %5061 = vmatprep.mubr.bf16.mxu1 %v9994_v44  ;;  %v5189_v53 = vor.u32 %v5188_v27, %v5185_v7  ;;  %v5199_v20 = vrot.slane %v5197_v51, 4  ;;  %v5202_v24 = vrot.slane %v5200_v38, 5  ;;  %v5166_v8 = vrot.slane %v5164_v45, 5  ;;  %v5661_v27 = vld [vmem:[#allocation2 + $0x228] sm:$0xee] }
 0x172   :  { %13943 = vst [vmem:[#allocation7_spill] sm:$0xff] %v12467_v9  ;;  %v2115_v56 = vadd.f32 %v8924_v33, %v11932_v52  ;;  %v8996_v40 = vpop.f32.mrf.mxu1  ;;  %v13944_v44 = vcombine.low %v12353_v30, %v12359_v50  ;;  %v5162_v9 = vrot.slane %v5161_v25, 4  ;;  %v5180_v4 = vrot.slane %v5178_v19, 5  ;;  %v12505_v19 = vld [vmem:[#allocation2 + $0xe8] sm:$0x11] }
 0x173   :  { %v8926_v3 = vpop.f32.mrf.mxu0  ;;  %v12487_v28 = vadd.f32 %v8996_v40, %v8995_v34  ;;  %v12494_v7 = vsel %vm10633_vm6, %v8418_v18, %v5714_v23  ;;  %v13945_v45 = vcombine.high %v12365_v31, %v12373_v5  ;;  %v5176_v38 = vrot.slane %v5175_v14, 4 }
 0x174   :  { %v12485_v21 = vadd.f32 %v12411_v12, %v2115_v56  ;;  %v8927_v52 = vadd.f32 %v8926_v3, %v8925_v6  ;;  %4724 = vmatmul.mubr.bf16.gmra.mxu0 %v13944_v44  ;;  %v8998_v13 = vpop.f32.mrf.mxu1  ;;  %v5206_v12 = vshll.u32 %v12479_v26, 16  ;;  %v12503_v30 = vsel %vm10633_vm6, %v8419_v47, %v5718_v17 }
 0x175   :  { %v8928_v33 = vpop.f32.mrf.mxu0  ;;  %4731 = vmatprep.mubr.bf16.mxu0 %v13945_v45  ;;  %v5194_v50 = vrot.slane %v5192_v10, 5  ;;  %v5190_v34 = vrot.slane %v5189_v53, 4  ;;  %v5203_v25 = vor.u32 %v5202_v24, %v5199_v20  ;;  %v5211_v56 = vshrl.u32 %v12174_v55, 16 }
 0x176   :  { %v2116_v51 = vadd.f32 %v8927_v52, %v11996_v46  ;;  %v8999_v23 = vpop.f32.mrf.mxu1  ;;  %v794_v18 = vld [vmem:[#allocation2 + $0x108] sm:$0x11]  ;;  %v5214_v46 = vshll.u32 %v12174_v55, 16  ;;  %v13946_v47 = vrot.slane %v12032_v60, 4  ;;  %v8465_v53 = vcombine.high %v12438_v43, %v12461_v22  ;;  %v10012_v43 = vld [vmem:[%s13882_s1 + $0x660] sm:$0xff]  }
 0x177   :  { %v8929_v6 = vpop.f32.mrf.mxu0  ;;  %v12512_v40 = vadd.f32 %v8999_v23, %v8998_v13  ;;  %v5208_v55 = vrot.slane %v5206_v12, 5  ;;  %v8420_v24 = vrot.slane %v5660_v36, 9  ;;  %v13948_v13 = vcombine.high %v12401_v59, %v12286_v11 }
 0x178   :  { %v12510_v3 = vadd.f32 %v12446_v62, %v2116_v51  ;;  %v8930_v14 = vadd.f32 %v8929_v6, %v8928_v33  ;;  %v795_v17 = vsel %vm10255_vm8, %v13946_v47, %v794_v18  ;;  %5062 = vmatmul.mubr.bf16.gmra.mxu1 %v9992_v61  ;;  %v13947_v62 = vld [vmem:[#allocation8_spill] sm:$0xff]  ;;  %v5722_v60 = vrot.slane %v12451_v1, 5  ;;  %v13949_v6 = vld [vmem:[#allocation10_spill] sm:$0xff] }
 0x179   :  { %v8931_v10 = vpop.f32.mrf.mxu0  ;;  %796 = vst [vmem:[#allocation2 + $0x108] sm:$0x11] %v795_v17  ;;  %5069 = vmatprep.mubr.bf16.mxu1 %v13948_v13  ;;  %v8421_v44 = vrot.slane %v5661_v27, 9  ;;  %v5220_v61 = vshll.u32 %v12505_v19, 16  ;;  %v5204_v51 = vrot.slane %v5203_v25, 4  ;;  %v5726_v45 = vrot.slane %v12479_v26, 5 }
 0x17a   :  { %v2117_v52 = vadd.f32 %v8930_v14, %v13947_v62  ;;  %v5225_v23 = vshrl.u32 %v13949_v6, 16  ;;  %v5228_v36 = vshll.u32 %v13949_v6, 16  ;;  %v5213_v14 = vrot.slane %v5211_v56, 4  ;;  %v12545_v17 = vld [vmem:[#allocation2 + $0x238] sm:$0xee] }
 0x17b   :  { %v8932_v33 = vpop.f32.mrf.mxu0  ;;  %v5216_v47 = vrot.slane %v5214_v46, 5  ;;  %v13950_v1 = vcombine.low %v12365_v31, %v12373_v5  ;;  %v12539_v25 = vsel %vm10334_vm3, %v5162_v9, %v5166_v8  ;;  %v12543_v26 = vsel %vm10334_vm3, %v5176_v38, %v5180_v4  ;;  %v13951_v46 = vld [vmem:[#allocation9_spill] sm:$0xff]  ;;  %v9081_v38 = vpop.f32.mrf.mxu1 }
 0x17c   :  { %v12532_v12 = vadd.f32 %v12469_v48, %v2117_v52  ;;  %v8933_v18 = vadd.f32 %v8932_v33, %v8931_v10  ;;  %v5239_v48 = vshrl.u32 %v12218_v16, 16  ;;  %v5242_v56 = vshll.u32 %v12218_v16, 16 }
 0x17d   :  { %4732 = vmatmul.mubr.bf16.gmra.mxu0 %v13950_v1  ;;  %v8934_v27 = vpop.f32.mrf.mxu0  ;;  %v13952_v31 = vcombine.high %v12405_v57, %v12434_v41  ;;  %v12555_v5 = vsel %vm10334_vm3, %v5190_v34, %v5194_v50  ;;  %v12559_v4 = vsel %vm10633_vm6, %v8420_v24, %v5722_v60  ;;  %v12561_v9 = vrot.slane %v5220_v61, 5  ;;  %v10007_v24 = vld [vmem:[%s13882_s1 + $0x638] sm:$0xff]  }
 0x17e   :  { %v2118_v10 = vadd.f32 %v8933_v18, %v13951_v46  ;;  %v12565_v16 = vsel %vm10334_vm3, %v5204_v51, %v5208_v55  ;;  %v12569_v62 = vsel %vm10633_vm6, %v8421_v44, %v5726_v45  ;;  %v5227_v52 = vrot.slane %v5225_v23, 4  ;;  %v12577_v61 = vld [vmem:[#allocation2 + $0xb8] sm:$0xee]  ;;  %v9082_v51 = vpop.f32.mrf.mxu1  ;;  %v12586_v45 = vld [vmem:[#allocation2 + $0x1f0] sm:$0x11] }
 0x17f   :  { %5575 = vmatprep.mubr.bf16.mxu0 %v13952_v31  ;;  %v8935_v8 = vpop.f32.mrf.mxu0  ;;  %v5230_v13 = vrot.slane %v5228_v36, 5  ;;  %v5217_v60 = vor.u32 %v5216_v47, %v5213_v14  ;;  %v13954_v33 = vcombine.low %v12401_v59, %v12286_v11  ;;  %v12588_v6 = vrot.slane %v5239_v48, 4  ;;  %v13955_v14 = vld [vmem:[#allocation11_spill] sm:$0xff]  ;;  %v12601_v48 = vld [vmem:[#allocation2 + $0x1b8] sm:$0x11]  ;;  %v13958_v55 = vld [vmem:[#allocation12_spill] sm:$0xff] }
 0x180   :  { %v12572_v50 = vadd.f32 %v12487_v28, %v2118_v10  ;;  %v8936_v34 = vadd.f32 %v8935_v8, %v8934_v27  ;;  %v10008_v28 = vld [vmem:[%s13882_s1 + $0x670] sm:$0xff]   ;;  %v12590_v23 = vrot.slane %v5242_v56, 5  ;;  %v5253_v36 = vshrl.u32 %v12220_v42, 16  ;;  %v12599_v27 = vld [vmem:[#allocation2 + $0x108] sm:$0x11]  ;;  %v9084_v46 = vpop.f32.mrf.mxu1 }
 0x181   :  { %5070 = vmatmul.mubr.bf16.gmra.mxu1 %v13954_v33  ;;  %v9017_v44 = vpop.f32.mrf.mxu0  ;;  %v5256_v18 = vshll.u32 %v12220_v42, 16  ;;  %v9083_v11 = vadd.f32 %v9082_v51, %v9081_v38  ;;  %v8387_v59 = vcombine.high %v12539_v25, %v12543_v26  ;;  %v8467_v1 = vcombine.high %v12494_v7, %v12503_v30  ;;  %v12607_v8 = vld [vmem:[#allocation2 + $0x1c0] sm:$0xee]  ;;  %v10009_v33 = vld [vmem:[%s13882_s1 + $0x630] sm:$0xff]   ;;  %v10017_v51 = vld [vmem:[%s13882_s1 + $0x6b8] sm:$0xff]  }
 0x182   :  { %13953 = vst [vmem:[#allocation8_spill] sm:$0xff] %v12572_v50  ;;  %v2119_v47 = vadd.f32 %v8936_v34, %v13955_v14  ;;  %5993 = vmatprep.mubr.bf16.mxu1 %v8465_v53  ;;  %v5231_v42 = vor.u32 %v5230_v13, %v5227_v52  ;;  %v13957_v13 = vcombine.low %v12405_v57, %v12434_v41  ;;  %v9085_v20 = vpop.f32.mrf.mxu1  ;;  %v5248_v41 = vshll.u32 %v12586_v45, 16 }
 0x183   :  { %v9018_v56 = vpop.f32.mrf.mxu0  ;;  %v5258_v53 = vrot.slane %v5256_v18, 5  ;;  %v9086_v52 = vadd.f32 %v9085_v20, %v9084_v46  ;;  %v5245_v57 = vor.u32 %v12590_v23, %v12588_v6  ;;  %v5262_v20 = vshll.u32 %v12601_v48, 16 }
 0x184   :  { %v12610_v38 = vadd.f32 %v12512_v40, %v2119_v47  ;;  %v9019_v34 = vadd.f32 %v9018_v56, %v9017_v44  ;;  %v10010_v40 = vld [vmem:[%s13882_s1 + $0x668] sm:$0xff]   ;;  %v5218_v44 = vrot.slane %v5217_v60, 4  ;;  %v5234_v47 = vshll.u32 %v12599_v27, 16  ;;  %v10018_v60 = vld [vmem:[%s13882_s1 + $0x6f0] sm:$0xff]  }
 0x185   :  { %5576 = vmatmul.mubr.bf16.vlgmr.msra.gmra.mxu0 %v13957_v13  ;;  %v9020_v14 = vpop.f32.mrf.mxu0  ;;  %v5255_v56 = vrot.slane %v5253_v36, 4  ;;  %v5665_v13 = vld [vmem:[#allocation2 + $0x1d8] sm:$0xee]  ;;  %v5267_v18 = vshrl.u32 %v12279_v0, 16  ;;  %v5270_v6 = vshll.u32 %v12279_v0, 16  ;;  %v8424_v46 = vrot.slane %v12607_v8, 9 }
 0x186   :  { %13956 = vst [vmem:[#allocation10_spill] sm:$0xff] %v12610_v38  ;;  %9514 = vmatpush3.bf16.msra.mxu0 %v10007_v24  ;;  %v3004_v31 = vadd.f32 %v9019_v34, %v13958_v55  ;;  %5583 = vmatprep.mubr.bf16.mxu0 %v8387_v59  ;;  %v9087_v24 = vpop.f32.mrf.mxu1  ;;  %v5232_v55 = vrot.slane %v5231_v42, 4  ;;  %v5738_v34 = vrot.slane %v12586_v45, 5  ;;  %v10011_v42 = vld [vmem:[%s13882_s1 + $0x628] sm:$0xff]   ;;  %v5236_v38 = vrot.slane %v5234_v47, 5 }
 0x187   :  { %v9021_v36 = vpop.f32.mrf.mxu0  ;;  %9515 = vmatprep.subr.bf16.mxu0 %v10008_v28  ;;  %v5259_v50 = vor.u32 %v5258_v53, %v5255_v56  ;;  %v8425_v0 = vrot.slane %v5665_v13, 9  ;;  %v5246_v22 = vrot.slane %v5245_v57, 4  ;;  %v12654_v8 = vld [vmem:[#allocation2 + $0x270] sm:$0x11]  ;;  %v5734_v13 = vrot.slane %v12599_v27, 5  ;;  %v10013_v27 = vld [vmem:[%s13882_s1 + $0x620] sm:$0xff]  }
 0x188   :  { %v12639_v23 = vadd.f32 %v9083_v11, %v3004_v31  ;;  %v9022_v59 = vadd.f32 %v9021_v36, %v9020_v14  ;;  %v9088_v10 = vpop.f32.mrf.mxu1  ;;  %v5742_v11 = vrot.slane %v12601_v48, 5  ;;  %v13959_v31 = vld [vmem:[#allocation13_spill] sm:$0xff]  ;;  %v10019_v53 = vld [vmem:[%s13882_s1 + $0x6b0] sm:$0xff]   ;;  %v12664_v48 = vsel %vm10334_vm3, %v5218_v44, %v12561_v9 }
 0x189   :  { %5994 = vmatmul.mubr.bf16.vlgmr.msra.gmra.mxu1 %v8464_v32  ;;  %v9023_v28 = vpop.f32.mrf.mxu0  ;;  %v9089_v45 = vadd.f32 %v9088_v10, %v9087_v24  ;;  %v5250_v32 = vrot.slane %v5248_v41, 5  ;;  %v5269_v10 = vrot.slane %v5267_v18, 4  ;;  %v5264_v36 = vrot.slane %v5262_v20, 5 }
 0x18a   :  { %v3005_v14 = vadd.f32 %v9022_v59, %v13959_v31  ;;  %6001 = vmatprep.mubr.bf16.mxu1 %v8467_v1  ;;  %9516 = vmatpush3.bf16.msra.mxu0 %v10009_v33  ;;  %v9090_v56 = vpop.f32.mrf.mxu1  ;;  %v8469_v1 = vcombine.high %v12559_v4, %v12569_v62  ;;  %v5272_v33 = vrot.slane %v5270_v6, 5  ;;  %v13960_v24 = vcombine.low %v12539_v25, %v12543_v26  ;;  %v13961_v26 = vld [vmem:[#allocation14_spill] sm:$0xff] }
 0x18b   :  { %v9024_v47 = vpop.f32.mrf.mxu0  ;;  %9517 = vmatprep.subr.bf16.mxu0 %v10010_v40  ;;  %9578 = vmatpush3.bf16.msra.mxu1 %v10017_v51  ;;  %v10022_v40 = vld [vmem:[%s13882_s1 + $0x6e8] sm:$0xff]   ;;  %v12677_v51 = vsel %vm10334_vm3, %v5232_v55, %v5236_v38  ;;  %v12687_v20 = vsel %vm10633_vm6, %v8424_v46, %v5738_v34  ;;  %v12691_v25 = vsel %vm10633_vm6, %v8425_v0, %v5742_v11  ;;  %v5284_v6 = vshll.u32 %v12293_v58, 16 }
 0x18c   :  { %v12666_v57 = vadd.f32 %v9086_v52, %v3005_v14  ;;  %v9025_v41 = vadd.f32 %v9024_v47, %v9023_v28  ;;  %9579 = vmatprep.subr.bf16.mxu1 %v10018_v60  ;;  %v9091_v44 = vpop.f32.mrf.mxu1  ;;  %v5260_v52 = vrot.slane %v5259_v50, 4  ;;  %v10014_v60 = vld [vmem:[%s13882_s1 + $0x658] sm:$0xff]   ;;  %v13962_v55 = vcombine.high %v12555_v5, %v12565_v16 }
 0x18d   :  { %5584 = vmatmul.mubr.bf16.gmra.mxu0 %v13960_v24  ;;  %v9026_v9 = vpop.f32.mrf.mxu0  ;;  %v9092_v18 = vadd.f32 %v9091_v44, %v9090_v56  ;;  %v5281_v50 = vshrl.u32 %v12293_v58, 16  ;;  %v8388_v46 = vcombine.low %v12555_v5, %v12565_v16  ;;  %v13963_v28 = vrot.slane %v12505_v19, 5  ;;  %v10023_v58 = vld [vmem:[%s13882_s1 + $0x6a8] sm:$0xff]  }
 0x18e   :  { %v3006_v38 = vadd.f32 %v9025_v41, %v13961_v26  ;;  %5591 = vmatprep.mubr.bf16.mxu0 %v13962_v55  ;;  %9518 = vmatpush3.bf16.msra.mxu0 %v10011_v42  ;;  %v9093_v34 = vpop.f32.mrf.mxu1  ;;  %v13964_v0 = vrot.slane %v12545_v17, 9  ;;  %v5273_v31 = vor.u32 %v5272_v33, %v5269_v10  ;;  %v5276_v42 = vshll.u32 %v12654_v8, 16  ;;  %v12746_v41 = vld [vmem:[#allocation2 + $0x1e0] sm:$0x11] }
 0x18f   :  { %v9027_v59 = vpop.f32.mrf.mxu0  ;;  %9519 = vmatprep.subr.bf16.mxu0 %v10012_v43  ;;  %9580 = vmatpush3.bf16.msra.mxu1 %v10019_v53  ;;  %v13965_v16 = vrot.slane %v12577_v61, 9  ;;  %v12723_v17 = vsel %vm10334_vm3, %v5246_v22, %v5250_v32  ;;  %v10015_v43 = vld [vmem:[%s13882_s1 + $0x618] sm:$0xff]   ;;  %v13966_v61 = vcombine.low %v12494_v7, %v12503_v30  ;;  %v8391_v22 = vcombine.high %v12664_v48, %v12677_v51  ;;  %v10020_v7 = vld [vmem:[%s13882_s1 + $0x650] sm:$0xff]  }
 0x190   :  { %v12707_v11 = vsel %vm10633_vm6, %v13964_v0, %v13963_v28  ;;  %v12713_v14 = vadd.f32 %v9089_v45, %v3006_v38  ;;  %v9028_v5 = vadd.f32 %v9027_v59, %v9026_v9  ;;  %9581 = vmatprep.subr.bf16.mxu1 %v10022_v40  ;;  %v10024_v45 = vld [vmem:[%s13882_s1 + $0x6e0] sm:$0xff]   ;;  %v12731_v53 = vld [vmem:[#allocation2 + $0x178] sm:$0xff]  ;;  %v9094_v56 = vpop.f32.mrf.mxu1  ;;  %v12740_v32 = vsel %vm10334_vm3, %v5260_v52, %v5264_v36  ;;  %v12751_v30 = vld [vmem:[#allocation2 + $0x150] sm:$0xff] }
 0x191   :  { %v12719_v19 = vsel %vm10633_vm6, %v13965_v16, %v5734_v13  ;;  %6002 = vmatmul.mubr.bf16.gmra.mxu1 %v13966_v61  ;;  %v9029_v47 = vpop.f32.mrf.mxu0  ;;  %v8472_v10 = vcombine.low %v12687_v20, %v12691_v25  ;;  %v8473_v33 = vcombine.high %v12687_v20, %v12691_v25  ;;  %v565_v13 = vld [vmem:[#allocation2 + $0x110] sm:$0x11]  ;;  %v13967_v40 = vld [vmem:[#allocation15_spill] sm:$0xff]  ;;  %v9095_v36 = vadd.f32 %v9094_v56, %v9093_v34  ;;  %v12764_v28 = vld [vmem:[#allocation2 + $0x38] sm:$0xee] }
 0x192   :  { %v3007_v24 = vadd.f32 %v9028_v5, %v13967_v40  ;;  %6009 = vmatprep.mubr.bf16.mxu1 %v8469_v1  ;;  %9520 = vmatpush3.bf16.msra.mxu0 %v10013_v27  ;;  %v12754_v9 = vrot.slane %v5281_v50, 4  ;;  %v12756_v44 = vrot.slane %v5284_v6, 5  ;;  %v9096_v26 = vpop.f32.mrf.mxu1  ;;  %v8470_v38 = vcombine.low %v12707_v11, %v12719_v19  ;;  %v10025_v27 = vld [vmem:[%s13882_s1 + $0x6a0] sm:$0xff]   ;;  %v5667_v34 = vld [vmem:[#allocation2 + $0x268] sm:$0xee]  ;;  %v10028_v0 = vld [vmem:[%s13882_s1 + $0x6d8] sm:$0xff]  }
 0x193   :  { %v9030_v52 = vpop.f32.mrf.mxu0  ;;  %9521 = vmatprep.subr.bf16.mxu0 %v10014_v60  ;;  %v12760_v55 = vrot.slane %v5273_v31, 4  ;;  %v12762_v59 = vrot.slane %v5276_v42, 5  ;;  %9582 = vmatpush3.bf16.msra.mxu1 %v10023_v58  ;;  %v5295_v1 = vshrl.u32 %v12731_v53, 16  ;;  %v5298_v60 = vshll.u32 %v12731_v53, 16  ;;  %v13968_v53 = vld [vmem:[#allocation16_spill] sm:$0xff] }
 0x194   :  { %v12770_v50 = vadd.f32 %v9092_v18, %v3007_v24  ;;  %v9031_v6 = vadd.f32 %v9030_v52, %v9029_v47  ;;  %9583 = vmatprep.subr.bf16.mxu1 %v10024_v45  ;;  %v566_v31 = vsel %vm10274_vm13, 0, %v565_v13  ;;  %v9097_v58 = vpop.f32.mrf.mxu1  ;;  %v8471_v5 = vcombine.high %v12707_v11, %v12719_v19  ;;  %v10021_v13 = vld [vmem:[%s13882_s1 + $0x610] sm:$0xff]   ;;  %v10037_v19 = vld [vmem:[%s13882_s1 + $0x680] sm:$0xff]  }
 0x195   :  { %5592 = vmatmul.mubr.bf16.gmra.mxu0 %v8388_v46  ;;  %v9032_v42 = vpop.f32.mrf.mxu0  ;;  %v8392_v18 = vcombine.low %v12723_v17, %v12740_v32  ;;  %v5309_v16 = vshrl.u32 %v12751_v30, 16  ;;  %v5312_v45 = vshll.u32 %v12751_v30, 16  ;;  %567 = vst [vmem:[#allocation2 + $0x110] sm:$0x11] %v566_v31  ;;  %v9098_v47 = vadd.f32 %v9097_v58, %v9096_v26  ;;  %v12791_v40 = vld [vmem:[#allocation2 + $0x90] sm:$0x11] }
 0x196   :  { %v3008_v61 = vadd.f32 %v9031_v6, %v13968_v53  ;;  %5599 = vmatprep.mubr.bf16.mxu0 %v8391_v22  ;;  %9522 = vmatpush3.bf16.msra.mxu0 %v10015_v43  ;;  %v5287_v46 = vor.u32 %v12756_v44, %v12754_v9  ;;  %v5290_v56 = vshll.u32 %v12746_v41, 16  ;;  %v9099_v52 = vpop.f32.mrf.mxu1  ;;  %v8426_v30 = vrot.slane %v12764_v28, 9  ;;  %v12796_v6 = vld [vmem:[#allocation2 + $0x278] sm:$0x11]  ;;  %v10026_v9 = vld [vmem:[%s13882_s1 + $0x648] sm:$0xff]  }
 0x197   :  { %v9033_v24 = vpop.f32.mrf.mxu0  ;;  %9523 = vmatprep.subr.bf16.mxu0 %v10020_v7  ;;  %v5746_v22 = vrot.slane %v12654_v8, 5  ;;  %v8427_v26 = vrot.slane %v5667_v34, 9  ;;  %v5750_v43 = vrot.slane %v12746_v41, 5  ;;  %9584 = vmatpush3.bf16.msra.mxu1 %v10025_v27  ;;  %v10029_v44 = vld [vmem:[%s13882_s1 + $0x698] sm:$0xff]   ;;  %v12806_v28 = vrot.slane %v5295_v1, 4  ;;  %v10030_v41 = vld [vmem:[%s13882_s1 + $0x6d0] sm:$0xff]  }
 0x198   :  { %v12804_v31 = vadd.f32 %v9095_v36, %v3008_v61  ;;  %v9034_v7 = vadd.f32 %v9033_v24, %v9032_v42  ;;  %v12808_v8 = vrot.slane %v5298_v60, 5  ;;  %9585 = vmatprep.subr.bf16.mxu1 %v10028_v0  ;;  %v13969_v27 = vcombine.low %v12559_v4, %v12569_v62  ;;  %v9100_v36 = vpop.f32.mrf.mxu1  ;;  %v10027_v0 = vld [vmem:[%s13882_s1 + $0x608] sm:$0xff]   ;;  %v12827_v53 = vld [vmem:[#allocation2 + $0x118] sm:$0xff] }
 0x199   :  { %v8390_v34 = vcombine.low %v12664_v48, %v12677_v51  ;;  %v9035_v58 = vpop.f32.mrf.mxu0  ;;  %v8393_v1 = vcombine.high %v12723_v17, %v12740_v32  ;;  %v12820_v42 = vrot.slane %v5309_v16, 4  ;;  %v12822_v60 = vrot.slane %v5312_v45, 5 }
 0x19a   :  { %6010 = vmatmul.mubr.bf16.gmra.mxu1 %v13969_v27  ;;  %v3009_v4 = vadd.f32 %v9034_v7, %v12289_v35  ;;  %v9101_v62 = vadd.f32 %v9100_v36, %v9099_v52  ;;  %v5288_v48 = vrot.slane %v5287_v46, 4  ;;  %v5292_v51 = vrot.slane %v5290_v56, 5  ;;  %9524 = vmatpush3.bf16.msra.mxu0 %v10021_v13  ;;  %v9102_v24 = vpop.f32.mrf.mxu1  ;;  %v12845_v46 = vld [vmem:[#allocation2 + $0x178] sm:$0xee]  ;;  %v10031_v56 = vld [vmem:[%s13882_s1 + $0x690] sm:$0xff]  }
 0x19b   :  { %6017 = vmatprep.mubr.bf16.mxu1 %v8471_v5  ;;  %v9036_v61 = vpop.f32.mrf.mxu0  ;;  %v12834_v16 = vsel %vm10334_vm3, %v12760_v55, %v12762_v59  ;;  %v12838_v45 = vsel %vm10633_vm6, %v8426_v30, %v5746_v22  ;;  %v12842_v35 = vsel %vm10633_vm6, %v8427_v26, %v5750_v43  ;;  %v5304_v5 = vshll.u32 %v12791_v40, 16  ;;  %9525 = vmatprep.subr.bf16.mxu0 %v10026_v9  ;;  %v10032_v55 = vld [vmem:[%s13882_s1 + $0x640] sm:$0xff]   ;;  %v5124_v26 = vld [vmem:[#allocation2 + $0xd8] sm:$0xff]  ;;  %v10034_v43 = vld [vmem:[%s13882_s1 + $0x6c8] sm:$0xff]  }
 0x19c   :  { %9586 = vmatpush3.bf16.msra.mxu1 %v10029_v44  ;;  %v12853_v59 = vadd.f32 %v9098_v47, %v3009_v4  ;;  %v9037_v13 = vadd.f32 %v9036_v61, %v9035_v58  ;;  %v5301_v52 = vor.u32 %v12808_v8, %v12806_v28  ;;  %v5318_v30 = vshll.u32 %v12796_v6, 16  ;;  %v842_v22 = vld [vmem:[#allocation2 + $0x110] sm:$0x11]  ;;  %v9103_v44 = vpop.f32.mrf.mxu1  ;;  %v12874_v36 = vld [vmem:[#allocation2 + $0x150] sm:$0xee] }
 0x19d   :  { %9587 = vmatprep.subr.bf16.mxu1 %v10030_v41  ;;  %5600 = vmatmul.mubr.bf16.gmra.mxu0 %v8390_v34  ;;  %v9038_v9 = vpop.f32.mrf.mxu0  ;;  %v5315_v47 = vor.u32 %v12822_v60, %v12820_v42  ;;  %v13970_v7 = vrot.slane %v12213_v39, 4  ;;  %v5323_v8 = vshrl.u32 %v12827_v53, 16  ;;  %v5326_v41 = vshll.u32 %v12827_v53, 16  ;;  %v10033_v39 = vld [vmem:[%s13882_s1 + $0x600] sm:$0xff]   ;;  %v10035_v42 = vld [vmem:[%s13882_s1 + $0x688] sm:$0xff]  }
 0x19e   :  { %v3010_v27 = vadd.f32 %v9037_v13, %v12336_v2  ;;  %5607 = vmatprep.mubr.bf16.mxu0 %v8393_v1  ;;  %v9104_v58 = vadd.f32 %v9103_v44, %v9102_v24  ;;  %v12872_v34 = vsel %vm10334_vm3, %v5288_v48, %v5292_v51  ;;  %9526 = vmatpush3.bf16.msra.mxu0 %v10027_v0  ;;  %v9105_v2 = vpop.f32.mrf.mxu1  ;;  %v5306_v53 = vrot.slane %v5304_v5, 5  ;;  %v10038_v0 = vld [vmem:[%s13882_s1 + $0x778] sm:$0xff]   ;;  %v10036_v5 = vld [vmem:[%s13882_s1 + $0x6c0] sm:$0xff]  }
 0x19f   :  { %v843_v28 = vsel %vm10255_vm8, %v13970_v7, %v842_v22  ;;  %v9039_v60 = vpop.f32.mrf.mxu0  ;;  %v8475_v1 = vcombine.high %v12838_v45, %v12842_v35  ;;  %v5337_v4 = vshrl.u32 %v5124_v26, 16  ;;  %v5340_v48 = vshll.u32 %v5124_v26, 16  ;;  %9527 = vmatprep.subr.bf16.mxu0 %v10032_v55  ;;  %v12890_v22 = vld [vmem:[#allocation2 + $0x30] sm:$0x11]  ;;  %v12895_v26 = vld [vmem:[#allocation2 + $0x148] sm:$0xff] }
 0x1a0   :  { %844 = vst [vmem:[#allocation2 + $0x110] sm:$0x11] %v843_v28  ;;  %9588 = vmatpush3.bf16.msra.mxu1 %v10031_v56  ;;  %v12887_v51 = vadd.f32 %v9101_v62, %v3010_v27  ;;  %v9040_v61 = vadd.f32 %v9039_v60, %v9038_v9  ;;  %v5302_v24 = vrot.slane %v5301_v52, 4  ;;  %v8428_v13 = vrot.slane %v12845_v46, 9  ;;  %v9106_v62 = vpop.f32.mrf.mxu1  ;;  %v12900_v46 = vld [vmem:[#allocation2 + $0x1e8] sm:$0xff] }
 0x1a1   :  { %9589 = vmatprep.subr.bf16.mxu1 %v10034_v43  ;;  %v9041_v56 = vpop.f32.mrf.mxu0  ;;  %v5316_v55 = vrot.slane %v5315_v47, 4  ;;  %v5320_v9 = vrot.slane %v5318_v30, 5  ;;  %v5325_v52 = vrot.slane %v5323_v8, 4  ;;  %v5328_v44 = vrot.slane %v5326_v41, 5 }
 0x1a2   :  { %6018 = vmatmul.mubr.bf16.gmra.mxu1 %v8470_v38  ;;  %v3011_v43 = vadd.f32 %v9040_v61, %v12382_v15  ;;  %v9107_v7 = vadd.f32 %v9106_v62, %v9105_v2  ;;  %v8395_v28 = vcombine.high %v12834_v16, %v12872_v34  ;;  %v5754_v11 = vrot.slane %v12791_v40, 5  ;;  %9528 = vmatpush3.bf16.msra.mxu0 %v10033_v39  ;;  %v9108_v30 = vpop.f32.mrf.mxu1 }
 0x1a3   :  { %6025 = vmatprep.mubr.bf16.mxu1 %v8473_v33  ;;  %v9042_v38 = vpop.f32.mrf.mxu0  ;;  %v8429_v47 = vrot.slane %v12874_v36, 9  ;;  %v5758_v15 = vrot.slane %v12796_v6, 5  ;;  %v5339_v8 = vrot.slane %v5337_v4, 4  ;;  %v5342_v41 = vrot.slane %v5340_v48, 5  ;;  %9641 = vmatprep.subr.bf16.mxu0 %v10038_v0 }
 0x1a4   :  { %9590 = vmatpush3.bf16.msra.mxu1 %v10035_v42  ;;  %v12914_v33 = vadd.f32 %v9104_v58, %v3011_v43  ;;  %v9043_v27 = vadd.f32 %v9042_v38, %v9041_v56  ;;  %v12918_v40 = vsel %vm10334_vm3, %v5302_v24, %v5306_v53  ;;  %v5332_v39 = vshll.u32 %v12890_v22, 16  ;;  %v9109_v6 = vpop.f32.mrf.mxu1 }
 0x1a5   :  { %9591 = vmatprep.subr.bf16.mxu1 %v10036_v5  ;;  %5608 = vmatmul.mubr.bf16.gmra.mxu0 %v8392_v18  ;;  %v9044_v36 = vpop.f32.mrf.mxu0  ;;  %v12926_v42 = vsel %vm10334_vm3, %v5316_v55, %v5320_v9  ;;  %v5329_v60 = vor.u32 %v5328_v44, %v5325_v52  ;;  %v6446_v2 = vshrl.u32 %v12895_v26, 16  ;;  %v6449_v53 = vshll.u32 %v12895_v26, 16  ;;  %v5670_v5 = vld [vmem:[#allocation2 + $0x118] sm:$0xee]  ;;  %v12944_v52 = vld [vmem:[#allocation2 + $0x20] sm:$0x11] }
 0x1a6   :  { %v3012_v4 = vadd.f32 %v9043_v27, %v12409_v63  ;;  %5615 = vmatprep.mubr.bf16.mxu0 %v8395_v28  ;;  %v9110_v48 = vadd.f32 %v9109_v6, %v9108_v30  ;;  %v6460_v17 = vshrl.u32 %v12900_v46, 16  ;;  %v6463_v32 = vshll.u32 %v12900_v46, 16  ;;  %v9111_v55 = vpop.f32.mrf.mxu1  ;;  %v12955_v44 = vld [vmem:[#allocation2 + $0xd8] sm:$0xee] }
 0x1a7   :  { %v12928_v58 = vld [vmem:[#allocation2 + $0x110] sm:$0x11]  ;;  %v9045_v18 = vpop.f32.mrf.mxu0  ;;  %v8394_v0 = vcombine.low %v12834_v16, %v12872_v34  ;;  %v5343_v61 = vor.u32 %v5342_v41, %v5339_v8  ;;  %v12942_v63 = vsel %vm10633_vm6, %v8428_v13, %v5754_v11  ;;  %v5334_v9 = vrot.slane %v5332_v39, 5  ;;  %v13971_v13 = vld [vmem:[#allocation6_spill] sm:$0xff] }
 0x1a8   :  { %v5346_v24 = vshll.u32 %v12928_v58, 16  ;;  %9592 = vmatpush3.bf16.msra.mxu1 %v10037_v19  ;;  %v12938_v56 = vadd.f32 %v9107_v7, %v3012_v4  ;;  %v9046_v62 = vadd.f32 %v9045_v18, %v9044_v36  ;;  %v8397_v16 = vcombine.high %v12918_v40, %v12926_v42  ;;  %v9112_v20 = vpop.f32.mrf.mxu1 }
 0x1a9   :  { %v12953_v34 = vsel %vm10633_vm6, %v8429_v47, %v5758_v15  ;;  %v6448_v43 = vrot.slane %v6446_v2, 4  ;;  %v6451_v7 = vrot.slane %v6449_v53, 5  ;;  %v9047_v11 = vpop.f32.mrf.mxu0  ;;  %v5330_v25 = vrot.slane %v5329_v60, 4 }
 0x1aa   :  { %6026 = vmatmul.mubr.bf16.gmra.mxu1 %v8472_v10  ;;  %v3013_v28 = vadd.f32 %v9046_v62, %v13971_v13  ;;  %v12961_v10 = vld [vmem:[#allocation2 + $0x60] sm:$0x11]  ;;  %v6462_v19 = vrot.slane %v6460_v17, 4  ;;  %v6465_v38 = vrot.slane %v6463_v32, 5  ;;  %v8474_v30 = vcombine.low %v12838_v45, %v12842_v35  ;;  %v9114_v39 = vpop.f32.mrf.mxu1  ;;  %v12972_v35 = vld [vmem:[#allocation2 + $0xc8] sm:$0xff] }
 0x1ab   :  { %6033 = vmatprep.mubr.bf16.mxu1 %v8475_v1  ;;  %v9113_v47 = vadd.f32 %v9112_v20, %v9111_v55  ;;  %v5344_v15 = vrot.slane %v5343_v61, 4  ;;  %v5348_v8 = vrot.slane %v5346_v24, 5  ;;  %v9048_v27 = vpop.f32.mrf.mxu0  ;;  %v8430_v36 = vrot.slane %v5670_v5, 9  ;;  %v12987_v55 = vld [vmem:[#allocation2 + $0x198] sm:$0xff] }
 0x1ac   :  { %v12965_v41 = vadd.f32 %v9110_v48, %v3013_v28  ;;  %v5762_v6 = vrot.slane %v12890_v22, 5  ;;  %v6455_v1 = vshll.u32 %v12944_v52, 16  ;;  %v9049_v60 = vadd.f32 %v9048_v27, %v9047_v11  ;;  %v9115_v17 = vpop.f32.mrf.mxu1  ;;  %v130_v20 = vld [vmem:[#allocation2 + $0x78] sm:$0x11] }
 0x1ad   :  { %5616 = vmatmul.mubr.bf16.gmra.mxu0 %v8394_v0  ;;  %v8477_v2 = vcombine.high %v12942_v63, %v12953_v34  ;;  %v6452_v53 = vor.u32 %v6451_v7, %v6448_v43  ;;  %v6469_v45 = vshll.u32 %v12961_v10, 16  ;;  %v9050_v4 = vpop.f32.mrf.mxu0  ;;  %v8396_v48 = vcombine.low %v12918_v40, %v12926_v42  ;;  %v13972_v0 = vld [vmem:[#allocation7_spill] sm:$0xff] }
 0x1ae   :  { %5623 = vmatprep.mubr.bf16.mxu0 %v8397_v16  ;;  %v12978_v22 = vsel %vm10334_vm3, %v5330_v25, %v5334_v9  ;;  %v8431_v32 = vrot.slane %v12955_v44, 9  ;;  %v6466_v18 = vor.u32 %v6465_v38, %v6462_v19  ;;  %v3014_v61 = vadd.f32 %v9049_v60, %v13972_v0  ;;  %v65_v40 = vld [vmem:[#allocation2 + $0x68] sm:$0x11]  ;;  %v9117_v16 = vpop.f32.mrf.mxu1 }
 0x1af   :  { %v9116_v24 = vadd.f32 %v9115_v17, %v9114_v39  ;;  %v12984_v5 = vsel %vm10334_vm3, %v5344_v15, %v5348_v8  ;;  %v5766_v62 = vrot.slane %v12928_v58, 5  ;;  %v9051_v42 = vpop.f32.mrf.mxu0  ;;  %v12991_v9 = vsel %vm10633_vm6, %v8430_v36, %v5762_v6  ;;  %v13014_v17 = vld [vmem:[#allocation2 + $0x18] sm:$0xff] }
 0x1b0   :  { %v6457_v44 = vrot.slane %v6455_v1, 5  ;;  %v6474_v43 = vshrl.u32 %v12972_v35, 16  ;;  %v6477_v7 = vshll.u32 %v12972_v35, 16  ;;  %v12995_v13 = vadd.f32 %v9113_v47, %v3014_v61  ;;  %v9118_v19 = vpop.f32.mrf.mxu1 }
 0x1b1   :  { %v9052_v28 = vadd.f32 %v9051_v42, %v9050_v4  ;;  %v6453_v11 = vrot.slane %v6452_v53, 4  ;;  %v6471_v58 = vrot.slane %v6469_v45, 5  ;;  %v9053_v25 = vpop.f32.mrf.mxu0  ;;  %v8399_v38 = vcombine.high %v12978_v22, %v12984_v5  ;;  %v13029_v42 = vld [vmem:[#allocation2 + $0x1c8] sm:$0x11] }
 0x1b2   :  { %6034 = vmatmul.mubr.bf16.gmra.mxu1 %v8474_v30  ;;  %v6467_v15 = vrot.slane %v6466_v18, 4  ;;  %v6488_v8 = vshrl.u32 %v12987_v55, 16  ;;  %v6491_v27 = vshll.u32 %v12987_v55, 16  ;;  %v9119_v30 = vadd.f32 %v9118_v19, %v9117_v16  ;;  %v9120_v1 = vpop.f32.mrf.mxu1  ;;  %v13031_v16 = vld [vmem:[#allocation2 + $0x160] sm:$0x11] }
 0x1b3   :  { %6041 = vmatprep.mubr.bf16.mxu1 %v8477_v2  ;;  %v3015_v39 = vadd.f32 %v9052_v28, %v12485_v21  ;;  %v13004_v47 = vsel %vm10633_vm6, %v8431_v32, %v5766_v62  ;;  %v66_v36 = vsel %vm10255_vm8, 0, %v65_v40  ;;  %v9054_v6 = vpop.f32.mrf.mxu0  ;;  %v6476_v60 = vrot.slane %v6474_v43, 4  ;;  %v13018_v40 = vld [vmem:[#allocation2 + $0x140] sm:$0xff] }
 0x1b4   :  { %v6479_v2 = vrot.slane %v6477_v7, 5  ;;  %67 = vst [vmem:[#allocation2 + $0x68] sm:$0x11] %v66_v36  ;;  %v131_v53 = vsel %vm10274_vm13, 0, %v130_v20  ;;  %v8476_v21 = vcombine.low %v12942_v63, %v12953_v34  ;;  %v9055_v4 = vadd.f32 %v9054_v6, %v9053_v25  ;;  %v9121_v18 = vpop.f32.mrf.mxu1 }
 0x1b5   :  { %v13010_v45 = vadd.f32 %v9116_v24, %v3015_v39  ;;  %5624 = vmatmul.mubr.bf16.gmra.mxu0 %v8396_v48  ;;  %132 = vst [vmem:[#allocation2 + $0x78] sm:$0x11] %v131_v53  ;;  %v9056_v32 = vpop.f32.mrf.mxu0  ;;  %v8479_v0 = vcombine.high %v12991_v9, %v13004_v47  ;;  %v6490_v61 = vrot.slane %v6488_v8, 4  ;;  %v6493_v62 = vrot.slane %v6491_v27, 5 }
 0x1b6   :  { %5631 = vmatprep.mubr.bf16.mxu0 %v8399_v38  ;;  %v3016_v24 = vadd.f32 %v9055_v4, %v12510_v3  ;;  %v9122_v48 = vadd.f32 %v9121_v18, %v9120_v1  ;;  %v13023_v63 = vsel %vm10334_vm3, %v6453_v11, %v6457_v44  ;;  %v13027_v34 = vsel %vm10334_vm3, %v6467_v15, %v6471_v58  ;;  %v9123_v8 = vpop.f32.mrf.mxu1 }
 0x1b7   :  { %v9057_v43 = vpop.f32.mrf.mxu0  ;;  %v8398_v7 = vcombine.low %v12978_v22, %v12984_v5  ;;  %v6480_v28 = vor.u32 %v6479_v2, %v6476_v60  ;;  %v6502_v3 = vshrl.u32 %v13014_v17, 16  ;;  %v6505_v20 = vshll.u32 %v13014_v17, 16 }
 0x1b8   :  { %v13037_v44 = vadd.f32 %v9119_v30, %v3016_v24  ;;  %v9058_v11 = vadd.f32 %v9057_v43, %v9056_v32  ;;  %v6516_v58 = vshrl.u32 %v13018_v40, 16  ;;  %v6519_v25 = vshll.u32 %v13018_v40, 16  ;;  %v13050_v30 = vld [vmem:[#allocation2 + $0x218] sm:$0x11] }
 0x1b9   :  { %v8529_v19 = vcombine.high %v12895_v26, %v12900_v46  ;;  %v6483_v38 = vshll.u32 %v13029_v42, 16  ;;  %v6494_v22 = vor.u32 %v6493_v62, %v6490_v61  ;;  %v6497_v5 = vshll.u32 %v13031_v16, 16  ;;  %13973 = vst [vmem:[#allocation9_spill] sm:$0xff] %v13050_v30 }
 0x1ba   :  { %6042 = vmatmul.mubr.bf16.gmra.mxu1 %v8476_v21  ;;  %v3017_v15 = vadd.f32 %v9058_v11, %v12532_v12  ;;  %v8478_v27 = vcombine.low %v12991_v9, %v13004_v47  ;;  %v8593_v39 = vcombine.high %v13023_v63, %v13027_v34  ;;  %v6504_v36 = vrot.slane %v6502_v3, 4 }
 0x1bb   :  { %6049 = vmatprep.mubr.bf16.mxu1 %v8479_v0  ;;  %v6507_v6 = vrot.slane %v6505_v20, 5 }
 0x1bc   :  { %10 = vsyncpa [#allocation4], 0  ;;  %v9059_v1 = vpop.f32.mrf.mxu0  ;;  %v13052_v60 = vadd.f32 %v9122_v48, %v3017_v15  ;;  %v9124_v2 = vpop.f32.mrf.mxu1  ;;  %v6481_v53 = vrot.slane %v6480_v28, 4  ;;  %v13054_v21 = vld [vmem:[#allocation2 + $0x120] sm:$0x11]  ;;  %v6518_v12 = vrot.slane %v6516_v58, 4  ;;  %v8528_v24 = vcombine.low %v12895_v26, %v12900_v46 }
 0x1bd   :  { %5632 = vmatmul.mubr.bf16.gmra.mxu0 %v8398_v7  ;;  %13974 = vst [vmem:[#allocation11_spill] sm:$0xff] %v13054_v21  ;;  %v6521_v4 = vrot.slane %v6519_v25, 5  ;;  %v9125_v32 = vadd.f32 %v9124_v2, %v9123_v8  ;;  %v6485_v9 = vrot.slane %v6483_v38, 5  ;;  %v6495_v47 = vrot.slane %v6494_v22, 4  ;;  %v13056_v0 = vld [vmem:[#allocation2 + $0x158] sm:$0xff]  ;;  %v13064_v20 = vld [vmem:[#allocation2 + $0x68] sm:$0xff] }
 0x1be   :  { %6332 = vmatprep.mubr.bf16.mxu0 %v8529_v19  ;;  %v6499_v18 = vrot.slane %v6497_v5, 5  ;;  %v9060_v61 = vpop.f32.mrf.mxu0  ;;  %v9126_v62 = vpop.f32.mrf.mxu1  ;;  %v6511_v48 = vshll.u32 %v13050_v30, 16  ;;  %v6508_v28 = vor.u32 %v6507_v6, %v6504_v36  ;;  %v6525_v3 = vshll.u32 %v13054_v21, 16  ;;  %v13975_v38 = vld [vmem:[#allocation8_spill] sm:$0xff]  ;;  %v10039_v15 = vld [vmem:[%s13882_s1 + $0x738] sm:$0xff]   ;;  %v13097_v7 = vld [vmem:[#allocation2 + $0xa0] sm:$0xff] }
 0x1bf   :  { %v9061_v43 = vadd.f32 %v9060_v61, %v9059_v1  ;;  %v8531_v25 = vcombine.high %v12972_v35, %v12987_v55  ;;  %v6522_v19 = vor.u32 %v6521_v4, %v6518_v12  ;;  %v6530_v26 = vshrl.u32 %v13056_v0, 16  ;;  %v13978_v21 = vld [vmem:[#allocation10_spill] sm:$0xff] }
 0x1c0   :  { %v9062_v11 = vpop.f32.mrf.mxu0  ;;  %v9127_v58 = vpop.f32.mrf.mxu1  ;;  %v6533_v46 = vshll.u32 %v13056_v0, 16  ;;  %v13076_v8 = vsel %vm10334_vm3, %v6481_v53, %v6485_v9  ;;  %v8592_v6 = vcombine.low %v13023_v63, %v13027_v34  ;;  %v6513_v2 = vrot.slane %v6511_v48, 5  ;;  %v13089_v53 = vld [vmem:[#allocation2 + $0x130] sm:$0xff] }
 0x1c1   :  { %v3018_v22 = vadd.f32 %v9061_v43, %v13975_v38  ;;  %v9128_v5 = vadd.f32 %v9127_v58, %v9126_v62  ;;  %v6544_v12 = vshrl.u32 %v13064_v20, 16  ;;  %v6547_v4 = vshll.u32 %v13064_v20, 16  ;;  %v13093_v62 = vld [vmem:[#allocation2 + $0x248] sm:$0x11] }
 0x1c2   :  { %6050 = vmatmul.mubr.bf16.gmra.mxu1 %v8478_v27  ;;  %v13080_v27 = vsel %vm10334_vm3, %v6495_v47, %v6499_v18  ;;  %v9063_v36 = vpop.f32.mrf.mxu0  ;;  %v9209_v1 = vpop.f32.mrf.mxu1  ;;  %v6509_v18 = vrot.slane %v6508_v28, 4  ;;  %v6527_v61 = vrot.slane %v6525_v3, 5  ;;  %13977 = vst [vmem:[#allocation13_spill] sm:$0xff] %v13093_v62  ;;  %v6523_v48 = vrot.slane %v6522_v19, 4  ;;  %v10043_v28 = vld [vmem:[%s13882_s1 + $0x730] sm:$0xff]  }
 0x1c3   :  { %6894 = vmatprep.mubr.bf16.mxu1 %v8593_v39  ;;  %v10042_v39 = vld [vmem:[%s13882_s1 + $0x770] sm:$0xff]   ;;  %v13091_v9 = vadd.f32 %v9125_v32, %v3018_v22  ;;  %v9064_v47 = vadd.f32 %v9063_v36, %v9062_v11  ;;  %v8595_v43 = vcombine.high %v13076_v8, %v13080_v27  ;;  %v6532_v58 = vrot.slane %v6530_v26, 4 }
 0x1c4   :  { %v9145_v63 = vpop.f32.mrf.mxu0  ;;  %v9210_v34 = vpop.f32.mrf.mxu1  ;;  %v6535_v38 = vrot.slane %v6533_v46, 5  ;;  %v6561_v3 = vshll.u32 %v13089_v53, 16  ;;  %v6546_v26 = vrot.slane %v6544_v12, 4  ;;  %v6549_v46 = vrot.slane %v6547_v4, 5 }
 0x1c5   :  { %13976 = vst [vmem:[#allocation12_spill] sm:$0xff] %v13091_v9  ;;  %6333 = vmatmul.mubr.bf16.vlgmr.msra.gmra.mxu0 %v8528_v24  ;;  %v3019_v30 = vadd.f32 %v9064_v47, %v13978_v21  ;;  %v9211_v32 = vadd.f32 %v9210_v34, %v9209_v1  ;;  %v6558_v24 = vshrl.u32 %v13089_v53, 16  ;;  %v10046_v21 = vld [vmem:[%s13882_s1 + $0x768] sm:$0xff]   ;;  %v13113_v1 = vld [vmem:[#allocation2 + $0x78] sm:$0x11]  ;;  %v6572_v47 = vshrl.u32 %v13097_v7, 16 }
 0x1c6   :  { %9642 = vmatpush3.bf16.msra.mxu0 %v10039_v15  ;;  %6340 = vmatprep.mubr.bf16.mxu0 %v8531_v25  ;;  %v9146_v11 = vpop.f32.mrf.mxu0  ;;  %v9212_v22 = vpop.f32.mrf.mxu1  ;;  %v6539_v25 = vshll.u32 %v13093_v62, 16  ;;  %13980 = vst [vmem:[#allocation15_spill] sm:$0xff] %v13113_v1  ;;  %v8533_v9 = vcombine.high %v13014_v17, %v13018_v40  ;;  %v13121_v62 = vsel %vm10334_vm3, %v6509_v18, %v6513_v2 }
 0x1c7   :  { %9643 = vmatprep.subr.bf16.mxu0 %v10042_v39  ;;  %v13111_v15 = vadd.f32 %v9128_v5, %v3019_v30  ;;  %v9147_v36 = vadd.f32 %v9146_v11, %v9145_v63  ;;  %v6575_v39 = vshll.u32 %v13097_v7, 16  ;;  %v13125_v30 = vsel %vm10334_vm3, %v6523_v48, %v6527_v61  ;;  %v13131_v63 = vld [vmem:[#allocation2 + $0xe0] sm:$0x11] }
 0x1c8   :  { %v9148_v34 = vpop.f32.mrf.mxu0  ;;  %v9213_v19 = vpop.f32.mrf.mxu1  ;;  %v6536_v5 = vor.u32 %v6535_v38, %v6532_v58  ;;  %13981 = vst [vmem:[#allocation16_spill] sm:$0xff] %v13131_v63  ;;  %v6560_v11 = vrot.slane %v6558_v24, 4  ;;  %v8594_v18 = vcombine.low %v13076_v8, %v13080_v27  ;;  %v6550_v48 = vor.u32 %v6549_v46, %v6546_v26 }
 0x1c9   :  { %13979 = vst [vmem:[#allocation14_spill] sm:$0xff] %v13111_v15  ;;  %v3760_v12 = vadd.f32 %v9147_v36, %v12639_v23  ;;  %v9214_v4 = vadd.f32 %v9213_v19, %v9212_v22  ;;  %v6563_v15 = vrot.slane %v6561_v3, 5  ;;  %v10050_v23 = vld [vmem:[%s13882_s1 + $0x760] sm:$0xff]   ;;  %v6553_v58 = vshll.u32 %v13113_v1, 16  ;;  %v13141_v22 = vld [vmem:[#allocation2 + $0x58] sm:$0x11] }
 0x1ca   :  { %6895 = vmatmul.mubr.bf16.vlgmr.msra.gmra.mxu1 %v8592_v6  ;;  %9644 = vmatpush3.bf16.msra.mxu0 %v10043_v28  ;;  %v10047_v6 = vld [vmem:[%s13882_s1 + $0x728] sm:$0xff]   ;;  %v9149_v2 = vpop.f32.mrf.mxu0  ;;  %v9215_v61 = vpop.f32.mrf.mxu1  ;;  %13982 = vst [vmem:[#allocation6_spill] sm:$0xff] %v13141_v22  ;;  %v6574_v24 = vrot.slane %v6572_v47, 4  ;;  %v6577_v3 = vrot.slane %v6575_v39, 5  ;;  %v13143_v19 = vld [vmem:[#allocation2 + $0x1d0] sm:$0xff]  ;;  %v13983_v27 = vcombine.low %v12972_v35, %v12987_v55  ;;  %v6537_v26 = vrot.slane %v6536_v5, 4 }
 0x1cb   :  { %6902 = vmatprep.mubr.bf16.mxu1 %v8595_v43  ;;  %9645 = vmatprep.subr.bf16.mxu0 %v10046_v21  ;;  %v6541_v43 = vrot.slane %v6539_v25, 5  ;;  %v13139_v38 = vadd.f32 %v9211_v32, %v3760_v12  ;;  %v9150_v28 = vadd.f32 %v9149_v2, %v9148_v34  ;;  %v8597_v25 = vcombine.high %v13121_v62, %v13125_v30  ;;  %v10051_v35 = vld [vmem:[%s13882_s1 + $0x720] sm:$0xff]   ;;  %v10054_v55 = vld [vmem:[%s13882_s1 + $0x758] sm:$0xff]  }
 0x1cc   :  { %v9151_v8 = vpop.f32.mrf.mxu0  ;;  %v9216_v21 = vpop.f32.mrf.mxu1  ;;  %v8535_v32 = vcombine.high %v13056_v0, %v13064_v20  ;;  %v6567_v46 = vshll.u32 %v13131_v63, 16  ;;  %v6564_v39 = vor.u32 %v6563_v15, %v6560_v11  ;;  %v13160_v34 = vld [vmem:[#allocation2 + $0x220] sm:$0xff]  ;;  %v6551_v2 = vrot.slane %v6550_v48, 4  ;;  %v160_v1 = vld [vmem:[#allocation2 + $0xf8] sm:$0x11] }
 0x1cd   :  { %6341 = vmatmul.mubr.bf16.gmra.mxu0 %v13983_v27  ;;  %v3761_v36 = vadd.f32 %v9150_v28, %v12666_v57  ;;  %v9217_v47 = vadd.f32 %v9216_v21, %v9215_v61  ;;  %v6555_v27 = vrot.slane %v6553_v58, 5  ;;  %v6581_v57 = vshll.u32 %v13141_v22, 16 }
 0x1ce   :  { %6348 = vmatprep.mubr.bf16.mxu0 %v8533_v9  ;;  %9646 = vmatpush3.bf16.msra.mxu0 %v10047_v6  ;;  %v9152_v12 = vpop.f32.mrf.mxu0  ;;  %v9218_v5 = vpop.f32.mrf.mxu1  ;;  %v6586_v9 = vshrl.u32 %v13143_v19, 16  ;;  %v95_v6 = vld [vmem:[#allocation2 + $0x70] sm:$0x11]  ;;  %v6578_v21 = vor.u32 %v6577_v3, %v6574_v24  ;;  %v6589_v63 = vshll.u32 %v13143_v19, 16  ;;  %v6569_v48 = vrot.slane %v6567_v46, 5 }
 0x1cf   :  { %9647 = vmatprep.subr.bf16.mxu0 %v10050_v23  ;;  %v13164_v61 = vadd.f32 %v9214_v4, %v3761_v36  ;;  %v9153_v28 = vadd.f32 %v9152_v12, %v9151_v8  ;;  %v13169_v23 = vsel %vm10334_vm3, %v6537_v26, %v6541_v43  ;;  %v6600_v58 = vshrl.u32 %v13160_v34, 16 }
 0x1d0   :  { %v9154_v15 = vpop.f32.mrf.mxu0  ;;  %v9219_v11 = vpop.f32.mrf.mxu1  ;;  %v6603_v22 = vshll.u32 %v13160_v34, 16  ;;  %v6565_v24 = vrot.slane %v6564_v39, 4  ;;  %v96_v3 = vsel %vm10255_vm8, 0, %v95_v6  ;;  %v13181_v26 = vsel %vm10334_vm3, %v6551_v2, %v6555_v27 }
 0x1d1   :  { %v3762_v4 = vadd.f32 %v9153_v28, %v12713_v14  ;;  %v9220_v36 = vadd.f32 %v9219_v11, %v9218_v5  ;;  %v6583_v46 = vrot.slane %v6581_v57, 5  ;;  %v10058_v14 = vld [vmem:[%s13882_s1 + $0x750] sm:$0xff]   ;;  %97 = vst [vmem:[#allocation2 + $0x70] sm:$0x11] %v96_v3  ;;  %v6579_v12 = vrot.slane %v6578_v21, 4  ;;  %v10062_v11 = vld [vmem:[%s13882_s1 + $0x748] sm:$0xff]  }
 0x1d2   :  { %6903 = vmatmul.mubr.bf16.gmra.mxu1 %v8594_v18  ;;  %9648 = vmatpush3.bf16.msra.mxu0 %v10051_v35  ;;  %v10055_v18 = vld [vmem:[%s13882_s1 + $0x718] sm:$0xff]   ;;  %v9155_v43 = vpop.f32.mrf.mxu0  ;;  %v9221_v8 = vpop.f32.mrf.mxu1  ;;  %v161_v35 = vsel %vm10274_vm13, 0, %v160_v1  ;;  %v13190_v5 = vld [vmem:[#allocation2 + $0x180] sm:$0x11]  ;;  %v6591_v6 = vrot.slane %v6589_v63, 5  ;;  %v8596_v27 = vcombine.low %v13121_v62, %v13125_v30  ;;  %v6605_v49 = vrot.slane %v6603_v22, 5 }
 0x1d3   :  { %6910 = vmatprep.mubr.bf16.mxu1 %v8597_v25  ;;  %9649 = vmatprep.subr.bf16.mxu0 %v10054_v55  ;;  %v6588_v25 = vrot.slane %v6586_v9, 4  ;;  %v13188_v39 = vadd.f32 %v9217_v47, %v3762_v4  ;;  %v9156_v37 = vadd.f32 %v9155_v43, %v9154_v15  ;;  %162 = vst [vmem:[#allocation2 + $0xf8] sm:$0x11] %v161_v35  ;;  %v6602_v9 = vrot.slane %v6600_v58, 4  ;;  %v13200_v63 = vld [vmem:[#allocation2 + $0x210] sm:$0x11] }
 0x1d4   :  { %v9157_v2 = vpop.f32.mrf.mxu0  ;;  %v13984_v55 = vcombine.low %v13014_v17, %v13018_v40  ;;  %v9222_v57 = vpop.f32.mrf.mxu1  ;;  %v8599_v28 = vcombine.high %v13169_v23, %v13181_v26  ;;  %v10059_v17 = vld [vmem:[%s13882_s1 + $0x710] sm:$0xff]   ;;  %v8534_v22 = vcombine.low %v13056_v0, %v13064_v20  ;;  %v6595_v21 = vshll.u32 %v13190_v5, 16  ;;  %v13216_v15 = vld [vmem:[#allocation2 + $0x208] sm:$0xff] }
 0x1d5   :  { %v3763_v1 = vadd.f32 %v9156_v37, %v12770_v50  ;;  %v9223_v47 = vadd.f32 %v9222_v57, %v9221_v8  ;;  %v13205_v40 = vld [vmem:[#allocation2 + $0x190] sm:$0xff]  ;;  %v8537_v50 = vcombine.high %v13089_v53, %v13097_v7  ;;  %v13225_v0 = vsel %vm10334_vm3, %v6579_v12, %v6583_v46 }
 0x1d6   :  { %6349 = vmatmul.mubr.bf16.gmra.mxu0 %v13984_v55  ;;  %v9158_v62 = vpop.f32.mrf.mxu0  ;;  %v9224_v30 = vpop.f32.mrf.mxu1  ;;  %v6592_v20 = vor.u32 %v6591_v6, %v6588_v25  ;;  %v6609_v3 = vshll.u32 %v13200_v63, 16  ;;  %v6614_v43 = vshrl.u32 %v13205_v40, 16  ;;  %v6617_v8 = vshll.u32 %v13205_v40, 16  ;;  %v10063_v25 = vld [vmem:[%s13882_s1 + $0x708] sm:$0xff]  }
 0x1d7   :  { %6356 = vmatprep.mubr.bf16.mxu0 %v8535_v32  ;;  %9650 = vmatpush3.bf16.msra.mxu0 %v10055_v18  ;;  %v13213_v32 = vsel %vm10334_vm3, %v6565_v24, %v6569_v48  ;;  %v13221_v58 = vadd.f32 %v9220_v36, %v3763_v1  ;;  %v9159_v4 = vadd.f32 %v9158_v62, %v9157_v2  ;;  %v6628_v35 = vshrl.u32 %v13216_v15, 16 }
 0x1d8   :  { %9651 = vmatprep.subr.bf16.mxu0 %v10058_v14  ;;  %v9160_v48 = vpop.f32.mrf.mxu0  ;;  %v9225_v24 = vpop.f32.mrf.mxu1  ;;  %v6606_v18 = vor.u32 %v6605_v49, %v6602_v9  ;;  %v6631_v46 = vshll.u32 %v13216_v15, 16  ;;  %v8598_v12 = vcombine.low %v13169_v23, %v13181_v26  ;;  %v8601_v55 = vcombine.high %v13213_v32, %v13225_v0 }
 0x1d9   :  { %v3764_v14 = vadd.f32 %v9159_v4, %v12804_v31  ;;  %v9226_v36 = vadd.f32 %v9225_v24, %v9224_v30  ;;  %v10066_v31 = vld [vmem:[%s13882_s1 + $0x740] sm:$0xff]   ;;  %v6593_v9 = vrot.slane %v6592_v20, 4  ;;  %v6611_v1 = vrot.slane %v6609_v3, 5 }
 0x1da   :  { %6911 = vmatmul.mubr.bf16.gmra.mxu1 %v8596_v27  ;;  %v9161_v37 = vpop.f32.mrf.mxu0  ;;  %v6597_v27 = vrot.slane %v6595_v21, 5  ;;  %v6607_v49 = vrot.slane %v6606_v18, 4  ;;  %v6616_v23 = vrot.slane %v6614_v43, 4  ;;  %v6630_v62 = vrot.slane %v6628_v35, 4  ;;  %v10067_v21 = vld [vmem:[%s13882_s1 + $0x700] sm:$0xff]  }
 0x1db   :  { %6918 = vmatprep.mubr.bf16.mxu1 %v8599_v28  ;;  %9652 = vmatpush3.bf16.msra.mxu0 %v10059_v17  ;;  %v13241_v6 = vadd.f32 %v9223_v47, %v3764_v14  ;;  %v9162_v2 = vadd.f32 %v9161_v37, %v9160_v48  ;;  %v13245_v28 = vld [vmem:[#allocation2 + $0x230] sm:$0x11]  ;;  %v13248_v17 = vld [vmem:[#allocation2 + $0x1a0] sm:$0x11]  ;;  %v6619_v47 = vrot.slane %v6617_v8, 5  ;;  %v6633_v30 = vrot.slane %v6631_v46, 5 }
 0x1dc   :  { %9653 = vmatprep.subr.bf16.mxu0 %v10062_v11  ;;  %v9163_v57 = vpop.f32.mrf.mxu0  ;;  %v8536_v20 = vcombine.low %v13089_v53, %v13097_v7  ;;  %v13261_v48 = vld [vmem:[#allocation2 + $0x70] sm:$0xff]  ;;  %v13265_v3 = vsel %vm10334_vm3, %v6593_v9, %v6597_v27  ;;  %v13269_v43 = vsel %vm10334_vm3, %v6607_v49, %v6611_v1  ;;  %v6623_v7 = vshll.u32 %v13245_v28, 16 }
 0x1dd   :  { %v3765_v26 = vadd.f32 %v9162_v2, %v12853_v59  ;;  %v8539_v59 = vcombine.high %v13143_v19, %v13160_v34  ;;  %v6637_v53 = vshll.u32 %v13248_v17, 16  ;;  %v6620_v14 = vor.u32 %v6619_v47, %v6616_v23 }
 0x1de   :  { %6357 = vmatmul.mubr.bf16.gmra.mxu0 %v8534_v22  ;;  %v9164_v22 = vpop.f32.mrf.mxu0  ;;  %v6625_v49 = vrot.slane %v6623_v7, 5 }
 0x1df   :  { %6364 = vmatprep.mubr.bf16.mxu0 %v8537_v50  ;;  %9654 = vmatpush3.bf16.msra.mxu0 %v10063_v25  ;;  %v13253_v11 = vadd.f32 %v9226_v36, %v3765_v26  ;;  %v9165_v4 = vadd.f32 %v9164_v22, %v9163_v57  ;;  %v13259_v50 = vld [vmem:[#allocation2 + $0x188] sm:$0xff]  ;;  %v6634_v36 = vor.u32 %v6633_v30, %v6630_v62  ;;  %v6639_v1 = vrot.slane %v6637_v53, 5 }
 0x1e0   :  { %9655 = vmatprep.subr.bf16.mxu0 %v10066_v31  ;;  %v9227_v24 = vpop.f32.mrf.mxu1  ;;  %v9166_v18 = vpop.f32.mrf.mxu0  ;;  %v6642_v25 = vshrl.u32 %v13259_v50, 16  ;;  %v6645_v37 = vshll.u32 %v13259_v50, 16  ;;  %v6659_v31 = vshll.u32 %v13261_v48, 16  ;;  %v6621_v47 = vrot.slane %v6620_v14, 4  ;;  %v13285_v22 = vld [vmem:[#allocation2 + $0x1a8] sm:$0x11] }
 0x1e1   :  { %v3766_v8 = vadd.f32 %v9165_v4, %v12887_v51  ;;  %v8600_v51 = vcombine.low %v13213_v32, %v13225_v0  ;;  %v6635_v62 = vrot.slane %v6634_v36, 4 }
 0x1e2   :  { %6919 = vmatmul.mubr.bf16.gmra.mxu1 %v8598_v12  ;;  %v9228_v35 = vpop.f32.mrf.mxu1  ;;  %v9167_v46 = vpop.f32.mrf.mxu0  ;;  %v6656_v12 = vshrl.u32 %v13261_v48, 16  ;;  %v6644_v4 = vrot.slane %v6642_v25, 4  ;;  %v6661_v32 = vrot.slane %v6659_v31, 5  ;;  %v13298_v36 = vsel %vm10334_vm3, %v6621_v47, %v6625_v49 }
 0x1e3   :  { %6926 = vmatprep.mubr.bf16.mxu1 %v8601_v55  ;;  %9656 = vmatpush3.bf16.msra.mxu0 %v10067_v21  ;;  %v9229_v2 = vadd.f32 %v9228_v35, %v9227_v24  ;;  %v9168_v27 = vadd.f32 %v9167_v46, %v9166_v18  ;;  %v8603_v55 = vcombine.high %v13265_v3, %v13269_v43  ;;  %v13287_v35 = vld [vmem:[#allocation2 + $0xf8] sm:$0x11]  ;;  %v6651_v46 = vshll.u32 %v13285_v22, 16 }
 0x1e4   :  { %v9230_v57 = vpop.f32.mrf.mxu1  ;;  %v9169_v9 = vpop.f32.mrf.mxu0  ;;  %v6658_v24 = vrot.slane %v6656_v12, 4  ;;  %v6640_v12 = vsel %vm10334_vm3, %v6635_v62, %v6639_v1  ;;  %v6665_v31 = vshll.u32 %v13287_v35, 16  ;;  %v6975_v1 = vld [vmem:[#allocation2 + $0x148] sm:$0xee] }
 0x1e5   :  { %v13282_v23 = vadd.f32 %v9229_v2, %v3766_v8  ;;  %v3767_v26 = vadd.f32 %v9168_v27, %v12914_v33  ;;  %v8538_v33 = vcombine.low %v13143_v19, %v13160_v34  ;;  %v8605_v49 = vcombine.high %v13298_v36, %v6640_v12 }
 0x1e6   :  { %6365 = vmatmul.mubr.bf16.gmra.mxu0 %v8536_v20  ;;  %v9231_v30 = vpop.f32.mrf.mxu1  ;;  %v9170_v21 = vpop.f32.mrf.mxu0  ;;  %v6647_v20 = vrot.slane %v6645_v37, 5  ;;  %v6662_v34 = vor.u32 %v6661_v32, %v6658_v24  ;;  %v6976_v32 = vld [vmem:[#allocation2 + $0x1e8] sm:$0xee] }
 0x1e7   :  { %6372 = vmatprep.mubr.bf16.mxu0 %v8539_v59  ;;  %v9232_v0 = vadd.f32 %v9231_v30, %v9230_v57  ;;  %v9171_v18 = vadd.f32 %v9170_v21, %v9169_v9  ;;  %v8541_v59 = vcombine.high %v13205_v40, %v13216_v15  ;;  %v8602_v9 = vcombine.low %v13265_v3, %v13269_v43 }
 0x1e8   :  { %v9233_v7 = vpop.f32.mrf.mxu1  ;;  %v9172_v53 = vpop.f32.mrf.mxu0  ;;  %v6648_v19 = vor.u32 %v6647_v20, %v6644_v4  ;;  %v6653_v30 = vrot.slane %v6651_v46, 5  ;;  %v6663_v21 = vrot.slane %v6662_v34, 4  ;;  %v6667_v4 = vrot.slane %v6665_v31, 5 }
 0x1e9   :  { %v13293_v8 = vadd.f32 %v9232_v0, %v3767_v26  ;;  %v3768_v14 = vadd.f32 %v9171_v18, %v12938_v56  ;;  %v8540_v43 = vcombine.low %v13205_v40, %v13216_v15  ;;  %v8625_v40 = vrot.slane %v6976_v32, 9 }
 0x1ea   :  { %6927 = vmatmul.mubr.bf16.gmra.mxu1 %v8600_v51  ;;  %v9234_v25 = vpop.f32.mrf.mxu1  ;;  %v9173_v37 = vpop.f32.mrf.mxu0  ;;  %v6649_v62 = vrot.slane %v6648_v19, 4  ;;  %v7029_v15 = vrot.slane %v12961_v10, 5  ;;  %v8604_v31 = vcombine.low %v13298_v36, %v6640_v12  ;;  %v7037_v32 = vrot.slane %v13031_v16, 5 }
 0x1eb   :  { %6934 = vmatprep.mubr.bf16.mxu1 %v8603_v55  ;;  %v9235_v2 = vadd.f32 %v9234_v25, %v9233_v7  ;;  %v9174_v27 = vadd.f32 %v9173_v37, %v9172_v53  ;;  %v8543_v53 = vcombine.high %v13259_v50, %v13261_v48  ;;  %v6668_v25 = vsel %vm10334_vm3, %v6663_v21, %v6667_v4 }
 0x1ec   :  { %v9236_v57 = vpop.f32.mrf.mxu1  ;;  %v9175_v56 = vpop.f32.mrf.mxu0  ;;  %v6654_v46 = vsel %vm10334_vm3, %v6649_v62, %v6653_v30  ;;  %v7030_v10 = vsel %vm10633_vm6, %v8625_v40, %v7029_v15  ;;  %v6980_v40 = vld [vmem:[#allocation2 + $0x140] sm:$0xee] }
 0x1ed   :  { %v13306_v51 = vadd.f32 %v9235_v2, %v3768_v14  ;;  %v3769_v55 = vadd.f32 %v9174_v27, %v12965_v41  ;;  %v8624_v41 = vrot.slane %v6975_v1, 9  ;;  %v8607_v27 = vcombine.high %v6654_v46, %v6668_v25  ;;  %v6978_v1 = vld [vmem:[#allocation2 + $0x198] sm:$0xee] }
 0x1ee   :  { %6373 = vmatmul.mubr.bf16.gmra.mxu0 %v8538_v33  ;;  %v9237_v26 = vpop.f32.mrf.mxu1  ;;  %v9176_v47 = vpop.f32.mrf.mxu0  ;;  %v7025_v33 = vrot.slane %v12944_v52, 5 }
 0x1ef   :  { %6380 = vmatprep.mubr.bf16.mxu0 %v8541_v59  ;;  %v9238_v20 = vadd.f32 %v9237_v26, %v9236_v57  ;;  %v9177_v24 = vadd.f32 %v9176_v47, %v9175_v56 }
 0x1f0   :  { %v9239_v0 = vpop.f32.mrf.mxu1  ;;  %v9178_v3 = vpop.f32.mrf.mxu0  ;;  %v7026_v54 = vsel %vm10633_vm6, %v8624_v41, %v7025_v33 }
 0x1f1   :  { %v13312_v18 = vadd.f32 %v9238_v20, %v3769_v55  ;;  %v3770_v7 = vadd.f32 %v9177_v24, %v12995_v13  ;;  %v8673_v62 = vcombine.high %v7026_v54, %v7030_v10  ;;  %v7033_v20 = vrot.slane %v13029_v42, 5 }
 0x1f2   :  { %6935 = vmatmul.mubr.bf16.gmra.mxu1 %v8602_v9  ;;  %v9240_v59 = vpop.f32.mrf.mxu1  ;;  %v9179_v14 = vpop.f32.mrf.mxu0  ;;  %v8627_v24 = vrot.slane %v6978_v1, 9 }
 0x1f3   :  { %6942 = vmatprep.mubr.bf16.mxu1 %v8605_v49  ;;  %v9241_v37 = vadd.f32 %v9240_v59, %v9239_v0  ;;  %v9180_v19 = vadd.f32 %v9179_v14, %v9178_v3  ;;  %v6977_v49 = vld [vmem:[#allocation2 + $0xc8] sm:$0xee]  ;;  %v6979_v14 = vld [vmem:[#allocation2 + $0x18] sm:$0xee] }
 0x1f4   :  { %v9242_v13 = vpop.f32.mrf.mxu1  ;;  %v9181_v34 = vpop.f32.mrf.mxu0  ;;  %v8626_v4 = vrot.slane %v6977_v49, 9  ;;  %v7038_v42 = vsel %vm10633_vm6, %v8627_v24, %v7037_v32  ;;  %v6981_v24 = vld [vmem:[#allocation2 + $0x158] sm:$0xee]  ;;  %v6982_v32 = vld [vmem:[#allocation2 + $0x68] sm:$0xee] }
 0x1f5   :  { %v13324_v2 = vadd.f32 %v9241_v37, %v3770_v7  ;;  %v3771_v52 = vadd.f32 %v9180_v19, %v13010_v45  ;;  %v8542_v45 = vcombine.low %v13259_v50, %v13261_v48  ;;  %v8606_v50 = vcombine.low %v6654_v46, %v6668_v25 }
 0x1f6   :  { %6381 = vmatmul.mubr.bf16.gmra.mxu0 %v8540_v43  ;;  %v9243_v57 = vpop.f32.mrf.mxu1  ;;  %v9182_v56 = vpop.f32.mrf.mxu0  ;;  %v7034_v33 = vsel %vm10633_vm6, %v8626_v4, %v7033_v20  ;;  %v8672_v25 = vcombine.low %v7026_v54, %v7030_v10  ;;  %v13988_v54 = vld [vmem:[#allocation14_spill] sm:$0xff] }
 0x1f7   :  { %6388 = vmatprep.mubr.bf16.mxu0 %v8543_v53  ;;  %v9244_v9 = vadd.f32 %v9243_v57, %v9242_v13  ;;  %v9183_v55 = vadd.f32 %v9182_v56, %v9181_v34  ;;  %v8675_v13 = vcombine.high %v7034_v33, %v7038_v42  ;;  %v8629_v56 = vrot.slane %v6980_v40, 9 }
 0x1f8   :  { %v9245_v26 = vpop.f32.mrf.mxu1  ;;  %v9184_v36 = vpop.f32.mrf.mxu0  ;;  %v8631_v40 = vrot.slane %v6982_v32, 9 }
 0x1f9   :  { %v13333_v12 = vadd.f32 %v9244_v9, %v3771_v52  ;;  %v3772_v47 = vadd.f32 %v9183_v55, %v13037_v44  ;;  %v8628_v52 = vrot.slane %v6979_v14, 9  ;;  %v13987_v9 = vld [vmem:[#allocation11_spill] sm:$0xff] }
 0x1fa   :  { %6943 = vmatmul.mubr.bf16.gmra.mxu1 %v8604_v31  ;;  %v9246_v30 = vpop.f32.mrf.mxu1  ;;  %v9185_v21 = vpop.f32.mrf.mxu0  ;;  %v7045_v55 = vrot.slane %v13987_v9, 5  ;;  %v6984_v9 = vld [vmem:[#allocation2 + $0xa0] sm:$0xee] }
 0x1fb   :  { %6950 = vmatprep.mubr.bf16.mxu1 %v8607_v27  ;;  %v9247_v0 = vadd.f32 %v9246_v30, %v9245_v26  ;;  %v9186_v3 = vadd.f32 %v9185_v21, %v9184_v36  ;;  %v13986_v27 = vld [vmem:[#allocation9_spill] sm:$0xff] }
 0x1fc   :  { %v9248_v43 = vpop.f32.mrf.mxu1  ;;  %v9187_v41 = vpop.f32.mrf.mxu0  ;;  %v7041_v57 = vrot.slane %v13986_v27, 5  ;;  %v7046_v21 = vsel %vm10633_vm6, %v8629_v56, %v7045_v55  ;;  %v6983_v56 = vld [vmem:[#allocation2 + $0x130] sm:$0xee] }
 0x1fd   :  { %v13338_v48 = vadd.f32 %v9247_v0, %v3772_v47  ;;  %v3773_v44 = vadd.f32 %v9186_v3, %v13052_v60  ;;  %v13985_v60 = vld [vmem:[#allocation12_spill] sm:$0xff] }
 0x1fe   :  { %6389 = vmatmul.mubr.bf16.gmra.mxu0 %v8542_v45  ;;  %v9249_v7 = vpop.f32.mrf.mxu1  ;;  %v9188_v53 = vpop.f32.mrf.mxu0  ;;  %v7042_v30 = vsel %vm10633_vm6, %v8628_v52, %v7041_v57 }
 0x1ff   :  { %7312 = vmatprep.mubr.bf16.mxu0 %v8673_v62  ;;  %v9250_v16 = vadd.f32 %v9249_v7, %v9248_v43  ;;  %v9189_v59 = vadd.f32 %v9188_v53, %v9187_v41  ;;  %v8674_v43 = vcombine.low %v7034_v33, %v7038_v42 }
 0x200   :  { %v9251_v15 = vpop.f32.mrf.mxu1  ;;  %v9190_v46 = vpop.f32.mrf.mxu0 }
 0x201   :  { %v13345_v37 = vadd.f32 %v9250_v16, %v3773_v44  ;;  %v3774_v19 = vadd.f32 %v9189_v59, %v13985_v60  ;;  %v8677_v44 = vcombine.high %v7042_v30, %v7046_v21  ;;  %v8630_v16 = vrot.slane %v6981_v24, 9  ;;  %v13989_v59 = vld [vmem:[#allocation13_spill] sm:$0xff]  ;;  %v13992_v24 = vld [vmem:[#allocation6_spill] sm:$0xff] }
 0x202   :  { %6951 = vmatmul.mubr.bf16.gmra.mxu1 %v8606_v50  ;;  %v9252_v34 = vpop.f32.mrf.mxu1  ;;  %v9191_v31 = vpop.f32.mrf.mxu0  ;;  %v7049_v14 = vrot.slane %v13989_v59, 5  ;;  %v7061_v32 = vrot.slane %v13992_v24, 5 }
 0x203   :  { %v9253_v49 = vadd.f32 %v9252_v34, %v9251_v15  ;;  %v9192_v1 = vadd.f32 %v9191_v31, %v9190_v46  ;;  %v13990_v15 = vld [vmem:[#allocation15_spill] sm:$0xff] }
 0x204   :  { %v9254_v26 = vpop.f32.mrf.mxu1  ;;  %v9273_v36 = vpop.f32.mrf.mxu0  ;;  %v7053_v46 = vrot.slane %v13990_v15, 5  ;;  %v7050_v31 = vsel %vm10633_vm6, %v8630_v16, %v7049_v14  ;;  %v6985_v14 = vld [vmem:[#allocation2 + $0x1d0] sm:$0xee] }
 0x205   :  { %v13350_v45 = vadd.f32 %v9253_v49, %v3774_v19  ;;  %v3775_v10 = vadd.f32 %v9192_v1, %v13988_v54  ;;  %v8676_v1 = vcombine.low %v7042_v30, %v7046_v21 }
 0x206   :  { %7313 = vmatmul.mubr.bf16.vlgmr.msra.gmra.mxu0 %v8672_v25  ;;  %v9255_v47 = vpop.f32.mrf.mxu1  ;;  %v9274_v62 = vpop.f32.mrf.mxu0  ;;  %v7054_v52 = vsel %vm10633_vm6, %v8631_v40, %v7053_v46  ;;  %v6986_v40 = vld [vmem:[#allocation2 + $0x220] sm:$0xee] }
 0x207   :  { %7320 = vmatprep.mubr.bf16.mxu0 %v8675_v13  ;;  %v9256_v4 = vadd.f32 %v9255_v47, %v9254_v26  ;;  %v9275_v20 = vadd.f32 %v9274_v62, %v9273_v36  ;;  %v8679_v36 = vcombine.high %v7050_v31, %v7054_v52  ;;  %v8632_v47 = vrot.slane %v6983_v56, 9  ;;  %v13991_v62 = vld [vmem:[#allocation16_spill] sm:$0xff] }
 0x208   :  { %v9337_v0 = vpop.f32.mrf.mxu1  ;;  %v9276_v3 = vpop.f32.mrf.mxu0 }
 0x209   :  { %v13357_v41 = vadd.f32 %v9256_v4, %v3775_v10  ;;  %v4740_v50 = vadd.f32 %v9275_v20, %v13139_v38  ;;  %v7057_v4 = vrot.slane %v13991_v62, 5  ;;  %v8633_v20 = vrot.slane %v6984_v9, 9 }
 0x20a   :  { %v9338_v7 = vpop.f32.mrf.mxu1  ;;  %v9277_v53 = vpop.f32.mrf.mxu0 }
 0x20b   :  { %v9339_v25 = vadd.f32 %v9338_v7, %v9337_v0  ;;  %v9278_v60 = vadd.f32 %v9277_v53, %v9276_v3  ;;  %v7058_v7 = vsel %vm10633_vm6, %v8632_v47, %v7057_v4  ;;  %v7062_v53 = vsel %vm10633_vm6, %v8633_v20, %v7061_v32 }
 0x20c   :  { %v9340_v19 = vpop.f32.mrf.mxu1  ;;  %v9279_v13 = vpop.f32.mrf.mxu0  ;;  %v8680_v4 = vcombine.low %v7058_v7, %v7062_v53 }
 0x20d   :  { %v13362_v34 = vadd.f32 %v9339_v25, %v4740_v50  ;;  %v4741_v33 = vadd.f32 %v9278_v60, %v13164_v61  ;;  %v8678_v25 = vcombine.low %v7050_v31, %v7054_v52 }
 0x20e   :  { %7321 = vmatmul.mubr.bf16.gmra.mxu0 %v8674_v43  ;;  %v9341_v38 = vpop.f32.mrf.mxu1  ;;  %v9280_v42 = vpop.f32.mrf.mxu0 }
 0x20f   :  { %7328 = vmatprep.mubr.bf16.mxu0 %v8677_v44  ;;  %v9342_v27 = vadd.f32 %v9341_v38, %v9340_v19  ;;  %v9281_v57 = vadd.f32 %v9280_v42, %v9279_v13  ;;  %v8681_v19 = vcombine.high %v7058_v7, %v7062_v53  ;;  %v8634_v38 = vrot.slane %v6985_v14, 9 }
 0x210   :  { %v9343_v55 = vpop.f32.mrf.mxu1  ;;  %v9282_v49 = vpop.f32.mrf.mxu0  ;;  %v7065_v42 = vrot.slane %v13190_v5, 5 }
 0x211   :  { %v13369_v26 = vadd.f32 %v9342_v27, %v4741_v33  ;;  %v4742_v61 = vadd.f32 %v9281_v57, %v13188_v39  ;;  %v8635_v27 = vrot.slane %v6986_v40, 9  ;;  %v7069_v57 = vrot.slane %v13200_v63, 5 }
 0x212   :  { %v9344_v54 = vpop.f32.mrf.mxu1  ;;  %v9283_v10 = vpop.f32.mrf.mxu0 }
 0x213   :  { %v9345_v0 = vadd.f32 %v9344_v54, %v9343_v55  ;;  %v9284_v3 = vadd.f32 %v9283_v10, %v9282_v49  ;;  %v7070_v5 = vsel %vm10633_vm6, %v8635_v27, %v7069_v57  ;;  %v6987_v54 = vld [vmem:[#allocation2 + $0x190] sm:$0xee]  ;;  %v6988_v10 = vld [vmem:[#allocation2 + $0x208] sm:$0xee] }
 0x214   :  { %v9346_v43 = vpop.f32.mrf.mxu1  ;;  %v9285_v50 = vpop.f32.mrf.mxu0 }
 0x215   :  { %v13374_v44 = vadd.f32 %v9345_v0, %v4742_v61  ;;  %v4743_v30 = vadd.f32 %v9284_v3, %v13221_v58  ;;  %v7066_v61 = vsel %vm10633_vm6, %v8634_v38, %v7065_v42  ;;  %v8636_v3 = vrot.slane %v6987_v54, 9 }
 0x216   :  { %7329 = vmatmul.mubr.bf16.gmra.mxu0 %v8676_v1  ;;  %v9347_v39 = vpop.f32.mrf.mxu1  ;;  %v9286_v21 = vpop.f32.mrf.mxu0  ;;  %v8683_v24 = vcombine.high %v7066_v61, %v7070_v5 }
 0x217   :  { %7336 = vmatprep.mubr.bf16.mxu0 %v8679_v36  ;;  %v9348_v16 = vadd.f32 %v9347_v39, %v9346_v43  ;;  %v9287_v59 = vadd.f32 %v9286_v21, %v9285_v50  ;;  %v7073_v43 = vrot.slane %v13245_v28, 5  ;;  %v8637_v50 = vrot.slane %v6988_v10, 9 }
 0x218   :  { %v9349_v15 = vpop.f32.mrf.mxu1  ;;  %v9288_v46 = vpop.f32.mrf.mxu0 }
 0x219   :  { %v13381_v60 = vadd.f32 %v9348_v16, %v4743_v30  ;;  %v4744_v58 = vadd.f32 %v9287_v59, %v13241_v6  ;;  %v7077_v30 = vrot.slane %v13248_v17, 5  ;;  %v7074_v40 = vsel %vm10633_vm6, %v8636_v3, %v7073_v43 }
 0x21a   :  { %v9350_v13 = vpop.f32.mrf.mxu1  ;;  %v9289_v33 = vpop.f32.mrf.mxu0 }
 0x21b   :  { %v9351_v56 = vadd.f32 %v9350_v13, %v9349_v15  ;;  %v9290_v9 = vadd.f32 %v9289_v33, %v9288_v46  ;;  %v7078_v28 = vsel %vm10633_vm6, %v8637_v50, %v7077_v30  ;;  %v6989_v46 = vld [vmem:[#allocation2 + $0x188] sm:$0xee]  ;;  %v8682_v13 = vcombine.low %v7066_v61, %v7070_v5 }
 0x21c   :  { %v9352_v55 = vpop.f32.mrf.mxu1  ;;  %v9291_v49 = vpop.f32.mrf.mxu0  ;;  %v8685_v38 = vcombine.high %v7074_v40, %v7078_v28  ;;  %v8638_v57 = vrot.slane %v6989_v46, 9 }
 0x21d   :  { %v13386_v1 = vadd.f32 %v9351_v56, %v4744_v58  ;;  %v4745_v31 = vadd.f32 %v9290_v9, %v13253_v11  ;;  %v7081_v56 = vrot.slane %v13285_v22, 5 }
 0x21e   :  { %7337 = vmatmul.mubr.bf16.gmra.mxu0 %v8678_v25  ;;  %v9353_v6 = vpop.f32.mrf.mxu1  ;;  %v9292_v52 = vpop.f32.mrf.mxu0  ;;  %v6990_v25 = vld [vmem:[#allocation2 + $0x70] sm:$0xee] }
 0x21f   :  { %7344 = vmatprep.mubr.bf16.mxu0 %v8681_v19  ;;  %v9354_v36 = vadd.f32 %v9353_v6, %v9352_v55  ;;  %v9293_v63 = vadd.f32 %v9292_v52, %v9291_v49  ;;  %v8639_v9 = vrot.slane %v6990_v25, 9  ;;  %v7085_v55 = vrot.slane %v13287_v35, 5 }
 0x220   :  { %v9355_v47 = vpop.f32.mrf.mxu1  ;;  %v9294_v62 = vpop.f32.mrf.mxu0 }
 0x221   :  { %v13393_v20 = vadd.f32 %v9354_v36, %v4745_v31  ;;  %v4746_v11 = vadd.f32 %v9293_v63, %v13282_v23  ;;  %v7082_v63 = vsel %vm10633_vm6, %v8638_v57, %v7081_v56  ;;  %v7086_v22 = vsel %vm10633_vm6, %v8639_v9, %v7085_v55 }
 0x222   :  { %v9356_v32 = vpop.f32.mrf.mxu1  ;;  %v9295_v0 = vpop.f32.mrf.mxu0 }
 0x223   :  { %v9357_v39 = vadd.f32 %v9356_v32, %v9355_v47  ;;  %v9296_v21 = vadd.f32 %v9295_v0, %v9294_v62  ;;  %v8684_v62 = vcombine.low %v7074_v40, %v7078_v28 }
 0x224   :  { %v9358_v16 = vpop.f32.mrf.mxu1  ;;  %v9297_v59 = vpop.f32.mrf.mxu0 }
 0x225   :  { %v13398_v14 = vadd.f32 %v9357_v39, %v4746_v11  ;;  %v4747_v7 = vadd.f32 %v9296_v21, %v13293_v8 }
 0x226   :  { %7345 = vmatmul.mubr.bf16.gmra.mxu0 %v8680_v4  ;;  %v9359_v23 = vpop.f32.mrf.mxu1  ;;  %v9298_v53 = vpop.f32.mrf.mxu0 }
 0x227   :  { %7352 = vmatprep.mubr.bf16.mxu0 %v8683_v24  ;;  %v9360_v15 = vadd.f32 %v9359_v23, %v9358_v16  ;;  %v9299_v17 = vadd.f32 %v9298_v53, %v9297_v59  ;;  %v8687_v24 = vcombine.high %v7082_v63, %v7086_v22 }
 0x228   :  { %v9361_v58 = vpop.f32.mrf.mxu1  ;;  %v9300_v19 = vpop.f32.mrf.mxu0 }
 0x229   :  { %v13405_v33 = vadd.f32 %v9360_v15, %v4747_v7  ;;  %v4748_v8 = vadd.f32 %v9299_v17, %v13306_v51  ;;  %v8743_v7 = vld [vmem:[%s13884_s3 + $0x30] sm:$0xff]   ;;  %v8686_v17 = vcombine.low %v7082_v63, %v7086_v22 }
 0x22a   :  { %v9362_v42 = vpop.f32.mrf.mxu1  ;;  %v9301_v27 = vpop.f32.mrf.mxu0  ;;  %v8733_v40 = vunpack.c.h.bf16 %v8743_v7  ;;  %v8732_v25 = vunpack.c.l.bf16 %v8743_v7 }
 0x22b   :  { %v9363_v49 = vadd.f32 %v9362_v42, %v9361_v58  ;;  %v9302_v31 = vadd.f32 %v9301_v27, %v9300_v19 }
 0x22c   :  { %v9364_v6 = vpop.f32.mrf.mxu1  ;;  %v9303_v52 = vpop.f32.mrf.mxu0 }
 0x22d   :  { %v13410_v36 = vadd.f32 %v9363_v49, %v4748_v8  ;;  %v4749_v61 = vadd.f32 %v9302_v31, %v13312_v18  ;;  %v8744_v18 = vld [vmem:[%s13884_s3 + $0x38] sm:$0xff]   ;;  %v8741_v31 = vld [vmem:[%s13884_s3 + $0x20] sm:$0xff]  }
 0x22e   :  { %7353 = vmatmul.mubr.bf16.gmra.mxu0 %v8682_v13  ;;  %v9365_v51 = vpop.f32.mrf.mxu1  ;;  %v9304_v5 = vpop.f32.mrf.mxu0  ;;  %v8737_v3 = vunpack.c.h.bf16 %v8744_v18  ;;  %v8742_v13 = vld [vmem:[%s13884_s3 + $0x28] sm:$0xff]   ;;  %v8724_v22 = vunpack.c.l.bf16 %v8741_v31 }
 0x22f   :  { %7360 = vmatprep.mubr.bf16.mxu0 %v8685_v38  ;;  %v9366_v54 = vadd.f32 %v9365_v51, %v9364_v6  ;;  %v9305_v35 = vadd.f32 %v9304_v5, %v9303_v52  ;;  %v8729_v42 = vunpack.c.h.bf16 %v8742_v13  ;;  %v8728_v9 = vunpack.c.l.bf16 %v8742_v13  ;;  %v8707_v13 = vld [vmem:[%s13884_s3] sm:$0xff]  }
 0x230   :  { %v9367_v10 = vpop.f32.mrf.mxu1  ;;  %v9306_v47 = vpop.f32.mrf.mxu0  ;;  %9737 = vmatprep.subr.mxu1 %v8737_v3 }
 0x231   :  { %v13417_v4 = vadd.f32 %v9366_v54, %v4749_v61  ;;  %v4750_v11 = vadd.f32 %v9305_v35, %v13324_v2  ;;  %9738 = vmatpush3.msra.mxu1 %v8737_v3  ;;  %v8736_v2 = vunpack.c.l.bf16 %v8744_v18  ;;  %v8725_v61 = vunpack.c.h.bf16 %v8741_v31 }
 0x232   :  { %v9368_v32 = vpop.f32.mrf.mxu1  ;;  %v9307_v0 = vpop.f32.mrf.mxu0 }
 0x233   :  { %v9369_v43 = vadd.f32 %v9368_v32, %v9367_v10  ;;  %v9308_v29 = vadd.f32 %v9307_v0, %v9306_v47  ;;  %9739 = vmatprep.subr.mxu1 %v8736_v2  ;;  %v8740_v10 = vld [vmem:[%s13884_s3 + $0x18] sm:$0xff]  }
 0x234   :  { %v9370_v50 = vpop.f32.mrf.mxu1  ;;  %v9309_v30 = vpop.f32.mrf.mxu0  ;;  %9740 = vmatpush3.msra.mxu1 %v8736_v2  ;;  %v8720_v0 = vunpack.c.l.bf16 %v8740_v10 }
 0x235   :  { %v13423_v39 = vadd.f32 %v9369_v43, %v4750_v11  ;;  %v4751_v21 = vadd.f32 %v9308_v29, %v13333_v12  ;;  %9741 = vmatprep.subr.mxu1 %v8733_v40  ;;  %v8721_v11 = vunpack.c.h.bf16 %v8740_v10  ;;  %v8739_v29 = vld [vmem:[%s13884_s3 + $0x10] sm:$0xff]  }
 0x236   :  { %7361 = vmatmul.mubr.bf16.gmra.mxu0 %v8684_v62  ;;  %v9371_v16 = vpop.f32.mrf.mxu1  ;;  %v9310_v59 = vpop.f32.mrf.mxu0  ;;  %9742 = vmatpush3.msra.mxu1 %v8733_v40  ;;  %v8716_v7 = vunpack.c.l.bf16 %v8739_v29  ;;  %v8738_v40 = vld [vmem:[%s13884_s3 + $0x8] sm:$0xff]  }
 0x237   :  { %7368 = vmatprep.mubr.bf16.mxu0 %v8687_v24  ;;  %v9372_v23 = vadd.f32 %v9371_v16, %v9370_v50  ;;  %v9311_v53 = vadd.f32 %v9310_v59, %v9309_v30  ;;  %9743 = vmatprep.subr.mxu1 %v8732_v25 }
 0x238   :  { %v9373_v28 = vpop.f32.mrf.mxu1  ;;  %v9312_v15 = vpop.f32.mrf.mxu0  ;;  %9744 = vmatpush3.msra.mxu1 %v8732_v25  ;;  %v8712_v25 = vunpack.c.l.bf16 %v8738_v40 }
 0x239   :  { %v13429_v46 = vadd.f32 %v9372_v23, %v4751_v21  ;;  %v4752_v12 = vadd.f32 %v9311_v53, %v13338_v48  ;;  %9745 = vmatprep.subr.mxu1 %v8729_v42  ;;  %v8717_v21 = vunpack.c.h.bf16 %v8739_v29 }
 0x23a   :  { %v9374_v58 = vpop.f32.mrf.mxu1  ;;  %v9313_v19 = vpop.f32.mrf.mxu0  ;;  %9746 = vmatpush3.msra.mxu1 %v8729_v42 }
 0x23b   :  { %v9375_v8 = vadd.f32 %v9374_v58, %v9373_v28  ;;  %v9314_v38 = vadd.f32 %v9313_v19, %v9312_v15  ;;  %9747 = vmatprep.subr.mxu1 %v8728_v9  ;;  %v8713_v15 = vunpack.c.h.bf16 %v8738_v40 }
 0x23c   :  { %v9376_v27 = vpop.f32.mrf.mxu1  ;;  %9748 = vmatpush3.msra.mxu1 %v8728_v9 }
 0x23d   :  { %v9315_v57 = vpop.f32.mrf.mxu0  ;;  %v13435_v56 = vadd.f32 %v9375_v8, %v4752_v12  ;;  %v4753_v48 = vadd.f32 %v9314_v38, %v13345_v37  ;;  %9749 = vmatprep.subr.mxu1 %v8725_v61  ;;  %v8709_v38 = vunpack.c.h.bf16 %v8707_v13 }
 0x23e   :  { %7369 = vmatmul.mubr.bf16.gmra.mxu0 %v8686_v17  ;;  %v9377_v55 = vpop.f32.mrf.mxu1  ;;  %9750 = vmatpush3.msra.mxu1 %v8725_v61 }
 0x23f   :  { %v9316_v49 = vpop.f32.mrf.mxu0  ;;  %v9378_v6 = vadd.f32 %v9377_v55, %v9376_v27  ;;  %9751 = vmatprep.subr.mxu1 %v8724_v22 }
 0x240   :  { %v9317_v52 = vadd.f32 %v9316_v49, %v9315_v57  ;;  %9752 = vmatpush3.msra.mxu1 %v8724_v22  ;;  %v8708_v57 = vunpack.c.l.bf16 %v8707_v13 }
 0x241   :  { %v9379_v51 = vpop.f32.mrf.mxu1  ;;  %v9318_v5 = vpop.f32.mrf.mxu0  ;;  %v13441_v63 = vadd.f32 %v9378_v6, %v4753_v48  ;;  %9753 = vmatprep.subr.mxu1 %v8721_v11 }
 0x242   :  { %v4754_v37 = vadd.f32 %v9317_v52, %v13350_v45  ;;  %9754 = vmatpush3.msra.mxu1 %v8721_v11 }
 0x243   :  { %v9380_v54 = vpop.f32.mrf.mxu1  ;;  %v9319_v35 = vpop.f32.mrf.mxu0  ;;  %9755 = vmatprep.subr.mxu1 %v8720_v0 }
 0x244   :  { %v9381_v47 = vadd.f32 %v9380_v54, %v9379_v51  ;;  %v9320_v62 = vadd.f32 %v9319_v35, %v9318_v5  ;;  %9756 = vmatpush3.msra.mxu1 %v8720_v0 }
 0x245   :  { %v9382_v24 = vpop.f32.mrf.mxu1  ;;  %v9401_v18 = vpop.f32.mrf.mxu0  ;;  %9757 = vmatprep.subr.mxu1 %v8717_v21 }
 0x246   :  { %v13447_v32 = vadd.f32 %v9381_v47, %v4754_v37  ;;  %v4755_v45 = vadd.f32 %v9320_v62, %v13357_v41  ;;  %9758 = vmatpush3.msra.mxu1 %v8717_v21 }
 0x247   :  { %v9383_v3 = vpop.f32.mrf.mxu1  ;;  %v9402_v43 = vpop.f32.mrf.mxu0  ;;  %9759 = vmatprep.subr.mxu1 %v8716_v7 }
 0x248   :  { %v9384_v50 = vadd.f32 %v9383_v3, %v9382_v24  ;;  %v9403_v30 = vadd.f32 %v9402_v43, %v9401_v18  ;;  %9760 = vmatpush3.msra.mxu1 %v8716_v7 }
 0x249   :  { %v13453_v2 = vpop.f32.mrf.mxu1  ;;  %v9404_v16 = vpop.f32.mrf.mxu0  ;;  %9761 = vmatprep.subr.mxu1 %v8713_v15 }
 0x24a   :  { %v13455_v59 = vadd.f32 %v9384_v50, %v4755_v45  ;;  %v13458_v41 = vadd.f32 %v9403_v30, %v13362_v34  ;;  %9762 = vmatpush3.msra.mxu1 %v8713_v15 }
 0x24b   :  { %v13460_v23 = vpop.f32.mrf.mxu1  ;;  %v9405_v53 = vpop.f32.mrf.mxu0  ;;  %9763 = vmatprep.subr.mxu1 %v8712_v25 }
 0x24c   :  { %v9406_v28 = vadd.f32 %v9405_v53, %v9404_v16  ;;  %9764 = vmatpush3.msra.mxu1 %v8712_v25 }
 0x24d   :  { %v13465_v17 = vpop.f32.mrf.mxu1  ;;  %v9407_v12 = vpop.f32.mrf.mxu0  ;;  %9765 = vmatprep.subr.mxu1 %v8709_v38 }
 0x24e   :  { %v13468_v34 = vadd.f32 %v9406_v28, %v13369_v26  ;;  %9766 = vmatpush3.msra.mxu1 %v8709_v38 }
 0x24f   :  { %v13470_v58 = vpop.f32.mrf.mxu1  ;;  %v9408_v19 = vpop.f32.mrf.mxu0  ;;  %9767 = vmatprep.subr.mxu1 %v8708_v57 }
 0x250   :  { %v9409_v8 = vadd.f32 %v9408_v19, %v9407_v12  ;;  %9768 = vmatpush3.msra.mxu1 %v8708_v57 }
 0x251   :  { %v13475_v42 = vpop.f32.mrf.mxu1  ;;  %v9410_v27 = vpop.f32.mrf.mxu0 }
 0x252   :  { %v13478_v26 = vadd.f32 %v9409_v8, %v13374_v44 }
 0x253   :  { %v13480_v48 = vpop.f32.mrf.mxu1  ;;  %v9411_v9 = vpop.f32.mrf.mxu0 }
 0x254   :  { %v9412_v55 = vadd.f32 %v9411_v9, %v9410_v27 }
 0x255   :  { %v13482_v49 = vpop.f32.mrf.mxu1  ;;  %v9413_v31 = vpop.f32.mrf.mxu0 }
 0x256   :  { %v13485_v6 = vadd.f32 %v9412_v55, %v13381_v60 }
 0x257   :  { %v13487_v52 = vpop.f32.mrf.mxu1  ;;  %v9414_v61 = vpop.f32.mrf.mxu0 }
 0x258   :  { %v9415_v44 = vadd.f32 %v9414_v61, %v9413_v31 }
 0x259   :  { %v9416_v5 = vpop.f32.mrf.mxu0 }
 0x25a   :  { %v13489_v51 = vpop.f32.mrf.mxu1  ;;  %v13492_v37 = vadd.f32 %v9415_v44, %v13386_v1 }
 0x25b   :  { %v9417_v54 = vpop.f32.mrf.mxu0 }
 0x25c   :  { %v13494_v22 = vpop.f32.mrf.mxu1  ;;  %v9418_v35 = vadd.f32 %v9417_v54, %v9416_v5 }
 0x25d   :  { %v9419_v47 = vpop.f32.mrf.mxu0 }
 0x25e   :  { %v13496_v10 = vpop.f32.mrf.mxu1  ;;  %v13499_v60 = vadd.f32 %v9418_v35, %v13393_v20 }
 0x25f   :  { %v9420_v11 = vpop.f32.mrf.mxu0 }
 0x260   :  { %v13501_v62 = vpop.f32.mrf.mxu1  ;;  %v9421_v24 = vadd.f32 %v9420_v11, %v9419_v47 }
 0x261   :  { %v9422_v45 = vpop.f32.mrf.mxu0 }
 0x262   :  { %v13503_v18 = vpop.f32.mrf.mxu1  ;;  %v13506_v1 = vadd.f32 %v9421_v24, %v13398_v14 }
 0x263   :  { %v9423_v3 = vpop.f32.mrf.mxu0 }
 0x264   :  { %v13508_v0 = vpop.f32.mrf.mxu1  ;;  %v9424_v43 = vadd.f32 %v9423_v3, %v9422_v45 }
 0x265   :  { %v9425_v50 = vpop.f32.mrf.mxu0 }
 0x266   :  { %v13510_v29 = vpop.f32.mrf.mxu1  ;;  %v13513_v20 = vadd.f32 %v9424_v43, %v13405_v33 }
 0x267   :  { %v9426_v21 = vpop.f32.mrf.mxu0 }
 0x268   :  { %13993 = vst [vmem:[#allocation7_spill] sm:$0xff] %v13513_v20  ;;  %v13515_v30 = vpop.f32.mrf.mxu1  ;;  %v9427_v16 = vadd.f32 %v9426_v21, %v9425_v50 }
 0x269   :  { %v9428_v53 = vpop.f32.mrf.mxu0 }
 0x26a   :  { %v13517_v7 = vpop.f32.mrf.mxu1  ;;  %v13520_v14 = vadd.f32 %v9427_v16, %v13410_v36 }
 0x26b   :  { %13994 = vst [vmem:[#allocation8_spill] sm:$0xff] %v13517_v7  ;;  %v9429_v28 = vpop.f32.mrf.mxu0 }
 0x26c   :  { %13995 = vst [vmem:[#allocation10_spill] sm:$0xff] %v13520_v14  ;;  %v13522_v40 = vpop.f32.mrf.mxu1  ;;  %v9430_v15 = vadd.f32 %v9429_v28, %v9428_v53 }
 0x26d   :  { %13996 = vst [vmem:[#allocation12_spill] sm:$0xff] %v13522_v40  ;;  %v9431_v25 = vpop.f32.mrf.mxu0 }
 0x26e   :  { %v13524_v12 = vpop.f32.mrf.mxu1  ;;  %v13527_v33 = vadd.f32 %v9430_v15, %v13417_v4 }
 0x26f   :  { %13997 = vst [vmem:[#allocation9_spill] sm:$0xff] %v13524_v12  ;;  %v9432_v13 = vpop.f32.mrf.mxu0 }
 0x270   :  { %13998 = vst [vmem:[#allocation11_spill] sm:$0xff] %v13527_v33  ;;  %v13529_v19 = vpop.f32.mrf.mxu1  ;;  %v9433_v8 = vadd.f32 %v9432_v13, %v9431_v25 }
 0x271   :  { %13999 = vst [vmem:[#allocation14_spill] sm:$0xff] %v13529_v19  ;;  %v9434_v27 = vpop.f32.mrf.mxu0 }
 0x272   :  { %v13531_v38 = vpop.f32.mrf.mxu1  ;;  %v13534_v36 = vadd.f32 %v9433_v8, %v13423_v39 }
 0x273   :  { %14000 = vst [vmem:[#allocation13_spill] sm:$0xff] %v13531_v38  ;;  %v9435_v9 = vpop.f32.mrf.mxu0 }
 0x274   :  { %14001 = vst [vmem:[#allocation15_spill] sm:$0xff] %v13534_v36  ;;  %v13536_v57 = vpop.f32.mrf.mxu1  ;;  %v9436_v55 = vadd.f32 %v9435_v9, %v9434_v27 }
 0x275   :  { %14002 = vst [vmem:[#allocation16_spill] sm:$0xff] %v13536_v57  ;;  %v9437_v61 = vpop.f32.mrf.mxu0 }
 0x276   :  { %v13538_v31 = vpop.f32.mrf.mxu1  ;;  %v13541_v4 = vadd.f32 %v9436_v55, %v13429_v46 }
 0x277   :  { %14003 = vst [vmem:[#allocation6_spill] sm:$0xff] %v13538_v31  ;;  %v9438_v5 = vpop.f32.mrf.mxu0 }
 0x278   :  { %14004 = vst [vmem:[#allocation17_spill] sm:$0xff] %v13541_v4  ;;  %v13543_v44 = vpop.f32.mrf.mxu1  ;;  %v9439_v54 = vadd.f32 %v9438_v5, %v9437_v61 }
 0x279   :  { %14005 = vst [vmem:[#allocation18_spill] sm:$0xff] %v13543_v44  ;;  %v9440_v47 = vpop.f32.mrf.mxu0 }
 0x27a   :  { %v13545_v35 = vpop.f32.mrf.mxu1  ;;  %v13548_v39 = vadd.f32 %v9439_v54, %v13435_v56 }
 0x27b   :  { %14006 = vst [vmem:[#allocation19_spill] sm:$0xff] %v13545_v35  ;;  %v9441_v24 = vpop.f32.mrf.mxu0 }
 0x27c   :  { %14007 = vst [vmem:[#allocation20_spill] sm:$0xff] %v13548_v39  ;;  %v13550_v11 = vpop.f32.mrf.mxu1  ;;  %v9442_v45 = vadd.f32 %v9441_v24, %v9440_v47 }
 0x27d   :  { %14008 = vst [vmem:[#allocation21_spill] sm:$0xff] %v13550_v11  ;;  %v9443_v43 = vpop.f32.mrf.mxu0 }
 0x27e   :  { %v13552_v3 = vpop.f32.mrf.mxu1  ;;  %v13555_v46 = vadd.f32 %v9442_v45, %v13441_v63 }
 0x27f   :  { %14009 = vst [vmem:[#allocation22_spill] sm:$0xff] %v13552_v3  ;;  %v9444_v21 = vpop.f32.mrf.mxu0 }
 0x280   :  { %14010 = vst [vmem:[#allocation23_spill] sm:$0xff] %v13555_v46  ;;  %v13557_v50 = vpop.f32.mrf.mxu1  ;;  %v9445_v16 = vadd.f32 %v9444_v21, %v9443_v43 }
 0x281   :  { %14011 = vst [vmem:[#allocation24_spill] sm:$0xff] %v13557_v50  ;;  %v9446_v28 = vpop.f32.mrf.mxu0 }
 0x282   :  { %v13559_v53 = vpop.f32.mrf.mxu1  ;;  %v13562_v56 = vadd.f32 %v9445_v16, %v13447_v32 }
 0x283   :  { %14012 = vst [vmem:[#allocation25_spill] sm:$0xff] %v13559_v53  ;;  %v9447_v25 = vpop.f32.mrf.mxu0 }
 0x284   :  { %14013 = vst [vmem:[#allocation26_spill] sm:$0xff] %v13562_v56  ;;  %v13564_v15 = vpop.f32.mrf.mxu1  ;;  %v9448_v13 = vadd.f32 %v9447_v25, %v9446_v28 }
 0x285   :  { %14014 = vst [vmem:[#allocation27_spill] sm:$0xff] %v13564_v15  ;;  %v9529_v27 = vpop.f32.mrf.mxu0 }
 0x286   :  { %v13566_v8 = vpop.f32.mrf.mxu1  ;;  %v13569_v63 = vadd.f32 %v9448_v13, %v13455_v59 }
 0x287   :  { %14015 = vst [vmem:[#allocation28_spill] sm:$0xff] %v13566_v8  ;;  %v9530_v55 = vpop.f32.mrf.mxu0 }
 0x288   :  { %14016 = vst [vmem:[#allocation29_spill] sm:$0xff] %v13569_v63  ;;  %v13571_v9 = vpop.f32.mrf.mxu1  ;;  %v9531_v40 = vadd.f32 %v9530_v55, %v9529_v27 }
 0x289   :  { %14017 = vst [vmem:[#allocation30_spill] sm:$0xff] %v13571_v9  ;;  %v9532_v5 = vpop.f32.mrf.mxu0 }
 0x28a   :  { %v9593_v61 = vpop.f32.mrf.mxu1 }
 0x28b   :  { %v9533_v47 = vpop.f32.mrf.mxu0 }
 0x28c   :  { %v9594_v54 = vpop.f32.mrf.mxu1 }
 0x28d   :  { %v9535_v32 = vpop.f32.mrf.mxu0 }
 0x28e   :  { %v9596_v24 = vpop.f32.mrf.mxu1 }
 0x28f   :  { %v9536_v43 = vpop.f32.mrf.mxu0 }
 0x290   :  { %v9597_v45 = vpop.f32.mrf.mxu1 }
 0x291   :  { %v13575_v16 = vpop.f32.mrf.mxu0 }
 0x292   :  { %v13573_v21 = vpop.f32.mrf.mxu1 }
 0x293   :  { %v13577_v28 = vpop.f32.mrf.mxu0 }
 0x294   :  { %v9600_v25 = vpop.f32.mrf.mxu1 }
 0x296   :  { %v13579_v59 = vpop.f32.mrf.mxu0  ;;  %v13583_v63 = vpop.f32.mrf.mxu1 }
 0x298   :  { %v13581_v13 = vpop.f32.mrf.mxu0  ;;  %v13589_v56 = vpop.f32.mrf.mxu1 }
 0x29a   :  { %v13585_v9 = vpop.f32.mrf.mxu0  ;;  %v13595_v53 = vpop.f32.mrf.mxu1 }
 0x29c   :  { %v13587_v8 = vpop.f32.mrf.mxu0  ;;  %v13601_v39 = vpop.f32.mrf.mxu1 }
 0x29e   :  { %v13591_v46 = vpop.f32.mrf.mxu0  ;;  %v13607_v35 = vpop.f32.mrf.mxu1 }
 0x2a0   :  { %v13593_v15 = vpop.f32.mrf.mxu0  ;;  %v13613_v36 = vpop.f32.mrf.mxu1 }
 0x2a2   :  { %v13597_v50 = vpop.f32.mrf.mxu0  ;;  %v13619_v38 = vpop.f32.mrf.mxu1 }
 0x2a4   :  { %v13599_v3 = vpop.f32.mrf.mxu0  ;;  %v13625_v14 = vpop.f32.mrf.mxu1 }
 0x2a5   :  { %14018 = vst [vmem:[#allocation31_spill] sm:$0xff] %v13599_v3 }
 0x2a6   :  { %v13603_v4 = vpop.f32.mrf.mxu0 }
 0x2a7   :  { %14019 = vst [vmem:[#allocation32_spill] sm:$0xff] %v13603_v4 }
 0x2a8   :  { %v13605_v11 = vpop.f32.mrf.mxu0 }
 0x2a9   :  { %14020 = vst [vmem:[#allocation33_spill] sm:$0xff] %v13605_v11 }
 0x2aa   :  { %v13609_v44 = vpop.f32.mrf.mxu0 }
 0x2ab   :  { %14021 = vst [vmem:[#allocation34_spill] sm:$0xff] %v13609_v44  ;;  %v13631_v44 = vpop.f32.mrf.mxu1 }
 0x2ac   :  { %v13611_v31 = vpop.f32.mrf.mxu0  ;;  %14029 = vst [vmem:[#allocation42_spill] sm:$0xff] %v13631_v44  ;;  %v9595_v44 = vadd.f32 %v9594_v54, %v9593_v61  ;;  %v9479_v61 = vadd.f32 %v13494_v22, %v13489_v51 }
 0x2ad   :  { %14022 = vst [vmem:[#allocation35_spill] sm:$0xff] %v13611_v31 }
 0x2ae   :  { %v13615_v33 = vpop.f32.mrf.mxu0 }
 0x2af   :  { %14023 = vst [vmem:[#allocation36_spill] sm:$0xff] %v13615_v33  ;;  %v13637_v33 = vpop.f32.mrf.mxu1 }
 0x2b0   :  { %v13617_v57 = vpop.f32.mrf.mxu0  ;;  %14032 = vst [vmem:[#allocation45_spill] sm:$0xff] %v13637_v33 }
 0x2b1   :  { %14024 = vst [vmem:[#allocation37_spill] sm:$0xff] %v13617_v57  ;;  %v13645_v7 = vpop.f32.mrf.mxu1 }
 0x2b2   :  { %v13621_v19 = vpop.f32.mrf.mxu0  ;;  %14035 = vst [vmem:[#allocation48_spill] sm:$0xff] %v13645_v7 }
 0x2b3   :  { %14025 = vst [vmem:[#allocation38_spill] sm:$0xff] %v13621_v19  ;;  %v9467_v19 = vadd.f32 %v13460_v23, %v13453_v2  ;;  %v9473_v2 = vadd.f32 %v13480_v48, %v13475_v42  ;;  %v13656_v23 = vpop.f32.mrf.mxu1  ;;  %v9476_v48 = vadd.f32 %v13487_v52, %v13482_v49 }
 0x2b4   :  { %v13623_v12 = vpop.f32.mrf.mxu0 }
 0x2b5   :  { %14026 = vst [vmem:[#allocation39_spill] sm:$0xff] %v13623_v12  ;;  %v6061_v49 = vadd.f32 %v9476_v48, %v13485_v6  ;;  %v6062_v6 = vadd.f32 %v9479_v61, %v13492_v37 }
 0x2b6   :  { %v13627_v11 = vpop.f32.mrf.mxu0 }
 0x2b7   :  { %14027 = vst [vmem:[#allocation40_spill] sm:$0xff] %v13627_v11 }
 0x2b8   :  { %v13629_v4 = vpop.f32.mrf.mxu0 }
 0x2b9   :  { %14028 = vst [vmem:[#allocation41_spill] sm:$0xff] %v13629_v4  ;;  %v6058_v4 = vadd.f32 %v9467_v19, %v13458_v41  ;;  %v9598_v19 = vadd.f32 %v9597_v45, %v9596_v24 }
 0x2ba   :  { %v13633_v31 = vpop.f32.mrf.mxu0 }
 0x2bb   :  { %14030 = vst [vmem:[#allocation43_spill] sm:$0xff] %v13633_v31  ;;  %v9470_v31 = vadd.f32 %v13470_v58, %v13465_v17  ;;  %v6397_v33 = vadd.f32 %v9531_v40, %v6058_v4  ;;  %v6060_v17 = vadd.f32 %v9473_v2, %v13478_v26  ;;  %v13660_v58 = vpop.f32.mrf.mxu1  ;;  %v13665_v40 = vld [vmem:[%s13883_s2] ss:$0 sm:$0xff]  ;;  %v9540_v26 = vadd.f32 %v13577_v28, %v13575_v16 }
 0x2bc   :  { %v13635_v20 = vpop.f32.mrf.mxu0 }
 0x2bd   :  { %14031 = vst [vmem:[#allocation44_spill] sm:$0xff] %v13635_v20  ;;  %v6059_v55 = vadd.f32 %v9470_v31, %v13468_v34  ;;  %v6959_v7 = vadd.f32 %v9595_v44, %v6397_v33  ;;  %v9601_v33 = vadd.f32 %v9600_v25, %v13573_v21  ;;  %v6400_v24 = vadd.f32 %v9540_v26, %v6061_v49  ;;  %v14040_v49 = vld [vmem:[#allocation7_spill] sm:$0xff] }
 0x2be   :  { %v13639_v57 = vpop.f32.mrf.mxu0  ;;  %v9482_v21 = vadd.f32 %v13501_v62, %v13496_v10  ;;  %v9485_v10 = vadd.f32 %v13508_v0, %v13503_v18 }
 0x2bf   :  { %14033 = vst [vmem:[#allocation46_spill] sm:$0xff] %v13639_v57  ;;  %v9534_v57 = vadd.f32 %v9533_v47, %v9532_v5  ;;  %v13677_v5 = vpop.f32.mrf.mxu1 }
 0x2c0   :  { %v13643_v12 = vpop.f32.mrf.mxu0 }
 0x2c1   :  { %14034 = vst [vmem:[#allocation47_spill] sm:$0xff] %v13643_v12  ;;  %v9537_v12 = vadd.f32 %v9536_v43, %v9535_v32  ;;  %v6398_v41 = vadd.f32 %v9534_v57, %v6059_v55  ;;  %v9604_v32 = vadd.f32 %v13589_v56, %v13583_v63  ;;  %v13690_v45 = vpop.f32.mrf.mxu1  ;;  %v9607_v56 = vadd.f32 %v13601_v39, %v13595_v53 }
 0x2c2   :  { %v13647_v11 = vpop.f32.mrf.mxu0  ;;  %v6063_v55 = vadd.f32 %v9482_v21, %v13499_v60  ;;  %v6064_v60 = vadd.f32 %v9485_v10, %v13506_v1 }
 0x2c3   :  { %14036 = vst [vmem:[#allocation49_spill] sm:$0xff] %v13647_v11  ;;  %v6399_v31 = vadd.f32 %v9537_v12, %v6060_v17  ;;  %v6960_v4 = vadd.f32 %v9598_v19, %v6398_v41  ;;  %v13705_v62 = vpop.f32.mrf.mxu1  ;;  %v9610_v17 = vadd.f32 %v13613_v36, %v13607_v35  ;;  %v9613_v36 = vadd.f32 %v13625_v14, %v13619_v38 }
 0x2c4   :  { %v13652_v20 = vpop.f32.mrf.mxu0 }
 0x2c5   :  { %v6961_v12 = vadd.f32 %v9601_v33, %v6399_v31 }
 0x2c6   :  { %v9657_v27 = vpop.f32.mrf.mxu0 }
 0x2c8   :  { %v9658_v11 = vpop.f32.mrf.mxu0 }
 0x2c9   :  { %v9659_v3 = vadd.f32 %v9658_v11, %v9657_v27 }
 0x2ca   :  { %v9660_v42 = vpop.f32.mrf.mxu0 }
 0x2cb   :  { %v7377_v34 = vadd.f32 %v9659_v3, %v6959_v7  ;;  %v9543_v3 = vadd.f32 %v13581_v13, %v13579_v59  ;;  %v6962_v59 = vadd.f32 %v9604_v32, %v6400_v24  ;;  %v9546_v13 = vadd.f32 %v13587_v8, %v13585_v9  ;;  %v14043_v32 = vld [vmem:[#allocation42_spill] sm:$0xff] }
 0x2cc   :  { %v9661_v57 = vpop.f32.mrf.mxu0  ;;  %v9549_v8 = vadd.f32 %v13593_v15, %v13591_v46 }
 0x2cd   :  { %v13673_v44 = vadd.f32 %v13665_v40, %v7377_v34  ;;  %v9662_v11 = vadd.f32 %v9661_v57, %v9660_v42  ;;  %v6401_v25 = vadd.f32 %v9543_v3, %v6062_v6  ;;  %v6402_v19 = vadd.f32 %v9546_v13, %v6063_v55  ;;  %v13718_v42 = vpop.f32.mrf.mxu1  ;;  %v14037_v57 = vld [vmem:[#allocation31_spill] sm:$0xff]  ;;  %v14048_v55 = vld [vmem:[#allocation48_spill] sm:$0xff] }
 0x2ce   :  { %v9663_v54 = vpop.f32.mrf.mxu0  ;;  %v9488_v34 = vadd.f32 %v13515_v30, %v13510_v29  ;;  %v6403_v31 = vadd.f32 %v9549_v8, %v6064_v60  ;;  %v14039_v29 = vld [vmem:[#allocation12_spill] sm:$0xff]  ;;  %v14049_v8 = vld [vmem:[#allocation34_spill] sm:$0xff]  ;;  %v14051_v60 = vld [vmem:[#allocation13_spill] sm:$0xff] }
 0x2cf   :  { %v7378_v52 = vadd.f32 %v9662_v11, %v6960_v4  ;;  %v7416_v7 = vmul.f32 %v13673_v44, %v13673_v44  ;;  %v6963_v53 = vadd.f32 %v9607_v56, %v6401_v25  ;;  %v6964_v33 = vadd.f32 %v9610_v17, %v6402_v19  ;;  %v14038_v11 = vld [vmem:[#allocation8_spill] sm:$0xff]  ;;  %v13733_v61 = vpop.f32.mrf.mxu1 }
 0x2d0   :  { %v9664_v47 = vpop.f32.mrf.mxu0  ;;  %v9552_v4 = vadd.f32 %v14037_v57, %v13597_v50  ;;  %v9491_v30 = vadd.f32 %v14039_v29, %v14038_v11  ;;  %v6965_v38 = vadd.f32 %v9613_v36, %v6403_v31  ;;  %v14042_v50 = vld [vmem:[#allocation33_spill] sm:$0xff]  ;;  %v14053_v31 = vld [vmem:[#allocation11_spill] sm:$0xff]  ;;  %v14054_v57 = vld [vmem:[#allocation36_spill] sm:$0xff] }
 0x2d1   :  { %v13687_v51 = vadd.f32 %v13665_v40, %v7378_v52  ;;  %v9665_v22 = vadd.f32 %v9664_v47, %v9663_v54  ;;  %9769 = vmatprep.mubr.f32.mxu1 %v7416_v7  ;;  %v6065_v52 = vadd.f32 %v9488_v34, %v14040_v49  ;;  %v9629_v25 = vpop.f32.mrf.mxu1 }
 0x2d2   :  { %v9666_v43 = vpop.f32.mrf.mxu0 }
 0x2d3   :  { %v7417_v16 = vmul.f32 %v13687_v51, %v13687_v51  ;;  %v7379_v28 = vadd.f32 %v9665_v22, %v6961_v12  ;;  %v14041_v12 = vld [vmem:[#allocation32_spill] sm:$0xff]  ;;  %v6404_v24 = vadd.f32 %v9552_v4, %v6065_v52  ;;  %v14044_v22 = vld [vmem:[#allocation45_spill] sm:$0xff]  ;;  %v14056_v52 = vld [vmem:[#allocation15_spill] sm:$0xff] }
 0x2d4   :  { %v9667_v63 = vpop.f32.mrf.mxu0  ;;  %v9555_v3 = vadd.f32 %v14042_v50, %v14041_v12  ;;  %v9616_v6 = vadd.f32 %v14044_v22, %v14043_v32  ;;  %v14055_v4 = vld [vmem:[#allocation37_spill] sm:$0xff]  ;;  %v14057_v12 = vld [vmem:[#allocation6_spill] sm:$0xff] }
 0x2d5   :  { %v13701_v37 = vadd.f32 %v13665_v40, %v7379_v28  ;;  %v9668_v2 = vadd.f32 %v9667_v63, %v9666_v43  ;;  %9770 = vmatmul.mubr.f32.vlgmr.msra.gmra.mxu1 %v7417_v16  ;;  %v14045_v16 = vld [vmem:[#allocation10_spill] sm:$0xff]  ;;  %v14046_v63 = vld [vmem:[#allocation9_spill] sm:$0xff] }
 0x2d6   :  { %v9669_v27 = vpop.f32.mrf.mxu0  ;;  %v6066_v28 = vadd.f32 %v9491_v30, %v14045_v16  ;;  %v9622_v30 = vadd.f32 %v13677_v5, %v13660_v58  ;;  %v14058_v50 = vld [vmem:[#allocation18_spill] sm:$0xff]  ;;  %v9625_v58 = vadd.f32 %v13705_v62, %v13690_v45 }
 0x2d7   :  { %v7380_v41 = vadd.f32 %v9668_v2, %v6962_v59  ;;  %v7418_v39 = vmul.f32 %v13701_v37, %v13701_v37  ;;  %v14047_v59 = vld [vmem:[#allocation14_spill] sm:$0xff] }
 0x2d8   :  { %v9670_v9 = vpop.f32.mrf.mxu0  ;;  %v9494_v13 = vadd.f32 %v14047_v59, %v14046_v63  ;;  %v14061_v63 = vld [vmem:[#allocation19_spill] sm:$0xff]  ;;  %v14062_v59 = vld [vmem:[#allocation21_spill] sm:$0xff] }
 0x2d9   :  { %v13715_v18 = vadd.f32 %v13665_v40, %v7380_v41  ;;  %v9671_v0 = vadd.f32 %v9670_v9, %v9669_v27  ;;  %9772 = vmatprep.mubr.f32.mxu1 %v7418_v39  ;;  %v6405_v27 = vadd.f32 %v9555_v3, %v6066_v28  ;;  %v9619_v41 = vadd.f32 %v13656_v23, %v14048_v55  ;;  %v14050_v9 = vld [vmem:[#allocation35_spill] sm:$0xff] }
 0x2da   :  { %v9672_v48 = vpop.f32.mrf.mxu0  ;;  %v9558_v19 = vadd.f32 %v14050_v9, %v14049_v8  ;;  %v6067_v36 = vadd.f32 %v9494_v13, %v14053_v31  ;;  %v9500_v3 = vadd.f32 %v14058_v50, %v14057_v12  ;;  %v9503_v13 = vadd.f32 %v14062_v59, %v14061_v63  ;;  %v14072_v12 = vld [vmem:[#allocation27_spill] sm:$0xff] }
 0x2db   :  { %v7419_v46 = vmul.f32 %v13715_v18, %v13715_v18  ;;  %v7381_v15 = vadd.f32 %v9671_v0, %v6963_v53  ;;  %v6966_v53 = vadd.f32 %v9616_v6, %v6404_v24  ;;  %v14059_v6 = vld [vmem:[#allocation38_spill] sm:$0xff] }
 0x2dc   :  { %v9673_v35 = vpop.f32.mrf.mxu0  ;;  %v6406_v29 = vadd.f32 %v9558_v19, %v6067_v36 }
 0x2dd   :  { %v13729_v1 = vadd.f32 %v13665_v40, %v7381_v15  ;;  %v9674_v26 = vadd.f32 %v9673_v35, %v9672_v48  ;;  %9773 = vmatmul.mubr.f32.gmra.mxu1 %v7419_v46  ;;  %v14052_v48 = vld [vmem:[#allocation16_spill] sm:$0xff]  ;;  %v9630_v46 = vpop.f32.mrf.mxu1 }
 0x2de   :  { %v9675_v54 = vpop.f32.mrf.mxu0  ;;  %v9497_v34 = vadd.f32 %v14052_v48, %v14051_v60  ;;  %v6968_v22 = vadd.f32 %v9622_v30, %v6406_v29  ;;  %v14070_v30 = vld [vmem:[#allocation44_spill] sm:$0xff] }
 0x2df   :  { %v7382_v7 = vadd.f32 %v9674_v26, %v6964_v33  ;;  %v7420_v14 = vmul.f32 %v13729_v1, %v13729_v1  ;;  %v6967_v33 = vadd.f32 %v9619_v41, %v6405_v27  ;;  %v9561_v26 = vadd.f32 %v14055_v4, %v14054_v57  ;;  %v14063_v27 = vld [vmem:[#allocation17_spill] sm:$0xff] }
 0x2e0   :  { %v9676_v47 = vpop.f32.mrf.mxu0  ;;  %v6069_v55 = vadd.f32 %v9500_v3, %v14063_v27 }
 0x2e1   :  { %v13743_v43 = vadd.f32 %v13665_v40, %v7382_v7  ;;  %v9677_v21 = vadd.f32 %v9676_v47, %v9675_v54  ;;  %9775 = vmatprep.mubr.f32.mxu1 %v7420_v14  ;;  %v6068_v7 = vadd.f32 %v9497_v34, %v14056_v52  ;;  %v9632_v14 = vpop.f32.mrf.mxu1  ;;  %v14066_v34 = vld [vmem:[#allocation20_spill] sm:$0xff] }
 0x2e2   :  { %v9678_v56 = vpop.f32.mrf.mxu0 }
 0x2e3   :  { %v7421_v2 = vmul.f32 %v13743_v43, %v13743_v43  ;;  %v7383_v10 = vadd.f32 %v9677_v21, %v6965_v38  ;;  %v6407_v32 = vadd.f32 %v9561_v26, %v6068_v7  ;;  %v14060_v21 = vld [vmem:[#allocation39_spill] sm:$0xff] }
 0x2e4   :  { %v9679_v39 = vpop.f32.mrf.mxu0  ;;  %v9564_v16 = vadd.f32 %v14060_v21, %v14059_v6 }
 0x2e5   :  { %v13755_v17 = vadd.f32 %v13665_v40, %v7383_v10  ;;  %v9680_v0 = vadd.f32 %v9679_v39, %v9678_v56  ;;  %9776 = vmatmul.mubr.f32.gmra.mxu1 %v7421_v2  ;;  %v9633_v2 = vpop.f32.mrf.mxu1  ;;  %v6969_v62 = vadd.f32 %v9625_v58, %v6407_v32  ;;  %v14064_v39 = vld [vmem:[#allocation40_spill] sm:$0xff] }
 0x2e6   :  { %v9681_v15 = vpop.f32.mrf.mxu0  ;;  %v6408_v19 = vadd.f32 %v9564_v16, %v6069_v55 }
 0x2e7   :  { %v7384_v35 = vadd.f32 %v9680_v0, %v6966_v53  ;;  %v7422_v23 = vmul.f32 %v13755_v17, %v13755_v17  ;;  %v14065_v53 = vld [vmem:[#allocation41_spill] sm:$0xff]  ;;  %v9628_v0 = vadd.f32 %v13733_v61, %v13718_v42  ;;  %v9635_v31 = vpop.f32.mrf.mxu1  ;;  %v14069_v61 = vld [vmem:[#allocation43_spill] sm:$0xff] }
 0x2e8   :  { %v9682_v11 = vpop.f32.mrf.mxu0  ;;  %v9567_v8 = vadd.f32 %v14065_v53, %v14064_v39 }
 0x2e9   :  { %v13767_v54 = vadd.f32 %v13665_v40, %v7384_v35  ;;  %v9683_v49 = vadd.f32 %v9682_v11, %v9681_v15  ;;  %9778 = vmatprep.mubr.f32.mxu1 %v7422_v23  ;;  %v6070_v15 = vadd.f32 %v9503_v13, %v14066_v34  ;;  %v14067_v35 = vld [vmem:[#allocation22_spill] sm:$0xff]  ;;  %v14068_v23 = vld [vmem:[#allocation24_spill] sm:$0xff]  ;;  %v9631_v11 = vadd.f32 %v9630_v46, %v9629_v25  ;;  %v9636_v3 = vpop.f32.mrf.mxu1 }
 0x2ea   :  { %v9684_v38 = vpop.f32.mrf.mxu0  ;;  %v6970_v42 = vadd.f32 %v9628_v0, %v6408_v19  ;;  %v14076_v13 = vld [vmem:[#allocation26_spill] sm:$0xff] }
 0x2eb   :  { %v7423_v47 = vmul.f32 %v13767_v54, %v13767_v54  ;;  %v7385_v24 = vadd.f32 %v9683_v49, %v6967_v33  ;;  %v9506_v33 = vadd.f32 %v14068_v23, %v14067_v35  ;;  %v6409_v26 = vadd.f32 %v9567_v8, %v6070_v15  ;;  %v9638_v27 = vpop.f32.mrf.mxu1  ;;  %v14080_v35 = vld [vmem:[#allocation29_spill] sm:$0xff] }
 0x2ec   :  { %v9685_v5 = vpop.f32.mrf.mxu0  ;;  %v9570_v49 = vadd.f32 %v14070_v30, %v14069_v61 }
 0x2ed   :  { %v13779_v28 = vadd.f32 %v13665_v40, %v7385_v24  ;;  %v9686_v56 = vadd.f32 %v9685_v5, %v9684_v38  ;;  %9779 = vmatmul.mubr.f32.gmra.mxu1 %v7423_v47  ;;  %v14071_v38 = vld [vmem:[#allocation25_spill] sm:$0xff]  ;;  %v14073_v24 = vld [vmem:[#allocation23_spill] sm:$0xff]  ;;  %v6971_v46 = vadd.f32 %v9631_v11, %v6409_v26  ;;  %v14074_v5 = vld [vmem:[#allocation46_spill] sm:$0xff]  ;;  %v9639_v15 = vpop.f32.mrf.mxu1 }
 0x2ee   :  { %v9687_v10 = vpop.f32.mrf.mxu0  ;;  %v9509_v50 = vadd.f32 %v14072_v12, %v14071_v38  ;;  %v6071_v32 = vadd.f32 %v9506_v33, %v14073_v24  ;;  %v9640_v11 = vadd.f32 %v9639_v15, %v9638_v27 }
 0x2ef   :  { %v7386_v41 = vadd.f32 %v9686_v56, %v6968_v22  ;;  %v7424_v45 = vmul.f32 %v13779_v28, %v13779_v28  ;;  %v14075_v22 = vld [vmem:[#allocation47_spill] sm:$0xff]  ;;  %v9634_v56 = vadd.f32 %v9633_v2, %v9632_v14  ;;  %v14079_v2 = vld [vmem:[#allocation49_spill] sm:$0xff] }
 0x2f0   :  { %v9688_v9 = vpop.f32.mrf.mxu0  ;;  %v9573_v6 = vadd.f32 %v14075_v22, %v14074_v5  ;;  %v6410_v16 = vadd.f32 %v9570_v49, %v6071_v32  ;;  %v9576_v0 = vadd.f32 %v13652_v20, %v14079_v2  ;;  %v13844_v32 = vld [vmem:[%s13885_s4] ss:$0 sm:$0xff]  ;;  %s10124_s4 = smov [#allocation3]  }
 0x2f1   :  { %v13791_v60 = vadd.f32 %v13665_v40, %v7386_v41  ;;  %v9689_v48 = vadd.f32 %v9688_v9, %v9687_v10  ;;  %9781 = vmatprep.mubr.f32.mxu1 %v7424_v45  ;;  %v6072_v10 = vadd.f32 %v9509_v50, %v14076_v13  ;;  %v14077_v41 = vld [vmem:[#allocation28_spill] sm:$0xff]  ;;  %v14078_v45 = vld [vmem:[#allocation30_spill] sm:$0xff]  ;;  %v9637_v9 = vadd.f32 %v9636_v3, %v9635_v31  ;;  %s7669_s23 = sshll.u32 %s10124_s4, 4  ;;  %s7670_s23 = int_to_ptr.vmem [resolvable:$true] %s7669_s23 }
 0x2f2   :  { %v9690_v36 = vpop.f32.mrf.mxu0  ;;  %v6972_v14 = vadd.f32 %v9634_v56, %v6410_v16  ;;  %s10101_s24 = scalar_lea.vmem %s7670_s23, 2048  ;;  %p10106_p1 = scmp.lt.s32.totalorder %s7670_s23, %s7670_s23 }
 0x2f3   :  { %v7425_v57 = vmul.f32 %v13791_v60, %v13791_v60  ;;  %v7387_v4 = vadd.f32 %v9689_v48, %v6969_v62  ;;  %v9512_v62 = vadd.f32 %v14078_v45, %v14077_v41  ;;  %v6411_v8 = vadd.f32 %v9573_v6, %v6072_v10  ;;  %p10102_p0 = scmp.ne.s32.totalorder %s7670_s23, %s10101_s24  ;;  %p10107_p2 = scmp.lt.s32.totalorder %s10101_s24, %s10101_s24 }
 0x2f4   :  { %v9691_v29 = vpop.f32.mrf.mxu0 }
 0x2f5   :  { %v13801_v52 = vadd.f32 %v13665_v40, %v7387_v4  ;;  %v9692_v7 = vadd.f32 %v9691_v29, %v9690_v36  ;;  %9782 = vmatmul.mubr.f32.gmra.mxu1 %v7425_v57  ;;  %v6073_v23 = vadd.f32 %v9512_v62, %v14080_v35  ;;  %v6973_v4 = vadd.f32 %v9637_v9, %v6411_v8  ;;  %p10108_p3 = por %p10107_p2, %p10106_p1 }
 0x2f6   :  { %v9693_v47 = vpop.f32.mrf.mxu0 }
 0x2f7   :  { %v7388_v58 = vadd.f32 %v9692_v7, %v6970_v42  ;;  %v7426_v25 = vmul.f32 %v13801_v52, %v13801_v52  ;;  %v6412_v26 = vadd.f32 %v9576_v0, %v6073_v23  ;;  %p10109_p4 = pnand %p10108_p3, %p10102_p0 }
 0x2f8   :  { %v9694_v21 = vpop.f32.mrf.mxu0 }
 0x2f9   :  { %v13811_v63 = vadd.f32 %v13665_v40, %v7388_v58  ;;  %v9695_v59 = vadd.f32 %v9694_v21, %v9693_v47  ;;  %9784 = vmatprep.mubr.f32.mxu1 %v7426_v25  ;;  %v6974_v7 = vadd.f32 %v9640_v11, %v6412_v26 }
 0x2fa   :  { %v9696_v55 = vpop.f32.mrf.mxu0 }
 0x2fb   :  { %v7427_v39 = vmul.f32 %v13811_v63, %v13811_v63  ;;  %v7389_v53 = vadd.f32 %v9695_v59, %v6971_v46 }
 0x2fc   :  { %v9697_v19 = vpop.f32.mrf.mxu0 }
 0x2fd   :  { %v13821_v48 = vadd.f32 %v13665_v40, %v7389_v53  ;;  %v9698_v34 = vadd.f32 %v9697_v19, %v9696_v55  ;;  %9785 = vmatmul.mubr.f32.gmra.mxu1 %v7427_v39 }
 0x2fe   :  { %v9699_v36 = vpop.f32.mrf.mxu0 }
 0x2ff   :  { %v7390_v33 = vadd.f32 %v9698_v34, %v6972_v14  ;;  %v7428_v57 = vmul.f32 %v13821_v48, %v13821_v48 }
 0x300   :  { %v9700_v31 = vpop.f32.mrf.mxu0 }
 0x301   :  { %v13827_v29 = vadd.f32 %v13665_v40, %v7390_v33  ;;  %v9701_v20 = vadd.f32 %v9700_v31, %v9699_v36  ;;  %9787 = vmatprep.mubr.f32.mxu1 %v7428_v57 }
 0x302   :  { %v9702_v42 = vpop.f32.mrf.mxu0 }
 0x303   :  { %v7429_v61 = vmul.f32 %v13827_v29, %v13827_v29  ;;  %v7391_v30 = vadd.f32 %v9701_v20, %v6973_v4 }
 0x304   :  { %v9703_v49 = vpop.f32.mrf.mxu0 }
 0x305   :  { %v13832_v38 = vadd.f32 %v13665_v40, %v7391_v30  ;;  %v9704_v12 = vadd.f32 %v9703_v49, %v9702_v42  ;;  %9788 = vmatmul.mubr.f32.gmra.mxu1 %v7429_v61 }
 0x307   :  { %v7392_v50 = vadd.f32 %v9704_v12, %v6974_v7  ;;  %v7430_v3 = vmul.f32 %v13832_v38, %v13832_v38 }
 0x309   :  { %v13837_v47 = vadd.f32 %v13665_v40, %v7392_v50  ;;  %9790 = vmatprep.mubr.f32.mxu1 %v7430_v3 }
 0x30b   :  { %v7431_v24 = vmul.f32 %v13837_v47, %v13837_v47 }
 0x30d   :  { %9791 = vmatmul.mubr.f32.gmra.mxu1 %v7431_v24 }
 0x395   :  { %v9771_v58 = vpop.f32.mrf.mxu1 }
 0x396   :  { %v7543_v25 = vadd.f32 %v9771_v58, %v13844_v32 }
 0x397   :  { %v7537_v46 = vpop.f32.mrf.mxu1 }
 0x398   :  { %10068 = vrsqrt.f32 %v7543_v25  ;;  %v7538_v5 = vadd.f32 %v13844_v32, %v7537_v46 }
 0x39a   :  { %10070 = vrsqrt.f32 %v7538_v5 }
 0x39d   :  { %v9774_v40 = vpop.f32.mrf.mxu1 }
 0x39e   :  { %v7553_v22 = vadd.f32 %v9774_v40, %v13844_v32 }
 0x39f   :  { %v7547_v6 = vpop.f32.mrf.mxu1 }
 0x3a0   :  { %10072 = vrsqrt.f32 %v7553_v22  ;;  %v7548_v21 = vadd.f32 %v13844_v32, %v7547_v6 }
 0x3a2   :  { %10074 = vrsqrt.f32 %v7548_v21 }
 0x3a5   :  { %v10069_v16 = vpop.eup %10068  ;;  %v9777_v56 = vpop.f32.mrf.mxu1 }
 0x3a6   :  { %v7633_v59 = vmul.f32 %v10069_v16, %v13687_v51  ;;  %v7563_v13 = vadd.f32 %v9777_v56, %v13844_v32 }
 0x3a7   :  { %v10071_v10 = vpop.eup %10070  ;;  %v7557_v27 = vpop.f32.mrf.mxu1 }
 0x3a8   :  { %7649 = vst [vmem:[#allocation3 + $0x8] sm:$0xff] %v7633_v59  ;;  %v7632_v55 = vmul.f32 %v10071_v10, %v13673_v44  ;;  %10076 = vrsqrt.f32 %v7563_v13  ;;  %v7558_v41 = vadd.f32 %v13844_v32, %v7557_v27 }
 0x3aa   :  { %7648 = vst [vmem:[#allocation3] sm:$0xff] %v7632_v55  ;;  %10078 = vrsqrt.f32 %v7558_v41 }
 0x3ad   :  { %v10073_v45 = vpop.eup %10072  ;;  %v9780_v62 = vpop.f32.mrf.mxu1 }
 0x3ae   :  { %v7635_v39 = vmul.f32 %v10073_v45, %v13715_v18  ;;  %v7573_v53 = vadd.f32 %v9780_v62, %v13844_v32 }
 0x3af   :  { %v10075_v8 = vpop.eup %10074  ;;  %v7567_v51 = vpop.f32.mrf.mxu1 }
 0x3b0   :  { %7651 = vst [vmem:[#allocation3 + $0x18] sm:$0xff] %v7635_v39  ;;  %v7634_v9 = vmul.f32 %v10075_v8, %v13701_v37  ;;  %10080 = vrsqrt.f32 %v7573_v53  ;;  %v7568_v19 = vadd.f32 %v13844_v32, %v7567_v51 }
 0x3b2   :  { %7650 = vst [vmem:[#allocation3 + $0x10] sm:$0xff] %v7634_v9  ;;  %10082 = vrsqrt.f32 %v7568_v19 }
 0x3b5   :  { %v10077_v44 = vpop.eup %10076  ;;  %v9783_v14 = vpop.f32.mrf.mxu1 }
 0x3b6   :  { %v7637_v2 = vmul.f32 %v10077_v44, %v13743_v43  ;;  %v7583_v0 = vadd.f32 %v9783_v14, %v13844_v32 }
 0x3b7   :  { %v10079_v34 = vpop.eup %10078  ;;  %v7577_v18 = vpop.f32.mrf.mxu1 }
 0x3b8   :  { %7653 = vst [vmem:[#allocation3 + $0x28] sm:$0xff] %v7637_v2  ;;  %v7636_v15 = vmul.f32 %v10079_v34, %v13729_v1  ;;  %10084 = vrsqrt.f32 %v7583_v0  ;;  %v7578_v36 = vadd.f32 %v13844_v32, %v7577_v18 }
 0x3ba   :  { %7652 = vst [vmem:[#allocation3 + $0x20] sm:$0xff] %v7636_v15  ;;  %10086 = vrsqrt.f32 %v7578_v36 }
 0x3bd   :  { %v10081_v37 = vpop.eup %10080  ;;  %v9786_v35 = vpop.f32.mrf.mxu1 }
 0x3be   :  { %v7639_v23 = vmul.f32 %v10081_v37, %v13767_v54  ;;  %v7593_v33 = vadd.f32 %v9786_v35, %v13844_v32 }
 0x3bf   :  { %v10083_v57 = vpop.eup %10082  ;;  %v7587_v43 = vpop.f32.mrf.mxu1 }
 0x3c0   :  { %7655 = vst [vmem:[#allocation3 + $0x38] sm:$0xff] %v7639_v23  ;;  %v7638_v4 = vmul.f32 %v10083_v57, %v13755_v17  ;;  %10088 = vrsqrt.f32 %v7593_v33  ;;  %v7588_v31 = vadd.f32 %v13844_v32, %v7587_v43 }
 0x3c2   :  { %7654 = vst [vmem:[#allocation3 + $0x30] sm:$0xff] %v7638_v4  ;;  %10090 = vrsqrt.f32 %v7588_v31 }
 0x3c5   :  { %v10085_v1 = vpop.eup %10084  ;;  %v9789_v26 = vpop.f32.mrf.mxu1 }
 0x3c6   :  { %v7641_v11 = vmul.f32 %v10085_v1, %v13791_v60  ;;  %v7603_v20 = vadd.f32 %v9789_v26, %v13844_v32 }
 0x3c7   :  { %v10087_v42 = vpop.eup %10086  ;;  %v7597_v54 = vpop.f32.mrf.mxu1 }
 0x3c8   :  { %7657 = vst [vmem:[#allocation3 + $0x48] sm:$0xff] %v7641_v11  ;;  %v7640_v61 = vmul.f32 %v10087_v42, %v13779_v28  ;;  %10092 = vrsqrt.f32 %v7603_v20  ;;  %v7598_v30 = vadd.f32 %v13844_v32, %v7597_v54 }
 0x3ca   :  { %7656 = vst [vmem:[#allocation3 + $0x40] sm:$0xff] %v7640_v61  ;;  %10094 = vrsqrt.f32 %v7598_v30 }
 0x3cd   :  { %v10089_v17 = vpop.eup %10088  ;;  %v9792_v49 = vpop.f32.mrf.mxu1 }
 0x3ce   :  { %v7643_v7 = vmul.f32 %v10089_v17, %v13811_v63  ;;  %v7613_v12 = vadd.f32 %v9792_v49, %v13844_v32 }
 0x3cf   :  { %v10091_v50 = vpop.eup %10090  ;;  %v7607_v60 = vpop.f32.mrf.mxu1 }
 0x3d0   :  { %7659 = vst [vmem:[#allocation3 + $0x58] sm:$0xff] %v7643_v7  ;;  %v7642_v3 = vmul.f32 %v10091_v50, %v13801_v52  ;;  %10096 = vrsqrt.f32 %v7613_v12  ;;  %v7608_v24 = vadd.f32 %v13844_v32, %v7607_v60 }
 0x3d2   :  { %7658 = vst [vmem:[#allocation3 + $0x50] sm:$0xff] %v7642_v3  ;;  %10098 = vrsqrt.f32 %v7608_v24 }
 0x3d5   :  { %v10093_v28 = vpop.eup %10092 }
 0x3d6   :  { %v7645_v58 = vmul.f32 %v10093_v28, %v13827_v29 }
 0x3d7   :  { %v10095_v25 = vpop.eup %10094 }
 0x3d8   :  { %7661 = vst [vmem:[#allocation3 + $0x68] sm:$0xff] %v7645_v58  ;;  %v7644_v46 = vmul.f32 %v10095_v25, %v13821_v48 }
 0x3da   :  { %7660 = vst [vmem:[#allocation3 + $0x60] sm:$0xff] %v7644_v46 }
 0x3dd   :  { %v10097_v63 = vpop.eup %10096 }
 0x3de   :  { %v7647_v5 = vmul.f32 %v10097_v63, %v13837_v47 }
 0x3df   :  { %v10099_v40 = vpop.eup %10098 }
 0x3e0   :  { %7663 = vst [vmem:[#allocation3 + $0x78] sm:$0xff] %v7647_v5  ;;  %v7646_v52 = vmul.f32 %v10099_v40, %v13832_v38 }
 0x3e2   :  { %7662 = vst [vmem:[#allocation3 + $0x70] sm:$0xff] %v7646_v52 }
 0x3e3   :  { %10112 = shalt.err (!%p10109_p4)
}
 0x3e4   :  { %s10125_s25 = smov 128   ;;  %s10126_s26 = smov 8  }
 0x3e5   :  { %7675 = dma.vmem_to_hbm [thread:$0]  %s7670_s23, 2048, %s13886_s5, [#allocation4], %s10125_s25, %s10125_s25, %s10126_s26  }
 0x3e6   :  { %10121 = dma.done.wait [#allocation4], 2048  }
 0x3e7   :  { %10122 = vsyncadd [#allocation4], 4294965248 }
 0x3e8   :  { %7679 = vsyncpa [#allocation4], 1 }

</bundles_post_ra>
